<compile_context>
chip_gen: v7x
topology: tpu7x:2x2x1
jax: 0.10.0
libtpu: 0.0.40
codegen_flags: <defaults>
</compile_context>

<pallas_src>
import math

import jax
import jax.numpy as jnp
from jax import lax
from jax.experimental import pallas as pl
from jax.experimental.pallas import tpu as pltpu

_VMEM_LIMIT = 16 * 1024 * 1024   # real per-call working sets here are < 2 MiB


# ----------------------------------------------------------------------------
# Pallas kernels
# ----------------------------------------------------------------------------

def _make_tap_conv_kernel(taps, cin, win_len, relu_cols, has_res):
    """Implicit-im2col conv fused with folded-BN bias, optional residual add
    and (column-masked) ReLU.

    x_ref: (n_phases, R, Cin) bf16  -- zero-padded input, phase-split for
           strided convs, spatially flattened.  For tap t the contribution to
           ALL output rows is x_ref[phase_t, off_t : off_t + win_len] @ W_t,
           so the conv is a sum of len(taps) small MXU GEMMs with no
           materialized im2col.
    w_ref: (len(taps)*Cin, F) bf16 (BN scale pre-folded)
    b_ref: (1, F) f32 folded bias
    res_ref (optional): (win_len, F) bf16 residual in the same flat layout
    o_ref: (win_len, F) bf16
    """
    def kernel(x_ref, w_ref, b_ref, *rest):
        if has_res:
            res_ref, o_ref = rest
        else:
            (o_ref,) = rest

        acc = None
        for t, (phase, off) in enumerate(taps):            # static, unrolled
            a = x_ref[phase, off:off + win_len, :]          # (L, Cin) bf16
            wt = w_ref[t * cin:(t + 1) * cin, :]            # (Cin, F) bf16
            part = jnp.dot(a, wt, preferred_element_type=jnp.float32)
            acc = part if acc is None else acc + part

        y = acc + b_ref[...]                                # folded BN/conv bias
        if has_res:
            y = y + res_ref[...].astype(jnp.float32)

        nf = y.shape[-1]
        if relu_cols >= nf:
            y = jnp.maximum(y, 0.0)
        else:
            # fused-downsample columns (identity path) must NOT get a ReLU
            keep = lax.broadcasted_iota(jnp.int32, (1, nf), 1) < relu_cols
            y = jnp.where(keep, jnp.maximum(y, 0.0), y)
        o_ref[...] = y.astype(o_ref.dtype)

    return kernel


def _stem_gemm_kernel(a_ref, b_ref, bias_ref, o_ref):
    """Materialized-im2col stem: GEMM + folded-BN bias + ReLU (f32 epilogue)."""
    y = jnp.dot(a_ref[...], b_ref[...], preferred_element_type=jnp.float32)
    y = y + bias_ref[...]
    o_ref[...] = jnp.maximum(y, 0.0).astype(o_ref.dtype)


def _pool_fc_kernel(x_ref, w_ref, b_ref, o_ref):
    """Fused global average pool + FC.  x: (N, H*W, C); w: (C, 128-padded)."""
    pooled = jnp.mean(x_ref[...].astype(jnp.float32), axis=1)         # (N, C)
    y = jnp.dot(pooled.astype(jnp.bfloat16), w_ref[...],
                preferred_element_type=jnp.float32) + b_ref[...]
    o_ref[...] = y


# ----------------------------------------------------------------------------
# Wrappers
# ----------------------------------------------------------------------------

def _num_tensorcores():
    """Best-effort TensorCore count (2 on v7x, 1 on v5e/v6e).  Only used to
    decide whether splitting M of the stem GEMM across a parallel grid can
    ever pay off; falls back to 1 (single full-M block) on any doubt."""
    try:
        info = pltpu.get_tpu_info()
    except Exception:
        return 1
    for name in ("num_cores", "core_count", "num_tensorcores", "tensorcore_count"):
        v = getattr(info, name, None)
        if isinstance(v, int) and v > 0:
            return v
    return 1


def _pick_tm(m_rows, n_cols, n_cores):
    """Single full-M block unless a multi-TensorCore chip gets >=2 blocks of
    >=128 rows; tiles stay multiples of 16 (bf16 sublane packing) and are
    capped so the f32 epilogue intermediate stays <= ~256 KiB."""
    tm = m_rows
    if n_cores > 1:
        per_core = m_rows // n_cores
        if m_rows % n_cores == 0 and per_core >= 128 and per_core % 16 == 0:
            tm = per_core
    cap = max(128, (256 * 1024) // max(n_cols * 4, 1))
    while tm > cap and tm % 2 == 0 and (tm // 2) >= 128 and (tm // 2) % 16 == 0:
        tm //= 2
    return tm


def stem_conv(x_nhwc, layer):
    """7x7/s2/p3 stem: materialized im2col (K zero-padded to 256) + one fused
    GEMM/bias/ReLU kernel, M split across TensorCores only when worthwhile."""
    k, s, p = layer["k"], layer["stride"], layer["pad"]
    n, h, w, c = x_nhwc.shape
    xp = jnp.pad(x_nhwc, ((0, 0), (p, p), (p, p), (0, 0)))
    ho = (h + 2 * p - k) // s + 1
    wo = (w + 2 * p - k) // s + 1
    patches = [xp[:, i:i + s * ho:s, j:j + s * wo:s, :]
               for i in range(k) for j in range(k)]
    cols = jnp.concatenate(patches, axis=-1).reshape(n * ho * wo, k * k * c)
    kp = layer["w"].shape[0]                       # weight rows already padded
    cols = jnp.pad(cols, ((0, 0), (0, kp - cols.shape[1])))

    m, nf = cols.shape[0], layer["w"].shape[1]
    tm = _pick_tm(m, nf, _num_tensorcores())
    mp = pl.cdiv(m, tm) * tm
    if mp != m:
        cols = jnp.pad(cols, ((0, mp - m), (0, 0)))

    out = pl.pallas_call(
        _stem_gemm_kernel,
        out_shape=jax.ShapeDtypeStruct((mp, nf), jnp.bfloat16),
        grid=(mp // tm,),
        in_specs=[pl.BlockSpec((tm, kp), lambda i: (i, 0)),   # im2col rows
                  pl.BlockSpec((kp, nf), lambda i: (0, 0)),   # resident weights
                  pl.BlockSpec((1, nf), lambda i: (0, 0))],   # folded bias
        out_specs=pl.BlockSpec((tm, nf), lambda i: (i, 0)),
        compiler_params=pltpu.CompilerParams(
            dimension_semantics=("parallel",),
            vmem_limit_bytes=_VMEM_LIMIT),
    )(cols, layer["w"], layer["bias"])
    return out[:m].reshape(n, ho, wo, nf)


def conv_bn_act(x_nhwc, layer, res=None):
    """3x3 (and fused 3x3 + 1x1-downsample) convs via the implicit-im2col
    kernel.  Strided convs are phase-decomposed in the wrapper (no data
    duplication) so every kernel tap becomes a contiguous window."""
    k, s, p = layer["k"], layer["stride"], layer["pad"]
    n, h, w, cin = x_nhwc.shape
    ho = (h + 2 * p - k) // s + 1
    wo = (w + 2 * p - k) // s + 1
    xp = jnp.pad(x_nhwc, ((0, 0), (p, p), (p, p), (0, 0)))

    if s == 1:
        phases = xp[None]
        hs, ws = xp.shape[1], xp.shape[2]
    else:
        hp, wp = xp.shape[1], xp.shape[2]
        hp2, wp2 = -(-hp // s) * s, -(-wp // s) * s
        xp = jnp.pad(xp, ((0, 0), (0, hp2 - hp), (0, wp2 - wp), (0, 0)))
        hs, ws = hp2 // s, wp2 // s
        phases = jnp.stack([xp[:, pi::s, pj::s, :]
                            for pi in range(s) for pj in range(s)], axis=0)

    r = n * hs * ws
    x_flat = phases.reshape(phases.shape[0], r, cin)

    # tap (i, j) -> (phase index, flat offset into that phase)
    taps = [((i % s) * s + (j % s), (i // s) * ws + (j // s))
            for i in range(k) for j in range(k)]
    dmax = max(off for _, off in taps)
    win = r - dmax                               # covers every valid output row

    nf = layer["w"].shape[1]
    args = [x_flat, layer["w"], layer["bias"]]
    if res is not None:
        # place the residual on the same flat (padded-grid) layout
        res_p = jnp.pad(res.astype(jnp.bfloat16),
                        ((0, 0), (0, hs - ho), (0, ws - wo), (0, 0)))
        args.append(res_p.reshape(r, nf)[:win])

    kernel = _make_tap_conv_kernel(tuple(taps), cin, win,
                                   layer["relu_cols"], res is not None)
    out_flat = pl.pallas_call(
        kernel,
        out_shape=jax.ShapeDtypeStruct((win, nf), jnp.bfloat16),
        compiler_params=pltpu.CompilerParams(vmem_limit_bytes=_VMEM_LIMIT),
    )(*args)

    # back to NHWC: re-pad the discarded rows, reshape, crop to the valid grid
    out = jnp.pad(out_flat, ((0, dmax), (0, 0)))
    return out.reshape(n, hs, ws, nf)[:, :ho, :wo, :]


def maxpool_3x3_s2(x_nhwc):
    # TODO(synk): kept in XLA; not folded into the stem kernel.
    return lax.reduce_window(
        x_nhwc, jnp.array(-jnp.inf, x_nhwc.dtype), lax.max,
        window_dimensions=(1, 3, 3, 1), window_strides=(1, 2, 2, 1),
        padding=((0, 0), (1, 1), (1, 1), (0, 0)))


def basic_block(x, bp):
    c1 = bp["conv1"]
    if bp["fused_down"]:
        planes = c1["relu_cols"]
        y = conv_bn_act(x, c1)                   # conv1 ++ downsample, one kernel
        out, identity = y[..., :planes], y[..., planes:]
    else:
        out = conv_bn_act(x, c1)
        identity = x
    return conv_bn_act(out, bp["conv2"], res=identity)   # add before final ReLU


def avgpool_fc(x_nhwc, fc):
    n, h, w, c = x_nhwc.shape
    logits = pl.pallas_call(
        _pool_fc_kernel,
        out_shape=jax.ShapeDtypeStruct((n, fc["w"].shape[1]), jnp.float32),
        compiler_params=pltpu.CompilerParams(vmem_limit_bytes=_VMEM_LIMIT),
    )(x_nhwc.reshape(n, h * w, c), fc["w"], fc["bias"])
    return logits[:, :fc["num_classes"]]         # drop the zero-padded classes


# ----------------------------------------------------------------------------
# Parameter init (PyTorch-equivalent) and inference-ready preparation
# ----------------------------------------------------------------------------

def _make_conv(key, cin, cout, k):
    # kaiming_normal_(mode='fan_out', nonlinearity='relu'); bias zeros
    std = math.sqrt(2.0 / (cout * k * k))
    w = std * jax.random.normal(key, (cout, cin, k, k), jnp.float32)
    b = jnp.zeros((cout,), jnp.float32)
    return (w, b)


def _make_bn(c):
    return dict(gamma=jnp.ones((c,), jnp.float32),
                beta=jnp.zeros((c,), jnp.float32),
                mean=jnp.zeros((c,), jnp.float32),
                var=jnp.ones((c,), jnp.float32))


def init_params(key, layers=(1, 1, 1), num_classes=10):
    keys = iter(jax.random.split(key, 64))
    params = {"conv1": _make_conv(next(keys), 3, 64, 7), "bn1": _make_bn(64)}
    in_c = 64
    for li, (planes, nblocks, stride) in enumerate(
            zip((64, 128, 256), layers, (1, 2, 2)), start=1):
        blocks = []
        for b in range(nblocks):
            s = stride if b == 0 else 1
            bp = {"stride": s,
                  "conv1": _make_conv(next(keys), in_c, planes, 3),
                  "bn1": _make_bn(planes),
                  "conv2": _make_conv(next(keys), planes, planes, 3),
                  "bn2": _make_bn(planes)}
            if s != 1 or in_c != planes:
                bp["down"] = _make_conv(next(keys), in_c, planes, 1)
                bp["down_bn"] = _make_bn(planes)
            in_c = planes
            blocks.append(bp)
        params[f"layer{li}"] = blocks
    fc_w = 0.01 * jax.random.normal(next(keys), (num_classes, 256), jnp.float32)
    fc_b = jnp.zeros((num_classes,), jnp.float32)
    params["fc"] = (fc_w, fc_b)
    return params


def prepare_params(params):
    """One-time conversion to inference-ready constants: bf16 GEMM weights with
    the BN scale folded IN, folded f32 biases, fused downsample columns,
    zero-padded stem K and zero-padded FC class dim."""
    eps = 1e-5

    def fold_mat(conv, bn, k):
        w, b = conv
        cout, cin = w.shape[0], w.shape[1]
        scale = bn["gamma"] / jnp.sqrt(bn["var"] + eps)
        wmat = jnp.transpose(w, (2, 3, 1, 0)).reshape(k * k * cin, cout)
        wmat = wmat * scale[None, :]                    # BN scale folded in
        bias = (b - bn["mean"]) * scale + bn["beta"]
        return wmat, bias.reshape(1, cout).astype(jnp.float32)

    # stem: pad K (147) up to a multiple of 128 (-> 256)
    w0, b0 = fold_mat(params["conv1"], params["bn1"], 7)
    kpad = ((w0.shape[0] + 127) // 128) * 128
    w0 = jnp.pad(w0, ((0, kpad - w0.shape[0]), (0, 0)))
    prep = {"conv1": dict(w=w0.astype(jnp.bfloat16), bias=b0,
                          k=7, stride=2, pad=3)}

    for li in (1, 2, 3):
        blocks = []
        for bp in params[f"layer{li}"]:
            s = bp["stride"]
            planes = bp["conv1"][0].shape[0]
            cin = bp["conv1"][0].shape[1]
            w1, b1 = fold_mat(bp["conv1"], bp["bn1"], 3)
            nb = {"fused_down": "down" in bp}
            if "down" in bp:
                # 1x1/s2 downsample == center tap (i=j=1) of the 3x3/s2 conv1:
                # append it as extra output columns (no ReLU on those columns).
                wd, bd = fold_mat(bp["down"], bp["down_bn"], 1)      # (cin, planes)
                wd_full = jnp.zeros((9 * cin, planes), wd.dtype)
                wd_full = wd_full.at[4 * cin:5 * cin, :].set(wd)
                w1 = jnp.concatenate([w1, wd_full], axis=1)          # (9*cin, 2*planes)
                b1 = jnp.concatenate([b1, bd], axis=1)
            nb["conv1"] = dict(w=w1.astype(jnp.bfloat16), bias=b1,
                               k=3, stride=s, pad=1, relu_cols=planes)
            w2, b2 = fold_mat(bp["conv2"], bp["bn2"], 3)
            nb["conv2"] = dict(w=w2.astype(jnp.bfloat16), bias=b2,
                               k=3, stride=1, pad=1, relu_cols=planes)
            blocks.append(nb)
        prep[f"layer{li}"] = blocks

    fc_w, fc_b = params["fc"]
    nc = fc_w.shape[0]
    nf = ((nc + 127) // 128) * 128                    # lane-dense FC output
    wfc = jnp.zeros((fc_w.shape[1], nf), jnp.float32).at[:, :nc].set(fc_w.T)
    bfc = jnp.zeros((1, nf), jnp.float32).at[0, :nc].set(fc_b)
    prep["fc"] = dict(w=wfc.astype(jnp.bfloat16), bias=bfc, num_classes=nc)
    return prep


# ----------------------------------------------------------------------------
# Forward
# ----------------------------------------------------------------------------

def resnet_forward(prep, x_nchw):
    x = jnp.transpose(x_nchw, (0, 2, 3, 1)).astype(jnp.bfloat16)   # NCHW -> NHWC
    x = stem_conv(x, prep["conv1"])
    x = maxpool_3x3_s2(x)
    for li in (1, 2, 3):
        for bp in prep[f"layer{li}"]:
            x = basic_block(x, bp)
    return avgpool_fc(x, prep["fc"])                               # (N, classes) f32


if __name__ == "__main__":
    key = jax.random.PRNGKey(0)
    pkey, xkey = jax.random.split(key)
    params = init_params(pkey, layers=(1, 1, 1), num_classes=10)
    prep = prepare_params(params)
    x = jax.random.normal(xkey, (2, 3, 32, 32), jnp.float32)       # NCHW like PyTorch

    fwd = jax.jit(lambda inp: resnet_forward(prep, inp))
    logits = fwd(x)
    jax.block_until_ready(logits)
    assert logits.shape == (2, 10) and logits.dtype == jnp.float32
    print("KERNEL_OK")
</pallas_src>

<mosaic_0001>
module attributes {stable_mosaic.version = 11 : i64} {
  func.func @_stem_gemm_kernel(%arg0: i32, %arg1: memref<512x256xbf16, #tpu.memory_space<vmem>>, %arg2: memref<256x64xbf16, #tpu.memory_space<vmem>>, %arg3: memref<1x64xf32, #tpu.memory_space<vmem>>, %arg4: memref<512x64xbf16, #tpu.memory_space<vmem>>) attributes {dimension_semantics = [#tpu.dimension_semantics<parallel>], iteration_bounds = array<i64: 1>, scalar_prefetch = 0 : i64, scratch_operands = 0 : i64, tpu.core_type = #tpu.core_type<tc>, window_params = [{transform_indices = @transform_0, window_bounds = array<i64: 512, 256>}, {pipeline_mode = #tpu.pipeline_mode<synchronous>, transform_indices = @transform_1, window_bounds = array<i64: 256, 64>}, {pipeline_mode = #tpu.pipeline_mode<synchronous>, transform_indices = @transform_2, window_bounds = array<i64: 1, 64>}, {transform_indices = @transform_3, window_bounds = array<i64: 512, 64>}]} {
    %c0 = arith.constant 0 : index
    %c0_0 = arith.constant 0 : index
    %0 = vector.load %arg1[%c0, %c0_0] : memref<512x256xbf16, #tpu.memory_space<vmem>>, vector<512x256xbf16>
    %c0_1 = arith.constant 0 : index
    %c0_2 = arith.constant 0 : index
    %1 = vector.load %arg2[%c0_1, %c0_2] : memref<256x64xbf16, #tpu.memory_space<vmem>>, vector<256x64xbf16>
    %cst = arith.constant dense<0.000000e+00> : vector<512x64xf32>
    %2 = tpu.matmul %0, %1, %cst {dimension_numbers = #tpu.dot_dimension_numbers<[1], [0], [0], [1], [0, 0, 1, 1], [], []>} : vector<512x256xbf16>, vector<256x64xbf16>, vector<512x64xf32> -> vector<512x64xf32>
    %c0_3 = arith.constant 0 : index
    %c0_4 = arith.constant 0 : index
    %3 = vector.load %arg3[%c0_3, %c0_4] : memref<1x64xf32, #tpu.memory_space<vmem>>, vector<1x64xf32>
    %4 = vector.broadcast %3 : vector<1x64xf32> to vector<512x64xf32>
    %5 = arith.addf %2, %4 : vector<512x64xf32>
    %cst_5 = arith.constant 0.000000e+00 : f32
    %6 = vector.broadcast %cst_5 : f32 to vector<512x64xf32>
    %7 = arith.maximumf %5, %6 : vector<512x64xf32>
    %8 = arith.truncf %7 : vector<512x64xf32> to vector<512x64xbf16>
    %c0_6 = arith.constant 0 : index
    %c0_7 = arith.constant 0 : index
    %9 = vector.load %arg4[%c0_6, %c0_7] : memref<512x64xbf16, #tpu.memory_space<vmem>>, vector<512x64xbf16>
    tpu.vector_store %arg4[%c0_6, %c0_7], %8 {strides = array<i32>} : memref<512x64xbf16, #tpu.memory_space<vmem>>, vector<512x64xbf16>,
    return
  }
  func.func @transform_0(%arg0: i32) -> (i32, i32) {
    %c0_i32 = arith.constant 0 : i32
    %c0_i32_0 = arith.constant 0 : i32
    return %arg0, %c0_i32 : i32, i32
  }
  func.func @transform_1(%arg0: i32) -> (i32, i32) {
    %c0_i32 = arith.constant 0 : i32
    %c0_i32_0 = arith.constant 0 : i32
    %c0_i32_1 = arith.constant 0 : i32
    return %c0_i32, %c0_i32_0 : i32, i32
  }
  func.func @transform_2(%arg0: i32) -> (i32, i32) {
    %c0_i32 = arith.constant 0 : i32
    %c0_i32_0 = arith.constant 0 : i32
    %c0_i32_1 = arith.constant 0 : i32
    return %c0_i32, %c0_i32_0 : i32, i32
  }
  func.func @transform_3(%arg0: i32) -> (i32, i32) {
    %c0_i32 = arith.constant 0 : i32
    %c0_i32_0 = arith.constant 0 : i32
    return %arg0, %c0_i32 : i32, i32
  }
}

module attributes {stable_mosaic.version = 11 : i64} {
  func.func @kernel(%arg0: memref<1x200x64xbf16, #tpu.memory_space<vmem>>, %arg1: memref<576x64xbf16, #tpu.memory_space<vmem>>, %arg2: memref<1x64xf32, #tpu.memory_space<vmem>>, %arg3: memref<178x64xbf16, #tpu.memory_space<vmem>>) attributes {dimension_semantics = [], scalar_prefetch = 0 : i64, scratch_operands = 0 : i64, tpu.core_type = #tpu.core_type<tc>} {
    %c0 = arith.constant 0 : index
    %c0_0 = arith.constant 0 : index
    %c0_1 = arith.constant 0 : index
    %0 = vector.load %arg0[%c0, %c0_0, %c0_1] : memref<1x200x64xbf16, #tpu.memory_space<vmem>>, vector<1x178x64xbf16>
    %1 = vector.shape_cast %0 : vector<1x178x64xbf16> to vector<178x64xbf16>
    %c0_2 = arith.constant 0 : index
    %c0_3 = arith.constant 0 : index
    %2 = vector.load %arg1[%c0_2, %c0_3] : memref<576x64xbf16, #tpu.memory_space<vmem>>, vector<64x64xbf16>
    %cst = arith.constant dense<0.000000e+00> : vector<178x64xf32>
    %3 = tpu.matmul %1, %2, %cst {dimension_numbers = #tpu.dot_dimension_numbers<[1], [0], [0], [1], [0, 0, 1, 1], [], []>} : vector<178x64xbf16>, vector<64x64xbf16>, vector<178x64xf32> -> vector<178x64xf32>
    %c0_4 = arith.constant 0 : index
    %c1 = arith.constant 1 : index
    %c0_5 = arith.constant 0 : index
    %4 = vector.load %arg0[%c0_4, %c1, %c0_5] : memref<1x200x64xbf16, #tpu.memory_space<vmem>>, vector<1x178x64xbf16>
    %5 = vector.shape_cast %4 : vector<1x178x64xbf16> to vector<178x64xbf16>
    %c64 = arith.constant 64 : index
    %c0_6 = arith.constant 0 : index
    %6 = vector.load %arg1[%c64, %c0_6] : memref<576x64xbf16, #tpu.memory_space<vmem>>, vector<64x64xbf16>
    %cst_7 = arith.constant dense<0.000000e+00> : vector<178x64xf32>
    %7 = tpu.matmul %5, %6, %cst_7 {dimension_numbers = #tpu.dot_dimension_numbers<[1], [0], [0], [1], [0, 0, 1, 1], [], []>} : vector<178x64xbf16>, vector<64x64xbf16>, vector<178x64xf32> -> vector<178x64xf32>
    %8 = arith.addf %3, %7 : vector<178x64xf32>
    %c0_8 = arith.constant 0 : index
    %c2 = arith.constant 2 : index
    %c0_9 = arith.constant 0 : index
    %9 = vector.load %arg0[%c0_8, %c2, %c0_9] : memref<1x200x64xbf16, #tpu.memory_space<vmem>>, vector<1x178x64xbf16>
    %10 = vector.shape_cast %9 : vector<1x178x64xbf16> to vector<178x64xbf16>
    %c128 = arith.constant 128 : index
    %c0_10 = arith.constant 0 : index
    %11 = vector.load %arg1[%c128, %c0_10] : memref<576x64xbf16, #tpu.memory_space<vmem>>, vector<64x64xbf16>
    %cst_11 = arith.constant dense<0.000000e+00> : vector<178x64xf32>
    %12 = tpu.matmul %10, %11, %cst_11 {dimension_numbers = #tpu.dot_dimension_numbers<[1], [0], [0], [1], [0, 0, 1, 1], [], []>} : vector<178x64xbf16>, vector<64x64xbf16>, vector<178x64xf32> -> vector<178x64xf32>
    %13 = arith.addf %8, %12 : vector<178x64xf32>
    %c0_12 = arith.constant 0 : index
    %c10 = arith.constant 10 : index
    %c0_13 = arith.constant 0 : index
    %14 = vector.load %arg0[%c0_12, %c10, %c0_13] : memref<1x200x64xbf16, #tpu.memory_space<vmem>>, vector<1x178x64xbf16>
    %15 = vector.shape_cast %14 : vector<1x178x64xbf16> to vector<178x64xbf16>
    %c192 = arith.constant 192 : index
    %c0_14 = arith.constant 0 : index
    %16 = vector.load %arg1[%c192, %c0_14] : memref<576x64xbf16, #tpu.memory_space<vmem>>, vector<64x64xbf16>
    %cst_15 = arith.constant dense<0.000000e+00> : vector<178x64xf32>
    %17 = tpu.matmul %15, %16, %cst_15 {dimension_numbers = #tpu.dot_dimension_numbers<[1], [0], [0], [1], [0, 0, 1, 1], [], []>} : vector<178x64xbf16>, vector<64x64xbf16>, vector<178x64xf32> -> vector<178x64xf32>
    %18 = arith.addf %13, %17 : vector<178x64xf32>
    %c0_16 = arith.constant 0 : index
    %c11 = arith.constant 11 : index
    %c0_17 = arith.constant 0 : index
    %19 = vector.load %arg0[%c0_16, %c11, %c0_17] : memref<1x200x64xbf16, #tpu.memory_space<vmem>>, vector<1x178x64xbf16>
    %20 = vector.shape_cast %19 : vector<1x178x64xbf16> to vector<178x64xbf16>
    %c256 = arith.constant 256 : index
    %c0_18 = arith.constant 0 : index
    %21 = vector.load %arg1[%c256, %c0_18] : memref<576x64xbf16, #tpu.memory_space<vmem>>, vector<64x64xbf16>
    %cst_19 = arith.constant dense<0.000000e+00> : vector<178x64xf32>
    %22 = tpu.matmul %20, %21, %cst_19 {dimension_numbers = #tpu.dot_dimension_numbers<[1], [0], [0], [1], [0, 0, 1, 1], [], []>} : vector<178x64xbf16>, vector<64x64xbf16>, vector<178x64xf32> -> vector<178x64xf32>
    %23 = arith.addf %18, %22 : vector<178x64xf32>
    %c0_20 = arith.constant 0 : index
    %c12 = arith.constant 12 : index
    %c0_21 = arith.constant 0 : index
    %24 = vector.load %arg0[%c0_20, %c12, %c0_21] : memref<1x200x64xbf16, #tpu.memory_space<vmem>>, vector<1x178x64xbf16>
    %25 = vector.shape_cast %24 : vector<1x178x64xbf16> to vector<178x64xbf16>
    %c320 = arith.constant 320 : index
    %c0_22 = arith.constant 0 : index
    %26 = vector.load %arg1[%c320, %c0_22] : memref<576x64xbf16, #tpu.memory_space<vmem>>, vector<64x64xbf16>
    %cst_23 = arith.constant dense<0.000000e+00> : vector<178x64xf32>
    %27 = tpu.matmul %25, %26, %cst_23 {dimension_numbers = #tpu.dot_dimension_numbers<[1], [0], [0], [1], [0, 0, 1, 1], [], []>} : vector<178x64xbf16>, vector<64x64xbf16>, vector<178x64xf32> -> vector<178x64xf32>
    %28 = arith.addf %23, %27 : vector<178x64xf32>
    %c0_24 = arith.constant 0 : index
    %c20 = arith.constant 20 : index
    %c0_25 = arith.constant 0 : index
    %29 = vector.load %arg0[%c0_24, %c20, %c0_25] : memref<1x200x64xbf16, #tpu.memory_space<vmem>>, vector<1x178x64xbf16>
    %30 = vector.shape_cast %29 : vector<1x178x64xbf16> to vector<178x64xbf16>
    %c384 = arith.constant 384 : index
    %c0_26 = arith.constant 0 : index
    %31 = vector.load %arg1[%c384, %c0_26] : memref<576x64xbf16, #tpu.memory_space<vmem>>, vector<64x64xbf16>
    %cst_27 = arith.constant dense<0.000000e+00> : vector<178x64xf32>
    %32 = tpu.matmul %30, %31, %cst_27 {dimension_numbers = #tpu.dot_dimension_numbers<[1], [0], [0], [1], [0, 0, 1, 1], [], []>} : vector<178x64xbf16>, vector<64x64xbf16>, vector<178x64xf32> -> vector<178x64xf32>
    %33 = arith.addf %28, %32 : vector<178x64xf32>
    %c0_28 = arith.constant 0 : index
    %c21 = arith.constant 21 : index
    %c0_29 = arith.constant 0 : index
    %34 = vector.load %arg0[%c0_28, %c21, %c0_29] : memref<1x200x64xbf16, #tpu.memory_space<vmem>>, vector<1x178x64xbf16>
    %35 = vector.shape_cast %34 : vector<1x178x64xbf16> to vector<178x64xbf16>
    %c448 = arith.constant 448 : index
    %c0_30 = arith.constant 0 : index
    %36 = vector.load %arg1[%c448, %c0_30] : memref<576x64xbf16, #tpu.memory_space<vmem>>, vector<64x64xbf16>
    %cst_31 = arith.constant dense<0.000000e+00> : vector<178x64xf32>
    %37 = tpu.matmul %35, %36, %cst_31 {dimension_numbers = #tpu.dot_dimension_numbers<[1], [0], [0], [1], [0, 0, 1, 1], [], []>} : vector<178x64xbf16>, vector<64x64xbf16>, vector<178x64xf32> -> vector<178x64xf32>
    %38 = arith.addf %33, %37 : vector<178x64xf32>
    %c0_32 = arith.constant 0 : index
    %c22 = arith.constant 22 : index
    %c0_33 = arith.constant 0 : index
    %39 = vector.load %arg0[%c0_32, %c22, %c0_33] : memref<1x200x64xbf16, #tpu.memory_space<vmem>>, vector<1x178x64xbf16>
    %40 = vector.shape_cast %39 : vector<1x178x64xbf16> to vector<178x64xbf16>
    %c512 = arith.constant 512 : index
    %c0_34 = arith.constant 0 : index
    %41 = vector.load %arg1[%c512, %c0_34] : memref<576x64xbf16, #tpu.memory_space<vmem>>, vector<64x64xbf16>
    %cst_35 = arith.constant dense<0.000000e+00> : vector<178x64xf32>
    %42 = tpu.matmul %40, %41, %cst_35 {dimension_numbers = #tpu.dot_dimension_numbers<[1], [0], [0], [1], [0, 0, 1, 1], [], []>} : vector<178x64xbf16>, vector<64x64xbf16>, vector<178x64xf32> -> vector<178x64xf32>
    %43 = arith.addf %38, %42 : vector<178x64xf32>
    %c0_36 = arith.constant 0 : index
    %c0_37 = arith.constant 0 : index
    %44 = vector.load %arg2[%c0_36, %c0_37] : memref<1x64xf32, #tpu.memory_space<vmem>>, vector<1x64xf32>
    %45 = vector.broadcast %44 : vector<1x64xf32> to vector<178x64xf32>
    %46 = arith.addf %43, %45 : vector<178x64xf32>
    %cst_38 = arith.constant 0.000000e+00 : f32
    %47 = vector.broadcast %cst_38 : f32 to vector<178x64xf32>
    %48 = arith.maximumf %46, %47 : vector<178x64xf32>
    %49 = arith.truncf %48 : vector<178x64xf32> to vector<178x64xbf16>
    %c0_39 = arith.constant 0 : index
    %c0_40 = arith.constant 0 : index
    %50 = vector.load %arg3[%c0_39, %c0_40] : memref<178x64xbf16, #tpu.memory_space<vmem>>, vector<178x64xbf16>
    tpu.vector_store %arg3[%c0_39, %c0_40], %49 {strides = array<i32>} : memref<178x64xbf16, #tpu.memory_space<vmem>>, vector<178x64xbf16>,
    return
  }
}

module attributes {stable_mosaic.version = 11 : i64} {
  func.func @kernel(%arg0: memref<1x200x64xbf16, #tpu.memory_space<vmem>>, %arg1: memref<576x64xbf16, #tpu.memory_space<vmem>>, %arg2: memref<1x64xf32, #tpu.memory_space<vmem>>, %arg3: memref<178x64xbf16, #tpu.memory_space<vmem>>, %arg4: memref<178x64xbf16, #tpu.memory_space<vmem>>) attributes {dimension_semantics = [], scalar_prefetch = 0 : i64, scratch_operands = 0 : i64, tpu.core_type = #tpu.core_type<tc>} {
    %c0 = arith.constant 0 : index
    %c0_0 = arith.constant 0 : index
    %c0_1 = arith.constant 0 : index
    %0 = vector.load %arg0[%c0, %c0_0, %c0_1] : memref<1x200x64xbf16, #tpu.memory_space<vmem>>, vector<1x178x64xbf16>
    %1 = vector.shape_cast %0 : vector<1x178x64xbf16> to vector<178x64xbf16>
    %c0_2 = arith.constant 0 : index
    %c0_3 = arith.constant 0 : index
    %2 = vector.load %arg1[%c0_2, %c0_3] : memref<576x64xbf16, #tpu.memory_space<vmem>>, vector<64x64xbf16>
    %cst = arith.constant dense<0.000000e+00> : vector<178x64xf32>
    %3 = tpu.matmul %1, %2, %cst {dimension_numbers = #tpu.dot_dimension_numbers<[1], [0], [0], [1], [0, 0, 1, 1], [], []>} : vector<178x64xbf16>, vector<64x64xbf16>, vector<178x64xf32> -> vector<178x64xf32>
    %c0_4 = arith.constant 0 : index
    %c1 = arith.constant 1 : index
    %c0_5 = arith.constant 0 : index
    %4 = vector.load %arg0[%c0_4, %c1, %c0_5] : memref<1x200x64xbf16, #tpu.memory_space<vmem>>, vector<1x178x64xbf16>
    %5 = vector.shape_cast %4 : vector<1x178x64xbf16> to vector<178x64xbf16>
    %c64 = arith.constant 64 : index
    %c0_6 = arith.constant 0 : index
    %6 = vector.load %arg1[%c64, %c0_6] : memref<576x64xbf16, #tpu.memory_space<vmem>>, vector<64x64xbf16>
    %cst_7 = arith.constant dense<0.000000e+00> : vector<178x64xf32>
    %7 = tpu.matmul %5, %6, %cst_7 {dimension_numbers = #tpu.dot_dimension_numbers<[1], [0], [0], [1], [0, 0, 1, 1], [], []>} : vector<178x64xbf16>, vector<64x64xbf16>, vector<178x64xf32> -> vector<178x64xf32>
    %8 = arith.addf %3, %7 : vector<178x64xf32>
    %c0_8 = arith.constant 0 : index
    %c2 = arith.constant 2 : index
    %c0_9 = arith.constant 0 : index
    %9 = vector.load %arg0[%c0_8, %c2, %c0_9] : memref<1x200x64xbf16, #tpu.memory_space<vmem>>, vector<1x178x64xbf16>
    %10 = vector.shape_cast %9 : vector<1x178x64xbf16> to vector<178x64xbf16>
    %c128 = arith.constant 128 : index
    %c0_10 = arith.constant 0 : index
    %11 = vector.load %arg1[%c128, %c0_10] : memref<576x64xbf16, #tpu.memory_space<vmem>>, vector<64x64xbf16>
    %cst_11 = arith.constant dense<0.000000e+00> : vector<178x64xf32>
    %12 = tpu.matmul %10, %11, %cst_11 {dimension_numbers = #tpu.dot_dimension_numbers<[1], [0], [0], [1], [0, 0, 1, 1], [], []>} : vector<178x64xbf16>, vector<64x64xbf16>, vector<178x64xf32> -> vector<178x64xf32>
    %13 = arith.addf %8, %12 : vector<178x64xf32>
    %c0_12 = arith.constant 0 : index
    %c10 = arith.constant 10 : index
    %c0_13 = arith.constant 0 : index
    %14 = vector.load %arg0[%c0_12, %c10, %c0_13] : memref<1x200x64xbf16, #tpu.memory_space<vmem>>, vector<1x178x64xbf16>
    %15 = vector.shape_cast %14 : vector<1x178x64xbf16> to vector<178x64xbf16>
    %c192 = arith.constant 192 : index
    %c0_14 = arith.constant 0 : index
    %16 = vector.load %arg1[%c192, %c0_14] : memref<576x64xbf16, #tpu.memory_space<vmem>>, vector<64x64xbf16>
    %cst_15 = arith.constant dense<0.000000e+00> : vector<178x64xf32>
    %17 = tpu.matmul %15, %16, %cst_15 {dimension_numbers = #tpu.dot_dimension_numbers<[1], [0], [0], [1], [0, 0, 1, 1], [], []>} : vector<178x64xbf16>, vector<64x64xbf16>, vector<178x64xf32> -> vector<178x64xf32>
    %18 = arith.addf %13, %17 : vector<178x64xf32>
    %c0_16 = arith.constant 0 : index
    %c11 = arith.constant 11 : index
    %c0_17 = arith.constant 0 : index
    %19 = vector.load %arg0[%c0_16, %c11, %c0_17] : memref<1x200x64xbf16, #tpu.memory_space<vmem>>, vector<1x178x64xbf16>
    %20 = vector.shape_cast %19 : vector<1x178x64xbf16> to vector<178x64xbf16>
    %c256 = arith.constant 256 : index
    %c0_18 = arith.constant 0 : index
    %21 = vector.load %arg1[%c256, %c0_18] : memref<576x64xbf16, #tpu.memory_space<vmem>>, vector<64x64xbf16>
    %cst_19 = arith.constant dense<0.000000e+00> : vector<178x64xf32>
    %22 = tpu.matmul %20, %21, %cst_19 {dimension_numbers = #tpu.dot_dimension_numbers<[1], [0], [0], [1], [0, 0, 1, 1], [], []>} : vector<178x64xbf16>, vector<64x64xbf16>, vector<178x64xf32> -> vector<178x64xf32>
    %23 = arith.addf %18, %22 : vector<178x64xf32>
    %c0_20 = arith.constant 0 : index
    %c12 = arith.constant 12 : index
    %c0_21 = arith.constant 0 : index
    %24 = vector.load %arg0[%c0_20, %c12, %c0_21] : memref<1x200x64xbf16, #tpu.memory_space<vmem>>, vector<1x178x64xbf16>
    %25 = vector.shape_cast %24 : vector<1x178x64xbf16> to vector<178x64xbf16>
    %c320 = arith.constant 320 : index
    %c0_22 = arith.constant 0 : index
    %26 = vector.load %arg1[%c320, %c0_22] : memref<576x64xbf16, #tpu.memory_space<vmem>>, vector<64x64xbf16>
    %cst_23 = arith.constant dense<0.000000e+00> : vector<178x64xf32>
    %27 = tpu.matmul %25, %26, %cst_23 {dimension_numbers = #tpu.dot_dimension_numbers<[1], [0], [0], [1], [0, 0, 1, 1], [], []>} : vector<178x64xbf16>, vector<64x64xbf16>, vector<178x64xf32> -> vector<178x64xf32>
    %28 = arith.addf %23, %27 : vector<178x64xf32>
    %c0_24 = arith.constant 0 : index
    %c20 = arith.constant 20 : index
    %c0_25 = arith.constant 0 : index
    %29 = vector.load %arg0[%c0_24, %c20, %c0_25] : memref<1x200x64xbf16, #tpu.memory_space<vmem>>, vector<1x178x64xbf16>
    %30 = vector.shape_cast %29 : vector<1x178x64xbf16> to vector<178x64xbf16>
    %c384 = arith.constant 384 : index
    %c0_26 = arith.constant 0 : index
    %31 = vector.load %arg1[%c384, %c0_26] : memref<576x64xbf16, #tpu.memory_space<vmem>>, vector<64x64xbf16>
    %cst_27 = arith.constant dense<0.000000e+00> : vector<178x64xf32>
    %32 = tpu.matmul %30, %31, %cst_27 {dimension_numbers = #tpu.dot_dimension_numbers<[1], [0], [0], [1], [0, 0, 1, 1], [], []>} : vector<178x64xbf16>, vector<64x64xbf16>, vector<178x64xf32> -> vector<178x64xf32>
    %33 = arith.addf %28, %32 : vector<178x64xf32>
    %c0_28 = arith.constant 0 : index
    %c21 = arith.constant 21 : index
    %c0_29 = arith.constant 0 : index
    %34 = vector.load %arg0[%c0_28, %c21, %c0_29] : memref<1x200x64xbf16, #tpu.memory_space<vmem>>, vector<1x178x64xbf16>
    %35 = vector.shape_cast %34 : vector<1x178x64xbf16> to vector<178x64xbf16>
    %c448 = arith.constant 448 : index
    %c0_30 = arith.constant 0 : index
    %36 = vector.load %arg1[%c448, %c0_30] : memref<576x64xbf16, #tpu.memory_space<vmem>>, vector<64x64xbf16>
    %cst_31 = arith.constant dense<0.000000e+00> : vector<178x64xf32>
    %37 = tpu.matmul %35, %36, %cst_31 {dimension_numbers = #tpu.dot_dimension_numbers<[1], [0], [0], [1], [0, 0, 1, 1], [], []>} : vector<178x64xbf16>, vector<64x64xbf16>, vector<178x64xf32> -> vector<178x64xf32>
    %38 = arith.addf %33, %37 : vector<178x64xf32>
    %c0_32 = arith.constant 0 : index
    %c22 = arith.constant 22 : index
    %c0_33 = arith.constant 0 : index
    %39 = vector.load %arg0[%c0_32, %c22, %c0_33] : memref<1x200x64xbf16, #tpu.memory_space<vmem>>, vector<1x178x64xbf16>
    %40 = vector.shape_cast %39 : vector<1x178x64xbf16> to vector<178x64xbf16>
    %c512 = arith.constant 512 : index
    %c0_34 = arith.constant 0 : index
    %41 = vector.load %arg1[%c512, %c0_34] : memref<576x64xbf16, #tpu.memory_space<vmem>>, vector<64x64xbf16>
    %cst_35 = arith.constant dense<0.000000e+00> : vector<178x64xf32>
    %42 = tpu.matmul %40, %41, %cst_35 {dimension_numbers = #tpu.dot_dimension_numbers<[1], [0], [0], [1], [0, 0, 1, 1], [], []>} : vector<178x64xbf16>, vector<64x64xbf16>, vector<178x64xf32> -> vector<178x64xf32>
    %43 = arith.addf %38, %42 : vector<178x64xf32>
    %c0_36 = arith.constant 0 : index
    %c0_37 = arith.constant 0 : index
    %44 = vector.load %arg2[%c0_36, %c0_37] : memref<1x64xf32, #tpu.memory_space<vmem>>, vector<1x64xf32>
    %45 = vector.broadcast %44 : vector<1x64xf32> to vector<178x64xf32>
    %46 = arith.addf %43, %45 : vector<178x64xf32>
    %c0_38 = arith.constant 0 : index
    %c0_39 = arith.constant 0 : index
    %47 = vector.load %arg3[%c0_38, %c0_39] : memref<178x64xbf16, #tpu.memory_space<vmem>>, vector<178x64xbf16>
    %48 = arith.extf %47 : vector<178x64xbf16> to vector<178x64xf32>
    %49 = arith.addf %46, %48 : vector<178x64xf32>
    %cst_40 = arith.constant 0.000000e+00 : f32
    %50 = vector.broadcast %cst_40 : f32 to vector<178x64xf32>
    %51 = arith.maximumf %49, %50 : vector<178x64xf32>
    %52 = arith.truncf %51 : vector<178x64xf32> to vector<178x64xbf16>
    %c0_41 = arith.constant 0 : index
    %c0_42 = arith.constant 0 : index
    %53 = vector.load %arg4[%c0_41, %c0_42] : memref<178x64xbf16, #tpu.memory_space<vmem>>, vector<178x64xbf16>
    tpu.vector_store %arg4[%c0_41, %c0_42], %52 {strides = array<i32>} : memref<178x64xbf16, #tpu.memory_space<vmem>>, vector<178x64xbf16>,
    return
  }
}

module attributes {stable_mosaic.version = 11 : i64} {
  func.func @kernel(%arg0: memref<4x50x64xbf16, #tpu.memory_space<vmem>>, %arg1: memref<576x256xbf16, #tpu.memory_space<vmem>>, %arg2: memref<1x256xf32, #tpu.memory_space<vmem>>, %arg3: memref<44x256xbf16, #tpu.memory_space<vmem>>) attributes {dimension_semantics = [], scalar_prefetch = 0 : i64, scratch_operands = 0 : i64, tpu.core_type = #tpu.core_type<tc>} {
    %c0 = arith.constant 0 : index
    %c0_0 = arith.constant 0 : index
    %c0_1 = arith.constant 0 : index
    %0 = vector.load %arg0[%c0, %c0_0, %c0_1] : memref<4x50x64xbf16, #tpu.memory_space<vmem>>, vector<1x44x64xbf16>
    %1 = vector.shape_cast %0 : vector<1x44x64xbf16> to vector<44x64xbf16>
    %c0_2 = arith.constant 0 : index
    %c0_3 = arith.constant 0 : index
    %2 = vector.load %arg1[%c0_2, %c0_3] : memref<576x256xbf16, #tpu.memory_space<vmem>>, vector<64x256xbf16>
    %cst = arith.constant dense<0.000000e+00> : vector<44x256xf32>
    %3 = tpu.matmul %1, %2, %cst {dimension_numbers = #tpu.dot_dimension_numbers<[1], [0], [0], [1], [0, 0, 1, 1], [], []>} : vector<44x64xbf16>, vector<64x256xbf16>, vector<44x256xf32> -> vector<44x256xf32>
    %c1 = arith.constant 1 : index
    %c0_4 = arith.constant 0 : index
    %c0_5 = arith.constant 0 : index
    %4 = vector.load %arg0[%c1, %c0_4, %c0_5] : memref<4x50x64xbf16, #tpu.memory_space<vmem>>, vector<1x44x64xbf16>
    %5 = vector.shape_cast %4 : vector<1x44x64xbf16> to vector<44x64xbf16>
    %c64 = arith.constant 64 : index
    %c0_6 = arith.constant 0 : index
    %6 = vector.load %arg1[%c64, %c0_6] : memref<576x256xbf16, #tpu.memory_space<vmem>>, vector<64x256xbf16>
    %cst_7 = arith.constant dense<0.000000e+00> : vector<44x256xf32>
    %7 = tpu.matmul %5, %6, %cst_7 {dimension_numbers = #tpu.dot_dimension_numbers<[1], [0], [0], [1], [0, 0, 1, 1], [], []>} : vector<44x64xbf16>, vector<64x256xbf16>, vector<44x256xf32> -> vector<44x256xf32>
    %8 = arith.addf %3, %7 : vector<44x256xf32>
    %c0_8 = arith.constant 0 : index
    %c1_9 = arith.constant 1 : index
    %c0_10 = arith.constant 0 : index
    %9 = vector.load %arg0[%c0_8, %c1_9, %c0_10] : memref<4x50x64xbf16, #tpu.memory_space<vmem>>, vector<1x44x64xbf16>
    %10 = vector.shape_cast %9 : vector<1x44x64xbf16> to vector<44x64xbf16>
    %c128 = arith.constant 128 : index
    %c0_11 = arith.constant 0 : index
    %11 = vector.load %arg1[%c128, %c0_11] : memref<576x256xbf16, #tpu.memory_space<vmem>>, vector<64x256xbf16>
    %cst_12 = arith.constant dense<0.000000e+00> : vector<44x256xf32>
    %12 = tpu.matmul %10, %11, %cst_12 {dimension_numbers = #tpu.dot_dimension_numbers<[1], [0], [0], [1], [0, 0, 1, 1], [], []>} : vector<44x64xbf16>, vector<64x256xbf16>, vector<44x256xf32> -> vector<44x256xf32>
    %13 = arith.addf %8, %12 : vector<44x256xf32>
    %c2 = arith.constant 2 : index
    %c0_13 = arith.constant 0 : index
    %c0_14 = arith.constant 0 : index
    %14 = vector.load %arg0[%c2, %c0_13, %c0_14] : memref<4x50x64xbf16, #tpu.memory_space<vmem>>, vector<1x44x64xbf16>
    %15 = vector.shape_cast %14 : vector<1x44x64xbf16> to vector<44x64xbf16>
    %c192 = arith.constant 192 : index
    %c0_15 = arith.constant 0 : index
    %16 = vector.load %arg1[%c192, %c0_15] : memref<576x256xbf16, #tpu.memory_space<vmem>>, vector<64x256xbf16>
    %cst_16 = arith.constant dense<0.000000e+00> : vector<44x256xf32>
    %17 = tpu.matmul %15, %16, %cst_16 {dimension_numbers = #tpu.dot_dimension_numbers<[1], [0], [0], [1], [0, 0, 1, 1], [], []>} : vector<44x64xbf16>, vector<64x256xbf16>, vector<44x256xf32> -> vector<44x256xf32>
    %18 = arith.addf %13, %17 : vector<44x256xf32>
    %c3 = arith.constant 3 : index
    %c0_17 = arith.constant 0 : index
    %c0_18 = arith.constant 0 : index
    %19 = vector.load %arg0[%c3, %c0_17, %c0_18] : memref<4x50x64xbf16, #tpu.memory_space<vmem>>, vector<1x44x64xbf16>
    %20 = vector.shape_cast %19 : vector<1x44x64xbf16> to vector<44x64xbf16>
    %c256 = arith.constant 256 : index
    %c0_19 = arith.constant 0 : index
    %21 = vector.load %arg1[%c256, %c0_19] : memref<576x256xbf16, #tpu.memory_space<vmem>>, vector<64x256xbf16>
    %cst_20 = arith.constant dense<0.000000e+00> : vector<44x256xf32>
    %22 = tpu.matmul %20, %21, %cst_20 {dimension_numbers = #tpu.dot_dimension_numbers<[1], [0], [0], [1], [0, 0, 1, 1], [], []>} : vector<44x64xbf16>, vector<64x256xbf16>, vector<44x256xf32> -> vector<44x256xf32>
    %23 = arith.addf %18, %22 : vector<44x256xf32>
    %c2_21 = arith.constant 2 : index
    %c1_22 = arith.constant 1 : index
    %c0_23 = arith.constant 0 : index
    %24 = vector.load %arg0[%c2_21, %c1_22, %c0_23] : memref<4x50x64xbf16, #tpu.memory_space<vmem>>, vector<1x44x64xbf16>
    %25 = vector.shape_cast %24 : vector<1x44x64xbf16> to vector<44x64xbf16>
    %c320 = arith.constant 320 : index
    %c0_24 = arith.constant 0 : index
    %26 = vector.load %arg1[%c320, %c0_24] : memref<576x256xbf16, #tpu.memory_space<vmem>>, vector<64x256xbf16>
    %cst_25 = arith.constant dense<0.000000e+00> : vector<44x256xf32>
    %27 = tpu.matmul %25, %26, %cst_25 {dimension_numbers = #tpu.dot_dimension_numbers<[1], [0], [0], [1], [0, 0, 1, 1], [], []>} : vector<44x64xbf16>, vector<64x256xbf16>, vector<44x256xf32> -> vector<44x256xf32>
    %28 = arith.addf %23, %27 : vector<44x256xf32>
    %c0_26 = arith.constant 0 : index
    %c5 = arith.constant 5 : index
    %c0_27 = arith.constant 0 : index
    %29 = vector.load %arg0[%c0_26, %c5, %c0_27] : memref<4x50x64xbf16, #tpu.memory_space<vmem>>, vector<1x44x64xbf16>
    %30 = vector.shape_cast %29 : vector<1x44x64xbf16> to vector<44x64xbf16>
    %c384 = arith.constant 384 : index
    %c0_28 = arith.constant 0 : index
    %31 = vector.load %arg1[%c384, %c0_28] : memref<576x256xbf16, #tpu.memory_space<vmem>>, vector<64x256xbf16>
    %cst_29 = arith.constant dense<0.000000e+00> : vector<44x256xf32>
    %32 = tpu.matmul %30, %31, %cst_29 {dimension_numbers = #tpu.dot_dimension_numbers<[1], [0], [0], [1], [0, 0, 1, 1], [], []>} : vector<44x64xbf16>, vector<64x256xbf16>, vector<44x256xf32> -> vector<44x256xf32>
    %33 = arith.addf %28, %32 : vector<44x256xf32>
    %c1_30 = arith.constant 1 : index
    %c5_31 = arith.constant 5 : index
    %c0_32 = arith.constant 0 : index
    %34 = vector.load %arg0[%c1_30, %c5_31, %c0_32] : memref<4x50x64xbf16, #tpu.memory_space<vmem>>, vector<1x44x64xbf16>
    %35 = vector.shape_cast %34 : vector<1x44x64xbf16> to vector<44x64xbf16>
    %c448 = arith.constant 448 : index
    %c0_33 = arith.constant 0 : index
    %36 = vector.load %arg1[%c448, %c0_33] : memref<576x256xbf16, #tpu.memory_space<vmem>>, vector<64x256xbf16>
    %cst_34 = arith.constant dense<0.000000e+00> : vector<44x256xf32>
    %37 = tpu.matmul %35, %36, %cst_34 {dimension_numbers = #tpu.dot_dimension_numbers<[1], [0], [0], [1], [0, 0, 1, 1], [], []>} : vector<44x64xbf16>, vector<64x256xbf16>, vector<44x256xf32> -> vector<44x256xf32>
    %38 = arith.addf %33, %37 : vector<44x256xf32>
    %c0_35 = arith.constant 0 : index
    %c6 = arith.constant 6 : index
    %c0_36 = arith.constant 0 : index
    %39 = vector.load %arg0[%c0_35, %c6, %c0_36] : memref<4x50x64xbf16, #tpu.memory_space<vmem>>, vector<1x44x64xbf16>
    %40 = vector.shape_cast %39 : vector<1x44x64xbf16> to vector<44x64xbf16>
    %c512 = arith.constant 512 : index
    %c0_37 = arith.constant 0 : index
    %41 = vector.load %arg1[%c512, %c0_37] : memref<576x256xbf16, #tpu.memory_space<vmem>>, vector<64x256xbf16>
    %cst_38 = arith.constant dense<0.000000e+00> : vector<44x256xf32>
    %42 = tpu.matmul %40, %41, %cst_38 {dimension_numbers = #tpu.dot_dimension_numbers<[1], [0], [0], [1], [0, 0, 1, 1], [], []>} : vector<44x64xbf16>, vector<64x256xbf16>, vector<44x256xf32> -> vector<44x256xf32>
    %43 = arith.addf %38, %42 : vector<44x256xf32>
    %c0_39 = arith.constant 0 : index
    %c0_40 = arith.constant 0 : index
    %44 = vector.load %arg2[%c0_39, %c0_40] : memref<1x256xf32, #tpu.memory_space<vmem>>, vector<1x256xf32>
    %45 = vector.broadcast %44 : vector<1x256xf32> to vector<44x256xf32>
    %46 = arith.addf %43, %45 : vector<44x256xf32>
    %47 = tpu.iota {dimensions = array<i32: 1>} : vector<1x256xi32>
    %c128_i32 = arith.constant 128 : i32
    %48 = vector.broadcast %c128_i32 : i32 to vector<1x256xi32>
    %49 = arith.cmpi slt, %47, %48 : vector<1x256xi32>
    %cst_41 = arith.constant 0.000000e+00 : f32
    %50 = vector.broadcast %cst_41 : f32 to vector<44x256xf32>
    %51 = arith.maximumf %46, %50 : vector<44x256xf32>
    %52 = vector.shape_cast %49 : vector<1x256xi1> to vector<1x256xi1>
    %53 = vector.broadcast %52 : vector<1x256xi1> to vector<44x256xi1>
    %54 = arith.select %53, %51, %46 : vector<44x256xi1>, vector<44x256xf32>
    %55 = arith.truncf %54 : vector<44x256xf32> to vector<44x256xbf16>
    %c0_42 = arith.constant 0 : index
    %c0_43 = arith.constant 0 : index
    %56 = vector.load %arg3[%c0_42, %c0_43] : memref<44x256xbf16, #tpu.memory_space<vmem>>, vector<44x256xbf16>
    tpu.vector_store %arg3[%c0_42, %c0_43], %55 {strides = array<i32>} : memref<44x256xbf16, #tpu.memory_space<vmem>>, vector<44x256xbf16>,
    return
  }
}

module attributes {stable_mosaic.version = 11 : i64} {
  func.func @kernel(%arg0: memref<1x72x128xbf16, #tpu.memory_space<vmem>>, %arg1: memref<1152x128xbf16, #tpu.memory_space<vmem>>, %arg2: memref<1x128xf32, #tpu.memory_space<vmem>>, %arg3: memref<58x128xbf16, #tpu.memory_space<vmem>>, %arg4: memref<58x128xbf16, #tpu.memory_space<vmem>>) attributes {dimension_semantics = [], scalar_prefetch = 0 : i64, scratch_operands = 0 : i64, tpu.core_type = #tpu.core_type<tc>} {
    %c0 = arith.constant 0 : index
    %c0_0 = arith.constant 0 : index
    %c0_1 = arith.constant 0 : index
    %0 = vector.load %arg0[%c0, %c0_0, %c0_1] : memref<1x72x128xbf16, #tpu.memory_space<vmem>>, vector<1x58x128xbf16>
    %1 = vector.shape_cast %0 : vector<1x58x128xbf16> to vector<58x128xbf16>
    %c0_2 = arith.constant 0 : index
    %c0_3 = arith.constant 0 : index
    %2 = vector.load %arg1[%c0_2, %c0_3] : memref<1152x128xbf16, #tpu.memory_space<vmem>>, vector<128x128xbf16>
    %cst = arith.constant dense<0.000000e+00> : vector<58x128xf32>
    %3 = tpu.matmul %1, %2, %cst {dimension_numbers = #tpu.dot_dimension_numbers<[1], [0], [0], [1], [0, 0, 1, 1], [], []>} : vector<58x128xbf16>, vector<128x128xbf16>, vector<58x128xf32> -> vector<58x128xf32>
    %c0_4 = arith.constant 0 : index
    %c1 = arith.constant 1 : index
    %c0_5 = arith.constant 0 : index
    %4 = vector.load %arg0[%c0_4, %c1, %c0_5] : memref<1x72x128xbf16, #tpu.memory_space<vmem>>, vector<1x58x128xbf16>
    %5 = vector.shape_cast %4 : vector<1x58x128xbf16> to vector<58x128xbf16>
    %c128 = arith.constant 128 : index
    %c0_6 = arith.constant 0 : index
    %6 = vector.load %arg1[%c128, %c0_6] : memref<1152x128xbf16, #tpu.memory_space<vmem>>, vector<128x128xbf16>
    %cst_7 = arith.constant dense<0.000000e+00> : vector<58x128xf32>
    %7 = tpu.matmul %5, %6, %cst_7 {dimension_numbers = #tpu.dot_dimension_numbers<[1], [0], [0], [1], [0, 0, 1, 1], [], []>} : vector<58x128xbf16>, vector<128x128xbf16>, vector<58x128xf32> -> vector<58x128xf32>
    %8 = arith.addf %3, %7 : vector<58x128xf32>
    %c0_8 = arith.constant 0 : index
    %c2 = arith.constant 2 : index
    %c0_9 = arith.constant 0 : index
    %9 = vector.load %arg0[%c0_8, %c2, %c0_9] : memref<1x72x128xbf16, #tpu.memory_space<vmem>>, vector<1x58x128xbf16>
    %10 = vector.shape_cast %9 : vector<1x58x128xbf16> to vector<58x128xbf16>
    %c256 = arith.constant 256 : index
    %c0_10 = arith.constant 0 : index
    %11 = vector.load %arg1[%c256, %c0_10] : memref<1152x128xbf16, #tpu.memory_space<vmem>>, vector<128x128xbf16>
    %cst_11 = arith.constant dense<0.000000e+00> : vector<58x128xf32>
    %12 = tpu.matmul %10, %11, %cst_11 {dimension_numbers = #tpu.dot_dimension_numbers<[1], [0], [0], [1], [0, 0, 1, 1], [], []>} : vector<58x128xbf16>, vector<128x128xbf16>, vector<58x128xf32> -> vector<58x128xf32>
    %13 = arith.addf %8, %12 : vector<58x128xf32>
    %c0_12 = arith.constant 0 : index
    %c6 = arith.constant 6 : index
    %c0_13 = arith.constant 0 : index
    %14 = vector.load %arg0[%c0_12, %c6, %c0_13] : memref<1x72x128xbf16, #tpu.memory_space<vmem>>, vector<1x58x128xbf16>
    %15 = vector.shape_cast %14 : vector<1x58x128xbf16> to vector<58x128xbf16>
    %c384 = arith.constant 384 : index
    %c0_14 = arith.constant 0 : index
    %16 = vector.load %arg1[%c384, %c0_14] : memref<1152x128xbf16, #tpu.memory_space<vmem>>, vector<128x128xbf16>
    %cst_15 = arith.constant dense<0.000000e+00> : vector<58x128xf32>
    %17 = tpu.matmul %15, %16, %cst_15 {dimension_numbers = #tpu.dot_dimension_numbers<[1], [0], [0], [1], [0, 0, 1, 1], [], []>} : vector<58x128xbf16>, vector<128x128xbf16>, vector<58x128xf32> -> vector<58x128xf32>
    %18 = arith.addf %13, %17 : vector<58x128xf32>
    %c0_16 = arith.constant 0 : index
    %c7 = arith.constant 7 : index
    %c0_17 = arith.constant 0 : index
    %19 = vector.load %arg0[%c0_16, %c7, %c0_17] : memref<1x72x128xbf16, #tpu.memory_space<vmem>>, vector<1x58x128xbf16>
    %20 = vector.shape_cast %19 : vector<1x58x128xbf16> to vector<58x128xbf16>
    %c512 = arith.constant 512 : index
    %c0_18 = arith.constant 0 : index
    %21 = vector.load %arg1[%c512, %c0_18] : memref<1152x128xbf16, #tpu.memory_space<vmem>>, vector<128x128xbf16>
    %cst_19 = arith.constant dense<0.000000e+00> : vector<58x128xf32>
    %22 = tpu.matmul %20, %21, %cst_19 {dimension_numbers = #tpu.dot_dimension_numbers<[1], [0], [0], [1], [0, 0, 1, 1], [], []>} : vector<58x128xbf16>, vector<128x128xbf16>, vector<58x128xf32> -> vector<58x128xf32>
    %23 = arith.addf %18, %22 : vector<58x128xf32>
    %c0_20 = arith.constant 0 : index
    %c8 = arith.constant 8 : index
    %c0_21 = arith.constant 0 : index
    %24 = vector.load %arg0[%c0_20, %c8, %c0_21] : memref<1x72x128xbf16, #tpu.memory_space<vmem>>, vector<1x58x128xbf16>
    %25 = vector.shape_cast %24 : vector<1x58x128xbf16> to vector<58x128xbf16>
    %c640 = arith.constant 640 : index
    %c0_22 = arith.constant 0 : index
    %26 = vector.load %arg1[%c640, %c0_22] : memref<1152x128xbf16, #tpu.memory_space<vmem>>, vector<128x128xbf16>
    %cst_23 = arith.constant dense<0.000000e+00> : vector<58x128xf32>
    %27 = tpu.matmul %25, %26, %cst_23 {dimension_numbers = #tpu.dot_dimension_numbers<[1], [0], [0], [1], [0, 0, 1, 1], [], []>} : vector<58x128xbf16>, vector<128x128xbf16>, vector<58x128xf32> -> vector<58x128xf32>
    %28 = arith.addf %23, %27 : vector<58x128xf32>
    %c0_24 = arith.constant 0 : index
    %c12 = arith.constant 12 : index
    %c0_25 = arith.constant 0 : index
    %29 = vector.load %arg0[%c0_24, %c12, %c0_25] : memref<1x72x128xbf16, #tpu.memory_space<vmem>>, vector<1x58x128xbf16>
    %30 = vector.shape_cast %29 : vector<1x58x128xbf16> to vector<58x128xbf16>
    %c768 = arith.constant 768 : index
    %c0_26 = arith.constant 0 : index
    %31 = vector.load %arg1[%c768, %c0_26] : memref<1152x128xbf16, #tpu.memory_space<vmem>>, vector<128x128xbf16>
    %cst_27 = arith.constant dense<0.000000e+00> : vector<58x128xf32>
    %32 = tpu.matmul %30, %31, %cst_27 {dimension_numbers = #tpu.dot_dimension_numbers<[1], [0], [0], [1], [0, 0, 1, 1], [], []>} : vector<58x128xbf16>, vector<128x128xbf16>, vector<58x128xf32> -> vector<58x128xf32>
    %33 = arith.addf %28, %32 : vector<58x128xf32>
    %c0_28 = arith.constant 0 : index
    %c13 = arith.constant 13 : index
    %c0_29 = arith.constant 0 : index
    %34 = vector.load %arg0[%c0_28, %c13, %c0_29] : memref<1x72x128xbf16, #tpu.memory_space<vmem>>, vector<1x58x128xbf16>
    %35 = vector.shape_cast %34 : vector<1x58x128xbf16> to vector<58x128xbf16>
    %c896 = arith.constant 896 : index
    %c0_30 = arith.constant 0 : index
    %36 = vector.load %arg1[%c896, %c0_30] : memref<1152x128xbf16, #tpu.memory_space<vmem>>, vector<128x128xbf16>
    %cst_31 = arith.constant dense<0.000000e+00> : vector<58x128xf32>
    %37 = tpu.matmul %35, %36, %cst_31 {dimension_numbers = #tpu.dot_dimension_numbers<[1], [0], [0], [1], [0, 0, 1, 1], [], []>} : vector<58x128xbf16>, vector<128x128xbf16>, vector<58x128xf32> -> vector<58x128xf32>
    %38 = arith.addf %33, %37 : vector<58x128xf32>
    %c0_32 = arith.constant 0 : index
    %c14 = arith.constant 14 : index
    %c0_33 = arith.constant 0 : index
    %39 = vector.load %arg0[%c0_32, %c14, %c0_33] : memref<1x72x128xbf16, #tpu.memory_space<vmem>>, vector<1x58x128xbf16>
    %40 = vector.shape_cast %39 : vector<1x58x128xbf16> to vector<58x128xbf16>
    %c1024 = arith.constant 1024 : index
    %c0_34 = arith.constant 0 : index
    %41 = vector.load %arg1[%c1024, %c0_34] : memref<1152x128xbf16, #tpu.memory_space<vmem>>, vector<128x128xbf16>
    %cst_35 = arith.constant dense<0.000000e+00> : vector<58x128xf32>
    %42 = tpu.matmul %40, %41, %cst_35 {dimension_numbers = #tpu.dot_dimension_numbers<[1], [0], [0], [1], [0, 0, 1, 1], [], []>} : vector<58x128xbf16>, vector<128x128xbf16>, vector<58x128xf32> -> vector<58x128xf32>
    %43 = arith.addf %38, %42 : vector<58x128xf32>
    %c0_36 = arith.constant 0 : index
    %c0_37 = arith.constant 0 : index
    %44 = vector.load %arg2[%c0_36, %c0_37] : memref<1x128xf32, #tpu.memory_space<vmem>>, vector<1x128xf32>
    %45 = vector.broadcast %44 : vector<1x128xf32> to vector<58x128xf32>
    %46 = arith.addf %43, %45 : vector<58x128xf32>
    %c0_38 = arith.constant 0 : index
    %c0_39 = arith.constant 0 : index
    %47 = vector.load %arg3[%c0_38, %c0_39] : memref<58x128xbf16, #tpu.memory_space<vmem>>, vector<58x128xbf16>
    %48 = arith.extf %47 : vector<58x128xbf16> to vector<58x128xf32>
    %49 = arith.addf %46, %48 : vector<58x128xf32>
    %cst_40 = arith.constant 0.000000e+00 : f32
    %50 = vector.broadcast %cst_40 : f32 to vector<58x128xf32>
    %51 = arith.maximumf %49, %50 : vector<58x128xf32>
    %52 = arith.truncf %51 : vector<58x128xf32> to vector<58x128xbf16>
    %c0_41 = arith.constant 0 : index
    %c0_42 = arith.constant 0 : index
    %53 = vector.load %arg4[%c0_41, %c0_42] : memref<58x128xbf16, #tpu.memory_space<vmem>>, vector<58x128xbf16>
    tpu.vector_store %arg4[%c0_41, %c0_42], %52 {strides = array<i32>} : memref<58x128xbf16, #tpu.memory_space<vmem>>, vector<58x128xbf16>,
    return
  }
}

module attributes {stable_mosaic.version = 11 : i64} {
  func.func @kernel(%arg0: memref<4x18x128xbf16, #tpu.memory_space<vmem>>, %arg1: memref<1152x512xbf16, #tpu.memory_space<vmem>>, %arg2: memref<1x512xf32, #tpu.memory_space<vmem>>, %arg3: memref<14x512xbf16, #tpu.memory_space<vmem>>) attributes {dimension_semantics = [], scalar_prefetch = 0 : i64, scratch_operands = 0 : i64, tpu.core_type = #tpu.core_type<tc>} {
    %c0 = arith.constant 0 : index
    %c0_0 = arith.constant 0 : index
    %c0_1 = arith.constant 0 : index
    %0 = vector.load %arg0[%c0, %c0_0, %c0_1] : memref<4x18x128xbf16, #tpu.memory_space<vmem>>, vector<1x14x128xbf16>
    %1 = vector.shape_cast %0 : vector<1x14x128xbf16> to vector<14x128xbf16>
    %c0_2 = arith.constant 0 : index
    %c0_3 = arith.constant 0 : index
    %2 = vector.load %arg1[%c0_2, %c0_3] : memref<1152x512xbf16, #tpu.memory_space<vmem>>, vector<128x512xbf16>
    %cst = arith.constant dense<0.000000e+00> : vector<14x512xf32>
    %3 = tpu.matmul %1, %2, %cst {dimension_numbers = #tpu.dot_dimension_numbers<[1], [0], [0], [1], [0, 0, 1, 1], [], []>} : vector<14x128xbf16>, vector<128x512xbf16>, vector<14x512xf32> -> vector<14x512xf32>
    %c1 = arith.constant 1 : index
    %c0_4 = arith.constant 0 : index
    %c0_5 = arith.constant 0 : index
    %4 = vector.load %arg0[%c1, %c0_4, %c0_5] : memref<4x18x128xbf16, #tpu.memory_space<vmem>>, vector<1x14x128xbf16>
    %5 = vector.shape_cast %4 : vector<1x14x128xbf16> to vector<14x128xbf16>
    %c128 = arith.constant 128 : index
    %c0_6 = arith.constant 0 : index
    %6 = vector.load %arg1[%c128, %c0_6] : memref<1152x512xbf16, #tpu.memory_space<vmem>>, vector<128x512xbf16>
    %cst_7 = arith.constant dense<0.000000e+00> : vector<14x512xf32>
    %7 = tpu.matmul %5, %6, %cst_7 {dimension_numbers = #tpu.dot_dimension_numbers<[1], [0], [0], [1], [0, 0, 1, 1], [], []>} : vector<14x128xbf16>, vector<128x512xbf16>, vector<14x512xf32> -> vector<14x512xf32>
    %8 = arith.addf %3, %7 : vector<14x512xf32>
    %c0_8 = arith.constant 0 : index
    %c1_9 = arith.constant 1 : index
    %c0_10 = arith.constant 0 : index
    %9 = vector.load %arg0[%c0_8, %c1_9, %c0_10] : memref<4x18x128xbf16, #tpu.memory_space<vmem>>, vector<1x14x128xbf16>
    %10 = vector.shape_cast %9 : vector<1x14x128xbf16> to vector<14x128xbf16>
    %c256 = arith.constant 256 : index
    %c0_11 = arith.constant 0 : index
    %11 = vector.load %arg1[%c256, %c0_11] : memref<1152x512xbf16, #tpu.memory_space<vmem>>, vector<128x512xbf16>
    %cst_12 = arith.constant dense<0.000000e+00> : vector<14x512xf32>
    %12 = tpu.matmul %10, %11, %cst_12 {dimension_numbers = #tpu.dot_dimension_numbers<[1], [0], [0], [1], [0, 0, 1, 1], [], []>} : vector<14x128xbf16>, vector<128x512xbf16>, vector<14x512xf32> -> vector<14x512xf32>
    %13 = arith.addf %8, %12 : vector<14x512xf32>
    %c2 = arith.constant 2 : index
    %c0_13 = arith.constant 0 : index
    %c0_14 = arith.constant 0 : index
    %14 = vector.load %arg0[%c2, %c0_13, %c0_14] : memref<4x18x128xbf16, #tpu.memory_space<vmem>>, vector<1x14x128xbf16>
    %15 = vector.shape_cast %14 : vector<1x14x128xbf16> to vector<14x128xbf16>
    %c384 = arith.constant 384 : index
    %c0_15 = arith.constant 0 : index
    %16 = vector.load %arg1[%c384, %c0_15] : memref<1152x512xbf16, #tpu.memory_space<vmem>>, vector<128x512xbf16>
    %cst_16 = arith.constant dense<0.000000e+00> : vector<14x512xf32>
    %17 = tpu.matmul %15, %16, %cst_16 {dimension_numbers = #tpu.dot_dimension_numbers<[1], [0], [0], [1], [0, 0, 1, 1], [], []>} : vector<14x128xbf16>, vector<128x512xbf16>, vector<14x512xf32> -> vector<14x512xf32>
    %18 = arith.addf %13, %17 : vector<14x512xf32>
    %c3 = arith.constant 3 : index
    %c0_17 = arith.constant 0 : index
    %c0_18 = arith.constant 0 : index
    %19 = vector.load %arg0[%c3, %c0_17, %c0_18] : memref<4x18x128xbf16, #tpu.memory_space<vmem>>, vector<1x14x128xbf16>
    %20 = vector.shape_cast %19 : vector<1x14x128xbf16> to vector<14x128xbf16>
    %c512 = arith.constant 512 : index
    %c0_19 = arith.constant 0 : index
    %21 = vector.load %arg1[%c512, %c0_19] : memref<1152x512xbf16, #tpu.memory_space<vmem>>, vector<128x512xbf16>
    %cst_20 = arith.constant dense<0.000000e+00> : vector<14x512xf32>
    %22 = tpu.matmul %20, %21, %cst_20 {dimension_numbers = #tpu.dot_dimension_numbers<[1], [0], [0], [1], [0, 0, 1, 1], [], []>} : vector<14x128xbf16>, vector<128x512xbf16>, vector<14x512xf32> -> vector<14x512xf32>
    %23 = arith.addf %18, %22 : vector<14x512xf32>
    %c2_21 = arith.constant 2 : index
    %c1_22 = arith.constant 1 : index
    %c0_23 = arith.constant 0 : index
    %24 = vector.load %arg0[%c2_21, %c1_22, %c0_23] : memref<4x18x128xbf16, #tpu.memory_space<vmem>>, vector<1x14x128xbf16>
    %25 = vector.shape_cast %24 : vector<1x14x128xbf16> to vector<14x128xbf16>
    %c640 = arith.constant 640 : index
    %c0_24 = arith.constant 0 : index
    %26 = vector.load %arg1[%c640, %c0_24] : memref<1152x512xbf16, #tpu.memory_space<vmem>>, vector<128x512xbf16>
    %cst_25 = arith.constant dense<0.000000e+00> : vector<14x512xf32>
    %27 = tpu.matmul %25, %26, %cst_25 {dimension_numbers = #tpu.dot_dimension_numbers<[1], [0], [0], [1], [0, 0, 1, 1], [], []>} : vector<14x128xbf16>, vector<128x512xbf16>, vector<14x512xf32> -> vector<14x512xf32>
    %28 = arith.addf %23, %27 : vector<14x512xf32>
    %c0_26 = arith.constant 0 : index
    %c3_27 = arith.constant 3 : index
    %c0_28 = arith.constant 0 : index
    %29 = vector.load %arg0[%c0_26, %c3_27, %c0_28] : memref<4x18x128xbf16, #tpu.memory_space<vmem>>, vector<1x14x128xbf16>
    %30 = vector.shape_cast %29 : vector<1x14x128xbf16> to vector<14x128xbf16>
    %c768 = arith.constant 768 : index
    %c0_29 = arith.constant 0 : index
    %31 = vector.load %arg1[%c768, %c0_29] : memref<1152x512xbf16, #tpu.memory_space<vmem>>, vector<128x512xbf16>
    %cst_30 = arith.constant dense<0.000000e+00> : vector<14x512xf32>
    %32 = tpu.matmul %30, %31, %cst_30 {dimension_numbers = #tpu.dot_dimension_numbers<[1], [0], [0], [1], [0, 0, 1, 1], [], []>} : vector<14x128xbf16>, vector<128x512xbf16>, vector<14x512xf32> -> vector<14x512xf32>
    %33 = arith.addf %28, %32 : vector<14x512xf32>
    %c1_31 = arith.constant 1 : index
    %c3_32 = arith.constant 3 : index
    %c0_33 = arith.constant 0 : index
    %34 = vector.load %arg0[%c1_31, %c3_32, %c0_33] : memref<4x18x128xbf16, #tpu.memory_space<vmem>>, vector<1x14x128xbf16>
    %35 = vector.shape_cast %34 : vector<1x14x128xbf16> to vector<14x128xbf16>
    %c896 = arith.constant 896 : index
    %c0_34 = arith.constant 0 : index
    %36 = vector.load %arg1[%c896, %c0_34] : memref<1152x512xbf16, #tpu.memory_space<vmem>>, vector<128x512xbf16>
    %cst_35 = arith.constant dense<0.000000e+00> : vector<14x512xf32>
    %37 = tpu.matmul %35, %36, %cst_35 {dimension_numbers = #tpu.dot_dimension_numbers<[1], [0], [0], [1], [0, 0, 1, 1], [], []>} : vector<14x128xbf16>, vector<128x512xbf16>, vector<14x512xf32> -> vector<14x512xf32>
    %38 = arith.addf %33, %37 : vector<14x512xf32>
    %c0_36 = arith.constant 0 : index
    %c4 = arith.constant 4 : index
    %c0_37 = arith.constant 0 : index
    %39 = vector.load %arg0[%c0_36, %c4, %c0_37] : memref<4x18x128xbf16, #tpu.memory_space<vmem>>, vector<1x14x128xbf16>
    %40 = vector.shape_cast %39 : vector<1x14x128xbf16> to vector<14x128xbf16>
    %c1024 = arith.constant 1024 : index
    %c0_38 = arith.constant 0 : index
    %41 = vector.load %arg1[%c1024, %c0_38] : memref<1152x512xbf16, #tpu.memory_space<vmem>>, vector<128x512xbf16>
    %cst_39 = arith.constant dense<0.000000e+00> : vector<14x512xf32>
    %42 = tpu.matmul %40, %41, %cst_39 {dimension_numbers = #tpu.dot_dimension_numbers<[1], [0], [0], [1], [0, 0, 1, 1], [], []>} : vector<14x128xbf16>, vector<128x512xbf16>, vector<14x512xf32> -> vector<14x512xf32>
    %43 = arith.addf %38, %42 : vector<14x512xf32>
    %c0_40 = arith.constant 0 : index
    %c0_41 = arith.constant 0 : index
    %44 = vector.load %arg2[%c0_40, %c0_41] : memref<1x512xf32, #tpu.memory_space<vmem>>, vector<1x512xf32>
    %45 = vector.broadcast %44 : vector<1x512xf32> to vector<14x512xf32>
    %46 = arith.addf %43, %45 : vector<14x512xf32>
    %47 = tpu.iota {dimensions = array<i32: 1>} : vector<1x512xi32>
    %c256_i32 = arith.constant 256 : i32
    %48 = vector.broadcast %c256_i32 : i32 to vector<1x512xi32>
    %49 = arith.cmpi slt, %47, %48 : vector<1x512xi32>
    %cst_42 = arith.constant 0.000000e+00 : f32
    %50 = vector.broadcast %cst_42 : f32 to vector<14x512xf32>
    %51 = arith.maximumf %46, %50 : vector<14x512xf32>
    %52 = vector.shape_cast %49 : vector<1x512xi1> to vector<1x512xi1>
    %53 = vector.broadcast %52 : vector<1x512xi1> to vector<14x512xi1>
    %54 = arith.select %53, %51, %46 : vector<14x512xi1>, vector<14x512xf32>
    %55 = arith.truncf %54 : vector<14x512xf32> to vector<14x512xbf16>
    %c0_43 = arith.constant 0 : index
    %c0_44 = arith.constant 0 : index
    %56 = vector.load %arg3[%c0_43, %c0_44] : memref<14x512xbf16, #tpu.memory_space<vmem>>, vector<14x512xbf16>
    tpu.vector_store %arg3[%c0_43, %c0_44], %55 {strides = array<i32>} : memref<14x512xbf16, #tpu.memory_space<vmem>>, vector<14x512xbf16>,
    return
  }
}

module attributes {stable_mosaic.version = 11 : i64} {
  func.func @kernel(%arg0: memref<1x32x256xbf16, #tpu.memory_space<vmem>>, %arg1: memref<2304x256xbf16, #tpu.memory_space<vmem>>, %arg2: memref<1x256xf32, #tpu.memory_space<vmem>>, %arg3: memref<22x256xbf16, #tpu.memory_space<vmem>>, %arg4: memref<22x256xbf16, #tpu.memory_space<vmem>>) attributes {dimension_semantics = [], scalar_prefetch = 0 : i64, scratch_operands = 0 : i64, tpu.core_type = #tpu.core_type<tc>} {
    %c0 = arith.constant 0 : index
    %c0_0 = arith.constant 0 : index
    %c0_1 = arith.constant 0 : index
    %0 = vector.load %arg0[%c0, %c0_0, %c0_1] : memref<1x32x256xbf16, #tpu.memory_space<vmem>>, vector<1x22x256xbf16>
    %1 = vector.shape_cast %0 : vector<1x22x256xbf16> to vector<22x256xbf16>
    %c0_2 = arith.constant 0 : index
    %c0_3 = arith.constant 0 : index
    %2 = vector.load %arg1[%c0_2, %c0_3] : memref<2304x256xbf16, #tpu.memory_space<vmem>>, vector<256x256xbf16>
    %cst = arith.constant dense<0.000000e+00> : vector<22x256xf32>
    %3 = tpu.matmul %1, %2, %cst {dimension_numbers = #tpu.dot_dimension_numbers<[1], [0], [0], [1], [0, 0, 1, 1], [], []>} : vector<22x256xbf16>, vector<256x256xbf16>, vector<22x256xf32> -> vector<22x256xf32>
    %c0_4 = arith.constant 0 : index
    %c1 = arith.constant 1 : index
    %c0_5 = arith.constant 0 : index
    %4 = vector.load %arg0[%c0_4, %c1, %c0_5] : memref<1x32x256xbf16, #tpu.memory_space<vmem>>, vector<1x22x256xbf16>
    %5 = vector.shape_cast %4 : vector<1x22x256xbf16> to vector<22x256xbf16>
    %c256 = arith.constant 256 : index
    %c0_6 = arith.constant 0 : index
    %6 = vector.load %arg1[%c256, %c0_6] : memref<2304x256xbf16, #tpu.memory_space<vmem>>, vector<256x256xbf16>
    %cst_7 = arith.constant dense<0.000000e+00> : vector<22x256xf32>
    %7 = tpu.matmul %5, %6, %cst_7 {dimension_numbers = #tpu.dot_dimension_numbers<[1], [0], [0], [1], [0, 0, 1, 1], [], []>} : vector<22x256xbf16>, vector<256x256xbf16>, vector<22x256xf32> -> vector<22x256xf32>
    %8 = arith.addf %3, %7 : vector<22x256xf32>
    %c0_8 = arith.constant 0 : index
    %c2 = arith.constant 2 : index
    %c0_9 = arith.constant 0 : index
    %9 = vector.load %arg0[%c0_8, %c2, %c0_9] : memref<1x32x256xbf16, #tpu.memory_space<vmem>>, vector<1x22x256xbf16>
    %10 = vector.shape_cast %9 : vector<1x22x256xbf16> to vector<22x256xbf16>
    %c512 = arith.constant 512 : index
    %c0_10 = arith.constant 0 : index
    %11 = vector.load %arg1[%c512, %c0_10] : memref<2304x256xbf16, #tpu.memory_space<vmem>>, vector<256x256xbf16>
    %cst_11 = arith.constant dense<0.000000e+00> : vector<22x256xf32>
    %12 = tpu.matmul %10, %11, %cst_11 {dimension_numbers = #tpu.dot_dimension_numbers<[1], [0], [0], [1], [0, 0, 1, 1], [], []>} : vector<22x256xbf16>, vector<256x256xbf16>, vector<22x256xf32> -> vector<22x256xf32>
    %13 = arith.addf %8, %12 : vector<22x256xf32>
    %c0_12 = arith.constant 0 : index
    %c4 = arith.constant 4 : index
    %c0_13 = arith.constant 0 : index
    %14 = vector.load %arg0[%c0_12, %c4, %c0_13] : memref<1x32x256xbf16, #tpu.memory_space<vmem>>, vector<1x22x256xbf16>
    %15 = vector.shape_cast %14 : vector<1x22x256xbf16> to vector<22x256xbf16>
    %c768 = arith.constant 768 : index
    %c0_14 = arith.constant 0 : index
    %16 = vector.load %arg1[%c768, %c0_14] : memref<2304x256xbf16, #tpu.memory_space<vmem>>, vector<256x256xbf16>
    %cst_15 = arith.constant dense<0.000000e+00> : vector<22x256xf32>
    %17 = tpu.matmul %15, %16, %cst_15 {dimension_numbers = #tpu.dot_dimension_numbers<[1], [0], [0], [1], [0, 0, 1, 1], [], []>} : vector<22x256xbf16>, vector<256x256xbf16>, vector<22x256xf32> -> vector<22x256xf32>
    %18 = arith.addf %13, %17 : vector<22x256xf32>
    %c0_16 = arith.constant 0 : index
    %c5 = arith.constant 5 : index
    %c0_17 = arith.constant 0 : index
    %19 = vector.load %arg0[%c0_16, %c5, %c0_17] : memref<1x32x256xbf16, #tpu.memory_space<vmem>>, vector<1x22x256xbf16>
    %20 = vector.shape_cast %19 : vector<1x22x256xbf16> to vector<22x256xbf16>
    %c1024 = arith.constant 1024 : index
    %c0_18 = arith.constant 0 : index
    %21 = vector.load %arg1[%c1024, %c0_18] : memref<2304x256xbf16, #tpu.memory_space<vmem>>, vector<256x256xbf16>
    %cst_19 = arith.constant dense<0.000000e+00> : vector<22x256xf32>
    %22 = tpu.matmul %20, %21, %cst_19 {dimension_numbers = #tpu.dot_dimension_numbers<[1], [0], [0], [1], [0, 0, 1, 1], [], []>} : vector<22x256xbf16>, vector<256x256xbf16>, vector<22x256xf32> -> vector<22x256xf32>
    %23 = arith.addf %18, %22 : vector<22x256xf32>
    %c0_20 = arith.constant 0 : index
    %c6 = arith.constant 6 : index
    %c0_21 = arith.constant 0 : index
    %24 = vector.load %arg0[%c0_20, %c6, %c0_21] : memref<1x32x256xbf16, #tpu.memory_space<vmem>>, vector<1x22x256xbf16>
    %25 = vector.shape_cast %24 : vector<1x22x256xbf16> to vector<22x256xbf16>
    %c1280 = arith.constant 1280 : index
    %c0_22 = arith.constant 0 : index
    %26 = vector.load %arg1[%c1280, %c0_22] : memref<2304x256xbf16, #tpu.memory_space<vmem>>, vector<256x256xbf16>
    %cst_23 = arith.constant dense<0.000000e+00> : vector<22x256xf32>
    %27 = tpu.matmul %25, %26, %cst_23 {dimension_numbers = #tpu.dot_dimension_numbers<[1], [0], [0], [1], [0, 0, 1, 1], [], []>} : vector<22x256xbf16>, vector<256x256xbf16>, vector<22x256xf32> -> vector<22x256xf32>
    %28 = arith.addf %23, %27 : vector<22x256xf32>
    %c0_24 = arith.constant 0 : index
    %c8 = arith.constant 8 : index
    %c0_25 = arith.constant 0 : index
    %29 = vector.load %arg0[%c0_24, %c8, %c0_25] : memref<1x32x256xbf16, #tpu.memory_space<vmem>>, vector<1x22x256xbf16>
    %30 = vector.shape_cast %29 : vector<1x22x256xbf16> to vector<22x256xbf16>
    %c1536 = arith.constant 1536 : index
    %c0_26 = arith.constant 0 : index
    %31 = vector.load %arg1[%c1536, %c0_26] : memref<2304x256xbf16, #tpu.memory_space<vmem>>, vector<256x256xbf16>
    %cst_27 = arith.constant dense<0.000000e+00> : vector<22x256xf32>
    %32 = tpu.matmul %30, %31, %cst_27 {dimension_numbers = #tpu.dot_dimension_numbers<[1], [0], [0], [1], [0, 0, 1, 1], [], []>} : vector<22x256xbf16>, vector<256x256xbf16>, vector<22x256xf32> -> vector<22x256xf32>
    %33 = arith.addf %28, %32 : vector<22x256xf32>
    %c0_28 = arith.constant 0 : index
    %c9 = arith.constant 9 : index
    %c0_29 = arith.constant 0 : index
    %34 = vector.load %arg0[%c0_28, %c9, %c0_29] : memref<1x32x256xbf16, #tpu.memory_space<vmem>>, vector<1x22x256xbf16>
    %35 = vector.shape_cast %34 : vector<1x22x256xbf16> to vector<22x256xbf16>
    %c1792 = arith.constant 1792 : index
    %c0_30 = arith.constant 0 : index
    %36 = vector.load %arg1[%c1792, %c0_30] : memref<2304x256xbf16, #tpu.memory_space<vmem>>, vector<256x256xbf16>
    %cst_31 = arith.constant dense<0.000000e+00> : vector<22x256xf32>
    %37 = tpu.matmul %35, %36, %cst_31 {dimension_numbers = #tpu.dot_dimension_numbers<[1], [0], [0], [1], [0, 0, 1, 1], [], []>} : vector<22x256xbf16>, vector<256x256xbf16>, vector<22x256xf32> -> vector<22x256xf32>
    %38 = arith.addf %33, %37 : vector<22x256xf32>
    %c0_32 = arith.constant 0 : index
    %c10 = arith.constant 10 : index
    %c0_33 = arith.constant 0 : index
    %39 = vector.load %arg0[%c0_32, %c10, %c0_33] : memref<1x32x256xbf16, #tpu.memory_space<vmem>>, vector<1x22x256xbf16>
    %40 = vector.shape_cast %39 : vector<1x22x256xbf16> to vector<22x256xbf16>
    %c2048 = arith.constant 2048 : index
    %c0_34 = arith.constant 0 : index
    %41 = vector.load %arg1[%c2048, %c0_34] : memref<2304x256xbf16, #tpu.memory_space<vmem>>, vector<256x256xbf16>
    %cst_35 = arith.constant dense<0.000000e+00> : vector<22x256xf32>
    %42 = tpu.matmul %40, %41, %cst_35 {dimension_numbers = #tpu.dot_dimension_numbers<[1], [0], [0], [1], [0, 0, 1, 1], [], []>} : vector<22x256xbf16>, vector<256x256xbf16>, vector<22x256xf32> -> vector<22x256xf32>
    %43 = arith.addf %38, %42 : vector<22x256xf32>
    %c0_36 = arith.constant 0 : index
    %c0_37 = arith.constant 0 : index
    %44 = vector.load %arg2[%c0_36, %c0_37] : memref<1x256xf32, #tpu.memory_space<vmem>>, vector<1x256xf32>
    %45 = vector.broadcast %44 : vector<1x256xf32> to vector<22x256xf32>
    %46 = arith.addf %43, %45 : vector<22x256xf32>
    %c0_38 = arith.constant 0 : index
    %c0_39 = arith.constant 0 : index
    %47 = vector.load %arg3[%c0_38, %c0_39] : memref<22x256xbf16, #tpu.memory_space<vmem>>, vector<22x256xbf16>
    %48 = arith.extf %47 : vector<22x256xbf16> to vector<22x256xf32>
    %49 = arith.addf %46, %48 : vector<22x256xf32>
    %cst_40 = arith.constant 0.000000e+00 : f32
    %50 = vector.broadcast %cst_40 : f32 to vector<22x256xf32>
    %51 = arith.maximumf %49, %50 : vector<22x256xf32>
    %52 = arith.truncf %51 : vector<22x256xf32> to vector<22x256xbf16>
    %c0_41 = arith.constant 0 : index
    %c0_42 = arith.constant 0 : index
    %53 = vector.load %arg4[%c0_41, %c0_42] : memref<22x256xbf16, #tpu.memory_space<vmem>>, vector<22x256xbf16>
    tpu.vector_store %arg4[%c0_41, %c0_42], %52 {strides = array<i32>} : memref<22x256xbf16, #tpu.memory_space<vmem>>, vector<22x256xbf16>,
    return
  }
}

module attributes {stable_mosaic.version = 11 : i64} {
  func.func @_pool_fc_kernel(%arg0: memref<2x4x256xbf16, #tpu.memory_space<vmem>>, %arg1: memref<256x128xbf16, #tpu.memory_space<vmem>>, %arg2: memref<1x128xf32, #tpu.memory_space<vmem>>, %arg3: memref<2x128xf32, #tpu.memory_space<vmem>>) attributes {dimension_semantics = [], scalar_prefetch = 0 : i64, scratch_operands = 0 : i64, tpu.core_type = #tpu.core_type<tc>} {
    %c0 = arith.constant 0 : index
    %c0_0 = arith.constant 0 : index
    %c0_1 = arith.constant 0 : index
    %0 = vector.load %arg0[%c0, %c0_0, %c0_1] : memref<2x4x256xbf16, #tpu.memory_space<vmem>>, vector<2x4x256xbf16>
    %1 = arith.extf %0 : vector<2x4x256xbf16> to vector<2x4x256xf32>
    %cst = arith.constant dense<0.000000e+00> : vector<2x256xf32>
    %2 = vector.multi_reduction <add>, %1, %cst [1] : vector<2x4x256xf32> to vector<2x256xf32>
    %cst_2 = arith.constant 4.000000e+00 : f32
    %3 = vector.broadcast %cst_2 : f32 to vector<2x256xf32>
    %4 = arith.divf %2, %3 : vector<2x256xf32>
    %5 = arith.truncf %4 : vector<2x256xf32> to vector<2x256xbf16>
    %c0_3 = arith.constant 0 : index
    %c0_4 = arith.constant 0 : index
    %6 = vector.load %arg1[%c0_3, %c0_4] : memref<256x128xbf16, #tpu.memory_space<vmem>>, vector<256x128xbf16>
    %cst_5 = arith.constant dense<0.000000e+00> : vector<2x128xf32>
    %7 = tpu.matmul %5, %6, %cst_5 {dimension_numbers = #tpu.dot_dimension_numbers<[1], [0], [0], [1], [0, 0, 1, 1], [], []>} : vector<2x256xbf16>, vector<256x128xbf16>, vector<2x128xf32> -> vector<2x128xf32>
    %c0_6 = arith.constant 0 : index
    %c0_7 = arith.constant 0 : index
    %8 = vector.load %arg2[%c0_6, %c0_7] : memref<1x128xf32, #tpu.memory_space<vmem>>, vector<1x128xf32>
    %9 = vector.broadcast %8 : vector<1x128xf32> to vector<2x128xf32>
    %10 = arith.addf %7, %9 : vector<2x128xf32>
    %c0_8 = arith.constant 0 : index
    %c0_9 = arith.constant 0 : index
    %11 = vector.load %arg3[%c0_8, %c0_9] : memref<2x128xf32, #tpu.memory_space<vmem>>, vector<2x128xf32>
    tpu.vector_store %arg3[%c0_8, %c0_9], %10 {strides = array<i32>} : memref<2x128xf32, #tpu.memory_space<vmem>>, vector<2x128xf32>,
    return
  }
}

</mosaic_0001>

<bundles_post_ra>
// kernel: _lambda_.8
= control target key start
LH: loop header
LB: loop body
LE: loop exit
PB: predicated region body
PF: predicated region fallthrough
CT: control target
= control target key end

     0   :  { %v1566_v0 = vmov 0   ;;  %vm1143_vm0 = vcmask 519168   ;;  %s2184_s1 = inlined_call_operand.vmem [shape: bf16[256,64], index: 1, kind: input, shape index: {}]   ;;  %s2185_s0 = inlined_call_operand.vmem [shape: bf16[512,256], index: 0, kind: input, shape index: {}]   ;;  %s2186_s2 = inlined_call_operand.vmem [shape: f32[1,64], index: 2, kind: input, shape index: {}]   ;;  %s2187_s3 = inlined_call_operand.vmem [shape: bf16[512,64], index: 3, kind: output, shape index: {}]  }
   0x1   :  { %534 = vmatprep.subr.bf16.mxu0 %v1566_v0  ;;  %1421 = vmatprep.subr.bf16.mxu1 %v1566_v0  ;;  %v1454_v1 = vld [vmem:[%s2184_s1] sm:$0xff]   ;;  %v1455_v2 = vld [vmem:[%s2184_s1 + $0x8] sm:$0xff]   ;;  %v1456_v3 = vld [vmem:[%s2184_s1 + $0x10] sm:$0xff]  }
   0x2   :  { %535 = vmatpush1.bf16.msra.mxu0 %v1454_v1  ;;  %1437 = vmatpush1.bf16.msra.mxu1 %v1454_v1  ;;  %v1457_v4 = vld [vmem:[%s2184_s1 + $0x18] sm:$0xff]   ;;  %v1458_v5 = vld [vmem:[%s2184_s1 + $0x20] sm:$0xff]   ;;  %v1459_v7 = vld [vmem:[%s2184_s1 + $0x28] sm:$0xff]  }
   0x3   :  { %536 = vmatprep.subr.bf16.mxu0 %v1566_v0  ;;  %1422 = vmatprep.subr.bf16.mxu1 %v1566_v0  ;;  %v1472_v6 = vld [vmem:[%s2185_s0 + $0x4] ss:$8 sps:$4 sm:$0xff]   ;;  %v1460_v9 = vld [vmem:[%s2184_s1 + $0x30] sm:$0xff]   ;;  %v1461_v10 = vld [vmem:[%s2184_s1 + $0x38] sm:$0xff]  }
   0x4   :  { %v1475_v8 = vld [vmem:[%s2185_s0 + $0x104] ss:$8 sps:$4 sm:$0xff]   ;;  %566 = vmatprep.mubr.bf16.mxu0 %v1472_v6  ;;  %v1464_v13 = vld [vmem:[%s2184_s1 + $0x50] sm:$0xff]   ;;  %v1465_v14 = vld [vmem:[%s2184_s1 + $0x58] sm:$0xff]  }
   0x5   :  { %694 = vmatprep.mubr.bf16.mxu1 %v1475_v8  ;;  %v1462_v11 = vld [vmem:[%s2184_s1 + $0x40] sm:$0xff]   ;;  %v1463_v12 = vld [vmem:[%s2184_s1 + $0x48] sm:$0xff]   ;;  %v1468_v17 = vld [vmem:[%s2184_s1 + $0x70] sm:$0xff]  }
   0x6   :  { %537 = vmatpush1.bf16.msra.mxu0 %v1455_v2  ;;  %1438 = vmatpush1.bf16.msra.mxu1 %v1455_v2  ;;  %v1466_v15 = vld [vmem:[%s2184_s1 + $0x60] sm:$0xff]   ;;  %v1467_v16 = vld [vmem:[%s2184_s1 + $0x68] sm:$0xff]   ;;  %v1469_v18 = vld [vmem:[%s2184_s1 + $0x78] sm:$0xff]  }
   0x7   :  { %538 = vmatprep.subr.bf16.mxu0 %v1566_v0  ;;  %1423 = vmatprep.subr.bf16.mxu1 %v1566_v0  ;;  %v1470_v19 = vld [vmem:[%s2185_s0] ss:$8 sps:$4 sm:$0xff]   ;;  %v1476_v21 = vld [vmem:[%s2185_s0 + $0x14] ss:$8 sps:$4 sm:$0xff]   ;;  %v1480_v23 = vld [vmem:[%s2185_s0 + $0x10] ss:$8 sps:$4 sm:$0xff]  }
   0x8   :  { %v1473_v20 = vld [vmem:[%s2185_s0 + $0x100] ss:$8 sps:$4 sm:$0xff]   ;;  %v1478_v22 = vld [vmem:[%s2185_s0 + $0x114] ss:$8 sps:$4 sm:$0xff]   ;;  %v1481_v24 = vld [vmem:[%s2185_s0 + $0x110] ss:$8 sps:$4 sm:$0xff]  }
   0x9   :  { %v1482_v25 = vld [vmem:[%s2185_s0 + $0x24] ss:$8 sps:$4 sm:$0xff]   ;;  %v1486_v27 = vld [vmem:[%s2185_s0 + $0x20] ss:$8 sps:$4 sm:$0xff]   ;;  %v1488_v29 = vld [vmem:[%s2185_s0 + $0x34] ss:$8 sps:$4 sm:$0xff]  }
   0xa   :  { %539 = vmatpush1.bf16.msra.mxu0 %v1456_v3  ;;  %1439 = vmatpush1.bf16.msra.mxu1 %v1456_v3  ;;  %v1484_v26 = vld [vmem:[%s2185_s0 + $0x124] ss:$8 sps:$4 sm:$0xff]   ;;  %v1487_v28 = vld [vmem:[%s2185_s0 + $0x120] ss:$8 sps:$4 sm:$0xff]   ;;  %v1490_v30 = vld [vmem:[%s2185_s0 + $0x134] ss:$8 sps:$4 sm:$0xff]  }
   0xb   :  { %540 = vmatprep.subr.bf16.mxu0 %v1566_v0  ;;  %1424 = vmatprep.subr.bf16.mxu1 %v1566_v0  ;;  %v1492_v31 = vld [vmem:[%s2185_s0 + $0x30] ss:$8 sps:$4 sm:$0xff]   ;;  %v1494_v33 = vld [vmem:[%s2185_s0 + $0x44] ss:$8 sps:$4 sm:$0xff]   ;;  %v1498_v35 = vld [vmem:[%s2185_s0 + $0x40] ss:$8 sps:$4 sm:$0xff]  }
   0xc   :  { %v1493_v32 = vld [vmem:[%s2185_s0 + $0x130] ss:$8 sps:$4 sm:$0xff]   ;;  %v1496_v34 = vld [vmem:[%s2185_s0 + $0x144] ss:$8 sps:$4 sm:$0xff]   ;;  %v1499_v36 = vld [vmem:[%s2185_s0 + $0x140] ss:$8 sps:$4 sm:$0xff]  }
   0xd   :  { %v1500_v37 = vld [vmem:[%s2185_s0 + $0x54] ss:$8 sps:$4 sm:$0xff]   ;;  %v1504_v39 = vld [vmem:[%s2185_s0 + $0x50] ss:$8 sps:$4 sm:$0xff]   ;;  %v1506_v41 = vld [vmem:[%s2185_s0 + $0x64] ss:$8 sps:$4 sm:$0xff]  }
   0xe   :  { %541 = vmatpush1.bf16.msra.mxu0 %v1457_v4  ;;  %1440 = vmatpush1.bf16.msra.mxu1 %v1457_v4  ;;  %v1502_v38 = vld [vmem:[%s2185_s0 + $0x154] ss:$8 sps:$4 sm:$0xff]   ;;  %v1505_v40 = vld [vmem:[%s2185_s0 + $0x150] ss:$8 sps:$4 sm:$0xff]   ;;  %v1508_v42 = vld [vmem:[%s2185_s0 + $0x164] ss:$8 sps:$4 sm:$0xff]  }
   0xf   :  { %542 = vmatprep.subr.bf16.mxu0 %v1566_v0  ;;  %1425 = vmatprep.subr.bf16.mxu1 %v1566_v0  ;;  %v1510_v43 = vld [vmem:[%s2185_s0 + $0x60] ss:$8 sps:$4 sm:$0xff]   ;;  %v1512_v45 = vld [vmem:[%s2185_s0 + $0x74] ss:$8 sps:$4 sm:$0xff]   ;;  %v1516_v47 = vld [vmem:[%s2185_s0 + $0x70] ss:$8 sps:$4 sm:$0xff]  }
  0x10   :  { %v1511_v44 = vld [vmem:[%s2185_s0 + $0x160] ss:$8 sps:$4 sm:$0xff]   ;;  %v1514_v46 = vld [vmem:[%s2185_s0 + $0x174] ss:$8 sps:$4 sm:$0xff]   ;;  %v1517_v48 = vld [vmem:[%s2185_s0 + $0x170] ss:$8 sps:$4 sm:$0xff]  }
  0x11   :  { %v1518_v49 = vld [vmem:[%s2185_s0 + $0x84] ss:$8 sps:$4 sm:$0xff]   ;;  %v1522_v51 = vld [vmem:[%s2185_s0 + $0x80] ss:$8 sps:$4 sm:$0xff]   ;;  %v1524_v53 = vld [vmem:[%s2185_s0 + $0x94] ss:$8 sps:$4 sm:$0xff]  }
  0x12   :  { %543 = vmatpush1.bf16.msra.mxu0 %v1458_v5  ;;  %1441 = vmatpush1.bf16.msra.mxu1 %v1458_v5  ;;  %v1520_v50 = vld [vmem:[%s2185_s0 + $0x184] ss:$8 sps:$4 sm:$0xff]   ;;  %v1523_v52 = vld [vmem:[%s2185_s0 + $0x180] ss:$8 sps:$4 sm:$0xff]   ;;  %v1526_v54 = vld [vmem:[%s2185_s0 + $0x194] ss:$8 sps:$4 sm:$0xff]  }
  0x13   :  { %544 = vmatprep.subr.bf16.mxu0 %v1566_v0  ;;  %1426 = vmatprep.subr.bf16.mxu1 %v1566_v0  ;;  %v1528_v55 = vld [vmem:[%s2185_s0 + $0x90] ss:$8 sps:$4 sm:$0xff]   ;;  %v1530_v57 = vld [vmem:[%s2185_s0 + $0xa4] ss:$8 sps:$4 sm:$0xff]   ;;  %v1534_v59 = vld [vmem:[%s2185_s0 + $0xa0] ss:$8 sps:$4 sm:$0xff]  }
  0x14   :  { %v1529_v56 = vld [vmem:[%s2185_s0 + $0x190] ss:$8 sps:$4 sm:$0xff]   ;;  %v1532_v58 = vld [vmem:[%s2185_s0 + $0x1a4] ss:$8 sps:$4 sm:$0xff]   ;;  %v1535_v60 = vld [vmem:[%s2185_s0 + $0x1a0] ss:$8 sps:$4 sm:$0xff]  }
  0x15   :  { %v1536_v61 = vld [vmem:[%s2185_s0 + $0xb4] ss:$8 sps:$4 sm:$0xff]   ;;  %v1540_v63 = vld [vmem:[%s2185_s0 + $0xb0] ss:$8 sps:$4 sm:$0xff]   ;;  %v1542_v1 = vld [vmem:[%s2185_s0 + $0xc4] ss:$8 sps:$4 sm:$0xff]  }
  0x16   :  { %545 = vmatpush1.bf16.msra.mxu0 %v1459_v7  ;;  %1442 = vmatpush1.bf16.msra.mxu1 %v1459_v7  ;;  %v1538_v62 = vld [vmem:[%s2185_s0 + $0x1b4] ss:$8 sps:$4 sm:$0xff]   ;;  %v1544_v2 = vld [vmem:[%s2185_s0 + $0x1c4] ss:$8 sps:$4 sm:$0xff]   ;;  %v1546_v3 = vld [vmem:[%s2185_s0 + $0xc0] ss:$8 sps:$4 sm:$0xff]  }
  0x17   :  { %546 = vmatprep.subr.bf16.mxu0 %v1566_v0  ;;  %1427 = vmatprep.subr.bf16.mxu1 %v1566_v0  ;;  %v1547_v4 = vld [vmem:[%s2185_s0 + $0x1c0] ss:$8 sps:$4 sm:$0xff]   ;;  %v1548_v5 = vld [vmem:[%s2185_s0 + $0xd4] ss:$8 sps:$4 sm:$0xff]   ;;  %v1552_v7 = vld [vmem:[%s2185_s0 + $0xd0] ss:$8 sps:$4 sm:$0xff]  }
  0x18   :  { %v1550_v6 = vld [vmem:[%s2185_s0 + $0x1d4] ss:$8 sps:$4 sm:$0xff]   ;;  %v1553_v8 = vld [vmem:[%s2185_s0 + $0x1d0] ss:$8 sps:$4 sm:$0xff]  }
  0x1a   :  { %547 = vmatpush1.bf16.msra.mxu0 %v1460_v9  ;;  %1443 = vmatpush1.bf16.msra.mxu1 %v1460_v9  ;;  %v1554_v9 = vld [vmem:[%s2185_s0 + $0xe4] ss:$8 sps:$4 sm:$0xff]  }
  0x1b   :  { %548 = vmatprep.subr.bf16.mxu0 %v1566_v0  ;;  %1428 = vmatprep.subr.bf16.mxu1 %v1566_v0 }
  0x1e   :  { %549 = vmatpush1.bf16.msra.mxu0 %v1461_v10  ;;  %1444 = vmatpush1.bf16.msra.mxu1 %v1461_v10  ;;  %v1556_v10 = vld [vmem:[%s2185_s0 + $0x1e4] ss:$8 sps:$4 sm:$0xff]  }
  0x1f   :  { %550 = vmatprep.subr.bf16.mxu0 %v1566_v0  ;;  %1429 = vmatprep.subr.bf16.mxu1 %v1566_v0 }
  0x22   :  { %551 = vmatpush1.bf16.msra.mxu0 %v1462_v11  ;;  %1445 = vmatpush1.bf16.msra.mxu1 %v1462_v11  ;;  %v1558_v11 = vld [vmem:[%s2185_s0 + $0xe0] ss:$8 sps:$4 sm:$0xff]  }
  0x23   :  { %552 = vmatprep.subr.bf16.mxu0 %v1566_v0  ;;  %1430 = vmatprep.subr.bf16.mxu1 %v1566_v0 }
  0x26   :  { %553 = vmatpush1.bf16.msra.mxu0 %v1463_v12  ;;  %1446 = vmatpush1.bf16.msra.mxu1 %v1463_v12  ;;  %v1559_v12 = vld [vmem:[%s2185_s0 + $0x1e0] ss:$8 sps:$4 sm:$0xff]  }
  0x27   :  { %554 = vmatprep.subr.bf16.mxu0 %v1566_v0  ;;  %1431 = vmatprep.subr.bf16.mxu1 %v1566_v0 }
  0x2a   :  { %555 = vmatpush1.bf16.msra.mxu0 %v1464_v13  ;;  %1447 = vmatpush1.bf16.msra.mxu1 %v1464_v13  ;;  %v1560_v13 = vld [vmem:[%s2185_s0 + $0xf4] ss:$8 sps:$4 sm:$0xff]  }
  0x2b   :  { %556 = vmatprep.subr.bf16.mxu0 %v1566_v0  ;;  %1432 = vmatprep.subr.bf16.mxu1 %v1566_v0 }
  0x2e   :  { %557 = vmatpush1.bf16.msra.mxu0 %v1465_v14  ;;  %1448 = vmatpush1.bf16.msra.mxu1 %v1465_v14  ;;  %v1562_v14 = vld [vmem:[%s2185_s0 + $0x1f4] ss:$8 sps:$4 sm:$0xff]  }
  0x2f   :  { %558 = vmatprep.subr.bf16.mxu0 %v1566_v0  ;;  %1433 = vmatprep.subr.bf16.mxu1 %v1566_v0 }
  0x32   :  { %559 = vmatpush1.bf16.msra.mxu0 %v1466_v15  ;;  %1449 = vmatpush1.bf16.msra.mxu1 %v1466_v15  ;;  %v1564_v15 = vld [vmem:[%s2185_s0 + $0xf0] ss:$8 sps:$4 sm:$0xff]  }
  0x33   :  { %560 = vmatprep.subr.bf16.mxu0 %v1566_v0  ;;  %1434 = vmatprep.subr.bf16.mxu1 %v1566_v0 }
  0x36   :  { %561 = vmatpush1.bf16.msra.mxu0 %v1467_v16  ;;  %1450 = vmatpush1.bf16.msra.mxu1 %v1467_v16  ;;  %v1565_v16 = vld [vmem:[%s2185_s0 + $0x1f0] ss:$8 sps:$4 sm:$0xff]  }
  0x37   :  { %562 = vmatprep.subr.bf16.mxu0 %v1566_v0  ;;  %1435 = vmatprep.subr.bf16.mxu1 %v1566_v0 }
  0x3a   :  { %563 = vmatpush1.bf16.msra.mxu0 %v1468_v17  ;;  %1451 = vmatpush1.bf16.msra.mxu1 %v1468_v17  ;;  %v1862_v17 = vld [vmem:[%s2186_s2] ss:$0 sm:$0xff] }
  0x3b   :  { %564 = vmatprep.subr.bf16.mxu0 %v1566_v0  ;;  %1436 = vmatprep.subr.bf16.mxu1 %v1566_v0  ;;  %v1541_v0 = vld [vmem:[%s2185_s0 + $0x1b0] ss:$8 sps:$4 sm:$0xff]  }
  0x3e   :  { %565 = vmatpush1.bf16.msra.mxu0 %v1469_v18  ;;  %1452 = vmatpush1.bf16.msra.mxu1 %v1469_v18 }
  0x41   :  { %567 = vmatmul.mubr.bf16.vlgmr.msra.gmra.mrb[0].mxu0 %v1470_v19  ;;  %695 = vmatmul.mubr.bf16.vlgmr.msra.gmra.mrb[0].mxu1 %v1473_v20 }
  0x42   :  { %574 = vmatprep.mubr.bf16.mxu0 %v1476_v21  ;;  %702 = vmatprep.mubr.bf16.mxu1 %v1478_v22 }
  0x49   :  { %575 = vmatmul.mubr.bf16.gmra.mrb[4].mxu0 %v1480_v23  ;;  %703 = vmatmul.mubr.bf16.gmra.mrb[4].mxu1 %v1481_v24 }
  0x4a   :  { %582 = vmatprep.mubr.bf16.mxu0 %v1482_v25  ;;  %710 = vmatprep.mubr.bf16.mxu1 %v1484_v26 }
  0x51   :  { %583 = vmatmul.mubr.bf16.gmra.mrb[8].mxu0 %v1486_v27  ;;  %711 = vmatmul.mubr.bf16.gmra.mrb[8].mxu1 %v1487_v28 }
  0x52   :  { %590 = vmatprep.mubr.bf16.mxu0 %v1488_v29  ;;  %718 = vmatprep.mubr.bf16.mxu1 %v1490_v30 }
  0x59   :  { %591 = vmatmul.mubr.bf16.gmra.mrb[12].mxu0 %v1492_v31  ;;  %719 = vmatmul.mubr.bf16.gmra.mrb[12].mxu1 %v1493_v32 }
  0x5a   :  { %598 = vmatprep.mubr.bf16.mxu0 %v1494_v33  ;;  %726 = vmatprep.mubr.bf16.mxu1 %v1496_v34 }
  0x61   :  { %599 = vmatmul.mubr.bf16.gmra.mrb[16].mxu0 %v1498_v35  ;;  %727 = vmatmul.mubr.bf16.gmra.mrb[16].mxu1 %v1499_v36 }
  0x62   :  { %606 = vmatprep.mubr.bf16.mxu0 %v1500_v37  ;;  %734 = vmatprep.mubr.bf16.mxu1 %v1502_v38 }
  0x69   :  { %607 = vmatmul.mubr.bf16.gmra.mrb[20].mxu0 %v1504_v39  ;;  %735 = vmatmul.mubr.bf16.gmra.mrb[20].mxu1 %v1505_v40 }
  0x6a   :  { %614 = vmatprep.mubr.bf16.mxu0 %v1506_v41  ;;  %742 = vmatprep.mubr.bf16.mxu1 %v1508_v42 }
  0x71   :  { %615 = vmatmul.mubr.bf16.gmra.mrb[24].mxu0 %v1510_v43  ;;  %743 = vmatmul.mubr.bf16.gmra.mrb[24].mxu1 %v1511_v44 }
  0x72   :  { %622 = vmatprep.mubr.bf16.mxu0 %v1512_v45  ;;  %750 = vmatprep.mubr.bf16.mxu1 %v1514_v46 }
  0x79   :  { %623 = vmatmul.mubr.bf16.gmra.mrb[28].mxu0 %v1516_v47  ;;  %751 = vmatmul.mubr.bf16.gmra.mrb[28].mxu1 %v1517_v48 }
  0x7a   :  { %630 = vmatprep.mubr.bf16.mxu0 %v1518_v49  ;;  %758 = vmatprep.mubr.bf16.mxu1 %v1520_v50 }
  0x81   :  { %631 = vmatmul.mubr.bf16.gmra.mrb[32].mxu0 %v1522_v51  ;;  %759 = vmatmul.mubr.bf16.gmra.mrb[32].mxu1 %v1523_v52 }
  0x82   :  { %638 = vmatprep.mubr.bf16.mxu0 %v1524_v53  ;;  %766 = vmatprep.mubr.bf16.mxu1 %v1526_v54 }
  0x89   :  { %639 = vmatmul.mubr.bf16.gmra.mrb[36].mxu0 %v1528_v55  ;;  %767 = vmatmul.mubr.bf16.gmra.mrb[36].mxu1 %v1529_v56 }
  0x8a   :  { %646 = vmatprep.mubr.bf16.mxu0 %v1530_v57  ;;  %774 = vmatprep.mubr.bf16.mxu1 %v1532_v58 }
  0x91   :  { %647 = vmatmul.mubr.bf16.gmra.mrb[40].mxu0 %v1534_v59  ;;  %775 = vmatmul.mubr.bf16.gmra.mrb[40].mxu1 %v1535_v60 }
  0x92   :  { %654 = vmatprep.mubr.bf16.mxu0 %v1536_v61  ;;  %782 = vmatprep.mubr.bf16.mxu1 %v1538_v62 }
  0x99   :  { %655 = vmatmul.mubr.bf16.gmra.mrb[44].mxu0 %v1540_v63  ;;  %783 = vmatmul.mubr.bf16.gmra.mrb[44].mxu1 %v1541_v0 }
  0x9a   :  { %662 = vmatprep.mubr.bf16.mxu0 %v1542_v1  ;;  %790 = vmatprep.mubr.bf16.mxu1 %v1544_v2 }
  0xa1   :  { %663 = vmatmul.mubr.bf16.gmra.mrb[48].mxu0 %v1546_v3  ;;  %791 = vmatmul.mubr.bf16.gmra.mrb[48].mxu1 %v1547_v4 }
  0xa2   :  { %670 = vmatprep.mubr.bf16.mxu0 %v1548_v5  ;;  %798 = vmatprep.mubr.bf16.mxu1 %v1550_v6 }
  0xa9   :  { %671 = vmatmul.mubr.bf16.gmra.mrb[52].mxu0 %v1552_v7  ;;  %799 = vmatmul.mubr.bf16.gmra.mrb[52].mxu1 %v1553_v8 }
  0xaa   :  { %678 = vmatprep.mubr.bf16.mxu0 %v1554_v9  ;;  %806 = vmatprep.mubr.bf16.mxu1 %v1556_v10 }
  0xb1   :  { %679 = vmatmul.mubr.bf16.gmra.mrb[56].mxu0 %v1558_v11  ;;  %807 = vmatmul.mubr.bf16.gmra.mrb[56].mxu1 %v1559_v12 }
  0xb2   :  { %686 = vmatprep.mubr.bf16.mxu0 %v1560_v13  ;;  %814 = vmatprep.mubr.bf16.mxu1 %v1562_v14 }
  0xb9   :  { %687 = vmatmul.mubr.bf16.gmra.mrb[60].mxu0 %v1564_v15  ;;  %815 = vmatmul.mubr.bf16.gmra.mrb[60].mxu1 %v1565_v16 }
 0x114   :  { %v568_v18 = vpop.f32.mrb[0].mxu0  ;;  %v696_v19 = vpop.f32.mrb[0].mxu1 }
 0x115   :  { %v569_v20 = vadd.f32 %v1862_v17, %v568_v18  ;;  %v697_v21 = vadd.f32 %v1862_v17, %v696_v19  ;;  %v570_v22 = vpop.f32.mrb[1].mxu0  ;;  %v698_v23 = vpop.f32.mrb[1].mxu1 }
 0x116   :  { %v571_v24 = vpop.f32.mrb[2].mxu0  ;;  %v699_v25 = vpop.f32.mrb[2].mxu1 }
 0x117   :  { %v823_v26 = vmax.f32 %v569_v20, 0.0  ;;  %v855_v27 = vmax.f32 %v697_v21, 0.0  ;;  %v572_v28 = vadd.f32 %v1862_v17, %v571_v24  ;;  %v700_v29 = vadd.f32 %v1862_v17, %v699_v25  ;;  %v573_v30 = vpop.f32.mrb[3].mxu0  ;;  %v701_v31 = vpop.f32.mrb[3].mxu1 }
 0x119   :  { %v1357_v32 = vpack.c.bf16 %v823_v26, %v823_v26  ;;  %v1389_v33 = vpack.c.bf16 %v855_v27, %v855_v27  ;;  %v824_v34 = vmax.f32 %v572_v28, 0.0  ;;  %v856_v35 = vmax.f32 %v700_v29, 0.0 }
 0x11b   :  { %1144 = vst.msk [vmem:[%s2187_s3] sm:$0xf] %vm1143_vm0, %v1357_v32  ;;  %1176 = vst.msk [vmem:[%s2187_s3 + $0x80] sm:$0xf] %vm1143_vm0, %v1389_v33  ;;  %v1358_v36 = vpack.c.bf16 %v824_v34, %v824_v34  ;;  %v1390_v37 = vpack.c.bf16 %v856_v35, %v856_v35 }
 0x11c   :  { %v576_v38 = vpop.f32.mrb[4].mxu0  ;;  %v704_v39 = vpop.f32.mrb[4].mxu1 }
 0x11d   :  { %1145 = vst.msk [vmem:[%s2187_s3 + $0x4] sm:$0xf] %vm1143_vm0, %v1358_v36  ;;  %1177 = vst.msk [vmem:[%s2187_s3 + $0x84] sm:$0xf] %vm1143_vm0, %v1390_v37  ;;  %v577_v40 = vadd.f32 %v1862_v17, %v576_v38  ;;  %v705_v41 = vadd.f32 %v1862_v17, %v704_v39  ;;  %v578_v42 = vpop.f32.mrb[5].mxu0  ;;  %v706_v43 = vpop.f32.mrb[5].mxu1 }
 0x11e   :  { %v579_v44 = vpop.f32.mrb[6].mxu0  ;;  %v707_v45 = vpop.f32.mrb[6].mxu1 }
 0x11f   :  { %v825_v46 = vmax.f32 %v577_v40, 0.0  ;;  %v857_v47 = vmax.f32 %v705_v41, 0.0  ;;  %v580_v48 = vadd.f32 %v1862_v17, %v579_v44  ;;  %v708_v49 = vadd.f32 %v1862_v17, %v707_v45  ;;  %v581_v50 = vpop.f32.mrb[7].mxu0  ;;  %v709_v51 = vpop.f32.mrb[7].mxu1 }
 0x121   :  { %v1359_v52 = vpack.c.bf16 %v825_v46, %v825_v46  ;;  %v1391_v53 = vpack.c.bf16 %v857_v47, %v857_v47  ;;  %v826_v54 = vmax.f32 %v580_v48, 0.0  ;;  %v858_v55 = vmax.f32 %v708_v49, 0.0 }
 0x123   :  { %1146 = vst.msk [vmem:[%s2187_s3 + $0x8] sm:$0xf] %vm1143_vm0, %v1359_v52  ;;  %1178 = vst.msk [vmem:[%s2187_s3 + $0x88] sm:$0xf] %vm1143_vm0, %v1391_v53  ;;  %v1360_v56 = vpack.c.bf16 %v826_v54, %v826_v54  ;;  %v1392_v57 = vpack.c.bf16 %v858_v55, %v858_v55 }
 0x124   :  { %v584_v58 = vpop.f32.mrb[8].mxu0  ;;  %v712_v59 = vpop.f32.mrb[8].mxu1 }
 0x125   :  { %1147 = vst.msk [vmem:[%s2187_s3 + $0xc] sm:$0xf] %vm1143_vm0, %v1360_v56  ;;  %1179 = vst.msk [vmem:[%s2187_s3 + $0x8c] sm:$0xf] %vm1143_vm0, %v1392_v57  ;;  %v585_v60 = vadd.f32 %v1862_v17, %v584_v58  ;;  %v713_v61 = vadd.f32 %v1862_v17, %v712_v59  ;;  %v586_v62 = vpop.f32.mrb[9].mxu0  ;;  %v714_v63 = vpop.f32.mrb[9].mxu1 }
 0x126   :  { %v587_v0 = vpop.f32.mrb[10].mxu0  ;;  %v715_v1 = vpop.f32.mrb[10].mxu1 }
 0x127   :  { %v827_v2 = vmax.f32 %v585_v60, 0.0  ;;  %v859_v3 = vmax.f32 %v713_v61, 0.0  ;;  %v588_v4 = vadd.f32 %v1862_v17, %v587_v0  ;;  %v716_v5 = vadd.f32 %v1862_v17, %v715_v1  ;;  %v589_v6 = vpop.f32.mrb[11].mxu0  ;;  %v717_v7 = vpop.f32.mrb[11].mxu1 }
 0x129   :  { %v1361_v8 = vpack.c.bf16 %v827_v2, %v827_v2  ;;  %v1393_v9 = vpack.c.bf16 %v859_v3, %v859_v3  ;;  %v828_v10 = vmax.f32 %v588_v4, 0.0  ;;  %v860_v11 = vmax.f32 %v716_v5, 0.0 }
 0x12b   :  { %1148 = vst.msk [vmem:[%s2187_s3 + $0x10] sm:$0xf] %vm1143_vm0, %v1361_v8  ;;  %1180 = vst.msk [vmem:[%s2187_s3 + $0x90] sm:$0xf] %vm1143_vm0, %v1393_v9  ;;  %v1362_v12 = vpack.c.bf16 %v828_v10, %v828_v10  ;;  %v1394_v13 = vpack.c.bf16 %v860_v11, %v860_v11 }
 0x12c   :  { %v592_v14 = vpop.f32.mrb[12].mxu0  ;;  %v720_v15 = vpop.f32.mrb[12].mxu1 }
 0x12d   :  { %1149 = vst.msk [vmem:[%s2187_s3 + $0x14] sm:$0xf] %vm1143_vm0, %v1362_v12  ;;  %1181 = vst.msk [vmem:[%s2187_s3 + $0x94] sm:$0xf] %vm1143_vm0, %v1394_v13  ;;  %v593_v16 = vadd.f32 %v1862_v17, %v592_v14  ;;  %v721_v18 = vadd.f32 %v1862_v17, %v720_v15  ;;  %v594_v19 = vpop.f32.mrb[13].mxu0  ;;  %v722_v20 = vpop.f32.mrb[13].mxu1 }
 0x12e   :  { %v595_v21 = vpop.f32.mrb[14].mxu0  ;;  %v723_v22 = vpop.f32.mrb[14].mxu1 }
 0x12f   :  { %v829_v23 = vmax.f32 %v593_v16, 0.0  ;;  %v861_v24 = vmax.f32 %v721_v18, 0.0  ;;  %v596_v25 = vadd.f32 %v1862_v17, %v595_v21  ;;  %v724_v26 = vadd.f32 %v1862_v17, %v723_v22  ;;  %v597_v27 = vpop.f32.mrb[15].mxu0  ;;  %v725_v28 = vpop.f32.mrb[15].mxu1 }
 0x131   :  { %v1363_v29 = vpack.c.bf16 %v829_v23, %v829_v23  ;;  %v1395_v30 = vpack.c.bf16 %v861_v24, %v861_v24  ;;  %v830_v31 = vmax.f32 %v596_v25, 0.0  ;;  %v862_v32 = vmax.f32 %v724_v26, 0.0 }
 0x133   :  { %1150 = vst.msk [vmem:[%s2187_s3 + $0x18] sm:$0xf] %vm1143_vm0, %v1363_v29  ;;  %1182 = vst.msk [vmem:[%s2187_s3 + $0x98] sm:$0xf] %vm1143_vm0, %v1395_v30  ;;  %v1364_v33 = vpack.c.bf16 %v830_v31, %v830_v31  ;;  %v1396_v34 = vpack.c.bf16 %v862_v32, %v862_v32 }
 0x134   :  { %v600_v35 = vpop.f32.mrb[16].mxu0  ;;  %v728_v36 = vpop.f32.mrb[16].mxu1 }
 0x135   :  { %1151 = vst.msk [vmem:[%s2187_s3 + $0x1c] sm:$0xf] %vm1143_vm0, %v1364_v33  ;;  %1183 = vst.msk [vmem:[%s2187_s3 + $0x9c] sm:$0xf] %vm1143_vm0, %v1396_v34  ;;  %v601_v37 = vadd.f32 %v1862_v17, %v600_v35  ;;  %v729_v38 = vadd.f32 %v1862_v17, %v728_v36  ;;  %v602_v39 = vpop.f32.mrb[17].mxu0  ;;  %v730_v40 = vpop.f32.mrb[17].mxu1 }
 0x136   :  { %v603_v41 = vpop.f32.mrb[18].mxu0  ;;  %v731_v42 = vpop.f32.mrb[18].mxu1 }
 0x137   :  { %v831_v43 = vmax.f32 %v601_v37, 0.0  ;;  %v863_v44 = vmax.f32 %v729_v38, 0.0  ;;  %v604_v45 = vadd.f32 %v1862_v17, %v603_v41  ;;  %v732_v46 = vadd.f32 %v1862_v17, %v731_v42  ;;  %v605_v47 = vpop.f32.mrb[19].mxu0  ;;  %v733_v48 = vpop.f32.mrb[19].mxu1 }
 0x139   :  { %v1365_v49 = vpack.c.bf16 %v831_v43, %v831_v43  ;;  %v1397_v50 = vpack.c.bf16 %v863_v44, %v863_v44  ;;  %v832_v51 = vmax.f32 %v604_v45, 0.0  ;;  %v864_v52 = vmax.f32 %v732_v46, 0.0 }
 0x13b   :  { %1152 = vst.msk [vmem:[%s2187_s3 + $0x20] sm:$0xf] %vm1143_vm0, %v1365_v49  ;;  %1184 = vst.msk [vmem:[%s2187_s3 + $0xa0] sm:$0xf] %vm1143_vm0, %v1397_v50  ;;  %v1366_v53 = vpack.c.bf16 %v832_v51, %v832_v51  ;;  %v1398_v54 = vpack.c.bf16 %v864_v52, %v864_v52 }
 0x13c   :  { %v608_v55 = vpop.f32.mrb[20].mxu0  ;;  %v736_v56 = vpop.f32.mrb[20].mxu1 }
 0x13d   :  { %1153 = vst.msk [vmem:[%s2187_s3 + $0x24] sm:$0xf] %vm1143_vm0, %v1366_v53  ;;  %1185 = vst.msk [vmem:[%s2187_s3 + $0xa4] sm:$0xf] %vm1143_vm0, %v1398_v54  ;;  %v609_v57 = vadd.f32 %v1862_v17, %v608_v55  ;;  %v737_v58 = vadd.f32 %v1862_v17, %v736_v56  ;;  %v610_v59 = vpop.f32.mrb[21].mxu0  ;;  %v738_v60 = vpop.f32.mrb[21].mxu1 }
 0x13e   :  { %v611_v61 = vpop.f32.mrb[22].mxu0  ;;  %v739_v62 = vpop.f32.mrb[22].mxu1 }
 0x13f   :  { %v833_v63 = vmax.f32 %v609_v57, 0.0  ;;  %v865_v0 = vmax.f32 %v737_v58, 0.0  ;;  %v612_v1 = vadd.f32 %v1862_v17, %v611_v61  ;;  %v740_v2 = vadd.f32 %v1862_v17, %v739_v62  ;;  %v613_v3 = vpop.f32.mrb[23].mxu0  ;;  %v741_v4 = vpop.f32.mrb[23].mxu1 }
 0x141   :  { %v1367_v5 = vpack.c.bf16 %v833_v63, %v833_v63  ;;  %v1399_v6 = vpack.c.bf16 %v865_v0, %v865_v0  ;;  %v834_v7 = vmax.f32 %v612_v1, 0.0  ;;  %v866_v8 = vmax.f32 %v740_v2, 0.0 }
 0x143   :  { %1154 = vst.msk [vmem:[%s2187_s3 + $0x28] sm:$0xf] %vm1143_vm0, %v1367_v5  ;;  %1186 = vst.msk [vmem:[%s2187_s3 + $0xa8] sm:$0xf] %vm1143_vm0, %v1399_v6  ;;  %v1368_v9 = vpack.c.bf16 %v834_v7, %v834_v7  ;;  %v1400_v10 = vpack.c.bf16 %v866_v8, %v866_v8 }
 0x144   :  { %v616_v11 = vpop.f32.mrb[24].mxu0  ;;  %v744_v12 = vpop.f32.mrb[24].mxu1 }
 0x145   :  { %1155 = vst.msk [vmem:[%s2187_s3 + $0x2c] sm:$0xf] %vm1143_vm0, %v1368_v9  ;;  %1187 = vst.msk [vmem:[%s2187_s3 + $0xac] sm:$0xf] %vm1143_vm0, %v1400_v10  ;;  %v617_v13 = vadd.f32 %v1862_v17, %v616_v11  ;;  %v745_v14 = vadd.f32 %v1862_v17, %v744_v12  ;;  %v618_v15 = vpop.f32.mrb[25].mxu0  ;;  %v746_v16 = vpop.f32.mrb[25].mxu1 }
 0x146   :  { %v619_v18 = vpop.f32.mrb[26].mxu0  ;;  %v747_v19 = vpop.f32.mrb[26].mxu1 }
 0x147   :  { %v835_v20 = vmax.f32 %v617_v13, 0.0  ;;  %v867_v21 = vmax.f32 %v745_v14, 0.0  ;;  %v620_v22 = vadd.f32 %v1862_v17, %v619_v18  ;;  %v748_v23 = vadd.f32 %v1862_v17, %v747_v19  ;;  %v621_v24 = vpop.f32.mrb[27].mxu0  ;;  %v749_v25 = vpop.f32.mrb[27].mxu1 }
 0x149   :  { %v1369_v26 = vpack.c.bf16 %v835_v20, %v835_v20  ;;  %v1401_v27 = vpack.c.bf16 %v867_v21, %v867_v21  ;;  %v836_v28 = vmax.f32 %v620_v22, 0.0  ;;  %v868_v29 = vmax.f32 %v748_v23, 0.0 }
 0x14b   :  { %1156 = vst.msk [vmem:[%s2187_s3 + $0x30] sm:$0xf] %vm1143_vm0, %v1369_v26  ;;  %1188 = vst.msk [vmem:[%s2187_s3 + $0xb0] sm:$0xf] %vm1143_vm0, %v1401_v27  ;;  %v1370_v30 = vpack.c.bf16 %v836_v28, %v836_v28  ;;  %v1402_v31 = vpack.c.bf16 %v868_v29, %v868_v29 }
 0x14c   :  { %v624_v32 = vpop.f32.mrb[28].mxu0  ;;  %v752_v33 = vpop.f32.mrb[28].mxu1 }
 0x14d   :  { %1157 = vst.msk [vmem:[%s2187_s3 + $0x34] sm:$0xf] %vm1143_vm0, %v1370_v30  ;;  %1189 = vst.msk [vmem:[%s2187_s3 + $0xb4] sm:$0xf] %vm1143_vm0, %v1402_v31  ;;  %v625_v34 = vadd.f32 %v1862_v17, %v624_v32  ;;  %v753_v35 = vadd.f32 %v1862_v17, %v752_v33  ;;  %v626_v36 = vpop.f32.mrb[29].mxu0  ;;  %v754_v37 = vpop.f32.mrb[29].mxu1 }
 0x14e   :  { %v627_v38 = vpop.f32.mrb[30].mxu0  ;;  %v755_v39 = vpop.f32.mrb[30].mxu1 }
 0x14f   :  { %v837_v40 = vmax.f32 %v625_v34, 0.0  ;;  %v869_v41 = vmax.f32 %v753_v35, 0.0  ;;  %v628_v42 = vadd.f32 %v1862_v17, %v627_v38  ;;  %v756_v43 = vadd.f32 %v1862_v17, %v755_v39  ;;  %v629_v44 = vpop.f32.mrb[31].mxu0  ;;  %v757_v45 = vpop.f32.mrb[31].mxu1 }
 0x151   :  { %v1371_v46 = vpack.c.bf16 %v837_v40, %v837_v40  ;;  %v1403_v47 = vpack.c.bf16 %v869_v41, %v869_v41  ;;  %v838_v48 = vmax.f32 %v628_v42, 0.0  ;;  %v870_v49 = vmax.f32 %v756_v43, 0.0 }
 0x153   :  { %1158 = vst.msk [vmem:[%s2187_s3 + $0x38] sm:$0xf] %vm1143_vm0, %v1371_v46  ;;  %1190 = vst.msk [vmem:[%s2187_s3 + $0xb8] sm:$0xf] %vm1143_vm0, %v1403_v47  ;;  %v1372_v50 = vpack.c.bf16 %v838_v48, %v838_v48  ;;  %v1404_v51 = vpack.c.bf16 %v870_v49, %v870_v49 }
 0x154   :  { %v632_v52 = vpop.f32.mrb[32].mxu0  ;;  %v760_v53 = vpop.f32.mrb[32].mxu1 }
 0x155   :  { %1159 = vst.msk [vmem:[%s2187_s3 + $0x3c] sm:$0xf] %vm1143_vm0, %v1372_v50  ;;  %1191 = vst.msk [vmem:[%s2187_s3 + $0xbc] sm:$0xf] %vm1143_vm0, %v1404_v51  ;;  %v633_v54 = vadd.f32 %v1862_v17, %v632_v52  ;;  %v761_v55 = vadd.f32 %v1862_v17, %v760_v53  ;;  %v634_v56 = vpop.f32.mrb[33].mxu0  ;;  %v762_v57 = vpop.f32.mrb[33].mxu1 }
 0x156   :  { %v635_v58 = vpop.f32.mrb[34].mxu0  ;;  %v763_v59 = vpop.f32.mrb[34].mxu1 }
 0x157   :  { %v839_v60 = vmax.f32 %v633_v54, 0.0  ;;  %v871_v61 = vmax.f32 %v761_v55, 0.0  ;;  %v636_v62 = vadd.f32 %v1862_v17, %v635_v58  ;;  %v764_v63 = vadd.f32 %v1862_v17, %v763_v59  ;;  %v637_v0 = vpop.f32.mrb[35].mxu0  ;;  %v765_v1 = vpop.f32.mrb[35].mxu1 }
 0x159   :  { %v1373_v2 = vpack.c.bf16 %v839_v60, %v839_v60  ;;  %v1405_v3 = vpack.c.bf16 %v871_v61, %v871_v61  ;;  %v840_v4 = vmax.f32 %v636_v62, 0.0  ;;  %v872_v5 = vmax.f32 %v764_v63, 0.0 }
 0x15b   :  { %1160 = vst.msk [vmem:[%s2187_s3 + $0x40] sm:$0xf] %vm1143_vm0, %v1373_v2  ;;  %1192 = vst.msk [vmem:[%s2187_s3 + $0xc0] sm:$0xf] %vm1143_vm0, %v1405_v3  ;;  %v1374_v6 = vpack.c.bf16 %v840_v4, %v840_v4  ;;  %v1406_v7 = vpack.c.bf16 %v872_v5, %v872_v5 }
 0x15c   :  { %v640_v8 = vpop.f32.mrb[36].mxu0  ;;  %v768_v9 = vpop.f32.mrb[36].mxu1 }
 0x15d   :  { %1161 = vst.msk [vmem:[%s2187_s3 + $0x44] sm:$0xf] %vm1143_vm0, %v1374_v6  ;;  %1193 = vst.msk [vmem:[%s2187_s3 + $0xc4] sm:$0xf] %vm1143_vm0, %v1406_v7  ;;  %v641_v10 = vadd.f32 %v1862_v17, %v640_v8  ;;  %v769_v11 = vadd.f32 %v1862_v17, %v768_v9  ;;  %v642_v12 = vpop.f32.mrb[37].mxu0  ;;  %v770_v13 = vpop.f32.mrb[37].mxu1 }
 0x15e   :  { %v643_v14 = vpop.f32.mrb[38].mxu0  ;;  %v771_v15 = vpop.f32.mrb[38].mxu1 }
 0x15f   :  { %v841_v16 = vmax.f32 %v641_v10, 0.0  ;;  %v873_v18 = vmax.f32 %v769_v11, 0.0  ;;  %v644_v19 = vadd.f32 %v1862_v17, %v643_v14  ;;  %v772_v20 = vadd.f32 %v1862_v17, %v771_v15  ;;  %v645_v21 = vpop.f32.mrb[39].mxu0  ;;  %v773_v22 = vpop.f32.mrb[39].mxu1 }
 0x161   :  { %v1375_v23 = vpack.c.bf16 %v841_v16, %v841_v16  ;;  %v1407_v24 = vpack.c.bf16 %v873_v18, %v873_v18  ;;  %v842_v25 = vmax.f32 %v644_v19, 0.0  ;;  %v874_v26 = vmax.f32 %v772_v20, 0.0 }
 0x163   :  { %1162 = vst.msk [vmem:[%s2187_s3 + $0x48] sm:$0xf] %vm1143_vm0, %v1375_v23  ;;  %1194 = vst.msk [vmem:[%s2187_s3 + $0xc8] sm:$0xf] %vm1143_vm0, %v1407_v24  ;;  %v1376_v27 = vpack.c.bf16 %v842_v25, %v842_v25  ;;  %v1408_v28 = vpack.c.bf16 %v874_v26, %v874_v26 }
 0x164   :  { %v648_v29 = vpop.f32.mrb[40].mxu0  ;;  %v776_v30 = vpop.f32.mrb[40].mxu1 }
 0x165   :  { %1163 = vst.msk [vmem:[%s2187_s3 + $0x4c] sm:$0xf] %vm1143_vm0, %v1376_v27  ;;  %1195 = vst.msk [vmem:[%s2187_s3 + $0xcc] sm:$0xf] %vm1143_vm0, %v1408_v28  ;;  %v649_v31 = vadd.f32 %v1862_v17, %v648_v29  ;;  %v777_v32 = vadd.f32 %v1862_v17, %v776_v30  ;;  %v650_v33 = vpop.f32.mrb[41].mxu0  ;;  %v778_v34 = vpop.f32.mrb[41].mxu1 }
 0x166   :  { %v651_v35 = vpop.f32.mrb[42].mxu0  ;;  %v779_v36 = vpop.f32.mrb[42].mxu1 }
 0x167   :  { %v843_v37 = vmax.f32 %v649_v31, 0.0  ;;  %v875_v38 = vmax.f32 %v777_v32, 0.0  ;;  %v652_v39 = vadd.f32 %v1862_v17, %v651_v35  ;;  %v780_v40 = vadd.f32 %v1862_v17, %v779_v36  ;;  %v653_v41 = vpop.f32.mrb[43].mxu0  ;;  %v781_v42 = vpop.f32.mrb[43].mxu1 }
 0x169   :  { %v1377_v43 = vpack.c.bf16 %v843_v37, %v843_v37  ;;  %v1409_v44 = vpack.c.bf16 %v875_v38, %v875_v38  ;;  %v844_v45 = vmax.f32 %v652_v39, 0.0  ;;  %v876_v46 = vmax.f32 %v780_v40, 0.0 }
 0x16b   :  { %1164 = vst.msk [vmem:[%s2187_s3 + $0x50] sm:$0xf] %vm1143_vm0, %v1377_v43  ;;  %1196 = vst.msk [vmem:[%s2187_s3 + $0xd0] sm:$0xf] %vm1143_vm0, %v1409_v44  ;;  %v1378_v47 = vpack.c.bf16 %v844_v45, %v844_v45  ;;  %v1410_v48 = vpack.c.bf16 %v876_v46, %v876_v46 }
 0x16c   :  { %v656_v49 = vpop.f32.mrb[44].mxu0  ;;  %v784_v50 = vpop.f32.mrb[44].mxu1 }
 0x16d   :  { %1165 = vst.msk [vmem:[%s2187_s3 + $0x54] sm:$0xf] %vm1143_vm0, %v1378_v47  ;;  %1197 = vst.msk [vmem:[%s2187_s3 + $0xd4] sm:$0xf] %vm1143_vm0, %v1410_v48  ;;  %v657_v51 = vadd.f32 %v1862_v17, %v656_v49  ;;  %v785_v52 = vadd.f32 %v1862_v17, %v784_v50  ;;  %v658_v53 = vpop.f32.mrb[45].mxu0  ;;  %v786_v54 = vpop.f32.mrb[45].mxu1 }
 0x16e   :  { %v659_v55 = vpop.f32.mrb[46].mxu0  ;;  %v787_v56 = vpop.f32.mrb[46].mxu1 }
 0x16f   :  { %v845_v57 = vmax.f32 %v657_v51, 0.0  ;;  %v877_v58 = vmax.f32 %v785_v52, 0.0  ;;  %v660_v59 = vadd.f32 %v1862_v17, %v659_v55  ;;  %v788_v60 = vadd.f32 %v1862_v17, %v787_v56  ;;  %v661_v61 = vpop.f32.mrb[47].mxu0  ;;  %v789_v62 = vpop.f32.mrb[47].mxu1 }
 0x171   :  { %v1379_v63 = vpack.c.bf16 %v845_v57, %v845_v57  ;;  %v1411_v0 = vpack.c.bf16 %v877_v58, %v877_v58  ;;  %v846_v1 = vmax.f32 %v660_v59, 0.0  ;;  %v878_v2 = vmax.f32 %v788_v60, 0.0 }
 0x173   :  { %1166 = vst.msk [vmem:[%s2187_s3 + $0x58] sm:$0xf] %vm1143_vm0, %v1379_v63  ;;  %1198 = vst.msk [vmem:[%s2187_s3 + $0xd8] sm:$0xf] %vm1143_vm0, %v1411_v0  ;;  %v1380_v3 = vpack.c.bf16 %v846_v1, %v846_v1  ;;  %v1412_v4 = vpack.c.bf16 %v878_v2, %v878_v2 }
 0x174   :  { %v664_v5 = vpop.f32.mrb[48].mxu0  ;;  %v792_v6 = vpop.f32.mrb[48].mxu1 }
 0x175   :  { %1167 = vst.msk [vmem:[%s2187_s3 + $0x5c] sm:$0xf] %vm1143_vm0, %v1380_v3  ;;  %1199 = vst.msk [vmem:[%s2187_s3 + $0xdc] sm:$0xf] %vm1143_vm0, %v1412_v4  ;;  %v665_v7 = vadd.f32 %v1862_v17, %v664_v5  ;;  %v793_v8 = vadd.f32 %v1862_v17, %v792_v6  ;;  %v666_v9 = vpop.f32.mrb[49].mxu0  ;;  %v794_v10 = vpop.f32.mrb[49].mxu1 }
 0x176   :  { %v667_v11 = vpop.f32.mrb[50].mxu0  ;;  %v795_v12 = vpop.f32.mrb[50].mxu1 }
 0x177   :  { %v847_v13 = vmax.f32 %v665_v7, 0.0  ;;  %v879_v14 = vmax.f32 %v793_v8, 0.0  ;;  %v668_v15 = vadd.f32 %v1862_v17, %v667_v11  ;;  %v796_v16 = vadd.f32 %v1862_v17, %v795_v12  ;;  %v669_v18 = vpop.f32.mrb[51].mxu0  ;;  %v797_v19 = vpop.f32.mrb[51].mxu1 }
 0x179   :  { %v1381_v20 = vpack.c.bf16 %v847_v13, %v847_v13  ;;  %v1413_v21 = vpack.c.bf16 %v879_v14, %v879_v14  ;;  %v848_v22 = vmax.f32 %v668_v15, 0.0  ;;  %v880_v23 = vmax.f32 %v796_v16, 0.0 }
 0x17b   :  { %1168 = vst.msk [vmem:[%s2187_s3 + $0x60] sm:$0xf] %vm1143_vm0, %v1381_v20  ;;  %1200 = vst.msk [vmem:[%s2187_s3 + $0xe0] sm:$0xf] %vm1143_vm0, %v1413_v21  ;;  %v1382_v24 = vpack.c.bf16 %v848_v22, %v848_v22  ;;  %v1414_v25 = vpack.c.bf16 %v880_v23, %v880_v23 }
 0x17c   :  { %v672_v26 = vpop.f32.mrb[52].mxu0  ;;  %v800_v27 = vpop.f32.mrb[52].mxu1 }
 0x17d   :  { %1169 = vst.msk [vmem:[%s2187_s3 + $0x64] sm:$0xf] %vm1143_vm0, %v1382_v24  ;;  %1201 = vst.msk [vmem:[%s2187_s3 + $0xe4] sm:$0xf] %vm1143_vm0, %v1414_v25  ;;  %v673_v28 = vadd.f32 %v1862_v17, %v672_v26  ;;  %v801_v29 = vadd.f32 %v1862_v17, %v800_v27  ;;  %v674_v30 = vpop.f32.mrb[53].mxu0  ;;  %v802_v31 = vpop.f32.mrb[53].mxu1 }
 0x17e   :  { %v675_v32 = vpop.f32.mrb[54].mxu0  ;;  %v803_v33 = vpop.f32.mrb[54].mxu1 }
 0x17f   :  { %v849_v34 = vmax.f32 %v673_v28, 0.0  ;;  %v881_v35 = vmax.f32 %v801_v29, 0.0  ;;  %v676_v36 = vadd.f32 %v1862_v17, %v675_v32  ;;  %v804_v37 = vadd.f32 %v1862_v17, %v803_v33  ;;  %v677_v38 = vpop.f32.mrb[55].mxu0  ;;  %v805_v39 = vpop.f32.mrb[55].mxu1 }
 0x181   :  { %v1383_v40 = vpack.c.bf16 %v849_v34, %v849_v34  ;;  %v1415_v41 = vpack.c.bf16 %v881_v35, %v881_v35  ;;  %v850_v42 = vmax.f32 %v676_v36, 0.0  ;;  %v882_v43 = vmax.f32 %v804_v37, 0.0 }
 0x183   :  { %1170 = vst.msk [vmem:[%s2187_s3 + $0x68] sm:$0xf] %vm1143_vm0, %v1383_v40  ;;  %1202 = vst.msk [vmem:[%s2187_s3 + $0xe8] sm:$0xf] %vm1143_vm0, %v1415_v41  ;;  %v1384_v44 = vpack.c.bf16 %v850_v42, %v850_v42  ;;  %v1416_v45 = vpack.c.bf16 %v882_v43, %v882_v43 }
 0x184   :  { %v680_v46 = vpop.f32.mrb[56].mxu0  ;;  %v808_v47 = vpop.f32.mrb[56].mxu1 }
 0x185   :  { %1171 = vst.msk [vmem:[%s2187_s3 + $0x6c] sm:$0xf] %vm1143_vm0, %v1384_v44  ;;  %1203 = vst.msk [vmem:[%s2187_s3 + $0xec] sm:$0xf] %vm1143_vm0, %v1416_v45  ;;  %v681_v48 = vadd.f32 %v1862_v17, %v680_v46  ;;  %v809_v49 = vadd.f32 %v1862_v17, %v808_v47  ;;  %v682_v50 = vpop.f32.mrb[57].mxu0  ;;  %v810_v51 = vpop.f32.mrb[57].mxu1 }
 0x186   :  { %v683_v52 = vpop.f32.mrb[58].mxu0  ;;  %v811_v53 = vpop.f32.mrb[58].mxu1 }
 0x187   :  { %v851_v54 = vmax.f32 %v681_v48, 0.0  ;;  %v883_v55 = vmax.f32 %v809_v49, 0.0  ;;  %v684_v56 = vadd.f32 %v1862_v17, %v683_v52  ;;  %v812_v57 = vadd.f32 %v1862_v17, %v811_v53  ;;  %v685_v58 = vpop.f32.mrb[59].mxu0  ;;  %v813_v59 = vpop.f32.mrb[59].mxu1 }
 0x189   :  { %v1385_v60 = vpack.c.bf16 %v851_v54, %v851_v54  ;;  %v1417_v61 = vpack.c.bf16 %v883_v55, %v883_v55  ;;  %v852_v62 = vmax.f32 %v684_v56, 0.0  ;;  %v884_v63 = vmax.f32 %v812_v57, 0.0 }
 0x18b   :  { %1172 = vst.msk [vmem:[%s2187_s3 + $0x70] sm:$0xf] %vm1143_vm0, %v1385_v60  ;;  %1204 = vst.msk [vmem:[%s2187_s3 + $0xf0] sm:$0xf] %vm1143_vm0, %v1417_v61  ;;  %v1386_v0 = vpack.c.bf16 %v852_v62, %v852_v62  ;;  %v1418_v1 = vpack.c.bf16 %v884_v63, %v884_v63 }
 0x18c   :  { %v688_v2 = vpop.f32.mrb[60].mxu0  ;;  %v816_v3 = vpop.f32.mrb[60].mxu1 }
 0x18d   :  { %1173 = vst.msk [vmem:[%s2187_s3 + $0x74] sm:$0xf] %vm1143_vm0, %v1386_v0  ;;  %1205 = vst.msk [vmem:[%s2187_s3 + $0xf4] sm:$0xf] %vm1143_vm0, %v1418_v1  ;;  %v689_v4 = vadd.f32 %v1862_v17, %v688_v2  ;;  %v817_v5 = vadd.f32 %v1862_v17, %v816_v3  ;;  %v690_v6 = vpop.f32.mrb[61].mxu0  ;;  %v818_v7 = vpop.f32.mrb[61].mxu1 }
 0x18e   :  { %v691_v8 = vpop.f32.mrb[62].mxu0  ;;  %v819_v9 = vpop.f32.mrb[62].mxu1 }
 0x18f   :  { %v853_v10 = vmax.f32 %v689_v4, 0.0  ;;  %v885_v11 = vmax.f32 %v817_v5, 0.0  ;;  %v692_v12 = vadd.f32 %v1862_v17, %v691_v8  ;;  %v820_v13 = vadd.f32 %v1862_v17, %v819_v9  ;;  %v693_v14 = vpop.f32.mrb[63].mxu0  ;;  %v821_v15 = vpop.f32.mrb[63].mxu1 }
 0x191   :  { %v1387_v16 = vpack.c.bf16 %v853_v10, %v853_v10  ;;  %v1419_v18 = vpack.c.bf16 %v885_v11, %v885_v11  ;;  %v854_v19 = vmax.f32 %v692_v12, 0.0  ;;  %v886_v20 = vmax.f32 %v820_v13, 0.0 }
 0x193   :  { %1174 = vst.msk [vmem:[%s2187_s3 + $0x78] sm:$0xf] %vm1143_vm0, %v1387_v16  ;;  %1206 = vst.msk [vmem:[%s2187_s3 + $0xf8] sm:$0xf] %vm1143_vm0, %v1419_v18  ;;  %v1388_v21 = vpack.c.bf16 %v854_v19, %v854_v19  ;;  %v1420_v22 = vpack.c.bf16 %v886_v20, %v886_v20 }
 0x195   :  { %1175 = vst.msk [vmem:[%s2187_s3 + $0x7c] sm:$0xf] %vm1143_vm0, %v1388_v21  ;;  %1207 = vst.msk [vmem:[%s2187_s3 + $0xfc] sm:$0xf] %vm1143_vm0, %v1420_v22 }

// kernel: _lambda_.9
= control target key start
LH: loop header
LB: loop body
LE: loop exit
PB: predicated region body
PF: predicated region fallthrough
CT: control target
= control target key end

     0   :  { %vm113_vm0 = vsmask.f32 7424  ;;  %vm233_vm1 = vcmask 523264   ;;  %vm1160_vm2 = vsmask.f32 6400  ;;  %vm1491_vm3 = vcmask 1045504   ;;  %s4746_s1 = inlined_call_operand.vmem [shape: bf16[576,64], index: 1, kind: input, shape index: {}]   ;;  %s4747_s0 = inlined_call_operand.vmem [shape: bf16[1,200,64], index: 0, kind: input, shape index: {}]   ;;  %s4748_s2 = inlined_call_operand.vmem [shape: f32[1,64], index: 2, kind: input, shape index: {}]   ;;  %s4749_s3 = inlined_call_operand.vmem [shape: bf16[178,64], index: 3, kind: output, shape index: {}]  }
   0x1   :  { %v3635_v0 = vld [vmem:[%s4746_s1 + $0x20] sm:$0xff]   ;;  %v3637_v2 = vld [vmem:[%s4746_s1 + $0x28] sm:$0xff]   ;;  %v3639_v4 = vld [vmem:[%s4746_s1 + $0x30] sm:$0xff]   ;;  %vm590_vm4 = vcmask 1046528   ;;  %vm2392_vm5 = vcmask 1044480   ;;  %vm2773_vm7 = vcmask 519168  }
   0x2   :  { %v3636_v1 = vld [vmem:[%s4746_s1 + $0x80] sm:$0xff]   ;;  %3179 = vmatprep.subr.bf16.mxu1 %v3635_v0  ;;  %v3638_v3 = vld [vmem:[%s4746_s1 + $0x88] sm:$0xff]   ;;  %v3640_v5 = vld [vmem:[%s4746_s1 + $0x90] sm:$0xff]   ;;  %vm2061_vm6 = vsmask.f32 5376  ;;  %vm2796_vm8 = vcmask 516096  }
   0x3   :  { %3307 = vmatprep.subr.bf16.mxu0 %v3636_v1  ;;  %3180 = vmatpush3.bf16.msra.mxu1 %v3635_v0  ;;  %v3641_v6 = vld [vmem:[%s4746_s1 + $0x38] sm:$0xff]   ;;  %v15_v8 = vld [vmem:[%s4747_s0] sm:$0xf]  ;;  %v3770_v9 = vld [vmem:[%s4747_s0 + $0x4] sm:$0xf] }
   0x4   :  { %3308 = vmatpush3.bf16.msra.mxu0 %v3636_v1  ;;  %3181 = vmatprep.subr.bf16.mxu1 %v3637_v2  ;;  %v3642_v7 = vld [vmem:[%s4746_s1 + $0x98] sm:$0xff]   ;;  %v3773_v10 = vcombine.low %v15_v8, %v3770_v9  ;;  %v3778_v11 = vld [vmem:[%s4747_s0 + $0x8] sm:$0xff]   ;;  %v825_v12 = vld [vmem:[%s4747_s0 + $0x4] sm:$0xe] }
   0x5   :  { %3309 = vmatprep.subr.bf16.mxu0 %v3638_v3  ;;  %v3786_v13 = vld [vmem:[%s4747_s0 + $0x8] sm:$0xf]  ;;  %v122_v16 = vshll.u32 %v3778_v11, 16  ;;  %v126_v17 = vshrl.u32 %v3778_v11, 16  ;;  %v3795_v18 = vld [vmem:[%s4747_s0 + $0xc] sm:$0xff]   ;;  %v3648_v28 = vld [vmem:[%s4746_s1] sm:$0xff]  }
   0x6   :  { %v115_v14 = vshrl.u32 %v3773_v10, 16  ;;  %v117_v15 = vshll.u32 %v3773_v10, 16  ;;  %v3800_v19 = vld [vmem:[%s4747_s0 + $0x10] sm:$0xff]   ;;  %v3803_v20 = vcombine.low %v825_v12, %v3786_v13  ;;  %v1170_v23 = vshrl.u32 %v3795_v18, 16  ;;  %v3821_v34 = vld [vmem:[%s4747_s0 + $0x18] sm:$0xff]   ;;  %v3839_v50 = vld [vmem:[%s4747_s0 + $0x20] sm:$0xff]  }
   0x7   :  { %3182 = vmatpush3.bf16.msra.mxu1 %v3637_v2  ;;  %v124_v22 = vrot.slane %v122_v16, 1  ;;  %v1173_v24 = vshll.u32 %v3795_v18, 16  ;;  %v130_v27 = vshll.u32 %v3800_v19, 16  ;;  %v3816_v33 = vld [vmem:[%s4747_s0 + $0x14] sm:$0xff]   ;;  %v134_v38 = vshrl.u32 %v3800_v19, 16  ;;  %v3833_v47 = vld [vmem:[%s4747_s0 + $0x1c] sm:$0xff]  }
   0x8   :  { %3310 = vmatpush3.bf16.msra.mxu0 %v3638_v3  ;;  %3183 = vmatprep.subr.bf16.mxu1 %v3639_v4  ;;  %v119_v21 = vrot.slane %v117_v15, 1  ;;  %v1162_v25 = vshrl.u32 %v3803_v20, 16  ;;  %v1165_v26 = vshll.u32 %v3803_v20, 16  ;;  %v1172_v31 = vrot.slane %v1170_v23, 1  ;;  %v3848_v56 = vld [vmem:[%s4747_s0 + $0x24] sm:$0xff]  }
   0x9   :  { %3311 = vmatprep.subr.bf16.mxu0 %v3640_v5  ;;  %v128_v30 = vor.u32 %v126_v17, %v124_v22  ;;  %v1175_v32 = vrot.slane %v1173_v24, 2  ;;  %v132_v37 = vrot.slane %v130_v27, 1  ;;  %v1179_v41 = vshrl.u32 %v3816_v33, 16  ;;  %v3654_v59 = vld [vmem:[%s4746_s1 + $0xa0] sm:$0xff]   ;;  %v3873_v16 = vld [vmem:[%s4747_s0 + $0x28] sm:$0xff]   ;;  %v3893_v27 = vld [vmem:[%s4747_s0 + $0x34] sm:$0xff]  }
   0xa   :  { %v120_v29 = vor.u32 %v119_v21, %v115_v14  ;;  %v1164_v35 = vrot.slane %v1162_v25, 1  ;;  %v1167_v36 = vrot.slane %v1165_v26, 2  ;;  %v1182_v42 = vshll.u32 %v3816_v33, 16  ;;  %v3880_v21 = vld [vmem:[%s4747_s0 + $0x2c] sm:$0xff]  }
   0xb   :  { %3184 = vmatpush3.bf16.msra.mxu1 %v3639_v4  ;;  %v1176_v40 = vor.u32 %v1175_v32, %v1172_v31  ;;  %v133_v44 = vsel %vm113_vm0, %v128_v30, %v132_v37  ;;  %v136_v45 = vor.u32 %v134_v38, %v132_v37  ;;  %v138_v46 = vshll.u32 %v3821_v34, 16  ;;  %v3655_v4 = vld [vmem:[%s4746_s1 + $0x8] sm:$0xff]   ;;  %v3887_v25 = vld [vmem:[%s4747_s0 + $0x30] sm:$0xff]  }
   0xc   :  { %3312 = vmatpush3.bf16.msra.mxu0 %v3640_v5  ;;  %3185 = vmatprep.subr.bf16.mxu1 %v3641_v6  ;;  %v125_v39 = vsel %vm113_vm0, %v120_v29, %v124_v22  ;;  %v1168_v43 = vor.u32 %v1167_v36, %v1164_v35  ;;  %v1181_v48 = vrot.slane %v1179_v41, 1  ;;  %v1184_v49 = vrot.slane %v1182_v42, 2 }
   0xd   :  { %3313 = vmatprep.subr.bf16.mxu0 %v3642_v7  ;;  %3187 = vmatprep.mubr.msk.bf16.mxu1 %vm233_vm1, %v125_v39  ;;  %v142_v51 = vshrl.u32 %v3821_v34, 16  ;;  %v140_v53 = vrot.slane %v138_v46, 1  ;;  %v1188_v54 = vshrl.u32 %v3833_v47, 16  ;;  %v1191_v55 = vshll.u32 %v3833_v47, 16  ;;  %v3661_v39 = vld [vmem:[%s4746_s1 + $0xb0] sm:$0xff]  }
   0xe   :  { %v1177_v52 = vsel %vm1160_vm2, %v1168_v43, %v1176_v40  ;;  %v1185_v57 = vor.u32 %v1184_v49, %v1181_v48  ;;  %v146_v58 = vshll.u32 %v3839_v50, 16  ;;  %v1197_v2 = vshrl.u32 %v3848_v56, 16  ;;  %v3913_v48 = vld [vmem:[%s4747_s0 + $0x38] sm:$0xff]  }
   0xf   :  { %3186 = vmatpush3.bf16.msra.mxu1 %v3641_v6  ;;  %3315 = vmatprep.mubr.msk.bf16.mxu0 %vm233_vm1, %v1177_v52  ;;  %v141_v60 = vsel %vm113_vm0, %v136_v45, %v140_v53  ;;  %v1190_v61 = vrot.slane %v1188_v54, 1  ;;  %v1193_v62 = vrot.slane %v1191_v55, 2  ;;  %v144_v63 = vor.u32 %v142_v51, %v140_v53  ;;  %v3656_v6 = vld [vmem:[%s4746_s1 + $0xa8] sm:$0xff]   ;;  %v3919_v51 = vld [vmem:[%s4747_s0 + $0x40] sm:$0xff]  }
  0x10   :  { %3314 = vmatpush3.bf16.msra.mxu0 %v3642_v7  ;;  %3211 = vmatprep.subr.bf16.mxu1 %v3648_v28  ;;  %v1186_v0 = vsel %vm1160_vm2, %v1176_v40, %v1185_v57  ;;  %v148_v1 = vrot.slane %v146_v58, 1  ;;  %v1200_v3 = vshll.u32 %v3848_v56, 16  ;;  %v150_v7 = vshrl.u32 %v3839_v50, 16  ;;  %v3662_v40 = vld [vmem:[%s4746_s1 + $0xb8] sm:$0xff]   ;;  %v1479_v53 = vld [vmem:[%s4747_s0 + $0x4] sm:$0xc] }
  0x11   :  { %3339 = vmatprep.subr.bf16.mxu0 %v3654_v59  ;;  %v1194_v5 = vor.u32 %v1193_v62, %v1190_v61  ;;  %v1199_v12 = vrot.slane %v1197_v2, 1  ;;  %v1493_v22 = vrot.slane %v3795_v18, 2  ;;  %v154_v24 = vshll.u32 %v3873_v16, 16 }
  0x12   :  { %3188 = vmatmul.mubr.msk.bf16.vlgmr.msra.gmra.mrb[0].mxu1 %vm233_vm1, %v133_v44  ;;  %v149_v8 = vsel %vm113_vm0, %v144_v63, %v148_v1  ;;  %v1202_v14 = vrot.slane %v1200_v3, 2  ;;  %v152_v23 = vor.u32 %v150_v7, %v148_v1  ;;  %v158_v26 = vshrl.u32 %v3873_v16, 16  ;;  %v3942_v1 = vld [vmem:[%s4747_s0 + $0x48] sm:$0xff]  }
  0x13   :  { %3212 = vmatpush3.bf16.msra.mxu1 %v3648_v28  ;;  %3191 = vmatprep.mubr.msk.bf16.mxu1 %vm233_vm1, %v141_v60  ;;  %v1195_v15 = vsel %vm1160_vm2, %v1185_v57, %v1194_v5  ;;  %v1206_v29 = vshrl.u32 %v3880_v21, 16  ;;  %v1209_v30 = vshll.u32 %v3880_v21, 16  ;;  %v156_v31 = vrot.slane %v154_v24, 1 }
  0x14   :  { %3316 = vmatmul.mubr.msk.bf16.vlgmr.msra.gmra.mrb[0].mxu0 %vm233_vm1, %v1186_v0  ;;  %3213 = vmatprep.subr.bf16.mxu1 %v3655_v4  ;;  %v1203_v17 = vor.u32 %v1202_v14, %v1199_v12  ;;  %v162_v32 = vshll.u32 %v3887_v25, 16  ;;  %v1215_v35 = vshrl.u32 %v3893_v27, 16  ;;  %v1218_v36 = vshll.u32 %v3893_v27, 16 }
  0x15   :  { %3340 = vmatpush3.bf16.msra.mxu0 %v3654_v59  ;;  %3319 = vmatprep.mubr.msk.bf16.mxu0 %vm233_vm1, %v1195_v15  ;;  %v1208_v37 = vrot.slane %v1206_v29, 1  ;;  %v1211_v38 = vrot.slane %v1209_v30, 2  ;;  %v157_v41 = vsel %vm113_vm0, %v152_v23, %v156_v31  ;;  %v160_v42 = vor.u32 %v158_v26, %v156_v31  ;;  %v3666_v59 = vld [vmem:[%s4746_s1 + $0x10] sm:$0xff]  }
  0x16   :  { %3341 = vmatprep.subr.bf16.mxu0 %v3656_v6  ;;  %v1204_v28 = vsel %vm1160_vm2, %v1194_v5, %v1203_v17  ;;  %v164_v43 = vrot.slane %v162_v32, 1  ;;  %v1217_v44 = vrot.slane %v1215_v35, 1  ;;  %v1220_v46 = vrot.slane %v1218_v36, 2  ;;  %v3973_v32 = vld [vmem:[%s4747_s0 + $0x58] ss:$0 sps:$4 sm:$0x33]  }
  0x17   :  { %3214 = vmatpush3.bf16.msra.mxu1 %v3655_v4  ;;  %v1212_v45 = vor.u32 %v1211_v38, %v1208_v37  ;;  %v166_v49 = vshrl.u32 %v3887_v25, 16  ;;  %v170_v58 = vshll.u32 %v3913_v48, 16  ;;  %v2909_v60 = vcombine.low %v1479_v53, %v3786_v13  ;;  %v3948_v4 = vld [vmem:[%s4747_s0 + $0x50] sm:$0xff]   ;;  %v3681_v53 = vld [vmem:[%s4746_s1 + $0xd8] sm:$0xff]  }
  0x18   :  { %v165_v52 = vsel %vm113_vm0, %v160_v42, %v164_v43  ;;  %v3927_v55 = vor.u32 %v1220_v46, %v1217_v44  ;;  %v174_v61 = vshrl.u32 %v3913_v48, 16  ;;  %v178_v62 = vshll.u32 %v3919_v51, 16  ;;  %3215 = vmatprep.subr.bf16.mxu1 %v3666_v59  ;;  %v3678_v44 = vld [vmem:[%s4746_s1 + $0xd0] sm:$0xff]  }
  0x19   :  { %3342 = vmatpush3.bf16.msra.mxu0 %v3656_v6  ;;  %v1213_v54 = vsel %vm1160_vm2, %v1203_v17, %v1212_v45  ;;  %v168_v57 = vor.u32 %v166_v49, %v164_v43  ;;  %v172_v0 = vrot.slane %v170_v58, 1  ;;  %v182_v2 = vshrl.u32 %v3919_v51, 16  ;;  %v4005_v49 = vld [vmem:[%s4747_s0 + $0x3c] sm:$0xff]  }
  0x1a   :  { %3192 = vmatmul.mubr.msk.bf16.gmra.mrb[4].mxu1 %vm233_vm1, %v149_v8  ;;  %3343 = vmatprep.subr.bf16.mxu0 %v3661_v39  ;;  %v1222_v63 = vsel %vm1160_vm2, %v1212_v45, %v3927_v55  ;;  %v1492_v3 = vrot.slane %v2909_v60, 2  ;;  %v180_v13 = vrot.slane %v178_v62, 1  ;;  %v186_v7 = vshll.u32 %v3942_v1, 16  ;;  %v3669_v8 = vld [vmem:[%s4746_s1 + $0xc0] sm:$0xff]  }
  0x1b   :  { %3195 = vmatprep.mubr.msk.bf16.mxu1 %vm233_vm1, %v157_v41  ;;  %3216 = vmatpush3.bf16.msra.mxu1 %v3666_v59  ;;  %v173_v5 = vsel %vm113_vm0, %v168_v57, %v172_v0  ;;  %v176_v6 = vor.u32 %v174_v61, %v172_v0  ;;  %v190_v15 = vshrl.u32 %v3942_v1, 16  ;;  %v194_v17 = vshll.u32 %v3948_v4, 16  ;;  %v3672_v41 = vld [vmem:[%s4746_s1 + $0xc8] sm:$0xff]  }
  0x1c   :  { %3320 = vmatmul.mubr.msk.bf16.gmra.mrb[4].mxu0 %vm233_vm1, %v1204_v28  ;;  %v1494_v12 = vsel %vm1491_vm3, %v1492_v3, %v1493_v22  ;;  %v184_v14 = vor.u32 %v182_v2, %v180_v13  ;;  %v1495_v24 = vrot.slane %v3816_v33, 2  ;;  %v188_v26 = vrot.slane %v186_v7, 1  ;;  %v3670_v28 = vld [vmem:[%s4746_s1 + $0x18] sm:$0xff]   ;;  %v4035_v2 = vld [vmem:[%s4747_s0 + $0x44] sm:$0xff]  }
  0x1d   :  { %3344 = vmatpush3.bf16.msra.mxu0 %v3661_v39  ;;  %3323 = vmatprep.mubr.msk.bf16.mxu0 %vm233_vm1, %v1213_v54  ;;  %v181_v23 = vsel %vm113_vm0, %v176_v6, %v180_v13  ;;  %v198_v29 = vshrl.u32 %v3948_v4, 16  ;;  %v1497_v30 = vrot.slane %v3833_v47, 2  ;;  %v196_v31 = vrot.slane %v194_v17, 1  ;;  %v3674_v47 = vld [vmem:[%s4746_s1 + $0x40] sm:$0xff]   ;;  %v3679_v7 = vld [vmem:[%s4746_s1 + $0x48] sm:$0xff]  }
  0x1e   :  { %3345 = vmatprep.subr.bf16.mxu0 %v3662_v40  ;;  %v189_v33 = vsel %vm113_vm0, %v184_v14, %v188_v26  ;;  %3217 = vmatprep.subr.bf16.mxu1 %v3670_v28  ;;  %v192_v35 = vor.u32 %v190_v15, %v188_v26  ;;  %v202_v36 = vshll.u32 %v3973_v32, 16  ;;  %v1496_v37 = vsel %vm1491_vm3, %v1493_v22, %v1495_v24 }
  0x1f   :  { %3218 = vmatpush3.bf16.msra.mxu1 %v3670_v28  ;;  %v200_v38 = vor.u32 %v198_v29, %v196_v31  ;;  %v1498_v39 = vsel %vm1491_vm3, %v1495_v24, %v1497_v30  ;;  %v1499_v43 = vrot.slane %v3848_v56, 2  ;;  %v1501_v22 = vrot.slane %v3880_v21, 2  ;;  %v4072_v24 = vld [vmem:[%s4747_s0 + $0x5c] ss:$0 sps:$4 sm:$0x77]  }
  0x20   :  { %3243 = vmatprep.subr.bf16.mxu1 %v3674_v47  ;;  %v197_v42 = vsel %vm113_vm0, %v192_v35, %v196_v31  ;;  %v206_v45 = vshrl.u32 %v3973_v32, 16  ;;  %v592_v54 = vrot.slane %v3778_v11, 1  ;;  %v594_v58 = vrot.slane %v3800_v19, 1  ;;  %v3689_v35 = vld [vmem:[%s4746_s1 + $0x58] sm:$0xff]  }
  0x21   :  { %3346 = vmatpush3.bf16.msra.mxu0 %v3662_v40  ;;  %v204_v40 = vrot.slane %v202_v36, 1  ;;  %v1500_v46 = vsel %vm1491_vm3, %v1497_v30, %v1499_v43  ;;  %v1503_v59 = vrot.slane %v3893_v27, 2  ;;  %v596_v60 = vrot.slane %v3821_v34, 1 }
  0x22   :  { %3196 = vmatmul.mubr.msk.bf16.gmra.mrb[8].mxu1 %vm233_vm1, %v165_v52  ;;  %3371 = vmatprep.subr.bf16.mxu0 %v3669_v8  ;;  %v1502_v52 = vsel %vm1491_vm3, %v1499_v43, %v1501_v22  ;;  %v1505_v61 = vrot.slane %v4005_v49, 2  ;;  %v4019_v62 = vsel %vm590_vm4, %v592_v54, %v594_v58  ;;  %v598_v6 = vrot.slane %v3839_v50, 1 }
  0x23   :  { %3199 = vmatprep.mubr.msk.bf16.mxu1 %vm233_vm1, %v173_v5  ;;  %v205_v18 = vsel %vm113_vm0, %v200_v38, %v204_v40  ;;  %v208_v57 = vor.u32 %v206_v45, %v204_v40  ;;  %v4028_v0 = vsel %vm590_vm4, %v594_v58, %v596_v60  ;;  %v1504_v3 = vsel %vm1491_vm3, %v1501_v22, %v1503_v59  ;;  %v4042_v5 = vld [vmem:[%s4747_s0 + $0x4c] sm:$0xff]   ;;  %v4155_v58 = vld [vmem:[%s4747_s0 + $0x18] sm:$0xff]  }
  0x24   :  { %3324 = vmatmul.mubr.msk.bf16.gmra.mrb[8].mxu0 %vm233_vm1, %v1222_v63  ;;  %v4025_v63 = vld [vmem:[%s4746_s1 + $0xe0] sm:$0xff]   ;;  %v1506_v13 = vsel %vm1491_vm3, %v1503_v59, %v1505_v61  ;;  %v1509_v15 = vrot.slane %v4042_v5, 2  ;;  %v602_v30 = vrot.slane %v3887_v25, 1  ;;  %v604_v31 = vrot.slane %v3913_v48, 1 }
  0x25   :  { %3347 = vmatprep.mubr.msk.bf16.mxu0 %vm233_vm1, %v1494_v12  ;;  %v4055_v12 = vsel %vm590_vm4, %v596_v60, %v598_v6  ;;  %v606_v40 = vrot.slane %v3919_v51, 1  ;;  %v608_v43 = vrot.slane %v3942_v1, 1  ;;  %v610_v45 = vrot.slane %v3948_v4, 1  ;;  %v4161_v60 = vld [vmem:[%s4747_s0 + $0x20] sm:$0xff]  }
  0x26   :  { %v4102_v38 = vsel %vm590_vm4, %v602_v30, %v604_v31 }
  0x2a   :  { %3200 = vmatmul.mubr.msk.bf16.gmra.mrb[12].mxu1 %vm233_vm1, %v181_v23  ;;  %v4067_v23 = vld [vmem:[%s4747_s0 + $0x54] sm:$0xff]  }
  0x2b   :  { %3203 = vmatprep.mubr.msk.bf16.mxu1 %vm233_vm1, %v189_v33  ;;  %v1511_v33 = vrot.slane %v4067_v23, 2 }
  0x2c   :  { %3348 = vmatmul.mubr.msk.bf16.vlgmr.msra.gmra.mrb[0].mxu0 %vm233_vm1, %v1496_v37  ;;  %v1726_v37 = vld [vmem:[%s4747_s0 + $0x8] sm:$0xc] }
  0x2d   :  { %3351 = vmatprep.mubr.msk.bf16.mxu0 %vm233_vm1, %v1498_v39  ;;  %3372 = vmatpush3.bf16.msra.mxu0 %v3669_v8  ;;  %v578_v8 = vld [vmem:[%s4747_s0] sm:$0xe]  ;;  %v1727_v39 = vld [vmem:[%s4747_s0 + $0xc] sm:$0xf] }
  0x2e   :  { %3373 = vmatprep.subr.bf16.mxu0 %v3672_v41  ;;  %v2847_v14 = vcombine.low %v578_v8, %v3770_v9  ;;  %v600_v9 = vrot.slane %v3873_v16, 1  ;;  %v4123_v22 = vcombine.low %v1726_v37, %v1727_v39  ;;  %v4750_v8 = vrot.slane %v3848_v56, 1 }
  0x30   :  { %v591_v17 = vrot.slane %v2847_v14, 1  ;;  %v4084_v29 = vsel %vm590_vm4, %v598_v6, %v600_v9  ;;  %v4095_v36 = vsel %vm590_vm4, %v600_v9, %v602_v30  ;;  %v923_v14 = vrot.slane %v3880_v21, 1 }
  0x31   :  { %3374 = vmatpush3.bf16.msra.mxu0 %v3672_v41  ;;  %v1512_v41 = vsel %vm1491_vm3, %v1509_v15, %v1511_v33  ;;  %v927_v21 = vrot.slane %v4005_v49, 1 }
  0x32   :  { %3204 = vmatmul.mubr.msk.bf16.gmra.mrb[16].mxu1 %vm233_vm1, %v197_v42  ;;  %3375 = vmatprep.subr.bf16.mxu0 %v3678_v44  ;;  %v4116_v42 = vld [vmem:[%s4746_s1 + $0x60] sm:$0xff]   ;;  %v4202_v9 = vsel %vm590_vm4, %v4750_v8, %v923_v14 }
  0x33   :  { %3207 = vmatprep.mubr.msk.bf16.mxu1 %vm233_vm1, %v205_v18 }
  0x34   :  { %3352 = vmatmul.mubr.msk.bf16.gmra.mrb[4].mxu0 %vm233_vm1, %v1500_v46  ;;  %v4138_v46 = vsel %vm590_vm4, %v608_v43, %v610_v45 }
  0x35   :  { %3355 = vmatprep.mubr.msk.bf16.mxu0 %vm233_vm1, %v1502_v52  ;;  %3376 = vmatpush3.bf16.msra.mxu0 %v3678_v44  ;;  %v4131_v44 = vsel %vm590_vm4, %v606_v40, %v608_v43  ;;  %v4752_v52 = vrot.slane %v3973_v32, 1  ;;  %v931_v43 = vrot.slane %v4042_v5, 1 }
  0x36   :  { %3377 = vmatprep.subr.bf16.mxu0 %v3681_v53 }
  0x39   :  { %3378 = vmatpush3.bf16.msra.mxu0 %v3681_v53  ;;  %v1815_v53 = vrot.slane %v4123_v22, 2 }
  0x3a   :  { %3208 = vmatmul.mubr.msk.bf16.gmra.mrb[20].mxu1 %vm233_vm1, %v208_v57  ;;  %3403 = vmatprep.subr.bf16.mxu0 %v4025_v63  ;;  %v4148_v57 = vsel %vm590_vm4, %v610_v45, %v4752_v52  ;;  %v933_v45 = vrot.slane %v4067_v23, 1  ;;  %v1245_v52 = vshll.u32 %v4042_v5, 16 }
  0x3b   :  { %3219 = vmatprep.mubr.msk.bf16.mxu1 %vm233_vm1, %v3773_v10  ;;  %v1507_v10 = vrot.slane %v4035_v2, 2 }
  0x3c   :  { %3356 = vmatmul.mubr.msk.bf16.gmra.mrb[8].mxu0 %vm233_vm1, %v1504_v3  ;;  %v1820_v3 = vrot.slane %v4161_v60, 2 }
  0x3d   :  { %3359 = vmatprep.mubr.msk.bf16.mxu0 %vm233_vm1, %v1506_v13  ;;  %v1508_v26 = vsel %vm1491_vm3, %v1505_v61, %v1507_v10  ;;  %v1510_v28 = vsel %vm1491_vm3, %v1507_v10, %v1509_v15  ;;  %v4174_v61 = vld [vmem:[%s4747_s0 + $0x30] sm:$0xff]   ;;  %v4180_v13 = vld [vmem:[%s4747_s0 + $0x38] sm:$0xff]   ;;  %v2380_v15 = vld [vmem:[%s4747_s0 + $0x8] sm:$0x8] }
  0x3e   :  { %v2971_v30 = vcombine.low %v2380_v15, %v1727_v39  ;;  %v929_v39 = vrot.slane %v4035_v2, 1 }
  0x42   :  { %3220 = vmatmul.mubr.msk.bf16.vlgmr.msra.gmra.mrb[0].mxu1 %vm233_vm1, %v3778_v11  ;;  %v3684_v11 = vld [vmem:[%s4746_s1 + $0x50] sm:$0xff]  }
  0x43   :  { %3244 = vmatpush3.bf16.msra.mxu1 %v3674_v47  ;;  %3223 = vmatprep.mubr.msk.bf16.mxu1 %vm233_vm1, %v3800_v19  ;;  %v4080_v19 = vsel %vm590_vm4, %v591_v17, %v592_v54  ;;  %v1513_v47 = vrot.slane %v4072_v24, 2 }
  0x44   :  { %3245 = vmatprep.subr.bf16.mxu1 %v3679_v7  ;;  %3360 = vmatmul.mubr.msk.bf16.gmra.mrb[12].mxu0 %vm233_vm1, %v1508_v26  ;;  %v925_v26 = vrot.slane %v3893_v27, 1  ;;  %v3700_v27 = vld [vmem:[%s4746_s1 + $0xf0] sm:$0xff]  }
  0x45   :  { %3363 = vmatprep.mubr.msk.bf16.mxu0 %vm233_vm1, %v1510_v28  ;;  %v1514_v18 = vsel %vm1491_vm3, %v1511_v33, %v1513_v47  ;;  %v4211_v28 = vld [vmem:[%s4747_s0 + $0x40] sm:$0xff]  }
  0x46   :  { %v4220_v33 = vsel %vm590_vm4, %v923_v14, %v925_v26 }
  0x47   :  { %3246 = vmatpush3.bf16.msra.mxu1 %v3679_v7  ;;  %v1824_v7 = vrot.slane %v4174_v61, 2 }
  0x48   :  { %3247 = vmatprep.subr.bf16.mxu1 %v3684_v11 }
  0x4a   :  { %3224 = vmatmul.mubr.msk.bf16.gmra.mrb[4].mxu1 %vm233_vm1, %v3821_v34  ;;  %v4119_v34 = vsel %vm590_vm4, %v604_v31, %v606_v40  ;;  %v4235_v40 = vld [vmem:[%s4747_s0 + $0x5c] ss:$0 sps:$4 sm:$0x33]  }
  0x4b   :  { %3227 = vmatprep.mubr.msk.bf16.mxu1 %vm233_vm1, %v3839_v50  ;;  %3248 = vmatpush3.bf16.msra.mxu1 %v3684_v11  ;;  %v4128_v50 = vld [vmem:[%s4747_s0 + $0x10] sm:$0xff]   ;;  %v4751_v15 = vrot.slane %v4235_v40, 1 }
  0x4c   :  { %3249 = vmatprep.subr.bf16.mxu1 %v3689_v35  ;;  %3364 = vmatmul.mubr.msk.bf16.gmra.mrb[16].mxu0 %vm233_vm1, %v1512_v41  ;;  %v1816_v54 = vrot.slane %v4128_v50, 2  ;;  %v2394_v37 = vrot.slane %v4128_v50, 3  ;;  %v2396_v41 = vrot.slane %v4155_v58, 3 }
  0x4d   :  { %3367 = vmatprep.mubr.msk.bf16.mxu0 %vm233_vm1, %v1514_v18  ;;  %v2398_v18 = vrot.slane %v4161_v60, 3 }
  0x4e   :  { %v1817_v59 = vsel %vm1491_vm3, %v1815_v53, %v1816_v54  ;;  %v1828_v53 = vrot.slane %v4211_v28, 2 }
  0x4f   :  { %3250 = vmatpush3.bf16.msra.mxu1 %v3689_v35  ;;  %v4223_v35 = vsel %vm590_vm4, %v925_v26, %v927_v21  ;;  %v1224_v26 = vshrl.u32 %v4005_v49, 16 }
  0x50   :  { %3275 = vmatprep.subr.bf16.mxu1 %v4116_v42 }
  0x52   :  { %3228 = vmatmul.mubr.msk.bf16.gmra.mrb[8].mxu1 %vm233_vm1, %v3873_v16  ;;  %v4167_v16 = vld [vmem:[%s4747_s0 + $0x28] sm:$0xff]  }
  0x53   :  { %3231 = vmatprep.mubr.msk.bf16.mxu1 %vm233_vm1, %v3887_v25  ;;  %v1818_v25 = vrot.slane %v4155_v58, 2  ;;  %v1822_v6 = vrot.slane %v4167_v16, 2 }
  0x54   :  { %3368 = vmatmul.mubr.msk.bf16.gmra.mrb[20].mxu0 %vm233_vm1, %v1513_v47 }
  0x55   :  { %3379 = vmatprep.mubr.msk.bf16.mxu0 %vm233_vm1, %v1817_v59  ;;  %v1819_v10 = vsel %vm1491_vm3, %v1816_v54, %v1818_v25  ;;  %v1821_v17 = vsel %vm1491_vm3, %v1818_v25, %v1820_v3  ;;  %v1823_v11 = vsel %vm1491_vm3, %v1820_v3, %v1822_v6  ;;  %v1825_v31 = vsel %vm1491_vm3, %v1822_v6, %v1824_v7  ;;  %v3691_v25 = vld [vmem:[%s4747_s0 + $0x58] ss:$0 sps:$4 sm:$0x11]  }
  0x56   :  { %v4250_v59 = vsel %vm590_vm4, %v927_v21, %v929_v39  ;;  %v4257_v3 = vsel %vm2392_vm5, %v2394_v37, %v2396_v41  ;;  %v4263_v6 = vsel %vm2392_vm5, %v2396_v41, %v2398_v18  ;;  %v1227_v21 = vshll.u32 %v4005_v49, 16 }
  0x58   :  { %v1229_v8 = vrot.slane %v1227_v21, 2  ;;  %v1254_v21 = vshll.u32 %v4067_v23, 16 }
  0x5a   :  { %3232 = vmatmul.mubr.msk.bf16.gmra.mrb[12].mxu1 %vm233_vm1, %v3913_v48  ;;  %v1826_v48 = vrot.slane %v4180_v13, 2 }
  0x5b   :  { %3235 = vmatprep.mubr.msk.bf16.mxu1 %vm233_vm1, %v3919_v51  ;;  %v3693_v51 = vld [vmem:[%s4746_s1 + $0xe8] sm:$0xff]  }
  0x5c   :  { %3380 = vmatmul.mubr.msk.bf16.vlgmr.msra.gmra.mrb[0].mxu0 %vm233_vm1, %v1819_v10  ;;  %v4228_v47 = vsel %vm1491_vm3, %v1824_v7, %v1826_v48  ;;  %v4266_v10 = vsel %vm590_vm4, %v931_v43, %v933_v45  ;;  %v3703_v7 = vld [vmem:[%s4746_s1 + $0xf8] sm:$0xff]  }
  0x5d   :  { %3383 = vmatprep.mubr.msk.bf16.mxu0 %vm233_vm1, %v1821_v17  ;;  %3404 = vmatpush3.bf16.msra.mxu0 %v4025_v63  ;;  %v2393_v63 = vrot.slane %v2971_v30, 3  ;;  %v2402_v17 = vrot.slane %v4174_v61, 3  ;;  %v2406_v30 = vrot.slane %v4211_v28, 3 }
  0x5e   :  { %3405 = vmatprep.subr.bf16.mxu0 %v3693_v51 }
  0x5f   :  { %v4247_v54 = vsel %vm2392_vm5, %v2393_v63, %v2394_v37  ;;  %v1233_v63 = vshrl.u32 %v4035_v2, 16  ;;  %v4285_v37 = vld [vmem:[%s4747_s0 + $0x48] sm:$0xff]  }
  0x61   :  { %3406 = vmatpush3.bf16.msra.mxu0 %v3693_v51  ;;  %v2404_v51 = vrot.slane %v4180_v13, 3 }
  0x62   :  { %3236 = vmatmul.mubr.msk.bf16.gmra.mrb[16].mxu1 %vm233_vm1, %v3942_v1  ;;  %v2400_v1 = vrot.slane %v4167_v16, 3  ;;  %3407 = vmatprep.subr.bf16.mxu0 %v3700_v27 }
  0x63   :  { %3239 = vmatprep.mubr.msk.bf16.mxu1 %vm233_vm1, %v3948_v4  ;;  %v4260_v4 = vsel %vm590_vm4, %v929_v39, %v931_v43  ;;  %v4290_v39 = vsel %vm590_vm4, %v933_v45, %v4751_v15  ;;  %v4296_v49 = vsel %vm2392_vm5, %v2402_v17, %v2404_v51  ;;  %v1236_v43 = vshll.u32 %v4035_v2, 16 }
  0x64   :  { %v4272_v14 = vsel %vm2392_vm5, %v2398_v18, %v2400_v1  ;;  %3384 = vmatmul.mubr.msk.bf16.gmra.mrb[4].mxu0 %vm233_vm1, %v1823_v11  ;;  %v4293_v41 = vsel %vm2392_vm5, %v2400_v1, %v2402_v17  ;;  %v4303_v11 = vld [vmem:[%s4747_s0 + $0x50] sm:$0xff]   ;;  %v1226_v18 = vrot.slane %v1224_v26, 1  ;;  %v4306_v45 = vsel %vm2392_vm5, %v2404_v51, %v2406_v30  ;;  %v4311_v17 = vld [vmem:[%s4746_s1 + $0x100] sm:$0xff]  }
  0x65   :  { %3387 = vmatprep.mubr.msk.bf16.mxu0 %vm233_vm1, %v1825_v31  ;;  %3408 = vmatpush3.bf16.msra.mxu0 %v3700_v27  ;;  %4753 = vst [vmem:[#allocation2_spill] sm:$0xff] %v4306_v45  ;;  %v1235_v1 = vrot.slane %v1233_v63, 1  ;;  %v1238_v2 = vrot.slane %v1236_v43, 2  ;;  %v2408_v31 = vrot.slane %v4285_v37, 3  ;;  %v1242_v15 = vshrl.u32 %v4042_v5, 16  ;;  %v4327_v63 = vld [vmem:[%s4747_s0 + $0x58] sm:$0xff]  }
  0x66   :  { %3409 = vmatprep.subr.bf16.mxu0 %v3703_v7  ;;  %v4317_v27 = vor.u32 %v1229_v8, %v1226_v18  ;;  %v2410_v51 = vrot.slane %v4303_v11, 3  ;;  %v1251_v26 = vshrl.u32 %v4067_v23, 16  ;;  %v1829_v23 = vsel %vm1491_vm3, %v1826_v48, %v1828_v53 }
  0x67   :  { %v1239_v43 = vor.u32 %v1238_v2, %v1235_v1  ;;  %v4330_v5 = vsel %vm2392_vm5, %v2406_v30, %v2408_v31  ;;  %v1244_v8 = vrot.slane %v1242_v15, 1  ;;  %v1256_v45 = vrot.slane %v1254_v21, 2 }
  0x68   :  { %v1253_v18 = vrot.slane %v1251_v26, 1  ;;  %v1260_v1 = vshrl.u32 %v4072_v24, 16  ;;  %v1263_v48 = vshll.u32 %v4072_v24, 16  ;;  %v1830_v21 = vrot.slane %v4285_v37, 2  ;;  %v3701_v24 = vld [vmem:[%s4746_s1 + $0x68] sm:$0xff]  }
  0x69   :  { %3410 = vmatpush3.bf16.msra.mxu0 %v3703_v7  ;;  %v4343_v30 = vsel %vm1160_vm2, %v4317_v27, %v1239_v43 }
  0x6a   :  { %3240 = vmatmul.mubr.msk.bf16.gmra.mrb[24].mxu1 %vm233_vm1, %v3691_v25  ;;  %v1247_v25 = vrot.slane %v1245_v52, 2  ;;  %3435 = vmatprep.subr.bf16.mxu0 %v4311_v17  ;;  %v2412_v52 = vrot.slane %v4327_v63, 3  ;;  %v1257_v2 = vor.u32 %v1256_v45, %v1253_v18  ;;  %v1262_v26 = vrot.slane %v1260_v1, 1  ;;  %v3706_v18 = vld [vmem:[%s4746_s1 + $0x78] sm:$0xff]  }
  0x6b   :  { %3251 = vmatprep.mubr.msk.bf16.mxu1 %vm233_vm1, %v4080_v19  ;;  %v4338_v19 = vsel %vm2392_vm5, %v2408_v31, %v2410_v51  ;;  %v2066_v1 = vshll.u32 %v4123_v22, 16 }
  0x6c   :  { %v1248_v15 = vor.u32 %v1247_v25, %v1244_v8  ;;  %3388 = vmatmul.mubr.msk.bf16.gmra.mrb[8].mxu0 %vm233_vm1, %v4228_v47  ;;  %v4356_v31 = vsel %vm2392_vm5, %v2410_v51, %v2412_v52  ;;  %v1265_v47 = vrot.slane %v1263_v48, 2  ;;  %v1831_v8 = vsel %vm1491_vm3, %v1828_v53, %v1830_v21  ;;  %v3704_v25 = vld [vmem:[%s4746_s1 + $0x70] sm:$0xff]  }
  0x6d   :  { %3391 = vmatprep.mubr.msk.bf16.mxu0 %vm233_vm1, %v1829_v23  ;;  %v2063_v53 = vshrl.u32 %v4123_v22, 16  ;;  %v2074_v48 = vshll.u32 %v4128_v50, 16 }
  0x6e   :  { %v4351_v7 = vsel %vm1160_vm2, %v1239_v43, %v1248_v15  ;;  %v4364_v45 = vsel %vm1160_vm2, %v1248_v15, %v1257_v2  ;;  %v1832_v43 = vrot.slane %v4303_v11, 2  ;;  %v4369_v51 = vor.u32 %v1265_v47, %v1262_v26 }
  0x6f   :  { %v2068_v47 = vrot.slane %v2066_v1, 3  ;;  %v2076_v22 = vrot.slane %v2074_v48, 3  ;;  %v2101_v48 = vshll.u32 %v4167_v16, 16 }
  0x70   :  { %v4382_v23 = vsel %vm1160_vm2, %v1257_v2, %v4369_v51  ;;  %v2071_v2 = vshrl.u32 %v4128_v50, 16  ;;  %v2083_v50 = vshll.u32 %v4155_v58, 16 }
  0x72   :  { %3252 = vmatmul.mubr.msk.bf16.vlgmr.msra.gmra.mrb[0].mxu1 %vm233_vm1, %v4019_v62  ;;  %v1833_v62 = vsel %vm1491_vm3, %v1830_v21, %v1832_v43  ;;  %v2065_v21 = vrot.slane %v2063_v53, 2 }
  0x73   :  { %3276 = vmatpush3.bf16.msra.mxu1 %v4116_v42  ;;  %3255 = vmatprep.mubr.msk.bf16.mxu1 %vm233_vm1, %v4028_v0  ;;  %v3702_v42 = vld [vmem:[%s4747_s0 + $0x60] ss:$0 sps:$4 sm:$0x77]   ;;  %v1834_v0 = vrot.slane %v4327_v63, 2 }
  0x74   :  { %3277 = vmatprep.subr.bf16.mxu1 %v3701_v24  ;;  %3392 = vmatmul.mubr.msk.bf16.gmra.mrb[12].mxu0 %vm233_vm1, %v1831_v8  ;;  %v1836_v15 = vrot.slane %v3702_v42, 2  ;;  %v2073_v8 = vrot.slane %v2071_v2, 2  ;;  %v2092_v42 = vshll.u32 %v4161_v60, 16 }
  0x75   :  { %3395 = vmatprep.mubr.msk.bf16.mxu0 %vm233_vm1, %v1833_v62  ;;  %v1835_v26 = vsel %vm1491_vm3, %v1832_v43, %v1834_v0  ;;  %v2069_v43 = vor.u32 %v2068_v47, %v2065_v21  ;;  %v2089_v62 = vshrl.u32 %v4161_v60, 16  ;;  %v2098_v60 = vshrl.u32 %v4167_v16, 16  ;;  %v3707_v16 = vld [vmem:[%s4746_s1 + $0x108] sm:$0xff]  }
  0x76   :  { %v2094_v1 = vrot.slane %v2092_v42, 3 }
  0x77   :  { %3278 = vmatpush3.bf16.msra.mxu1 %v3701_v24  ;;  %v1837_v24 = vsel %vm1491_vm3, %v1834_v0, %v1836_v15  ;;  %v2085_v0 = vrot.slane %v2083_v50, 3  ;;  %v2100_v21 = vrot.slane %v2098_v60, 2  ;;  %v2125_v50 = vshrl.u32 %v4211_v28, 16 }
  0x78   :  { %3279 = vmatprep.subr.bf16.mxu1 %v3704_v25 }
  0x7a   :  { %3256 = vmatmul.mubr.msk.bf16.gmra.mrb[4].mxu1 %vm233_vm1, %v4055_v12  ;;  %v2080_v12 = vshrl.u32 %v4155_v58, 16 }
  0x7b   :  { %3259 = vmatprep.mubr.msk.bf16.mxu1 %vm233_vm1, %v4084_v29  ;;  %3280 = vmatpush3.bf16.msra.mxu1 %v3704_v25  ;;  %v4411_v29 = vld [vmem:[%s4746_s1 + $0x80] sm:$0xff]   ;;  %v2077_v25 = vor.u32 %v2076_v22, %v2073_v8 }
  0x7c   :  { %3281 = vmatprep.subr.bf16.mxu1 %v3706_v18  ;;  %3396 = vmatmul.mubr.msk.bf16.gmra.mrb[16].mxu0 %vm233_vm1, %v1835_v26  ;;  %v2082_v58 = vrot.slane %v2080_v12, 2  ;;  %v2107_v26 = vshrl.u32 %v4174_v61, 16 }
  0x7d   :  { %3399 = vmatprep.mubr.msk.bf16.mxu0 %vm233_vm1, %v1837_v24  ;;  %v2078_v53 = vsel %vm2061_vm6, %v2069_v43, %v2077_v25  ;;  %v2103_v24 = vrot.slane %v2101_v48, 3  ;;  %v2128_v43 = vshll.u32 %v4211_v28, 16  ;;  %v3714_v28 = vld [vmem:[%s4747_s0 + $0xc] sm:$0xff]   ;;  %v2143_v48 = vshrl.u32 %v4303_v11, 16 }
  0x7e   :  { %v2086_v2 = vor.u32 %v2085_v0, %v2082_v58  ;;  %v2109_v8 = vrot.slane %v2107_v26, 2  ;;  %v915_v58 = vrot.slane %v3714_v28, 1  ;;  %v4754_v26 = vrot.slane %v3973_v32, 1  ;;  %v3717_v28 = vld [vmem:[%s4746_s1 + $0x88] sm:$0xff]  }
  0x7f   :  { %3282 = vmatpush3.bf16.msra.mxu1 %v3706_v18  ;;  %v2091_v18 = vrot.slane %v2089_v62, 2 }
  0x80   :  { %3467 = vmatprep.subr.bf16.mxu1 %v4411_v29 }
  0x82   :  { %3260 = vmatmul.mubr.msk.bf16.gmra.mrb[8].mxu1 %vm233_vm1, %v4095_v36  ;;  %v2095_v36 = vor.u32 %v2094_v1, %v2091_v18  ;;  %v2130_v18 = vrot.slane %v2128_v43, 3  ;;  %v2134_v1 = vshrl.u32 %v4285_v37, 16 }
  0x83   :  { %3263 = vmatprep.mubr.msk.bf16.mxu1 %vm233_vm1, %v4102_v38  ;;  %v2110_v38 = vshll.u32 %v4174_v61, 16  ;;  %v2119_v61 = vshll.u32 %v4180_v13, 16 }
  0x84   :  { %3400 = vmatmul.mubr.msk.bf16.gmra.mrb[24].mxu0 %vm233_vm1, %v1836_v15  ;;  %v2087_v15 = vsel %vm2061_vm6, %v2077_v25, %v2086_v2  ;;  %v2096_v47 = vsel %vm2061_vm6, %v2086_v2, %v2095_v36  ;;  %v3708_v25 = vld [vmem:[%s4746_s1 + $0x110] sm:$0xff]   ;;  %v2137_v2 = vshll.u32 %v4285_v37, 16 }
  0x85   :  { %3411 = vmatprep.mubr.msk.bf16.mxu0 %vm233_vm1, %v2078_v53  ;;  %v2112_v22 = vrot.slane %v2110_v38, 3  ;;  %v2121_v42 = vrot.slane %v2119_v61, 3  ;;  %v2127_v53 = vrot.slane %v2125_v50, 2  ;;  %v3715_v38 = vld [vmem:[%s4747_s0 + $0x14] sm:$0xff]   ;;  %v2155_v50 = vshll.u32 %v4327_v63, 16 }
  0x87   :  { %v2113_v12 = vor.u32 %v2112_v22, %v2109_v8  ;;  %v2131_v60 = vor.u32 %v2130_v18, %v2127_v53  ;;  %v2145_v8 = vrot.slane %v2143_v48, 2  ;;  %v4755_v18 = vrot.slane %v3848_v56, 1 }
  0x8a   :  { %3264 = vmatmul.mubr.msk.bf16.gmra.mrb[12].mxu1 %vm233_vm1, %v4119_v34  ;;  %v2104_v34 = vor.u32 %v2103_v24, %v2100_v21  ;;  %v2136_v21 = vrot.slane %v2134_v1, 2  ;;  %v2139_v24 = vrot.slane %v2137_v2, 3  ;;  %v3719_v1 = vld [vmem:[%s4746_s1 + $0x98] sm:$0xff]  }
  0x8b   :  { %3267 = vmatprep.mubr.msk.bf16.mxu1 %vm233_vm1, %v4131_v44  ;;  %v2116_v44 = vshrl.u32 %v4180_v13, 16 }
  0x8c   :  { %3412 = vmatmul.mubr.msk.bf16.vlgmr.msra.gmra.mrb[0].mxu0 %vm233_vm1, %v2087_v15  ;;  %v2105_v13 = vsel %vm2061_vm6, %v2095_v36, %v2104_v34  ;;  %v2114_v0 = vsel %vm2061_vm6, %v2104_v34, %v2113_v12  ;;  %v2146_v36 = vshll.u32 %v4303_v11, 16  ;;  %v917_v15 = vrot.slane %v3715_v38, 1  ;;  %v3716_v11 = vld [vmem:[%s4747_s0 + $0x1c] sm:$0xff]  }
  0x8d   :  { %3415 = vmatprep.mubr.msk.bf16.mxu0 %vm233_vm1, %v2096_v47  ;;  %3436 = vmatpush3.bf16.msra.mxu0 %v4311_v17  ;;  %v914_v17 = vrot.slane %v3803_v20, 1  ;;  %v2118_v62 = vrot.slane %v2116_v44, 2  ;;  %v919_v47 = vrot.slane %v3716_v11, 1  ;;  %v2140_v44 = vor.u32 %v2139_v24, %v2136_v21 }
  0x8e   :  { %3437 = vmatprep.subr.bf16.mxu0 %v3707_v16  ;;  %v2148_v22 = vrot.slane %v2146_v36, 3  ;;  %v918_v34 = vsel %vm590_vm4, %v915_v58, %v917_v15 }
  0x8f   :  { %v2122_v20 = vor.u32 %v2121_v42, %v2118_v62  ;;  %v920_v61 = vsel %vm590_vm4, %v917_v15, %v919_v47  ;;  %v2157_v42 = vrot.slane %v2155_v50, 3 }
  0x90   :  { %v2149_v43 = vor.u32 %v2148_v22, %v2145_v8 }
  0x91   :  { %3438 = vmatpush3.bf16.msra.mxu0 %v3707_v16  ;;  %v2123_v37 = vsel %vm2061_vm6, %v2113_v12, %v2122_v20  ;;  %v2132_v32 = vsel %vm2061_vm6, %v2122_v20, %v2131_v60  ;;  %v4481_v16 = vld [vmem:[%s4747_s0 + $0x60] ss:$0 sps:$4 sm:$0xff]   ;;  %v2152_v12 = vshrl.u32 %v4327_v63, 16  ;;  %v3718_v20 = vld [vmem:[%s4746_s1 + $0x90] sm:$0xff]  }
  0x92   :  { %3268 = vmatmul.mubr.msk.bf16.gmra.mrb[16].mxu1 %vm233_vm1, %v4138_v46  ;;  %3439 = vmatprep.subr.bf16.mxu0 %v3708_v25  ;;  %v3710_v46 = vld [vmem:[%s4746_s1 + $0x118] sm:$0xff]  }
  0x93   :  { %3271 = vmatprep.mubr.msk.bf16.mxu1 %vm233_vm1, %v4148_v57  ;;  %v916_v57 = vsel %vm590_vm4, %v914_v17, %v915_v58  ;;  %v2164_v17 = vshll.u32 %v4481_v16, 16  ;;  %v2154_v62 = vrot.slane %v2152_v12, 2  ;;  %v2150_v58 = vsel %vm2061_vm6, %v2140_v44, %v2149_v43 }
  0x94   :  { %3416 = vmatmul.mubr.msk.bf16.gmra.mrb[4].mxu0 %vm233_vm1, %v2105_v13  ;;  %v2141_v13 = vsel %vm2061_vm6, %v2131_v60, %v2140_v44 }
  0x95   :  { %3419 = vmatprep.mubr.msk.bf16.mxu0 %vm233_vm1, %v2114_v0  ;;  %3440 = vmatpush3.bf16.msra.mxu0 %v3708_v25  ;;  %v2161_v25 = vshrl.u32 %v4481_v16, 16  ;;  %v2166_v53 = vrot.slane %v2164_v17, 3  ;;  %v4606_v17 = vld [vmem:[%s4748_s2] ss:$0 sm:$0xff] }
  0x96   :  { %3441 = vmatprep.subr.bf16.mxu0 %v3710_v46 }
  0x97   :  { %v2163_v0 = vrot.slane %v2161_v25, 2 }
  0x99   :  { %3442 = vmatpush3.bf16.msra.mxu0 %v3710_v46  ;;  %v2158_v46 = vor.u32 %v2157_v42, %v2154_v62 }
  0x9a   :  { %3272 = vmatmul.mubr.msk.bf16.gmra.mrb[28].mxu1 %vm233_vm1, %v4754_v26 }
  0x9b   :  { %3283 = vmatprep.mubr.msk.bf16.mxu1 %vm233_vm1, %v916_v57  ;;  %v2167_v57 = vor.u32 %v2166_v53, %v2163_v0  ;;  %v2159_v56 = vsel %vm2061_vm6, %v2149_v43, %v2158_v46 }
  0x9c   :  { %3420 = vmatmul.mubr.msk.bf16.gmra.mrb[8].mxu0 %vm233_vm1, %v2123_v37 }
  0x9d   :  { %3423 = vmatprep.mubr.msk.bf16.mxu0 %vm233_vm1, %v2132_v32  ;;  %v2168_v2 = vsel %vm2061_vm6, %v2158_v46, %v2167_v57 }
  0xa2   :  { %3284 = vmatmul.mubr.msk.bf16.vlgmr.msra.gmra.mrb[0].mxu1 %vm233_vm1, %v918_v34 }
  0xa3   :  { %3471 = vmatpush3.bf16.msra.mxu1 %v4411_v29  ;;  %3287 = vmatprep.mubr.msk.bf16.mxu1 %vm233_vm1, %v920_v61  ;;  %v922_v29 = vsel %vm590_vm4, %v919_v47, %v4755_v18 }
  0xa4   :  { %3468 = vmatprep.subr.bf16.mxu1 %v3717_v28  ;;  %3424 = vmatmul.mubr.msk.bf16.gmra.mrb[12].mxu0 %vm233_vm1, %v2141_v13 }
  0xa5   :  { %3427 = vmatprep.mubr.msk.bf16.mxu0 %vm233_vm1, %v2150_v58 }
  0xa7   :  { %3472 = vmatpush3.bf16.msra.mxu1 %v3717_v28 }
  0xa8   :  { %3469 = vmatprep.subr.bf16.mxu1 %v3718_v20 }
  0xaa   :  { %3288 = vmatmul.mubr.msk.bf16.gmra.mrb[4].mxu1 %vm233_vm1, %v922_v29 }
  0xab   :  { %3291 = vmatprep.mubr.msk.bf16.mxu1 %vm233_vm1, %v4202_v9  ;;  %3473 = vmatpush3.bf16.msra.mxu1 %v3718_v20  ;;  %v1231_v9 = vsel %vm1160_vm2, %v3927_v55, %v4317_v27  ;;  %v2414_v55 = vrot.slane %v4481_v16, 3 }
  0xac   :  { %3470 = vmatprep.subr.bf16.mxu1 %v3719_v1  ;;  %3428 = vmatmul.mubr.msk.bf16.gmra.mrb[16].mxu0 %vm233_vm1, %v2159_v56 }
  0xad   :  { %3431 = vmatprep.mubr.msk.bf16.mxu0 %vm233_vm1, %v2168_v2 }
  0xaf   :  { %3474 = vmatpush3.bf16.msra.mxu1 %v3719_v1 }
  0xb2   :  { %3292 = vmatmul.mubr.msk.bf16.gmra.mrb[8].mxu1 %vm233_vm1, %v4220_v33  ;;  %v4756_v33 = vrot.slane %v4235_v40, 1  ;;  %v2415_v40 = vsel %vm2392_vm5, %v2412_v52, %v2414_v55 }
  0xb3   :  { %3295 = vmatprep.mubr.msk.bf16.mxu1 %vm233_vm1, %v4223_v35  ;;  %v4757_v35 = vld [vmem:[#allocation2_spill] sm:$0xff] }
  0xb4   :  { %3432 = vmatmul.mubr.msk.bf16.gmra.mrb[28].mxu0 %vm233_vm1, %v2167_v57 }
  0xb5   :  { %3443 = vmatprep.mubr.msk.bf16.mxu0 %vm233_vm1, %v4247_v54 }
  0xba   :  { %3296 = vmatmul.mubr.msk.bf16.gmra.mrb[12].mxu1 %vm233_vm1, %v4250_v59 }
  0xbb   :  { %3299 = vmatprep.mubr.msk.bf16.mxu1 %vm233_vm1, %v4260_v4 }
  0xbc   :  { %3444 = vmatmul.mubr.msk.bf16.vlgmr.msra.gmra.mrb[0].mxu0 %vm233_vm1, %v4257_v3 }
  0xbd   :  { %3447 = vmatprep.mubr.msk.bf16.mxu0 %vm233_vm1, %v4263_v6 }
  0xc2   :  { %3300 = vmatmul.mubr.msk.bf16.gmra.mrb[16].mxu1 %vm233_vm1, %v4266_v10 }
  0xc3   :  { %3303 = vmatprep.mubr.msk.bf16.mxu1 %vm233_vm1, %v4290_v39 }
  0xc4   :  { %3448 = vmatmul.mubr.msk.bf16.gmra.mrb[4].mxu0 %vm233_vm1, %v4272_v14 }
  0xc5   :  { %3451 = vmatprep.mubr.msk.bf16.mxu0 %vm233_vm1, %v4293_v41 }
  0xca   :  { %3304 = vmatmul.mubr.msk.bf16.gmra.mrb[32].mxu1 %vm233_vm1, %v4756_v33 }
  0xcb   :  { %3327 = vmatprep.mubr.msk.bf16.mxu1 %vm233_vm1, %v1231_v9 }
  0xcc   :  { %3452 = vmatmul.mubr.msk.bf16.gmra.mrb[8].mxu0 %vm233_vm1, %v4296_v49 }
  0xcd   :  { %3455 = vmatprep.mubr.msk.bf16.mxu0 %vm233_vm1, %v4757_v35 }
  0xd2   :  { %3328 = vmatmul.mubr.msk.bf16.vlgmr.msra.gmra.mrb[12].mxu1 %vm233_vm1, %v4343_v30 }
  0xd3   :  { %3331 = vmatprep.mubr.msk.bf16.mxu1 %vm233_vm1, %v4351_v7 }
  0xd4   :  { %3456 = vmatmul.mubr.msk.bf16.gmra.mrb[12].mxu0 %vm233_vm1, %v4330_v5 }
  0xd5   :  { %3459 = vmatprep.mubr.msk.bf16.mxu0 %vm233_vm1, %v4338_v19 }
  0xda   :  { %3332 = vmatmul.mubr.msk.bf16.gmra.mrb[16].mxu1 %vm233_vm1, %v4364_v45 }
  0xdb   :  { %3335 = vmatprep.mubr.msk.bf16.mxu1 %vm233_vm1, %v4382_v23 }
  0xdc   :  { %3460 = vmatmul.mubr.msk.bf16.gmra.mrb[16].mxu0 %vm233_vm1, %v4356_v31 }
  0xdd   :  { %3463 = vmatprep.mubr.msk.bf16.mxu0 %vm233_vm1, %v2415_v40 }
  0xe2   :  { %3336 = vmatmul.mubr.msk.bf16.gmra.mrb[36].mxu1 %vm233_vm1, %v4369_v51 }
  0xe4   :  { %3464 = vmatmul.mubr.msk.bf16.gmra.mrb[32].mxu0 %vm233_vm1, %v2414_v55 }
 0x10d   :  { %v3209_v54 = vpop.f32.mrb[20].mxu1 }
 0x10e   :  { %v384_v59 = vpop.f32.mrb[21].mxu1 }
 0x10f   :  { %v3210_v3 = vpop.f32.mrb[22].mxu1 }
 0x110   :  { %v387_v4 = vpop.f32.mrb[23].mxu1 }
 0x127   :  { %v4573_v6 = vpop.f32.mrb[20].mxu0 }
 0x128   :  { %v4575_v10 = vpop.f32.mrb[21].mxu0 }
 0x129   :  { %v3370_v14 = vpop.f32.mrb[22].mxu0 }
 0x12a   :  { %v4577_v39 = vpop.f32.mrb[23].mxu0 }
 0x13d   :  { %v3241_v41 = vpop.f32.mrb[24].mxu1 }
 0x13e   :  { %v573_v49 = vadd.f32 %v3241_v41, %v3209_v54  ;;  %v564_v27 = vpop.f32.mrb[25].mxu1 }
 0x13f   :  { %v565_v63 = vadd.f32 %v564_v27, %v384_v59  ;;  %v3242_v5 = vpop.f32.mrb[26].mxu1 }
 0x140   :  { %v567_v19 = vpop.f32.mrb[27].mxu1 }
 0x141   :  { %v568_v30 = vadd.f32 %v567_v19, %v387_v4 }
 0x157   :  { %v4579_v52 = vpop.f32.mrb[24].mxu0 }
 0x158   :  { %v4581_v7 = vpop.f32.mrb[25].mxu0 }
 0x159   :  { %v3402_v31 = vpop.f32.mrb[26].mxu0 }
 0x15a   :  { %v4583_v45 = vpop.f32.mrb[27].mxu0 }
 0x16d   :  { %v3273_v51 = vpop.f32.mrb[28].mxu1 }
 0x16e   :  { %v824_v23 = vadd.f32 %v3273_v51, %v573_v49  ;;  %v788_v60 = vpop.f32.mrb[29].mxu1 }
 0x16f   :  { %v4585_v48 = vadd.f32 %v788_v60, %v565_v63  ;;  %v3274_v36 = vpop.f32.mrb[30].mxu1 }
 0x170   :  { %v791_v26 = vpop.f32.mrb[31].mxu1 }
 0x171   :  { %v4587_v38 = vadd.f32 %v791_v26, %v568_v30 }
 0x175   :  { %v3285_v15 = vpop.f32.mrb[0].mxu1 }
 0x176   :  { %v1031_v37 = vpop.f32.mrb[1].mxu1 }
 0x177   :  { %v3286_v21 = vpop.f32.mrb[2].mxu1 }
 0x178   :  { %v1034_v24 = vpop.f32.mrb[3].mxu1 }
 0x17d   :  { %v3289_v11 = vpop.f32.mrb[4].mxu1 }
 0x17e   :  { %v1047_v47 = vpop.f32.mrb[5].mxu1 }
 0x17f   :  { %v3290_v32 = vpop.f32.mrb[6].mxu1 }
 0x180   :  { %v1050_v8 = vpop.f32.mrb[7].mxu1 }
 0x185   :  { %v4589_v22 = vpop.f32.mrb[8].mxu1 }
 0x186   :  { %v4591_v16 = vpop.f32.mrb[9].mxu1 }
 0x187   :  { %v4593_v34 = vpop.f32.mrb[10].mxu1  ;;  %v4597_v61 = vpop.f32.mrb[28].mxu0 }
 0x188   :  { %v4595_v44 = vpop.f32.mrb[11].mxu1  ;;  %v4599_v12 = vpop.f32.mrb[29].mxu0 }
 0x189   :  { %v3434_v50 = vpop.f32.mrb[30].mxu0 }
 0x18a   :  { %v4601_v43 = vpop.f32.mrb[31].mxu0 }
 0x18f   :  { %v3445_v25 = vpop.f32.mrb[0].mxu0 }
 0x190   :  { %v3475_v13 = vadd.f32 %v3445_v25, %v3285_v15  ;;  %v2510_v62 = vpop.f32.mrb[1].mxu0 }
 0x191   :  { %v3476_v42 = vadd.f32 %v2510_v62, %v1031_v37  ;;  %v3446_v28 = vpop.f32.mrb[2].mxu0 }
 0x192   :  { %v2636_v58 = vadd.f32 %v3475_v13, %v4606_v17  ;;  %v3477_v0 = vadd.f32 %v3446_v28, %v3286_v21  ;;  %v2513_v53 = vpop.f32.mrb[3].mxu0 }
 0x193   :  { %v2634_v18 = vadd.f32 %v3476_v42, %v4606_v17  ;;  %v3478_v29 = vadd.f32 %v2513_v53, %v1034_v24 }
 0x194   :  { %v2659_v46 = vmax.f32 %v2636_v58, 0.0  ;;  %v2637_v20 = vadd.f32 %v3477_v0, %v4606_v17 }
 0x195   :  { %v2657_v57 = vmax.f32 %v2634_v18, 0.0  ;;  %v2635_v56 = vadd.f32 %v3478_v29, %v4606_v17 }
 0x196   :  { %v3014_v1 = vpack.c.bf16 %v2659_v46, %v2659_v46  ;;  %v2660_v2 = vmax.f32 %v2637_v20, 0.0 }
 0x197   :  { %v3012_v9 = vpack.c.bf16 %v2657_v57, %v2657_v57  ;;  %v2658_v33 = vmax.f32 %v2635_v56, 0.0  ;;  %v3449_v35 = vpop.f32.mrb[4].mxu0 }
 0x198   :  { %2776 = vst.msk [vmem:[%s4749_s3 + $0x8] sm:$0xf] %vm2773_vm7, %v3014_v1  ;;  %v3015_v55 = vpack.c.bf16 %v2660_v2, %v2660_v2  ;;  %v3479_v40 = vadd.f32 %v3449_v35, %v3289_v11  ;;  %v2526_v54 = vpop.f32.mrb[5].mxu0 }
 0x199   :  { %2774 = vst.msk [vmem:[%s4749_s3] sm:$0xf] %vm2773_vm7, %v3012_v9  ;;  %v3013_v59 = vpack.c.bf16 %v2658_v33, %v2658_v33  ;;  %v3480_v3 = vadd.f32 %v2526_v54, %v1047_v47  ;;  %v3450_v4 = vpop.f32.mrb[6].mxu0 }
 0x19a   :  { %2777 = vst.msk [vmem:[%s4749_s3 + $0xc] sm:$0xf] %vm2773_vm7, %v3015_v55  ;;  %v2640_v14 = vadd.f32 %v3479_v40, %v4606_v17  ;;  %v3481_v41 = vadd.f32 %v3450_v4, %v3290_v32  ;;  %v2529_v49 = vpop.f32.mrb[7].mxu0 }
 0x19b   :  { %2775 = vst.msk [vmem:[%s4749_s3 + $0x4] sm:$0xf] %vm2773_vm7, %v3013_v59  ;;  %v2638_v63 = vadd.f32 %v3480_v3, %v4606_v17  ;;  %v3482_v5 = vadd.f32 %v2529_v49, %v1050_v8 }
 0x19c   :  { %v2663_v31 = vmax.f32 %v2640_v14, 0.0  ;;  %v2641_v51 = vadd.f32 %v3481_v41, %v4606_v17 }
 0x19d   :  { %v3305_v27 = vpop.f32.mrb[32].mxu1  ;;  %v2661_v26 = vmax.f32 %v2638_v63, 0.0  ;;  %v2639_v15 = vadd.f32 %v3482_v5, %v4606_v17 }
 0x19e   :  { %v4630_v19 = vadd.f32 %v3305_v27, %v824_v23  ;;  %v1111_v30 = vpop.f32.mrb[33].mxu1  ;;  %v3018_v21 = vpack.c.bf16 %v2663_v31, %v2663_v31  ;;  %v2664_v24 = vmax.f32 %v2641_v51, 0.0 }
 0x19f   :  { %v4634_v60 = vadd.f32 %v1111_v30, %v4585_v48  ;;  %v3306_v36 = vpop.f32.mrb[34].mxu1  ;;  %v3016_v47 = vpack.c.bf16 %v2661_v26, %v2661_v26  ;;  %v2662_v23 = vmax.f32 %v2639_v15, 0.0  ;;  %v3453_v32 = vpop.f32.mrb[8].mxu0 }
 0x1a0   :  { %v1114_v37 = vpop.f32.mrb[35].mxu1  ;;  %2780 = vst.msk [vmem:[%s4749_s3 + $0x18] sm:$0xf] %vm2773_vm7, %v3018_v21  ;;  %v3019_v48 = vpack.c.bf16 %v2664_v24, %v2664_v24  ;;  %v3483_v8 = vadd.f32 %v3453_v32, %v4589_v22  ;;  %v2542_v50 = vpop.f32.mrb[9].mxu0 }
 0x1a1   :  { %v4638_v11 = vadd.f32 %v1114_v37, %v4587_v38  ;;  %2778 = vst.msk [vmem:[%s4749_s3 + $0x10] sm:$0xf] %vm2773_vm7, %v3016_v47  ;;  %v3017_v25 = vpack.c.bf16 %v2662_v23, %v2662_v23  ;;  %v3484_v38 = vadd.f32 %v2542_v50, %v4591_v16  ;;  %v3454_v13 = vpop.f32.mrb[10].mxu0 }
 0x1a2   :  { %2781 = vst.msk [vmem:[%s4749_s3 + $0x1c] sm:$0xf] %vm2773_vm7, %v3019_v48  ;;  %v2644_v62 = vadd.f32 %v3483_v8, %v4606_v17  ;;  %v3485_v42 = vadd.f32 %v3454_v13, %v4593_v34  ;;  %v2545_v22 = vpop.f32.mrb[11].mxu0 }
 0x1a3   :  { %2779 = vst.msk [vmem:[%s4749_s3 + $0x14] sm:$0xf] %vm2773_vm7, %v3017_v25  ;;  %v2642_v58 = vadd.f32 %v3484_v38, %v4606_v17  ;;  %v3486_v16 = vadd.f32 %v2545_v22, %v4595_v44 }
 0x1a4   :  { %v2667_v53 = vmax.f32 %v2644_v62, 0.0  ;;  %v2645_v18 = vadd.f32 %v3485_v42, %v4606_v17 }
 0x1a5   :  { %v3329_v28 = vpop.f32.mrb[12].mxu1  ;;  %v2665_v46 = vmax.f32 %v2642_v58, 0.0  ;;  %v2643_v20 = vadd.f32 %v3486_v16, %v4606_v17 }
 0x1a6   :  { %v1410_v0 = vpop.f32.mrb[13].mxu1  ;;  %v3022_v57 = vpack.c.bf16 %v2667_v53, %v2667_v53  ;;  %v2668_v56 = vmax.f32 %v2645_v18, 0.0 }
 0x1a7   :  { %v3330_v29 = vpop.f32.mrb[14].mxu1  ;;  %v3020_v1 = vpack.c.bf16 %v2665_v46, %v2665_v46  ;;  %v2666_v2 = vmax.f32 %v2643_v20, 0.0  ;;  %v3457_v9 = vpop.f32.mrb[12].mxu0 }
 0x1a8   :  { %v1413_v34 = vpop.f32.mrb[15].mxu1  ;;  %2784 = vst.msk [vmem:[%s4749_s3 + $0x28] sm:$0xf] %vm2773_vm7, %v3022_v57  ;;  %v3023_v44 = vpack.c.bf16 %v2668_v56, %v2668_v56  ;;  %v3487_v33 = vadd.f32 %v3457_v9, %v3329_v28  ;;  %v2558_v35 = vpop.f32.mrb[13].mxu0 }
 0x1a9   :  { %2782 = vst.msk [vmem:[%s4749_s3 + $0x20] sm:$0xf] %vm2773_vm7, %v3020_v1  ;;  %v3021_v55 = vpack.c.bf16 %v2666_v2, %v2666_v2  ;;  %v3488_v40 = vadd.f32 %v2558_v35, %v1410_v0  ;;  %v3458_v54 = vpop.f32.mrb[14].mxu0 }
 0x1aa   :  { %2785 = vst.msk [vmem:[%s4749_s3 + $0x2c] sm:$0xf] %vm2773_vm7, %v3023_v44  ;;  %v2648_v59 = vadd.f32 %v3487_v33, %v4606_v17  ;;  %v3489_v3 = vadd.f32 %v3458_v54, %v3330_v29  ;;  %v2561_v4 = vpop.f32.mrb[15].mxu0 }
 0x1ab   :  { %2783 = vst.msk [vmem:[%s4749_s3 + $0x24] sm:$0xf] %vm2773_vm7, %v3021_v55  ;;  %v2646_v41 = vadd.f32 %v3488_v40, %v4606_v17  ;;  %v3490_v49 = vadd.f32 %v2561_v4, %v1413_v34 }
 0x1ac   :  { %v2671_v63 = vmax.f32 %v2648_v59, 0.0  ;;  %v2649_v5 = vadd.f32 %v3489_v3, %v4606_v17 }
 0x1ad   :  { %v3333_v14 = vpop.f32.mrb[16].mxu1  ;;  %v2669_v31 = vmax.f32 %v2646_v41, 0.0  ;;  %v2647_v51 = vadd.f32 %v3490_v49, %v4606_v17 }
 0x1ae   :  { %v1426_v27 = vpop.f32.mrb[17].mxu1  ;;  %v3026_v26 = vpack.c.bf16 %v2671_v63, %v2671_v63  ;;  %v2672_v15 = vmax.f32 %v2649_v5, 0.0 }
 0x1af   :  { %v3334_v30 = vpop.f32.mrb[18].mxu1  ;;  %v3024_v37 = vpack.c.bf16 %v2669_v31, %v2669_v31  ;;  %v2670_v21 = vmax.f32 %v2647_v51, 0.0  ;;  %v3461_v24 = vpop.f32.mrb[16].mxu0 }
 0x1b0   :  { %v1429_v36 = vpop.f32.mrb[19].mxu1  ;;  %2788 = vst.msk [vmem:[%s4749_s3 + $0x38] sm:$0xf] %vm2773_vm7, %v3026_v26  ;;  %v3027_v47 = vpack.c.bf16 %v2672_v15, %v2672_v15  ;;  %v3491_v23 = vadd.f32 %v3461_v24, %v3333_v14  ;;  %v2574_v32 = vpop.f32.mrb[17].mxu0 }
 0x1b1   :  { %2786 = vst.msk [vmem:[%s4749_s3 + $0x30] sm:$0xf] %vm2773_vm7, %v3024_v37  ;;  %v3025_v48 = vpack.c.bf16 %v2670_v21, %v2670_v21  ;;  %v3492_v8 = vadd.f32 %v2574_v32, %v1426_v27  ;;  %v3462_v50 = vpop.f32.mrb[18].mxu0 }
 0x1b2   :  { %2789 = vst.msk [vmem:[%s4749_s3 + $0x3c] sm:$0xf] %vm2773_vm7, %v3027_v47  ;;  %v2652_v25 = vadd.f32 %v3491_v23, %v4606_v17  ;;  %v3493_v38 = vadd.f32 %v3462_v50, %v3334_v30  ;;  %v2577_v13 = vpop.f32.mrb[19].mxu0 }
 0x1b3   :  { %2787 = vst.msk [vmem:[%s4749_s3 + $0x34] sm:$0xf] %vm2773_vm7, %v3025_v48  ;;  %v2650_v42 = vadd.f32 %v3492_v8, %v4606_v17  ;;  %v3494_v22 = vadd.f32 %v2577_v13, %v1429_v36 }
 0x1b4   :  { %v2675_v16 = vmax.f32 %v2652_v25, 0.0  ;;  %v2653_v0 = vadd.f32 %v3493_v38, %v4606_v17 }
 0x1b5   :  { %v3337_v62 = vpop.f32.mrb[36].mxu1  ;;  %v2673_v29 = vmax.f32 %v2650_v42, 0.0  ;;  %v2651_v46 = vadd.f32 %v3494_v22, %v4606_v17 }
 0x1b6   :  { %v1478_v28 = vadd.f32 %v3337_v62, %v4630_v19  ;;  %v1442_v58 = vpop.f32.mrb[37].mxu1  ;;  %v3030_v57 = vpack.c.bf16 %v2675_v16, %v2675_v16  ;;  %v2676_v56 = vmax.f32 %v2653_v0, 0.0 }
 0x1b7   :  { %v1476_v53 = vadd.f32 %v1442_v58, %v4634_v60  ;;  %v3338_v18 = vpop.f32.mrb[38].mxu1  ;;  %v3028_v19 = vpack.c.bf16 %v2673_v29, %v2673_v29  ;;  %v2674_v9 = vmax.f32 %v2651_v46, 0.0  ;;  %v3465_v33 = vpop.f32.mrb[32].mxu0 }
 0x1b8   :  { %v1725_v20 = vadd.f32 %v4573_v6, %v1478_v28  ;;  %v1445_v34 = vpop.f32.mrb[39].mxu1  ;;  %2792 = vst.msk [vmem:[%s4749_s3 + $0x48] sm:$0xf] %vm2773_vm7, %v3030_v57  ;;  %v3031_v60 = vpack.c.bf16 %v2676_v56, %v2676_v56  ;;  %v2590_v55 = vpop.f32.mrb[33].mxu0 }
 0x1b9   :  { %v1723_v1 = vadd.f32 %v4575_v10, %v1476_v53  ;;  %v1477_v2 = vadd.f32 %v1445_v34, %v4638_v11  ;;  %2790 = vst.msk [vmem:[%s4749_s3 + $0x40] sm:$0xf] %vm2773_vm7, %v3028_v19  ;;  %v3029_v10 = vpack.c.bf16 %v2674_v9, %v2674_v9  ;;  %v3466_v11 = vpop.f32.mrb[34].mxu0 }
 0x1ba   :  { %v2048_v44 = vadd.f32 %v4579_v52, %v1725_v20  ;;  %2793 = vst.msk [vmem:[%s4749_s3 + $0x4c] sm:$0xf] %vm2773_vm7, %v3031_v60 }
 0x1bb   :  { %v1724_v6 = vadd.f32 %v4577_v39, %v1477_v2  ;;  %v2046_v35 = vadd.f32 %v4581_v7, %v1723_v1  ;;  %v2593_v7 = vpop.f32.mrb[35].mxu0  ;;  %2791 = vst.msk [vmem:[%s4749_s3 + $0x44] sm:$0xf] %vm2773_vm7, %v3029_v10 }
 0x1bc   :  { %v2379_v52 = vadd.f32 %v4597_v61, %v2048_v44 }
 0x1bd   :  { %v2377_v40 = vadd.f32 %v4599_v12, %v2046_v35  ;;  %v2047_v39 = vadd.f32 %v4583_v45, %v1724_v6 }
 0x1be   :  { %v2626_v54 = vadd.f32 %v3465_v33, %v2379_v52 }
 0x1bf   :  { %v2624_v59 = vadd.f32 %v2590_v55, %v2377_v40  ;;  %v2378_v61 = vadd.f32 %v4601_v43, %v2047_v39 }
 0x1c0   :  { %v2656_v3 = vadd.f32 %v4606_v17, %v2626_v54 }
 0x1c1   :  { %v2654_v4 = vadd.f32 %v4606_v17, %v2624_v59  ;;  %v2625_v14 = vadd.f32 %v2593_v7, %v2378_v61 }
 0x1c2   :  { %v2679_v41 = vmax.f32 %v2656_v3, 0.0 }
 0x1c3   :  { %v2677_v12 = vmax.f32 %v2654_v4, 0.0  ;;  %v2655_v45 = vadd.f32 %v4606_v17, %v2625_v14 }
 0x1c4   :  { %v3034_v49 = vpack.c.bf16 %v2679_v41, %v2679_v41 }
 0x1c5   :  { %v3032_v27 = vpack.c.bf16 %v2677_v12, %v2677_v12  ;;  %v2678_v63 = vmax.f32 %v2655_v45, 0.0 }
 0x1c6   :  { %2797 = vst.msk [vmem:[%s4749_s3 + $0x58] sm:$0x1] %vm2796_vm8, %v3034_v49 }
 0x1c7   :  { %2794 = vst.msk [vmem:[%s4749_s3 + $0x50] sm:$0xf] %vm2773_vm7, %v3032_v27  ;;  %v3033_v43 = vpack.c.bf16 %v2678_v63, %v2678_v63 }
 0x1c9   :  { %2795 = vst.msk [vmem:[%s4749_s3 + $0x54] sm:$0xf] %vm2773_vm7, %v3033_v43 }

// kernel: _lambda_.10
= control target key start
LH: loop header
LB: loop body
LE: loop exit
PB: predicated region body
PF: predicated region fallthrough
CT: control target
= control target key end

     0   :  { %vm116_vm0 = vsmask.f32 7424  ;;  %vm236_vm1 = vcmask 523264   ;;  %vm1163_vm2 = vsmask.f32 6400  ;;  %vm1494_vm3 = vcmask 1045504   ;;  %s4916_s1 = inlined_call_operand.vmem [shape: bf16[576,64], index: 1, kind: input, shape index: {}]   ;;  %s4917_s0 = inlined_call_operand.vmem [shape: bf16[1,200,64], index: 0, kind: input, shape index: {}]   ;;  %s4918_s3 = inlined_call_operand.vmem [shape: bf16[178,64], index: 3, kind: input, shape index: {}]   ;;  %s4919_s2 = inlined_call_operand.vmem [shape: f32[1,64], index: 2, kind: input, shape index: {}]   ;;  %s4920_s4 = inlined_call_operand.vmem [shape: bf16[178,64], index: 4, kind: output, shape index: {}]  }
   0x1   :  { %v3761_v0 = vld [vmem:[%s4916_s1 + $0x20] sm:$0xff]   ;;  %v3763_v2 = vld [vmem:[%s4916_s1 + $0x28] sm:$0xff]   ;;  %v3765_v4 = vld [vmem:[%s4916_s1 + $0x30] sm:$0xff]   ;;  %vm593_vm4 = vcmask 1046528   ;;  %vm2395_vm5 = vcmask 1044480   ;;  %vm2845_vm7 = vcmask 519168  }
   0x2   :  { %v3762_v1 = vld [vmem:[%s4916_s1 + $0x80] sm:$0xff]   ;;  %3305 = vmatprep.subr.bf16.mxu1 %v3761_v0  ;;  %v3764_v3 = vld [vmem:[%s4916_s1 + $0x88] sm:$0xff]   ;;  %v3766_v5 = vld [vmem:[%s4916_s1 + $0x90] sm:$0xff]   ;;  %vm2064_vm6 = vsmask.f32 5376  ;;  %vm2868_vm8 = vcmask 516096  }
   0x3   :  { %3433 = vmatprep.subr.bf16.mxu0 %v3762_v1  ;;  %3306 = vmatpush3.bf16.msra.mxu1 %v3761_v0  ;;  %v3767_v6 = vld [vmem:[%s4916_s1 + $0x38] sm:$0xff]   ;;  %v18_v8 = vld [vmem:[%s4917_s0] sm:$0xf]  ;;  %v3901_v9 = vld [vmem:[%s4917_s0 + $0x4] sm:$0xf] }
   0x4   :  { %3434 = vmatpush3.bf16.msra.mxu0 %v3762_v1  ;;  %3307 = vmatprep.subr.bf16.mxu1 %v3763_v2  ;;  %v3768_v7 = vld [vmem:[%s4916_s1 + $0x98] sm:$0xff]   ;;  %v3904_v10 = vcombine.low %v18_v8, %v3901_v9  ;;  %v3909_v11 = vld [vmem:[%s4917_s0 + $0x8] sm:$0xff]   ;;  %v828_v12 = vld [vmem:[%s4917_s0 + $0x4] sm:$0xe] }
   0x5   :  { %3435 = vmatprep.subr.bf16.mxu0 %v3764_v3  ;;  %v3917_v13 = vld [vmem:[%s4917_s0 + $0x8] sm:$0xf]  ;;  %v125_v16 = vshll.u32 %v3909_v11, 16  ;;  %v129_v17 = vshrl.u32 %v3909_v11, 16  ;;  %v3926_v18 = vld [vmem:[%s4917_s0 + $0xc] sm:$0xff]   ;;  %v3774_v28 = vld [vmem:[%s4916_s1] sm:$0xff]  }
   0x6   :  { %v118_v14 = vshrl.u32 %v3904_v10, 16  ;;  %v120_v15 = vshll.u32 %v3904_v10, 16  ;;  %v3931_v19 = vld [vmem:[%s4917_s0 + $0x10] sm:$0xff]   ;;  %v3934_v20 = vcombine.low %v828_v12, %v3917_v13  ;;  %v1173_v23 = vshrl.u32 %v3926_v18, 16  ;;  %v3952_v34 = vld [vmem:[%s4917_s0 + $0x18] sm:$0xff]   ;;  %v3970_v50 = vld [vmem:[%s4917_s0 + $0x20] sm:$0xff]  }
   0x7   :  { %3308 = vmatpush3.bf16.msra.mxu1 %v3763_v2  ;;  %v127_v22 = vrot.slane %v125_v16, 1  ;;  %v1176_v24 = vshll.u32 %v3926_v18, 16  ;;  %v133_v27 = vshll.u32 %v3931_v19, 16  ;;  %v3947_v33 = vld [vmem:[%s4917_s0 + $0x14] sm:$0xff]   ;;  %v137_v38 = vshrl.u32 %v3931_v19, 16  ;;  %v3964_v47 = vld [vmem:[%s4917_s0 + $0x1c] sm:$0xff]  }
   0x8   :  { %3436 = vmatpush3.bf16.msra.mxu0 %v3764_v3  ;;  %3309 = vmatprep.subr.bf16.mxu1 %v3765_v4  ;;  %v122_v21 = vrot.slane %v120_v15, 1  ;;  %v1165_v25 = vshrl.u32 %v3934_v20, 16  ;;  %v1168_v26 = vshll.u32 %v3934_v20, 16  ;;  %v1175_v31 = vrot.slane %v1173_v23, 1  ;;  %v3979_v56 = vld [vmem:[%s4917_s0 + $0x24] sm:$0xff]  }
   0x9   :  { %3437 = vmatprep.subr.bf16.mxu0 %v3766_v5  ;;  %v131_v30 = vor.u32 %v129_v17, %v127_v22  ;;  %v1178_v32 = vrot.slane %v1176_v24, 2  ;;  %v135_v37 = vrot.slane %v133_v27, 1  ;;  %v1182_v41 = vshrl.u32 %v3947_v33, 16  ;;  %v3780_v59 = vld [vmem:[%s4916_s1 + $0xa0] sm:$0xff]   ;;  %v4004_v16 = vld [vmem:[%s4917_s0 + $0x28] sm:$0xff]   ;;  %v4024_v27 = vld [vmem:[%s4917_s0 + $0x34] sm:$0xff]  }
   0xa   :  { %v123_v29 = vor.u32 %v122_v21, %v118_v14  ;;  %v1167_v35 = vrot.slane %v1165_v25, 1  ;;  %v1170_v36 = vrot.slane %v1168_v26, 2  ;;  %v1185_v42 = vshll.u32 %v3947_v33, 16  ;;  %v4011_v21 = vld [vmem:[%s4917_s0 + $0x2c] sm:$0xff]  }
   0xb   :  { %3310 = vmatpush3.bf16.msra.mxu1 %v3765_v4  ;;  %v1179_v40 = vor.u32 %v1178_v32, %v1175_v31  ;;  %v136_v44 = vsel %vm116_vm0, %v131_v30, %v135_v37  ;;  %v139_v45 = vor.u32 %v137_v38, %v135_v37  ;;  %v141_v46 = vshll.u32 %v3952_v34, 16  ;;  %v3781_v4 = vld [vmem:[%s4916_s1 + $0x8] sm:$0xff]   ;;  %v4018_v25 = vld [vmem:[%s4917_s0 + $0x30] sm:$0xff]  }
   0xc   :  { %3438 = vmatpush3.bf16.msra.mxu0 %v3766_v5  ;;  %3311 = vmatprep.subr.bf16.mxu1 %v3767_v6  ;;  %v128_v39 = vsel %vm116_vm0, %v123_v29, %v127_v22  ;;  %v1171_v43 = vor.u32 %v1170_v36, %v1167_v35  ;;  %v1184_v48 = vrot.slane %v1182_v41, 1  ;;  %v1187_v49 = vrot.slane %v1185_v42, 2 }
   0xd   :  { %3439 = vmatprep.subr.bf16.mxu0 %v3768_v7  ;;  %3313 = vmatprep.mubr.msk.bf16.mxu1 %vm236_vm1, %v128_v39  ;;  %v145_v51 = vshrl.u32 %v3952_v34, 16  ;;  %v143_v53 = vrot.slane %v141_v46, 1  ;;  %v1191_v54 = vshrl.u32 %v3964_v47, 16  ;;  %v1194_v55 = vshll.u32 %v3964_v47, 16  ;;  %v3787_v39 = vld [vmem:[%s4916_s1 + $0xb0] sm:$0xff]  }
   0xe   :  { %v1180_v52 = vsel %vm1163_vm2, %v1171_v43, %v1179_v40  ;;  %v1188_v57 = vor.u32 %v1187_v49, %v1184_v48  ;;  %v149_v58 = vshll.u32 %v3970_v50, 16  ;;  %v1200_v2 = vshrl.u32 %v3979_v56, 16  ;;  %v4044_v48 = vld [vmem:[%s4917_s0 + $0x38] sm:$0xff]  }
   0xf   :  { %3312 = vmatpush3.bf16.msra.mxu1 %v3767_v6  ;;  %3441 = vmatprep.mubr.msk.bf16.mxu0 %vm236_vm1, %v1180_v52  ;;  %v144_v60 = vsel %vm116_vm0, %v139_v45, %v143_v53  ;;  %v1193_v61 = vrot.slane %v1191_v54, 1  ;;  %v1196_v62 = vrot.slane %v1194_v55, 2  ;;  %v147_v63 = vor.u32 %v145_v51, %v143_v53  ;;  %v3782_v6 = vld [vmem:[%s4916_s1 + $0xa8] sm:$0xff]   ;;  %v4050_v51 = vld [vmem:[%s4917_s0 + $0x40] sm:$0xff]  }
  0x10   :  { %3440 = vmatpush3.bf16.msra.mxu0 %v3768_v7  ;;  %3337 = vmatprep.subr.bf16.mxu1 %v3774_v28  ;;  %v1189_v0 = vsel %vm1163_vm2, %v1179_v40, %v1188_v57  ;;  %v151_v1 = vrot.slane %v149_v58, 1  ;;  %v1203_v3 = vshll.u32 %v3979_v56, 16  ;;  %v153_v7 = vshrl.u32 %v3970_v50, 16  ;;  %v3788_v40 = vld [vmem:[%s4916_s1 + $0xb8] sm:$0xff]   ;;  %v1482_v53 = vld [vmem:[%s4917_s0 + $0x4] sm:$0xc] }
  0x11   :  { %3465 = vmatprep.subr.bf16.mxu0 %v3780_v59  ;;  %v1197_v5 = vor.u32 %v1196_v62, %v1193_v61  ;;  %v1202_v12 = vrot.slane %v1200_v2, 1  ;;  %v1496_v22 = vrot.slane %v3926_v18, 2  ;;  %v157_v24 = vshll.u32 %v4004_v16, 16 }
  0x12   :  { %3314 = vmatmul.mubr.msk.bf16.vlgmr.msra.gmra.mrb[0].mxu1 %vm236_vm1, %v136_v44  ;;  %v152_v8 = vsel %vm116_vm0, %v147_v63, %v151_v1  ;;  %v1205_v14 = vrot.slane %v1203_v3, 2  ;;  %v155_v23 = vor.u32 %v153_v7, %v151_v1  ;;  %v161_v26 = vshrl.u32 %v4004_v16, 16  ;;  %v4073_v1 = vld [vmem:[%s4917_s0 + $0x48] sm:$0xff]  }
  0x13   :  { %3338 = vmatpush3.bf16.msra.mxu1 %v3774_v28  ;;  %3317 = vmatprep.mubr.msk.bf16.mxu1 %vm236_vm1, %v144_v60  ;;  %v1198_v15 = vsel %vm1163_vm2, %v1188_v57, %v1197_v5  ;;  %v1209_v29 = vshrl.u32 %v4011_v21, 16  ;;  %v1212_v30 = vshll.u32 %v4011_v21, 16  ;;  %v159_v31 = vrot.slane %v157_v24, 1 }
  0x14   :  { %3442 = vmatmul.mubr.msk.bf16.vlgmr.msra.gmra.mrb[0].mxu0 %vm236_vm1, %v1189_v0  ;;  %3339 = vmatprep.subr.bf16.mxu1 %v3781_v4  ;;  %v1206_v17 = vor.u32 %v1205_v14, %v1202_v12  ;;  %v165_v32 = vshll.u32 %v4018_v25, 16  ;;  %v1218_v35 = vshrl.u32 %v4024_v27, 16  ;;  %v1221_v36 = vshll.u32 %v4024_v27, 16 }
  0x15   :  { %3466 = vmatpush3.bf16.msra.mxu0 %v3780_v59  ;;  %3445 = vmatprep.mubr.msk.bf16.mxu0 %vm236_vm1, %v1198_v15  ;;  %v1211_v37 = vrot.slane %v1209_v29, 1  ;;  %v1214_v38 = vrot.slane %v1212_v30, 2  ;;  %v160_v41 = vsel %vm116_vm0, %v155_v23, %v159_v31  ;;  %v163_v42 = vor.u32 %v161_v26, %v159_v31  ;;  %v3792_v59 = vld [vmem:[%s4916_s1 + $0x10] sm:$0xff]  }
  0x16   :  { %3467 = vmatprep.subr.bf16.mxu0 %v3782_v6  ;;  %v1207_v28 = vsel %vm1163_vm2, %v1197_v5, %v1206_v17  ;;  %v167_v43 = vrot.slane %v165_v32, 1  ;;  %v1220_v44 = vrot.slane %v1218_v35, 1  ;;  %v1223_v46 = vrot.slane %v1221_v36, 2  ;;  %v4104_v32 = vld [vmem:[%s4917_s0 + $0x58] ss:$0 sps:$4 sm:$0x33]  }
  0x17   :  { %3340 = vmatpush3.bf16.msra.mxu1 %v3781_v4  ;;  %v1215_v45 = vor.u32 %v1214_v38, %v1211_v37  ;;  %v169_v49 = vshrl.u32 %v4018_v25, 16  ;;  %v173_v58 = vshll.u32 %v4044_v48, 16  ;;  %v2981_v60 = vcombine.low %v1482_v53, %v3917_v13  ;;  %v4079_v4 = vld [vmem:[%s4917_s0 + $0x50] sm:$0xff]   ;;  %v3807_v53 = vld [vmem:[%s4916_s1 + $0xd8] sm:$0xff]  }
  0x18   :  { %v168_v52 = vsel %vm116_vm0, %v163_v42, %v167_v43  ;;  %v4058_v55 = vor.u32 %v1223_v46, %v1220_v44  ;;  %v177_v61 = vshrl.u32 %v4044_v48, 16  ;;  %v181_v62 = vshll.u32 %v4050_v51, 16  ;;  %3341 = vmatprep.subr.bf16.mxu1 %v3792_v59  ;;  %v3804_v44 = vld [vmem:[%s4916_s1 + $0xd0] sm:$0xff]  }
  0x19   :  { %3468 = vmatpush3.bf16.msra.mxu0 %v3782_v6  ;;  %v1216_v54 = vsel %vm1163_vm2, %v1206_v17, %v1215_v45  ;;  %v171_v57 = vor.u32 %v169_v49, %v167_v43  ;;  %v175_v0 = vrot.slane %v173_v58, 1  ;;  %v185_v2 = vshrl.u32 %v4050_v51, 16  ;;  %v4136_v49 = vld [vmem:[%s4917_s0 + $0x3c] sm:$0xff]  }
  0x1a   :  { %3318 = vmatmul.mubr.msk.bf16.gmra.mrb[4].mxu1 %vm236_vm1, %v152_v8  ;;  %3469 = vmatprep.subr.bf16.mxu0 %v3787_v39  ;;  %v1225_v63 = vsel %vm1163_vm2, %v1215_v45, %v4058_v55  ;;  %v1495_v3 = vrot.slane %v2981_v60, 2  ;;  %v183_v13 = vrot.slane %v181_v62, 1  ;;  %v189_v7 = vshll.u32 %v4073_v1, 16  ;;  %v3795_v8 = vld [vmem:[%s4916_s1 + $0xc0] sm:$0xff]  }
  0x1b   :  { %3321 = vmatprep.mubr.msk.bf16.mxu1 %vm236_vm1, %v160_v41  ;;  %3342 = vmatpush3.bf16.msra.mxu1 %v3792_v59  ;;  %v176_v5 = vsel %vm116_vm0, %v171_v57, %v175_v0  ;;  %v179_v6 = vor.u32 %v177_v61, %v175_v0  ;;  %v193_v15 = vshrl.u32 %v4073_v1, 16  ;;  %v197_v17 = vshll.u32 %v4079_v4, 16  ;;  %v3798_v41 = vld [vmem:[%s4916_s1 + $0xc8] sm:$0xff]  }
  0x1c   :  { %3446 = vmatmul.mubr.msk.bf16.gmra.mrb[4].mxu0 %vm236_vm1, %v1207_v28  ;;  %v1497_v12 = vsel %vm1494_vm3, %v1495_v3, %v1496_v22  ;;  %v187_v14 = vor.u32 %v185_v2, %v183_v13  ;;  %v1498_v24 = vrot.slane %v3947_v33, 2  ;;  %v191_v26 = vrot.slane %v189_v7, 1  ;;  %v3796_v28 = vld [vmem:[%s4916_s1 + $0x18] sm:$0xff]   ;;  %v4166_v2 = vld [vmem:[%s4917_s0 + $0x44] sm:$0xff]  }
  0x1d   :  { %3470 = vmatpush3.bf16.msra.mxu0 %v3787_v39  ;;  %3449 = vmatprep.mubr.msk.bf16.mxu0 %vm236_vm1, %v1216_v54  ;;  %v184_v23 = vsel %vm116_vm0, %v179_v6, %v183_v13  ;;  %v201_v29 = vshrl.u32 %v4079_v4, 16  ;;  %v1500_v30 = vrot.slane %v3964_v47, 2  ;;  %v199_v31 = vrot.slane %v197_v17, 1  ;;  %v3800_v47 = vld [vmem:[%s4916_s1 + $0x40] sm:$0xff]   ;;  %v3805_v7 = vld [vmem:[%s4916_s1 + $0x48] sm:$0xff]  }
  0x1e   :  { %3471 = vmatprep.subr.bf16.mxu0 %v3788_v40  ;;  %v192_v33 = vsel %vm116_vm0, %v187_v14, %v191_v26  ;;  %3343 = vmatprep.subr.bf16.mxu1 %v3796_v28  ;;  %v195_v35 = vor.u32 %v193_v15, %v191_v26  ;;  %v205_v36 = vshll.u32 %v4104_v32, 16  ;;  %v1499_v37 = vsel %vm1494_vm3, %v1496_v22, %v1498_v24 }
  0x1f   :  { %3344 = vmatpush3.bf16.msra.mxu1 %v3796_v28  ;;  %v203_v38 = vor.u32 %v201_v29, %v199_v31  ;;  %v1501_v39 = vsel %vm1494_vm3, %v1498_v24, %v1500_v30  ;;  %v1502_v43 = vrot.slane %v3979_v56, 2  ;;  %v1504_v22 = vrot.slane %v4011_v21, 2  ;;  %v4203_v24 = vld [vmem:[%s4917_s0 + $0x5c] ss:$0 sps:$4 sm:$0x77]  }
  0x20   :  { %3369 = vmatprep.subr.bf16.mxu1 %v3800_v47  ;;  %v200_v42 = vsel %vm116_vm0, %v195_v35, %v199_v31  ;;  %v209_v45 = vshrl.u32 %v4104_v32, 16  ;;  %v595_v54 = vrot.slane %v3909_v11, 1  ;;  %v597_v58 = vrot.slane %v3931_v19, 1  ;;  %v3815_v35 = vld [vmem:[%s4916_s1 + $0x58] sm:$0xff]  }
  0x21   :  { %3472 = vmatpush3.bf16.msra.mxu0 %v3788_v40  ;;  %v207_v40 = vrot.slane %v205_v36, 1  ;;  %v1503_v46 = vsel %vm1494_vm3, %v1500_v30, %v1502_v43  ;;  %v1506_v59 = vrot.slane %v4024_v27, 2  ;;  %v599_v60 = vrot.slane %v3952_v34, 1 }
  0x22   :  { %3322 = vmatmul.mubr.msk.bf16.gmra.mrb[8].mxu1 %vm236_vm1, %v168_v52  ;;  %3497 = vmatprep.subr.bf16.mxu0 %v3795_v8  ;;  %v1505_v52 = vsel %vm1494_vm3, %v1502_v43, %v1504_v22  ;;  %v1508_v61 = vrot.slane %v4136_v49, 2  ;;  %v4150_v62 = vsel %vm593_vm4, %v595_v54, %v597_v58  ;;  %v601_v6 = vrot.slane %v3970_v50, 1 }
  0x23   :  { %3325 = vmatprep.mubr.msk.bf16.mxu1 %vm236_vm1, %v176_v5  ;;  %v208_v18 = vsel %vm116_vm0, %v203_v38, %v207_v40  ;;  %v211_v57 = vor.u32 %v209_v45, %v207_v40  ;;  %v4159_v0 = vsel %vm593_vm4, %v597_v58, %v599_v60  ;;  %v1507_v3 = vsel %vm1494_vm3, %v1504_v22, %v1506_v59  ;;  %v4173_v5 = vld [vmem:[%s4917_s0 + $0x4c] sm:$0xff]   ;;  %v4286_v58 = vld [vmem:[%s4917_s0 + $0x18] sm:$0xff]  }
  0x24   :  { %3450 = vmatmul.mubr.msk.bf16.gmra.mrb[8].mxu0 %vm236_vm1, %v1225_v63  ;;  %v4156_v63 = vld [vmem:[%s4916_s1 + $0xe0] sm:$0xff]   ;;  %v1509_v13 = vsel %vm1494_vm3, %v1506_v59, %v1508_v61  ;;  %v1512_v15 = vrot.slane %v4173_v5, 2  ;;  %v605_v30 = vrot.slane %v4018_v25, 1  ;;  %v607_v31 = vrot.slane %v4044_v48, 1 }
  0x25   :  { %3473 = vmatprep.mubr.msk.bf16.mxu0 %vm236_vm1, %v1497_v12  ;;  %v4186_v12 = vsel %vm593_vm4, %v599_v60, %v601_v6  ;;  %v609_v40 = vrot.slane %v4050_v51, 1  ;;  %v611_v43 = vrot.slane %v4073_v1, 1  ;;  %v613_v45 = vrot.slane %v4079_v4, 1  ;;  %v4292_v60 = vld [vmem:[%s4917_s0 + $0x20] sm:$0xff]  }
  0x26   :  { %v4233_v38 = vsel %vm593_vm4, %v605_v30, %v607_v31 }
  0x2a   :  { %3326 = vmatmul.mubr.msk.bf16.gmra.mrb[12].mxu1 %vm236_vm1, %v184_v23  ;;  %v4198_v23 = vld [vmem:[%s4917_s0 + $0x54] sm:$0xff]  }
  0x2b   :  { %3329 = vmatprep.mubr.msk.bf16.mxu1 %vm236_vm1, %v192_v33  ;;  %v1514_v33 = vrot.slane %v4198_v23, 2 }
  0x2c   :  { %3474 = vmatmul.mubr.msk.bf16.vlgmr.msra.gmra.mrb[0].mxu0 %vm236_vm1, %v1499_v37  ;;  %v1729_v37 = vld [vmem:[%s4917_s0 + $0x8] sm:$0xc] }
  0x2d   :  { %3477 = vmatprep.mubr.msk.bf16.mxu0 %vm236_vm1, %v1501_v39  ;;  %3498 = vmatpush3.bf16.msra.mxu0 %v3795_v8  ;;  %v581_v8 = vld [vmem:[%s4917_s0] sm:$0xe]  ;;  %v1730_v39 = vld [vmem:[%s4917_s0 + $0xc] sm:$0xf] }
  0x2e   :  { %3499 = vmatprep.subr.bf16.mxu0 %v3798_v41  ;;  %v2919_v14 = vcombine.low %v581_v8, %v3901_v9  ;;  %v603_v9 = vrot.slane %v4004_v16, 1  ;;  %v4254_v22 = vcombine.low %v1729_v37, %v1730_v39  ;;  %v4921_v8 = vrot.slane %v3979_v56, 1 }
  0x30   :  { %v594_v17 = vrot.slane %v2919_v14, 1  ;;  %v4215_v29 = vsel %vm593_vm4, %v601_v6, %v603_v9  ;;  %v4226_v36 = vsel %vm593_vm4, %v603_v9, %v605_v30  ;;  %v926_v14 = vrot.slane %v4011_v21, 1 }
  0x31   :  { %3500 = vmatpush3.bf16.msra.mxu0 %v3798_v41  ;;  %v1515_v41 = vsel %vm1494_vm3, %v1512_v15, %v1514_v33  ;;  %v930_v21 = vrot.slane %v4136_v49, 1 }
  0x32   :  { %3330 = vmatmul.mubr.msk.bf16.gmra.mrb[16].mxu1 %vm236_vm1, %v200_v42  ;;  %3501 = vmatprep.subr.bf16.mxu0 %v3804_v44  ;;  %v4247_v42 = vld [vmem:[%s4916_s1 + $0x60] sm:$0xff]   ;;  %v4333_v9 = vsel %vm593_vm4, %v4921_v8, %v926_v14 }
  0x33   :  { %3333 = vmatprep.mubr.msk.bf16.mxu1 %vm236_vm1, %v208_v18 }
  0x34   :  { %3478 = vmatmul.mubr.msk.bf16.gmra.mrb[4].mxu0 %vm236_vm1, %v1503_v46  ;;  %v4269_v46 = vsel %vm593_vm4, %v611_v43, %v613_v45 }
  0x35   :  { %3481 = vmatprep.mubr.msk.bf16.mxu0 %vm236_vm1, %v1505_v52  ;;  %3502 = vmatpush3.bf16.msra.mxu0 %v3804_v44  ;;  %v4262_v44 = vsel %vm593_vm4, %v609_v40, %v611_v43  ;;  %v4923_v52 = vrot.slane %v4104_v32, 1  ;;  %v934_v43 = vrot.slane %v4173_v5, 1 }
  0x36   :  { %3503 = vmatprep.subr.bf16.mxu0 %v3807_v53 }
  0x39   :  { %3504 = vmatpush3.bf16.msra.mxu0 %v3807_v53  ;;  %v1818_v53 = vrot.slane %v4254_v22, 2 }
  0x3a   :  { %3334 = vmatmul.mubr.msk.bf16.gmra.mrb[20].mxu1 %vm236_vm1, %v211_v57  ;;  %3529 = vmatprep.subr.bf16.mxu0 %v4156_v63  ;;  %v4279_v57 = vsel %vm593_vm4, %v613_v45, %v4923_v52  ;;  %v936_v45 = vrot.slane %v4198_v23, 1  ;;  %v1248_v52 = vshll.u32 %v4173_v5, 16 }
  0x3b   :  { %3345 = vmatprep.mubr.msk.bf16.mxu1 %vm236_vm1, %v3904_v10  ;;  %v1510_v10 = vrot.slane %v4166_v2, 2 }
  0x3c   :  { %3482 = vmatmul.mubr.msk.bf16.gmra.mrb[8].mxu0 %vm236_vm1, %v1507_v3  ;;  %v1823_v3 = vrot.slane %v4292_v60, 2 }
  0x3d   :  { %3485 = vmatprep.mubr.msk.bf16.mxu0 %vm236_vm1, %v1509_v13  ;;  %v1511_v26 = vsel %vm1494_vm3, %v1508_v61, %v1510_v10  ;;  %v1513_v28 = vsel %vm1494_vm3, %v1510_v10, %v1512_v15  ;;  %v4305_v61 = vld [vmem:[%s4917_s0 + $0x30] sm:$0xff]   ;;  %v4311_v13 = vld [vmem:[%s4917_s0 + $0x38] sm:$0xff]   ;;  %v2383_v15 = vld [vmem:[%s4917_s0 + $0x8] sm:$0x8] }
  0x3e   :  { %v3043_v30 = vcombine.low %v2383_v15, %v1730_v39  ;;  %v932_v39 = vrot.slane %v4166_v2, 1 }
  0x42   :  { %3346 = vmatmul.mubr.msk.bf16.vlgmr.msra.gmra.mrb[0].mxu1 %vm236_vm1, %v3909_v11  ;;  %v3810_v11 = vld [vmem:[%s4916_s1 + $0x50] sm:$0xff]  }
  0x43   :  { %3370 = vmatpush3.bf16.msra.mxu1 %v3800_v47  ;;  %3349 = vmatprep.mubr.msk.bf16.mxu1 %vm236_vm1, %v3931_v19  ;;  %v4211_v19 = vsel %vm593_vm4, %v594_v17, %v595_v54  ;;  %v1516_v47 = vrot.slane %v4203_v24, 2 }
  0x44   :  { %3371 = vmatprep.subr.bf16.mxu1 %v3805_v7  ;;  %3486 = vmatmul.mubr.msk.bf16.gmra.mrb[12].mxu0 %vm236_vm1, %v1511_v26  ;;  %v928_v26 = vrot.slane %v4024_v27, 1  ;;  %v3826_v27 = vld [vmem:[%s4916_s1 + $0xf0] sm:$0xff]  }
  0x45   :  { %3489 = vmatprep.mubr.msk.bf16.mxu0 %vm236_vm1, %v1513_v28  ;;  %v1517_v18 = vsel %vm1494_vm3, %v1514_v33, %v1516_v47  ;;  %v4342_v28 = vld [vmem:[%s4917_s0 + $0x40] sm:$0xff]  }
  0x46   :  { %v4351_v33 = vsel %vm593_vm4, %v926_v14, %v928_v26 }
  0x47   :  { %3372 = vmatpush3.bf16.msra.mxu1 %v3805_v7  ;;  %v1827_v7 = vrot.slane %v4305_v61, 2 }
  0x48   :  { %3373 = vmatprep.subr.bf16.mxu1 %v3810_v11 }
  0x4a   :  { %3350 = vmatmul.mubr.msk.bf16.gmra.mrb[4].mxu1 %vm236_vm1, %v3952_v34  ;;  %v4250_v34 = vsel %vm593_vm4, %v607_v31, %v609_v40  ;;  %v4366_v40 = vld [vmem:[%s4917_s0 + $0x5c] ss:$0 sps:$4 sm:$0x33]  }
  0x4b   :  { %3353 = vmatprep.mubr.msk.bf16.mxu1 %vm236_vm1, %v3970_v50  ;;  %3374 = vmatpush3.bf16.msra.mxu1 %v3810_v11  ;;  %v4259_v50 = vld [vmem:[%s4917_s0 + $0x10] sm:$0xff]   ;;  %v4922_v15 = vrot.slane %v4366_v40, 1 }
  0x4c   :  { %3375 = vmatprep.subr.bf16.mxu1 %v3815_v35  ;;  %3490 = vmatmul.mubr.msk.bf16.gmra.mrb[16].mxu0 %vm236_vm1, %v1515_v41  ;;  %v1819_v54 = vrot.slane %v4259_v50, 2  ;;  %v2397_v37 = vrot.slane %v4259_v50, 3  ;;  %v2399_v41 = vrot.slane %v4286_v58, 3 }
  0x4d   :  { %3493 = vmatprep.mubr.msk.bf16.mxu0 %vm236_vm1, %v1517_v18  ;;  %v2401_v18 = vrot.slane %v4292_v60, 3 }
  0x4e   :  { %v1820_v59 = vsel %vm1494_vm3, %v1818_v53, %v1819_v54  ;;  %v1831_v53 = vrot.slane %v4342_v28, 2 }
  0x4f   :  { %3376 = vmatpush3.bf16.msra.mxu1 %v3815_v35  ;;  %v4354_v35 = vsel %vm593_vm4, %v928_v26, %v930_v21  ;;  %v1227_v26 = vshrl.u32 %v4136_v49, 16 }
  0x50   :  { %3401 = vmatprep.subr.bf16.mxu1 %v4247_v42 }
  0x52   :  { %3354 = vmatmul.mubr.msk.bf16.gmra.mrb[8].mxu1 %vm236_vm1, %v4004_v16  ;;  %v4298_v16 = vld [vmem:[%s4917_s0 + $0x28] sm:$0xff]  }
  0x53   :  { %3357 = vmatprep.mubr.msk.bf16.mxu1 %vm236_vm1, %v4018_v25  ;;  %v1821_v25 = vrot.slane %v4286_v58, 2  ;;  %v1825_v6 = vrot.slane %v4298_v16, 2 }
  0x54   :  { %3494 = vmatmul.mubr.msk.bf16.gmra.mrb[20].mxu0 %vm236_vm1, %v1516_v47 }
  0x55   :  { %3505 = vmatprep.mubr.msk.bf16.mxu0 %vm236_vm1, %v1820_v59  ;;  %v1822_v10 = vsel %vm1494_vm3, %v1819_v54, %v1821_v25  ;;  %v1824_v17 = vsel %vm1494_vm3, %v1821_v25, %v1823_v3  ;;  %v1826_v11 = vsel %vm1494_vm3, %v1823_v3, %v1825_v6  ;;  %v1828_v31 = vsel %vm1494_vm3, %v1825_v6, %v1827_v7  ;;  %v3817_v25 = vld [vmem:[%s4917_s0 + $0x58] ss:$0 sps:$4 sm:$0x11]  }
  0x56   :  { %v4381_v59 = vsel %vm593_vm4, %v930_v21, %v932_v39  ;;  %v4388_v3 = vsel %vm2395_vm5, %v2397_v37, %v2399_v41  ;;  %v4394_v6 = vsel %vm2395_vm5, %v2399_v41, %v2401_v18  ;;  %v1230_v21 = vshll.u32 %v4136_v49, 16 }
  0x58   :  { %v1232_v8 = vrot.slane %v1230_v21, 2  ;;  %v1257_v21 = vshll.u32 %v4198_v23, 16 }
  0x5a   :  { %3358 = vmatmul.mubr.msk.bf16.gmra.mrb[12].mxu1 %vm236_vm1, %v4044_v48  ;;  %v1829_v48 = vrot.slane %v4311_v13, 2 }
  0x5b   :  { %3361 = vmatprep.mubr.msk.bf16.mxu1 %vm236_vm1, %v4050_v51  ;;  %v3819_v51 = vld [vmem:[%s4916_s1 + $0xe8] sm:$0xff]  }
  0x5c   :  { %3506 = vmatmul.mubr.msk.bf16.vlgmr.msra.gmra.mrb[0].mxu0 %vm236_vm1, %v1822_v10  ;;  %v4359_v47 = vsel %vm1494_vm3, %v1827_v7, %v1829_v48  ;;  %v4397_v10 = vsel %vm593_vm4, %v934_v43, %v936_v45  ;;  %v3829_v7 = vld [vmem:[%s4916_s1 + $0xf8] sm:$0xff]  }
  0x5d   :  { %3509 = vmatprep.mubr.msk.bf16.mxu0 %vm236_vm1, %v1824_v17  ;;  %3530 = vmatpush3.bf16.msra.mxu0 %v4156_v63  ;;  %v2396_v63 = vrot.slane %v3043_v30, 3  ;;  %v2405_v17 = vrot.slane %v4305_v61, 3  ;;  %v2409_v30 = vrot.slane %v4342_v28, 3 }
  0x5e   :  { %3531 = vmatprep.subr.bf16.mxu0 %v3819_v51 }
  0x5f   :  { %v4378_v54 = vsel %vm2395_vm5, %v2396_v63, %v2397_v37  ;;  %v1236_v63 = vshrl.u32 %v4166_v2, 16  ;;  %v4416_v37 = vld [vmem:[%s4917_s0 + $0x48] sm:$0xff]  }
  0x61   :  { %3532 = vmatpush3.bf16.msra.mxu0 %v3819_v51  ;;  %v2407_v51 = vrot.slane %v4311_v13, 3 }
  0x62   :  { %3362 = vmatmul.mubr.msk.bf16.gmra.mrb[16].mxu1 %vm236_vm1, %v4073_v1  ;;  %v2403_v1 = vrot.slane %v4298_v16, 3  ;;  %3533 = vmatprep.subr.bf16.mxu0 %v3826_v27 }
  0x63   :  { %3365 = vmatprep.mubr.msk.bf16.mxu1 %vm236_vm1, %v4079_v4  ;;  %v4391_v4 = vsel %vm593_vm4, %v932_v39, %v934_v43  ;;  %v4421_v39 = vsel %vm593_vm4, %v936_v45, %v4922_v15  ;;  %v4427_v49 = vsel %vm2395_vm5, %v2405_v17, %v2407_v51  ;;  %v1239_v43 = vshll.u32 %v4166_v2, 16 }
  0x64   :  { %v4403_v14 = vsel %vm2395_vm5, %v2401_v18, %v2403_v1  ;;  %3510 = vmatmul.mubr.msk.bf16.gmra.mrb[4].mxu0 %vm236_vm1, %v1826_v11  ;;  %v4424_v41 = vsel %vm2395_vm5, %v2403_v1, %v2405_v17  ;;  %v4434_v11 = vld [vmem:[%s4917_s0 + $0x50] sm:$0xff]   ;;  %v1229_v18 = vrot.slane %v1227_v26, 1  ;;  %v4437_v45 = vsel %vm2395_vm5, %v2407_v51, %v2409_v30  ;;  %v4442_v17 = vld [vmem:[%s4916_s1 + $0x100] sm:$0xff]  }
  0x65   :  { %3513 = vmatprep.mubr.msk.bf16.mxu0 %vm236_vm1, %v1828_v31  ;;  %3534 = vmatpush3.bf16.msra.mxu0 %v3826_v27  ;;  %4924 = vst [vmem:[#allocation2_spill] sm:$0xff] %v4437_v45  ;;  %v1238_v1 = vrot.slane %v1236_v63, 1  ;;  %v1241_v2 = vrot.slane %v1239_v43, 2  ;;  %v2411_v31 = vrot.slane %v4416_v37, 3  ;;  %v1245_v15 = vshrl.u32 %v4173_v5, 16  ;;  %v4458_v63 = vld [vmem:[%s4917_s0 + $0x58] sm:$0xff]  }
  0x66   :  { %3535 = vmatprep.subr.bf16.mxu0 %v3829_v7  ;;  %v4448_v27 = vor.u32 %v1232_v8, %v1229_v18  ;;  %v2413_v51 = vrot.slane %v4434_v11, 3  ;;  %v1254_v26 = vshrl.u32 %v4198_v23, 16  ;;  %v1832_v23 = vsel %vm1494_vm3, %v1829_v48, %v1831_v53 }
  0x67   :  { %v1242_v43 = vor.u32 %v1241_v2, %v1238_v1  ;;  %v4461_v5 = vsel %vm2395_vm5, %v2409_v30, %v2411_v31  ;;  %v1247_v8 = vrot.slane %v1245_v15, 1  ;;  %v1259_v45 = vrot.slane %v1257_v21, 2 }
  0x68   :  { %v1256_v18 = vrot.slane %v1254_v26, 1  ;;  %v1263_v1 = vshrl.u32 %v4203_v24, 16  ;;  %v1266_v48 = vshll.u32 %v4203_v24, 16  ;;  %v1833_v21 = vrot.slane %v4416_v37, 2  ;;  %v3827_v24 = vld [vmem:[%s4916_s1 + $0x68] sm:$0xff]  }
  0x69   :  { %3536 = vmatpush3.bf16.msra.mxu0 %v3829_v7  ;;  %v4474_v30 = vsel %vm1163_vm2, %v4448_v27, %v1242_v43 }
  0x6a   :  { %3366 = vmatmul.mubr.msk.bf16.gmra.mrb[24].mxu1 %vm236_vm1, %v3817_v25  ;;  %v1250_v25 = vrot.slane %v1248_v52, 2  ;;  %3561 = vmatprep.subr.bf16.mxu0 %v4442_v17  ;;  %v2415_v52 = vrot.slane %v4458_v63, 3  ;;  %v1260_v2 = vor.u32 %v1259_v45, %v1256_v18  ;;  %v1265_v26 = vrot.slane %v1263_v1, 1  ;;  %v3832_v18 = vld [vmem:[%s4916_s1 + $0x78] sm:$0xff]  }
  0x6b   :  { %3377 = vmatprep.mubr.msk.bf16.mxu1 %vm236_vm1, %v4211_v19  ;;  %v4469_v19 = vsel %vm2395_vm5, %v2411_v31, %v2413_v51  ;;  %v2069_v1 = vshll.u32 %v4254_v22, 16 }
  0x6c   :  { %v1251_v15 = vor.u32 %v1250_v25, %v1247_v8  ;;  %3514 = vmatmul.mubr.msk.bf16.gmra.mrb[8].mxu0 %vm236_vm1, %v4359_v47  ;;  %v4487_v31 = vsel %vm2395_vm5, %v2413_v51, %v2415_v52  ;;  %v1268_v47 = vrot.slane %v1266_v48, 2  ;;  %v1834_v8 = vsel %vm1494_vm3, %v1831_v53, %v1833_v21  ;;  %v3830_v25 = vld [vmem:[%s4916_s1 + $0x70] sm:$0xff]  }
  0x6d   :  { %3517 = vmatprep.mubr.msk.bf16.mxu0 %vm236_vm1, %v1832_v23  ;;  %v2066_v53 = vshrl.u32 %v4254_v22, 16  ;;  %v2077_v48 = vshll.u32 %v4259_v50, 16 }
  0x6e   :  { %v4482_v7 = vsel %vm1163_vm2, %v1242_v43, %v1251_v15  ;;  %v4495_v45 = vsel %vm1163_vm2, %v1251_v15, %v1260_v2  ;;  %v1835_v43 = vrot.slane %v4434_v11, 2  ;;  %v4500_v51 = vor.u32 %v1268_v47, %v1265_v26 }
  0x6f   :  { %v2071_v47 = vrot.slane %v2069_v1, 3  ;;  %v2079_v22 = vrot.slane %v2077_v48, 3  ;;  %v2104_v48 = vshll.u32 %v4298_v16, 16 }
  0x70   :  { %v4513_v23 = vsel %vm1163_vm2, %v1260_v2, %v4500_v51  ;;  %v2074_v2 = vshrl.u32 %v4259_v50, 16  ;;  %v2086_v50 = vshll.u32 %v4286_v58, 16 }
  0x72   :  { %3378 = vmatmul.mubr.msk.bf16.vlgmr.msra.gmra.mrb[0].mxu1 %vm236_vm1, %v4150_v62  ;;  %v1836_v62 = vsel %vm1494_vm3, %v1833_v21, %v1835_v43  ;;  %v2068_v21 = vrot.slane %v2066_v53, 2 }
  0x73   :  { %3402 = vmatpush3.bf16.msra.mxu1 %v4247_v42  ;;  %3381 = vmatprep.mubr.msk.bf16.mxu1 %vm236_vm1, %v4159_v0  ;;  %v3828_v42 = vld [vmem:[%s4917_s0 + $0x60] ss:$0 sps:$4 sm:$0x77]   ;;  %v1837_v0 = vrot.slane %v4458_v63, 2 }
  0x74   :  { %3403 = vmatprep.subr.bf16.mxu1 %v3827_v24  ;;  %3518 = vmatmul.mubr.msk.bf16.gmra.mrb[12].mxu0 %vm236_vm1, %v1834_v8  ;;  %v1839_v15 = vrot.slane %v3828_v42, 2  ;;  %v2076_v8 = vrot.slane %v2074_v2, 2  ;;  %v2095_v42 = vshll.u32 %v4292_v60, 16 }
  0x75   :  { %3521 = vmatprep.mubr.msk.bf16.mxu0 %vm236_vm1, %v1836_v62  ;;  %v1838_v26 = vsel %vm1494_vm3, %v1835_v43, %v1837_v0  ;;  %v2072_v43 = vor.u32 %v2071_v47, %v2068_v21  ;;  %v2092_v62 = vshrl.u32 %v4292_v60, 16  ;;  %v2101_v60 = vshrl.u32 %v4298_v16, 16  ;;  %v3833_v16 = vld [vmem:[%s4916_s1 + $0x108] sm:$0xff]  }
  0x76   :  { %v2097_v1 = vrot.slane %v2095_v42, 3 }
  0x77   :  { %3404 = vmatpush3.bf16.msra.mxu1 %v3827_v24  ;;  %v1840_v24 = vsel %vm1494_vm3, %v1837_v0, %v1839_v15  ;;  %v2088_v0 = vrot.slane %v2086_v50, 3  ;;  %v2103_v21 = vrot.slane %v2101_v60, 2  ;;  %v2128_v50 = vshrl.u32 %v4342_v28, 16 }
  0x78   :  { %3405 = vmatprep.subr.bf16.mxu1 %v3830_v25 }
  0x7a   :  { %3382 = vmatmul.mubr.msk.bf16.gmra.mrb[4].mxu1 %vm236_vm1, %v4186_v12  ;;  %v2083_v12 = vshrl.u32 %v4286_v58, 16 }
  0x7b   :  { %3385 = vmatprep.mubr.msk.bf16.mxu1 %vm236_vm1, %v4215_v29  ;;  %3406 = vmatpush3.bf16.msra.mxu1 %v3830_v25  ;;  %v4542_v29 = vld [vmem:[%s4916_s1 + $0x80] sm:$0xff]   ;;  %v2080_v25 = vor.u32 %v2079_v22, %v2076_v8 }
  0x7c   :  { %3407 = vmatprep.subr.bf16.mxu1 %v3832_v18  ;;  %3522 = vmatmul.mubr.msk.bf16.gmra.mrb[16].mxu0 %vm236_vm1, %v1838_v26  ;;  %v2085_v58 = vrot.slane %v2083_v12, 2  ;;  %v2110_v26 = vshrl.u32 %v4305_v61, 16 }
  0x7d   :  { %3525 = vmatprep.mubr.msk.bf16.mxu0 %vm236_vm1, %v1840_v24  ;;  %v2081_v53 = vsel %vm2064_vm6, %v2072_v43, %v2080_v25  ;;  %v2106_v24 = vrot.slane %v2104_v48, 3  ;;  %v2131_v43 = vshll.u32 %v4342_v28, 16  ;;  %v3840_v28 = vld [vmem:[%s4917_s0 + $0xc] sm:$0xff]   ;;  %v2146_v48 = vshrl.u32 %v4434_v11, 16 }
  0x7e   :  { %v2089_v2 = vor.u32 %v2088_v0, %v2085_v58  ;;  %v2112_v8 = vrot.slane %v2110_v26, 2  ;;  %v918_v58 = vrot.slane %v3840_v28, 1  ;;  %v4925_v26 = vrot.slane %v4104_v32, 1  ;;  %v3843_v28 = vld [vmem:[%s4916_s1 + $0x88] sm:$0xff]  }
  0x7f   :  { %3408 = vmatpush3.bf16.msra.mxu1 %v3832_v18  ;;  %v2094_v18 = vrot.slane %v2092_v62, 2 }
  0x80   :  { %3593 = vmatprep.subr.bf16.mxu1 %v4542_v29 }
  0x82   :  { %3386 = vmatmul.mubr.msk.bf16.gmra.mrb[8].mxu1 %vm236_vm1, %v4226_v36  ;;  %v2098_v36 = vor.u32 %v2097_v1, %v2094_v18  ;;  %v2133_v18 = vrot.slane %v2131_v43, 3  ;;  %v2137_v1 = vshrl.u32 %v4416_v37, 16 }
  0x83   :  { %3389 = vmatprep.mubr.msk.bf16.mxu1 %vm236_vm1, %v4233_v38  ;;  %v2113_v38 = vshll.u32 %v4305_v61, 16  ;;  %v2122_v61 = vshll.u32 %v4311_v13, 16 }
  0x84   :  { %3526 = vmatmul.mubr.msk.bf16.gmra.mrb[24].mxu0 %vm236_vm1, %v1839_v15  ;;  %v2090_v15 = vsel %vm2064_vm6, %v2080_v25, %v2089_v2  ;;  %v2099_v47 = vsel %vm2064_vm6, %v2089_v2, %v2098_v36  ;;  %v3834_v25 = vld [vmem:[%s4916_s1 + $0x110] sm:$0xff]   ;;  %v2140_v2 = vshll.u32 %v4416_v37, 16 }
  0x85   :  { %3537 = vmatprep.mubr.msk.bf16.mxu0 %vm236_vm1, %v2081_v53  ;;  %v2115_v22 = vrot.slane %v2113_v38, 3  ;;  %v2124_v42 = vrot.slane %v2122_v61, 3  ;;  %v2130_v53 = vrot.slane %v2128_v50, 2  ;;  %v3841_v38 = vld [vmem:[%s4917_s0 + $0x14] sm:$0xff]   ;;  %v2158_v50 = vshll.u32 %v4458_v63, 16 }
  0x87   :  { %v2116_v12 = vor.u32 %v2115_v22, %v2112_v8  ;;  %v2134_v60 = vor.u32 %v2133_v18, %v2130_v53  ;;  %v2148_v8 = vrot.slane %v2146_v48, 2  ;;  %v4926_v18 = vrot.slane %v3979_v56, 1 }
  0x8a   :  { %3390 = vmatmul.mubr.msk.bf16.gmra.mrb[12].mxu1 %vm236_vm1, %v4250_v34  ;;  %v2107_v34 = vor.u32 %v2106_v24, %v2103_v21  ;;  %v2139_v21 = vrot.slane %v2137_v1, 2  ;;  %v2142_v24 = vrot.slane %v2140_v2, 3  ;;  %v3845_v1 = vld [vmem:[%s4916_s1 + $0x98] sm:$0xff]  }
  0x8b   :  { %3393 = vmatprep.mubr.msk.bf16.mxu1 %vm236_vm1, %v4262_v44  ;;  %v2119_v44 = vshrl.u32 %v4311_v13, 16 }
  0x8c   :  { %3538 = vmatmul.mubr.msk.bf16.vlgmr.msra.gmra.mrb[0].mxu0 %vm236_vm1, %v2090_v15  ;;  %v2108_v13 = vsel %vm2064_vm6, %v2098_v36, %v2107_v34  ;;  %v2117_v0 = vsel %vm2064_vm6, %v2107_v34, %v2116_v12  ;;  %v2149_v36 = vshll.u32 %v4434_v11, 16  ;;  %v920_v15 = vrot.slane %v3841_v38, 1  ;;  %v3842_v11 = vld [vmem:[%s4917_s0 + $0x1c] sm:$0xff]  }
  0x8d   :  { %3541 = vmatprep.mubr.msk.bf16.mxu0 %vm236_vm1, %v2099_v47  ;;  %3562 = vmatpush3.bf16.msra.mxu0 %v4442_v17  ;;  %v917_v17 = vrot.slane %v3934_v20, 1  ;;  %v2121_v62 = vrot.slane %v2119_v44, 2  ;;  %v922_v47 = vrot.slane %v3842_v11, 1  ;;  %v2143_v44 = vor.u32 %v2142_v24, %v2139_v21 }
  0x8e   :  { %3563 = vmatprep.subr.bf16.mxu0 %v3833_v16  ;;  %v2151_v22 = vrot.slane %v2149_v36, 3  ;;  %v921_v34 = vsel %vm593_vm4, %v918_v58, %v920_v15 }
  0x8f   :  { %v2125_v20 = vor.u32 %v2124_v42, %v2121_v62  ;;  %v923_v61 = vsel %vm593_vm4, %v920_v15, %v922_v47  ;;  %v2160_v42 = vrot.slane %v2158_v50, 3 }
  0x90   :  { %v2152_v43 = vor.u32 %v2151_v22, %v2148_v8 }
  0x91   :  { %3564 = vmatpush3.bf16.msra.mxu0 %v3833_v16  ;;  %v2126_v37 = vsel %vm2064_vm6, %v2116_v12, %v2125_v20  ;;  %v2135_v32 = vsel %vm2064_vm6, %v2125_v20, %v2134_v60  ;;  %v4612_v16 = vld [vmem:[%s4917_s0 + $0x60] ss:$0 sps:$4 sm:$0xff]   ;;  %v2155_v12 = vshrl.u32 %v4458_v63, 16  ;;  %v3844_v20 = vld [vmem:[%s4916_s1 + $0x90] sm:$0xff]  }
  0x92   :  { %3394 = vmatmul.mubr.msk.bf16.gmra.mrb[16].mxu1 %vm236_vm1, %v4269_v46  ;;  %3565 = vmatprep.subr.bf16.mxu0 %v3834_v25  ;;  %v3836_v46 = vld [vmem:[%s4916_s1 + $0x118] sm:$0xff]  }
  0x93   :  { %3397 = vmatprep.mubr.msk.bf16.mxu1 %vm236_vm1, %v4279_v57  ;;  %v919_v57 = vsel %vm593_vm4, %v917_v17, %v918_v58  ;;  %v2167_v17 = vshll.u32 %v4612_v16, 16  ;;  %v2157_v62 = vrot.slane %v2155_v12, 2  ;;  %v2153_v58 = vsel %vm2064_vm6, %v2143_v44, %v2152_v43 }
  0x94   :  { %3542 = vmatmul.mubr.msk.bf16.gmra.mrb[4].mxu0 %vm236_vm1, %v2108_v13  ;;  %v2144_v13 = vsel %vm2064_vm6, %v2134_v60, %v2143_v44 }
  0x95   :  { %3545 = vmatprep.mubr.msk.bf16.mxu0 %vm236_vm1, %v2117_v0  ;;  %3566 = vmatpush3.bf16.msra.mxu0 %v3834_v25  ;;  %v2164_v25 = vshrl.u32 %v4612_v16, 16  ;;  %v2169_v53 = vrot.slane %v2167_v17, 3  ;;  %v3108_v17 = vld [vmem:[%s4918_s3] sm:$0xff]  }
  0x96   :  { %3567 = vmatprep.subr.bf16.mxu0 %v3836_v46 }
  0x97   :  { %v2166_v0 = vrot.slane %v2164_v25, 2  ;;  %v3151_v25 = vld [vmem:[%s4918_s3 + $0x8] sm:$0xff]  }
  0x99   :  { %3568 = vmatpush3.bf16.msra.mxu0 %v3836_v46  ;;  %v2161_v46 = vor.u32 %v2160_v42, %v2157_v62  ;;  %v4745_v62 = vld [vmem:[%s4919_s2] ss:$0 sm:$0xff] }
  0x9a   :  { %3398 = vmatmul.mubr.msk.bf16.gmra.mrb[28].mxu1 %vm236_vm1, %v4925_v26 }
  0x9b   :  { %3409 = vmatprep.mubr.msk.bf16.mxu1 %vm236_vm1, %v919_v57  ;;  %v2170_v57 = vor.u32 %v2169_v53, %v2166_v0  ;;  %v2162_v56 = vsel %vm2064_vm6, %v2152_v43, %v2161_v46  ;;  %v3109_v53 = vunpack.c.l.bf16 %v3108_v17 }
  0x9c   :  { %3546 = vmatmul.mubr.msk.bf16.gmra.mrb[8].mxu0 %vm236_vm1, %v2126_v37 }
  0x9d   :  { %3549 = vmatprep.mubr.msk.bf16.mxu0 %vm236_vm1, %v2135_v32  ;;  %v2171_v2 = vsel %vm2064_vm6, %v2161_v46, %v2170_v57 }
  0xa2   :  { %3410 = vmatmul.mubr.msk.bf16.vlgmr.msra.gmra.mrb[0].mxu1 %vm236_vm1, %v921_v34 }
  0xa3   :  { %3597 = vmatpush3.bf16.msra.mxu1 %v4542_v29  ;;  %3413 = vmatprep.mubr.msk.bf16.mxu1 %vm236_vm1, %v923_v61  ;;  %v925_v29 = vsel %vm593_vm4, %v922_v47, %v4926_v18 }
  0xa4   :  { %3594 = vmatprep.subr.bf16.mxu1 %v3843_v28  ;;  %3550 = vmatmul.mubr.msk.bf16.gmra.mrb[12].mxu0 %vm236_vm1, %v2144_v13 }
  0xa5   :  { %3553 = vmatprep.mubr.msk.bf16.mxu0 %vm236_vm1, %v2153_v58 }
  0xa7   :  { %3598 = vmatpush3.bf16.msra.mxu1 %v3843_v28  ;;  %v3113_v28 = vunpack.c.l.bf16 %v3151_v25 }
  0xa8   :  { %3595 = vmatprep.subr.bf16.mxu1 %v3844_v20 }
  0xaa   :  { %3414 = vmatmul.mubr.msk.bf16.gmra.mrb[4].mxu1 %vm236_vm1, %v925_v29 }
  0xab   :  { %3417 = vmatprep.mubr.msk.bf16.mxu1 %vm236_vm1, %v4333_v9  ;;  %3599 = vmatpush3.bf16.msra.mxu1 %v3844_v20  ;;  %v1234_v9 = vsel %vm1163_vm2, %v4058_v55, %v4448_v27  ;;  %v2417_v55 = vrot.slane %v4612_v16, 3  ;;  %v3114_v20 = vunpack.c.h.bf16 %v3151_v25 }
  0xac   :  { %3596 = vmatprep.subr.bf16.mxu1 %v3845_v1  ;;  %3554 = vmatmul.mubr.msk.bf16.gmra.mrb[16].mxu0 %vm236_vm1, %v2162_v56 }
  0xad   :  { %3557 = vmatprep.mubr.msk.bf16.mxu0 %vm236_vm1, %v2171_v2  ;;  %v3110_v2 = vunpack.c.h.bf16 %v3108_v17 }
  0xaf   :  { %3600 = vmatpush3.bf16.msra.mxu1 %v3845_v1 }
  0xb2   :  { %3418 = vmatmul.mubr.msk.bf16.gmra.mrb[8].mxu1 %vm236_vm1, %v4351_v33  ;;  %v4927_v33 = vrot.slane %v4366_v40, 1  ;;  %v2418_v40 = vsel %vm2395_vm5, %v2415_v52, %v2417_v55 }
  0xb3   :  { %3421 = vmatprep.mubr.msk.bf16.mxu1 %vm236_vm1, %v4354_v35  ;;  %v4928_v35 = vld [vmem:[#allocation2_spill] sm:$0xff] }
  0xb4   :  { %3558 = vmatmul.mubr.msk.bf16.gmra.mrb[28].mxu0 %vm236_vm1, %v2170_v57 }
  0xb5   :  { %3569 = vmatprep.mubr.msk.bf16.mxu0 %vm236_vm1, %v4378_v54 }
  0xba   :  { %3422 = vmatmul.mubr.msk.bf16.gmra.mrb[12].mxu1 %vm236_vm1, %v4381_v59 }
  0xbb   :  { %3425 = vmatprep.mubr.msk.bf16.mxu1 %vm236_vm1, %v4391_v4 }
  0xbc   :  { %3570 = vmatmul.mubr.msk.bf16.vlgmr.msra.gmra.mrb[0].mxu0 %vm236_vm1, %v4388_v3 }
  0xbd   :  { %3573 = vmatprep.mubr.msk.bf16.mxu0 %vm236_vm1, %v4394_v6 }
  0xc2   :  { %3426 = vmatmul.mubr.msk.bf16.gmra.mrb[16].mxu1 %vm236_vm1, %v4397_v10 }
  0xc3   :  { %3429 = vmatprep.mubr.msk.bf16.mxu1 %vm236_vm1, %v4421_v39 }
  0xc4   :  { %3574 = vmatmul.mubr.msk.bf16.gmra.mrb[4].mxu0 %vm236_vm1, %v4403_v14 }
  0xc5   :  { %3577 = vmatprep.mubr.msk.bf16.mxu0 %vm236_vm1, %v4424_v41 }
  0xca   :  { %3430 = vmatmul.mubr.msk.bf16.gmra.mrb[32].mxu1 %vm236_vm1, %v4927_v33 }
  0xcb   :  { %3453 = vmatprep.mubr.msk.bf16.mxu1 %vm236_vm1, %v1234_v9 }
  0xcc   :  { %3578 = vmatmul.mubr.msk.bf16.gmra.mrb[8].mxu0 %vm236_vm1, %v4427_v49 }
  0xcd   :  { %3581 = vmatprep.mubr.msk.bf16.mxu0 %vm236_vm1, %v4928_v35  ;;  %v3153_v35 = vld [vmem:[%s4918_s3 + $0x18] sm:$0xff]  }
  0xd2   :  { %3454 = vmatmul.mubr.msk.bf16.vlgmr.msra.gmra.mrb[12].mxu1 %vm236_vm1, %v4474_v30 }
  0xd3   :  { %3457 = vmatprep.mubr.msk.bf16.mxu1 %vm236_vm1, %v4482_v7 }
  0xd4   :  { %3582 = vmatmul.mubr.msk.bf16.gmra.mrb[12].mxu0 %vm236_vm1, %v4461_v5 }
  0xd5   :  { %3585 = vmatprep.mubr.msk.bf16.mxu0 %vm236_vm1, %v4469_v19 }
  0xda   :  { %3458 = vmatmul.mubr.msk.bf16.gmra.mrb[16].mxu1 %vm236_vm1, %v4495_v45 }
  0xdb   :  { %3461 = vmatprep.mubr.msk.bf16.mxu1 %vm236_vm1, %v4513_v23 }
  0xdc   :  { %3586 = vmatmul.mubr.msk.bf16.gmra.mrb[16].mxu0 %vm236_vm1, %v4487_v31 }
  0xdd   :  { %3589 = vmatprep.mubr.msk.bf16.mxu0 %vm236_vm1, %v2418_v40 }
  0xe2   :  { %3462 = vmatmul.mubr.msk.bf16.gmra.mrb[36].mxu1 %vm236_vm1, %v4500_v51 }
  0xe4   :  { %3590 = vmatmul.mubr.msk.bf16.gmra.mrb[32].mxu0 %vm236_vm1, %v2417_v55 }
 0x10d   :  { %v3335_v54 = vpop.f32.mrb[20].mxu1 }
 0x10e   :  { %v387_v59 = vpop.f32.mrb[21].mxu1 }
 0x10f   :  { %v3336_v3 = vpop.f32.mrb[22].mxu1 }
 0x110   :  { %v390_v4 = vpop.f32.mrb[23].mxu1 }
 0x127   :  { %v4704_v6 = vpop.f32.mrb[20].mxu0 }
 0x128   :  { %v4706_v10 = vpop.f32.mrb[21].mxu0 }
 0x129   :  { %v3496_v14 = vpop.f32.mrb[22].mxu0 }
 0x12a   :  { %v4708_v39 = vpop.f32.mrb[23].mxu0 }
 0x13d   :  { %v3367_v41 = vpop.f32.mrb[24].mxu1 }
 0x13e   :  { %v576_v49 = vadd.f32 %v3367_v41, %v3335_v54  ;;  %v567_v27 = vpop.f32.mrb[25].mxu1  ;;  %v3152_v54 = vld [vmem:[%s4918_s3 + $0x10] sm:$0xff]  }
 0x13f   :  { %v568_v63 = vadd.f32 %v567_v27, %v387_v59  ;;  %v3368_v5 = vpop.f32.mrb[26].mxu1 }
 0x140   :  { %v570_v19 = vpop.f32.mrb[27].mxu1 }
 0x141   :  { %v571_v30 = vadd.f32 %v570_v19, %v390_v4 }
 0x157   :  { %v4710_v52 = vpop.f32.mrb[24].mxu0 }
 0x158   :  { %v4712_v7 = vpop.f32.mrb[25].mxu0 }
 0x159   :  { %v3528_v31 = vpop.f32.mrb[26].mxu0 }
 0x15a   :  { %v4714_v45 = vpop.f32.mrb[27].mxu0 }
 0x16d   :  { %v3399_v51 = vpop.f32.mrb[28].mxu1 }
 0x16e   :  { %v4716_v23 = vadd.f32 %v3399_v51, %v576_v49  ;;  %v791_v60 = vpop.f32.mrb[29].mxu1  ;;  %v3121_v49 = vunpack.c.l.bf16 %v3153_v35 }
 0x16f   :  { %v4718_v48 = vadd.f32 %v791_v60, %v568_v63  ;;  %v3400_v36 = vpop.f32.mrb[30].mxu1 }
 0x170   :  { %v794_v26 = vpop.f32.mrb[31].mxu1 }
 0x171   :  { %v4720_v38 = vadd.f32 %v794_v26, %v571_v30  ;;  %v3117_v30 = vunpack.c.l.bf16 %v3152_v54  ;;  %v3122_v26 = vunpack.c.h.bf16 %v3153_v35 }
 0x175   :  { %v3411_v15 = vpop.f32.mrb[0].mxu1 }
 0x176   :  { %v1034_v37 = vpop.f32.mrb[1].mxu1 }
 0x177   :  { %v3412_v21 = vpop.f32.mrb[2].mxu1 }
 0x178   :  { %v1037_v24 = vpop.f32.mrb[3].mxu1 }
 0x17d   :  { %v3415_v11 = vpop.f32.mrb[4].mxu1 }
 0x17e   :  { %v1050_v47 = vpop.f32.mrb[5].mxu1 }
 0x17f   :  { %v3416_v32 = vpop.f32.mrb[6].mxu1 }
 0x180   :  { %v1053_v8 = vpop.f32.mrb[7].mxu1 }
 0x185   :  { %v4722_v22 = vpop.f32.mrb[8].mxu1 }
 0x186   :  { %v4724_v16 = vpop.f32.mrb[9].mxu1 }
 0x187   :  { %v4726_v34 = vpop.f32.mrb[10].mxu1  ;;  %v4730_v61 = vpop.f32.mrb[28].mxu0 }
 0x188   :  { %v4728_v44 = vpop.f32.mrb[11].mxu1  ;;  %v4732_v12 = vpop.f32.mrb[29].mxu0 }
 0x189   :  { %v3560_v50 = vpop.f32.mrb[30].mxu0 }
 0x18a   :  { %v4734_v43 = vpop.f32.mrb[31].mxu0  ;;  %v3118_v50 = vunpack.c.h.bf16 %v3152_v54 }
 0x18f   :  { %v3571_v13 = vpop.f32.mrb[0].mxu0 }
 0x190   :  { %v3601_v42 = vadd.f32 %v3571_v13, %v3411_v15  ;;  %v2513_v58 = vpop.f32.mrb[1].mxu0 }
 0x191   :  { %v3602_v0 = vadd.f32 %v2513_v58, %v1034_v37  ;;  %v3572_v18 = vpop.f32.mrb[2].mxu0 }
 0x192   :  { %v2639_v29 = vadd.f32 %v3601_v42, %v4745_v62  ;;  %v3603_v46 = vadd.f32 %v3572_v18, %v3412_v21  ;;  %v2516_v57 = vpop.f32.mrb[3].mxu0 }
 0x193   :  { %v2637_v56 = vadd.f32 %v3602_v0, %v4745_v62  ;;  %v3604_v1 = vadd.f32 %v2516_v57, %v1037_v24 }
 0x194   :  { %v2708_v9 = vadd.f32 %v3113_v28, %v2639_v29  ;;  %v2640_v33 = vadd.f32 %v3603_v46, %v4745_v62 }
 0x195   :  { %v2706_v55 = vadd.f32 %v3109_v53, %v2637_v56  ;;  %v2638_v40 = vadd.f32 %v3604_v1, %v4745_v62  ;;  %v3155_v53 = vld [vmem:[%s4918_s3 + $0x28] sm:$0xff]  }
 0x196   :  { %v2731_v59 = vmax.f32 %v2708_v9, 0.0  ;;  %v2709_v3 = vadd.f32 %v3114_v20, %v2640_v33  ;;  %v3129_v35 = vunpack.c.l.bf16 %v3155_v53 }
 0x197   :  { %v2729_v4 = vmax.f32 %v2706_v55, 0.0  ;;  %v2707_v14 = vadd.f32 %v3110_v2, %v2638_v40  ;;  %v3575_v41 = vpop.f32.mrb[4].mxu0 }
 0x198   :  { %v3086_v27 = vpack.c.bf16 %v2731_v59, %v2731_v59  ;;  %v2732_v63 = vmax.f32 %v2709_v3, 0.0  ;;  %v3605_v5 = vadd.f32 %v3575_v41, %v3415_v11  ;;  %v2529_v19 = vpop.f32.mrb[5].mxu0 }
 0x199   :  { %v3084_v31 = vpack.c.bf16 %v2729_v4, %v2729_v4  ;;  %v2730_v51 = vmax.f32 %v2707_v14, 0.0  ;;  %v3606_v60 = vadd.f32 %v2529_v19, %v1050_v47  ;;  %v3576_v36 = vpop.f32.mrb[6].mxu0 }
 0x19a   :  { %2848 = vst.msk [vmem:[%s4920_s4 + $0x8] sm:$0xf] %vm2845_vm7, %v3086_v27  ;;  %v3087_v15 = vpack.c.bf16 %v2732_v63, %v2732_v63  ;;  %v2643_v37 = vadd.f32 %v3605_v5, %v4745_v62  ;;  %v3607_v21 = vadd.f32 %v3576_v36, %v3416_v32  ;;  %v2532_v24 = vpop.f32.mrb[7].mxu0 }
 0x19b   :  { %2846 = vst.msk [vmem:[%s4920_s4] sm:$0xf] %vm2845_vm7, %v3084_v31  ;;  %v3085_v11 = vpack.c.bf16 %v2730_v51, %v2730_v51  ;;  %v2641_v47 = vadd.f32 %v3606_v60, %v4745_v62  ;;  %v3608_v17 = vadd.f32 %v2532_v24, %v1053_v8 }
 0x19c   :  { %2849 = vst.msk [vmem:[%s4920_s4 + $0xc] sm:$0xf] %vm2845_vm7, %v3087_v15  ;;  %v2712_v32 = vadd.f32 %v3121_v49, %v2643_v37  ;;  %v2644_v28 = vadd.f32 %v3607_v21, %v4745_v62  ;;  %v3130_v49 = vunpack.c.h.bf16 %v3155_v53  ;;  %v3156_v21 = vld [vmem:[%s4918_s3 + $0x30] sm:$0xff]  }
 0x19d   :  { %v3431_v25 = vpop.f32.mrb[32].mxu1  ;;  %2847 = vst.msk [vmem:[%s4920_s4 + $0x4] sm:$0xf] %vm2845_vm7, %v3085_v11  ;;  %v2642_v8 = vadd.f32 %v3608_v17, %v4745_v62 }
 0x19e   :  { %v4768_v13 = vadd.f32 %v3431_v25, %v4716_v23  ;;  %v1114_v42 = vpop.f32.mrb[33].mxu1  ;;  %v2710_v23 = vadd.f32 %v3117_v30, %v2641_v47  ;;  %v2735_v29 = vmax.f32 %v2712_v32, 0.0  ;;  %v2713_v46 = vadd.f32 %v3122_v26, %v2644_v28 }
 0x19f   :  { %v4776_v58 = vadd.f32 %v1114_v42, %v4718_v48  ;;  %v3432_v0 = vpop.f32.mrb[34].mxu1  ;;  %v3154_v48 = vld [vmem:[%s4918_s3 + $0x20] sm:$0xff]   ;;  %v2711_v56 = vadd.f32 %v3118_v50, %v2642_v8  ;;  %v3579_v1 = vpop.f32.mrb[8].mxu0  ;;  %v3133_v8 = vunpack.c.l.bf16 %v3156_v21 }
 0x1a0   :  { %v1117_v18 = vpop.f32.mrb[35].mxu1  ;;  %v2733_v57 = vmax.f32 %v2710_v23, 0.0  ;;  %v3090_v2 = vpack.c.bf16 %v2735_v29, %v2735_v29  ;;  %v2736_v9 = vmax.f32 %v2713_v46, 0.0  ;;  %v3609_v33 = vadd.f32 %v3579_v1, %v4722_v22  ;;  %v2545_v55 = vpop.f32.mrb[9].mxu0 }
 0x1a1   :  { %v4790_v20 = vadd.f32 %v1117_v18, %v4720_v38  ;;  %v2734_v54 = vmax.f32 %v2711_v56, 0.0  ;;  %v3610_v59 = vadd.f32 %v2545_v55, %v4724_v16  ;;  %v3125_v3 = vunpack.c.l.bf16 %v3154_v48  ;;  %v3580_v4 = vpop.f32.mrb[10].mxu0 }
 0x1a2   :  { %v3088_v40 = vpack.c.bf16 %v2733_v57, %v2733_v57  ;;  %2852 = vst.msk [vmem:[%s4920_s4 + $0x18] sm:$0xf] %vm2845_vm7, %v3090_v2  ;;  %v3091_v38 = vpack.c.bf16 %v2736_v9, %v2736_v9  ;;  %v2647_v14 = vadd.f32 %v3609_v33, %v4745_v62  ;;  %v3611_v41 = vadd.f32 %v3580_v4, %v4726_v34  ;;  %v2548_v22 = vpop.f32.mrb[11].mxu0 }
 0x1a3   :  { %v3089_v16 = vpack.c.bf16 %v2734_v54, %v2734_v54  ;;  %v2645_v63 = vadd.f32 %v3610_v59, %v4745_v62  ;;  %v3612_v5 = vadd.f32 %v2548_v22, %v4728_v44  ;;  %v3126_v19 = vunpack.c.h.bf16 %v3154_v48  ;;  %v3157_v44 = vld [vmem:[%s4918_s3 + $0x38] sm:$0xff]   ;;  %v3159_v54 = vld [vmem:[%s4918_s3 + $0x48] sm:$0xff]  }
 0x1a4   :  { %2850 = vst.msk [vmem:[%s4920_s4 + $0x10] sm:$0xf] %vm2845_vm7, %v3088_v40  ;;  %2853 = vst.msk [vmem:[%s4920_s4 + $0x1c] sm:$0xf] %vm2845_vm7, %v3091_v38  ;;  %v2716_v34 = vadd.f32 %v3129_v35, %v2647_v14  ;;  %v2648_v31 = vadd.f32 %v3611_v41, %v4745_v62  ;;  %v3137_v42 = vunpack.c.l.bf16 %v3157_v44  ;;  %v3138_v48 = vunpack.c.h.bf16 %v3157_v44  ;;  %v3158_v38 = vld [vmem:[%s4918_s3 + $0x40] sm:$0xff]  }
 0x1a5   :  { %v3455_v27 = vpop.f32.mrb[12].mxu1  ;;  %2851 = vst.msk [vmem:[%s4920_s4 + $0x14] sm:$0xf] %vm2845_vm7, %v3089_v16  ;;  %v2714_v60 = vadd.f32 %v3125_v3, %v2645_v63  ;;  %v2646_v36 = vadd.f32 %v3612_v5, %v4745_v62  ;;  %v3134_v33 = vunpack.c.h.bf16 %v3156_v21  ;;  %v3145_v63 = vunpack.c.l.bf16 %v3159_v54 }
 0x1a6   :  { %v1413_v30 = vpop.f32.mrb[13].mxu1  ;;  %v2739_v15 = vmax.f32 %v2716_v34, 0.0  ;;  %v2717_v37 = vadd.f32 %v3130_v49, %v2648_v31  ;;  %v3141_v31 = vunpack.c.l.bf16 %v3158_v38 }
 0x1a7   :  { %v3456_v51 = vpop.f32.mrb[14].mxu1  ;;  %v2737_v24 = vmax.f32 %v2714_v60, 0.0  ;;  %v2715_v50 = vadd.f32 %v3126_v19, %v2646_v36  ;;  %v3583_v25 = vpop.f32.mrb[12].mxu0 }
 0x1a8   :  { %v1416_v26 = vpop.f32.mrb[15].mxu1  ;;  %v3094_v11 = vpack.c.bf16 %v2739_v15, %v2739_v15  ;;  %v2740_v47 = vmax.f32 %v2717_v37, 0.0  ;;  %v3613_v17 = vadd.f32 %v3583_v25, %v3455_v27  ;;  %v2561_v32 = vpop.f32.mrb[13].mxu0 }
 0x1a9   :  { %v3092_v28 = vpack.c.bf16 %v2737_v24, %v2737_v24  ;;  %v2738_v0 = vmax.f32 %v2715_v50, 0.0  ;;  %v3614_v23 = vadd.f32 %v2561_v32, %v1413_v30  ;;  %v3584_v53 = vpop.f32.mrb[14].mxu0  ;;  %v3142_v50 = vunpack.c.h.bf16 %v3158_v38 }
 0x1aa   :  { %2856 = vst.msk [vmem:[%s4920_s4 + $0x28] sm:$0xf] %vm2845_vm7, %v3094_v11  ;;  %v3095_v18 = vpack.c.bf16 %v2740_v47, %v2740_v47  ;;  %v2651_v29 = vadd.f32 %v3613_v17, %v4745_v62  ;;  %v3615_v46 = vadd.f32 %v3584_v53, %v3456_v51  ;;  %v2564_v57 = vpop.f32.mrb[15].mxu0 }
 0x1ab   :  { %2854 = vst.msk [vmem:[%s4920_s4 + $0x20] sm:$0xf] %vm2845_vm7, %v3092_v28  ;;  %v3093_v1 = vpack.c.bf16 %v2738_v0, %v2738_v0  ;;  %v2649_v2 = vadd.f32 %v3614_v23, %v4745_v62  ;;  %v3616_v9 = vadd.f32 %v2564_v57, %v1416_v26  ;;  %v3146_v26 = vunpack.c.h.bf16 %v3159_v54 }
 0x1ac   :  { %2857 = vst.msk [vmem:[%s4920_s4 + $0x2c] sm:$0xf] %vm2845_vm7, %v3095_v18  ;;  %v2720_v55 = vadd.f32 %v3137_v42, %v2651_v29  ;;  %v2652_v40 = vadd.f32 %v3615_v46, %v4745_v62 }
 0x1ad   :  { %v3459_v56 = vpop.f32.mrb[16].mxu1  ;;  %2855 = vst.msk [vmem:[%s4920_s4 + $0x24] sm:$0xf] %vm2845_vm7, %v3093_v1  ;;  %v2718_v3 = vadd.f32 %v3133_v8, %v2649_v2  ;;  %v2650_v4 = vadd.f32 %v3616_v9, %v4745_v62 }
 0x1ae   :  { %v1429_v35 = vpop.f32.mrb[17].mxu1  ;;  %v2743_v41 = vmax.f32 %v2720_v55, 0.0  ;;  %v2721_v49 = vadd.f32 %v3138_v48, %v2652_v40 }
 0x1af   :  { %v3460_v59 = vpop.f32.mrb[18].mxu1  ;;  %v2741_v22 = vmax.f32 %v2718_v3, 0.0  ;;  %v2719_v27 = vadd.f32 %v3134_v33, %v2650_v4  ;;  %v3587_v16 = vpop.f32.mrb[16].mxu0 }
 0x1b0   :  { %v1432_v14 = vpop.f32.mrb[19].mxu1  ;;  %v3098_v5 = vpack.c.bf16 %v2743_v41, %v2743_v41  ;;  %v2744_v19 = vmax.f32 %v2721_v49, 0.0  ;;  %v3617_v30 = vadd.f32 %v3587_v16, %v3459_v56  ;;  %v2577_v34 = vpop.f32.mrb[17].mxu0 }
 0x1b1   :  { %v3096_v51 = vpack.c.bf16 %v2741_v22, %v2741_v22  ;;  %v2742_v60 = vmax.f32 %v2719_v27, 0.0  ;;  %v3618_v36 = vadd.f32 %v2577_v34, %v1429_v35  ;;  %v3588_v44 = vpop.f32.mrb[18].mxu0 }
 0x1b2   :  { %2860 = vst.msk [vmem:[%s4920_s4 + $0x38] sm:$0xf] %vm2845_vm7, %v3098_v5  ;;  %v3099_v15 = vpack.c.bf16 %v2744_v19, %v2744_v19  ;;  %v2655_v37 = vadd.f32 %v3617_v30, %v4745_v62  ;;  %v3619_v21 = vadd.f32 %v3588_v44, %v3460_v59  ;;  %v2580_v24 = vpop.f32.mrb[19].mxu0 }
 0x1b3   :  { %2858 = vst.msk [vmem:[%s4920_s4 + $0x30] sm:$0xf] %vm2845_vm7, %v3096_v51  ;;  %v3097_v11 = vpack.c.bf16 %v2742_v60, %v2742_v60  ;;  %v2653_v47 = vadd.f32 %v3618_v36, %v4745_v62  ;;  %v3620_v17 = vadd.f32 %v2580_v24, %v1432_v14 }
 0x1b4   :  { %2861 = vst.msk [vmem:[%s4920_s4 + $0x3c] sm:$0xf] %vm2845_vm7, %v3099_v15  ;;  %v2724_v28 = vadd.f32 %v3145_v63, %v2655_v37  ;;  %v2656_v0 = vadd.f32 %v3619_v21, %v4745_v62 }
 0x1b5   :  { %v3463_v25 = vpop.f32.mrb[36].mxu1  ;;  %2859 = vst.msk [vmem:[%s4920_s4 + $0x34] sm:$0xf] %vm2845_vm7, %v3097_v11  ;;  %v2722_v53 = vadd.f32 %v3141_v31, %v2653_v47 }
 0x1b6   :  { %v1481_v42 = vadd.f32 %v3463_v25, %v4768_v13  ;;  %v1445_v32 = vpop.f32.mrb[37].mxu1  ;;  %v2654_v13 = vadd.f32 %v3620_v17, %v4745_v62  ;;  %v2747_v46 = vmax.f32 %v2724_v28, 0.0  ;;  %v2725_v48 = vadd.f32 %v3146_v26, %v2656_v0 }
 0x1b7   :  { %v1479_v23 = vadd.f32 %v1445_v32, %v4776_v58  ;;  %v3464_v8 = vpop.f32.mrb[38].mxu1  ;;  %v2745_v1 = vmax.f32 %v2722_v53, 0.0  ;;  %v3591_v9 = vpop.f32.mrb[32].mxu0 }
 0x1b8   :  { %v1728_v18 = vadd.f32 %v4704_v6, %v1481_v42  ;;  %v1448_v29 = vpop.f32.mrb[39].mxu1  ;;  %v2723_v58 = vadd.f32 %v3142_v50, %v2654_v13  ;;  %v3102_v33 = vpack.c.bf16 %v2747_v46, %v2747_v46  ;;  %v2748_v35 = vmax.f32 %v2725_v48, 0.0  ;;  %v2682_v6 = vld [vmem:[%s4918_s3 + $0x58] sm:$0x1]  ;;  %v2593_v54 = vpop.f32.mrb[33].mxu0 }
 0x1b9   :  { %v1726_v57 = vadd.f32 %v4706_v10, %v1479_v23  ;;  %v1480_v56 = vadd.f32 %v1448_v29, %v4790_v20  ;;  %v3100_v59 = vpack.c.bf16 %v2745_v1, %v2745_v1  ;;  %v3592_v3 = vpop.f32.mrb[34].mxu0  ;;  %v2705_v41 = vunpack.c.l.bf16 %v2682_v6 }
 0x1ba   :  { %v2051_v2 = vadd.f32 %v4710_v52, %v1728_v18  ;;  %v2746_v10 = vmax.f32 %v2723_v58, 0.0  ;;  %v3160_v52 = vld [vmem:[%s4918_s3 + $0x50] sm:$0xff]   ;;  %2864 = vst.msk [vmem:[%s4920_s4 + $0x48] sm:$0xf] %vm2845_vm7, %v3102_v33  ;;  %v2596_v38 = vpop.f32.mrb[35].mxu0 }
 0x1bb   :  { %v1727_v55 = vadd.f32 %v4708_v39, %v1480_v56  ;;  %v2049_v40 = vadd.f32 %v4712_v7, %v1726_v57  ;;  %v3103_v39 = vpack.c.bf16 %v2748_v35, %v2748_v35  ;;  %2862 = vst.msk [vmem:[%s4920_s4 + $0x40] sm:$0xf] %vm2845_vm7, %v3100_v59  ;;  %v3149_v22 = vunpack.c.l.bf16 %v3160_v52 }
 0x1bc   :  { %v2382_v20 = vadd.f32 %v4730_v61, %v2051_v2  ;;  %v3101_v61 = vpack.c.bf16 %v2746_v10, %v2746_v10  ;;  %v3150_v63 = vunpack.c.h.bf16 %v3160_v52 }
 0x1bd   :  { %v2380_v4 = vadd.f32 %v4732_v12, %v2049_v40  ;;  %v2050_v7 = vadd.f32 %v4714_v45, %v1727_v55  ;;  %2865 = vst.msk [vmem:[%s4920_s4 + $0x4c] sm:$0xf] %vm2845_vm7, %v3103_v39 }
 0x1be   :  { %v2629_v14 = vadd.f32 %v3591_v9, %v2382_v20  ;;  %2863 = vst.msk [vmem:[%s4920_s4 + $0x44] sm:$0xf] %vm2845_vm7, %v3101_v61 }
 0x1bf   :  { %v2627_v49 = vadd.f32 %v2593_v54, %v2380_v4  ;;  %v2381_v12 = vadd.f32 %v4734_v43, %v2050_v7 }
 0x1c0   :  { %v2659_v45 = vadd.f32 %v4745_v62, %v2629_v14 }
 0x1c1   :  { %v2657_v27 = vadd.f32 %v4745_v62, %v2627_v49  ;;  %v2628_v16 = vadd.f32 %v2596_v38, %v2381_v12 }
 0x1c2   :  { %v2728_v5 = vadd.f32 %v2705_v41, %v2659_v45 }
 0x1c3   :  { %v2726_v19 = vadd.f32 %v3149_v22, %v2657_v27  ;;  %v2658_v30 = vadd.f32 %v4745_v62, %v2628_v16 }
 0x1c4   :  { %v2751_v34 = vmax.f32 %v2728_v5, 0.0 }
 0x1c5   :  { %v2749_v31 = vmax.f32 %v2726_v19, 0.0  ;;  %v2727_v51 = vadd.f32 %v3150_v63, %v2658_v30 }
 0x1c6   :  { %v3106_v43 = vpack.c.bf16 %v2751_v34, %v2751_v34 }
 0x1c7   :  { %v3104_v60 = vpack.c.bf16 %v2749_v31, %v2749_v31  ;;  %v2750_v36 = vmax.f32 %v2727_v51, 0.0 }
 0x1c8   :  { %2869 = vst.msk [vmem:[%s4920_s4 + $0x58] sm:$0x1] %vm2868_vm8, %v3106_v43 }
 0x1c9   :  { %2866 = vst.msk [vmem:[%s4920_s4 + $0x50] sm:$0xf] %vm2845_vm7, %v3104_v60  ;;  %v3105_v44 = vpack.c.bf16 %v2750_v36, %v2750_v36 }
 0x1cb   :  { %2867 = vst.msk [vmem:[%s4920_s4 + $0x54] sm:$0xf] %vm2845_vm7, %v3105_v44 }

// kernel: _lambda_.11
= control target key start
LH: loop header
LB: loop body
LE: loop exit
PB: predicated region body
PF: predicated region fallthrough
CT: control target
= control target key end

     0   :  { %v1942_v1 = vmov 0   ;;  %vm99_vm0 = vcmask 523264   ;;  %vm311_vm1 = vsmask.f32 7424  ;;  %vm955_vm2 = vsmask.f32 5376  ;;  %s2429_s1 = inlined_call_operand.vmem [shape: bf16[576,256], index: 1, kind: input, shape index: {}]   ;;  %s2430_s0 = inlined_call_operand.vmem [shape: bf16[4,50,64], index: 0, kind: input, shape index: {}]   ;;  %s2431_s2 = inlined_call_operand.vmem [shape: f32[1,256], index: 2, kind: input, shape index: {}]   ;;  %s2432_s3 = inlined_call_operand.vmem [shape: bf16[44,256], index: 3, kind: output, shape index: {}]  }
   0x1   :  { %v1811_v0 = vld [vmem:[%s2429_s1 + $0x44] ss:$8 sps:$4 sm:$0xff]   ;;  %141 = vmatprep.mubr.bf16.mxu1 %v1942_v1  ;;  %722 = vmatprep.mubr.bf16.mxu0 %v1942_v1  ;;  %v1815_v3 = vld [vmem:[%s2429_s1 + $0x40] ss:$8 sps:$4 sm:$0xff]   ;;  %v1817_v5 = vld [vmem:[%s2429_s1 + $0x54] ss:$8 sps:$4 sm:$0xff]  }
   0x2   :  { %v1971_v2 = vld [vmem:[%s2429_s1 + $0x104] ss:$8 sps:$4 sm:$0xff]   ;;  %109 = vmatprep.subr.bf16.mxu1 %v1811_v0  ;;  %v1979_v4 = vld [vmem:[%s2429_s1 + $0x100] ss:$8 sps:$4 sm:$0xff]   ;;  %v1989_v6 = vld [vmem:[%s2429_s1 + $0x114] ss:$8 sps:$4 sm:$0xff]  }
   0x3   :  { %690 = vmatprep.subr.bf16.mxu0 %v1971_v2  ;;  %110 = vmatpush1.bf16.msra.mxu1 %v1815_v3  ;;  %v1821_v7 = vld [vmem:[%s2429_s1 + $0x50] ss:$8 sps:$4 sm:$0xff]   ;;  %v1823_v9 = vld [vmem:[%s2429_s1 + $0x64] ss:$8 sps:$4 sm:$0xff]   ;;  %v1827_v11 = vld [vmem:[%s2429_s1 + $0x60] ss:$8 sps:$4 sm:$0xff]  }
   0x4   :  { %691 = vmatpush1.bf16.msra.mxu0 %v1979_v4  ;;  %111 = vmatprep.subr.bf16.mxu1 %v1817_v5  ;;  %v1997_v8 = vld [vmem:[%s2429_s1 + $0x110] ss:$8 sps:$4 sm:$0xff]   ;;  %v2006_v10 = vld [vmem:[%s2429_s1 + $0x124] ss:$8 sps:$4 sm:$0xff]   ;;  %v2014_v12 = vld [vmem:[%s2429_s1 + $0x120] ss:$8 sps:$4 sm:$0xff]  }
   0x5   :  { %692 = vmatprep.subr.bf16.mxu0 %v1989_v6  ;;  %v1829_v13 = vld [vmem:[%s2429_s1 + $0x74] ss:$8 sps:$4 sm:$0xff]   ;;  %v1833_v15 = vld [vmem:[%s2429_s1 + $0x70] ss:$8 sps:$4 sm:$0xff]   ;;  %v1839_v18 = vld [vmem:[%s2429_s1 + $0x144] ss:$8 sps:$4 sm:$0xff]  }
   0x6   :  { %v2024_v14 = vld [vmem:[%s2429_s1 + $0x134] ss:$8 sps:$4 sm:$0xff]   ;;  %v2033_v16 = vld [vmem:[%s2429_s1 + $0x130] ss:$8 sps:$4 sm:$0xff]   ;;  %v1842_v20 = vld [vmem:[%s2429_s1 + $0x4] ss:$8 sps:$4 sm:$0xff]  }
   0x7   :  { %112 = vmatpush1.bf16.msra.mxu1 %v1821_v7  ;;  %v1835_v17 = vld [vmem:[%s2430_s0 + $0x1c] sm:$0xff]   ;;  %v1836_v19 = vld [vmem:[%s2430_s0 + $0x54] sm:$0xff]   ;;  %v1850_v25 = vld [vmem:[%s2429_s1 + $0x164] ss:$8 sps:$4 sm:$0xff]   ;;  %vm1311_vm3 = vcmask 1044480  }
   0x8   :  { %693 = vmatpush1.bf16.msra.mxu0 %v1997_v8  ;;  %113 = vmatprep.subr.bf16.mxu1 %v1823_v9  ;;  %v1837_v21 = vld [vmem:[%s2429_s1 + $0x140] ss:$8 sps:$4 sm:$0xff]   ;;  %v1845_v23 = vld [vmem:[%s2429_s1 + $0x154] ss:$8 sps:$4 sm:$0xff]   ;;  %v1843_v24 = vld [vmem:[%s2429_s1 + $0x150] ss:$8 sps:$4 sm:$0xff]  }
   0x9   :  { %694 = vmatprep.subr.bf16.mxu0 %v2006_v10  ;;  %v1840_v22 = vld [vmem:[%s2429_s1] ss:$8 sps:$4 sm:$0xff]   ;;  %v1851_v26 = vld [vmem:[%s2429_s1 + $0x10] ss:$8 sps:$4 sm:$0xff]   ;;  %v1853_v28 = vld [vmem:[%s2429_s1 + $0x14] ss:$8 sps:$4 sm:$0xff]  }
   0xa   :  { %v1846_v27 = vld [vmem:[%s2430_s0 + $0x24] sm:$0xff]   ;;  %v1847_v29 = vld [vmem:[%s2430_s0 + $0x5c] sm:$0xff]   ;;  %v1854_v36 = vld [vmem:[%s2429_s1 + $0x170] ss:$8 sps:$4 sm:$0xff]  }
   0xb   :  { %114 = vmatpush1.bf16.msra.mxu1 %v1827_v11  ;;  %v1848_v30 = vld [vmem:[%s2429_s1 + $0x160] ss:$8 sps:$4 sm:$0xff]   ;;  %v1856_v31 = vld [vmem:[%s2429_s1 + $0x174] ss:$8 sps:$4 sm:$0xff]   ;;  %v1860_v33 = vld [vmem:[%s2429_s1 + $0x24] ss:$8 sps:$4 sm:$0xff]  }
   0xc   :  { %695 = vmatpush1.bf16.msra.mxu0 %v2014_v12  ;;  %115 = vmatprep.subr.bf16.mxu1 %v1829_v13  ;;  %v1858_v32 = vld [vmem:[%s2429_s1 + $0x20] ss:$8 sps:$4 sm:$0xff]   ;;  %v2095_v34 = vld [vmem:[%s2430_s0 + $0x38] sm:$0xff]   ;;  %v1857_v40 = vld [vmem:[%s2430_s0 + $0x2c] sm:$0x3f]  }
   0xd   :  { %696 = vmatprep.subr.bf16.mxu0 %v2024_v14  ;;  %v2100_v35 = vld [vmem:[%s2430_s0 + $0x40] sm:$0xff]   ;;  %v777_v37 = vshrl.u32 %v2095_v34, 16  ;;  %v779_v38 = vshll.u32 %v2095_v34, 16  ;;  %v1868_v42 = vld [vmem:[%s2429_s1 + $0x34] ss:$8 sps:$4 sm:$0xff]  }
   0xe   :  { %v783_v39 = vshll.u32 %v2100_v35, 16  ;;  %v1865_v41 = vld [vmem:[%s2429_s1 + $0x184] ss:$8 sps:$4 sm:$0xff]   ;;  %v1866_v45 = vld [vmem:[%s2429_s1 + $0x30] ss:$8 sps:$4 sm:$0xff]   ;;  %v787_v50 = vshrl.u32 %v2100_v35, 16 }
   0xf   :  { %116 = vmatpush1.bf16.msra.mxu1 %v1833_v15  ;;  %v781_v43 = vrot.slane %v779_v38, 1  ;;  %v1863_v46 = vld [vmem:[%s2429_s1 + $0x180] ss:$8 sps:$4 sm:$0xff]   ;;  %v1632_v49 = vld [vmem:[%s2430_s0 + $0x4c] sm:$0x7] }
  0x10   :  { %697 = vmatpush1.bf16.msra.mxu0 %v2033_v16  ;;  %236 = vmatprep.subr.bf16.mxu1 %v1842_v20  ;;  %v785_v44 = vrot.slane %v783_v39, 1  ;;  %v2130_v48 = vld [vmem:[%s2430_s0 + $0x48] sm:$0xf]  ;;  %v1871_v51 = vld [vmem:[%s2429_s1 + $0x194] ss:$8 sps:$4 sm:$0xff]   ;;  %v2157_v60 = vld [vmem:[%s2430_s0] sm:$0xff]  }
  0x11   :  { %847 = vmatprep.subr.bf16.mxu0 %v1839_v18  ;;  %v782_v47 = vor.u32 %v781_v43, %v777_v37  ;;  %v1633_v52 = vcombine.low %v2130_v48, %v1632_v49  ;;  %v1876_v54 = vld [vmem:[%s2429_s1 + $0x84] ss:$8 sps:$4 sm:$0xff]   ;;  %v1869_v55 = vld [vmem:[%s2429_s1 + $0x190] ss:$8 sps:$4 sm:$0xff]   ;;  %v1874_v62 = vld [vmem:[%s2429_s1 + $0x80] ss:$8 sps:$4 sm:$0xff]  }
  0x12   :  { %1563 = vmatmul.mubr.msk.bf16.vlgmr.msra.gmra.mrb[0].mxu1 %vm99_vm0, %v1835_v17  ;;  %v789_v57 = vor.u32 %v787_v50, %v785_v44  ;;  %v1879_v59 = vld [vmem:[%s2429_s1 + $0x1a4] ss:$8 sps:$4 sm:$0xff]   ;;  %v1877_v63 = vld [vmem:[%s2429_s1 + $0x1a0] ss:$8 sps:$4 sm:$0xff]   ;;  %v1883_v0 = vld [vmem:[%s2429_s1 + $0x94] ss:$8 sps:$4 sm:$0xff]  }
  0x13   :  { %1629 = vmatmul.mubr.msk.bf16.vlgmr.msra.gmra.mrb[0].mxu0 %vm99_vm0, %v1836_v19  ;;  %237 = vmatpush1.bf16.msra.mxu1 %v1840_v22  ;;  %v786_v53 = vsel %vm311_vm1, %v782_v47, %v785_v44  ;;  %v791_v56 = vshll.u32 %v1633_v52, 16  ;;  %v1886_v3 = vld [vmem:[%s2429_s1 + $0x1b4] ss:$8 sps:$4 sm:$0xff]   ;;  %v922_v5 = vld [vmem:[%s2430_s0] sm:$0xc]  ;;  %v795_v13 = vshrl.u32 %v1633_v52, 16 }
  0x14   :  { %848 = vmatpush1.bf16.msra.mxu0 %v1837_v21  ;;  %151 = vmatprep.mubr.bf16.mxu1 %v1942_v1  ;;  %v1881_v7 = vld [vmem:[%s2429_s1 + $0x90] ss:$8 sps:$4 sm:$0xff]   ;;  %v2184_v11 = vld [vmem:[%s2430_s0 + $0x4] sm:$0xf]  ;;  %v2193_v17 = vld [vmem:[%s2430_s0 + $0x8] sm:$0xff]   ;;  %v314_v37 = vshll.u32 %v2157_v60, 16 }
  0x15   :  { %849 = vmatprep.subr.bf16.mxu0 %v1845_v23  ;;  %732 = vmatprep.mubr.bf16.mxu0 %v1942_v1  ;;  %v793_v58 = vrot.slane %v791_v56, 1  ;;  %v1884_v9 = vld [vmem:[%s2429_s1 + $0x1b0] ss:$8 sps:$4 sm:$0xff]   ;;  %v1645_v15 = vcombine.low %v922_v5, %v2184_v11  ;;  %v1891_v18 = vld [vmem:[%s2429_s1 + $0xa4] ss:$8 sps:$4 sm:$0xff]   ;;  %v965_v22 = vshrl.u32 %v2193_v17, 16 }
  0x16   :  { %238 = vmatprep.subr.bf16.mxu1 %v1853_v28  ;;  %v1896_v19 = vld [vmem:[%s2429_s1 + $0x1c4] ss:$8 sps:$4 sm:$0xff]   ;;  %v968_v23 = vshll.u32 %v2193_v17, 16  ;;  %v312_v47 = vshrl.u32 %v2157_v60, 16  ;;  %v1894_v50 = vld [vmem:[%s2429_s1 + $0x1c0] ss:$8 sps:$4 sm:$0xff]  }
  0x17   :  { %239 = vmatpush1.bf16.msra.mxu1 %v1851_v26  ;;  %v794_v61 = vsel %vm311_vm1, %v789_v57, %v793_v58  ;;  %v957_v20 = vshrl.u32 %v1645_v15, 16  ;;  %v960_v21 = vshll.u32 %v1645_v15, 16  ;;  %v1889_v26 = vld [vmem:[%s2429_s1 + $0xa0] ss:$8 sps:$4 sm:$0xff]   ;;  %v1906_v43 = vld [vmem:[%s2429_s1 + $0xc4] ss:$8 sps:$4 sm:$0xff]  }
  0x18   :  { %850 = vmatpush1.bf16.msra.mxu0 %v1843_v24  ;;  %240 = vmatprep.subr.bf16.mxu1 %v1860_v33  ;;  %v2208_v24 = vld [vmem:[%s2430_s0 + $0x8] sm:$0xff]   ;;  %v1899_v33 = vld [vmem:[%s2429_s1 + $0xb4] ss:$8 sps:$4 sm:$0xff]   ;;  %v2260_v56 = vld [vmem:[%s2430_s0 + $0x18] ss:$0 sps:$4 sm:$0x11]  }
  0x19   :  { %851 = vmatprep.subr.bf16.mxu0 %v1850_v25  ;;  %v797_v25 = vor.u32 %v795_v13, %v793_v58  ;;  %v962_v28 = vrot.slane %v960_v21, 3  ;;  %v318_v44 = vshll.u32 %v2208_v24, 16  ;;  %v1900_v58 = vld [vmem:[%s2429_s1 + $0x1d0] ss:$8 sps:$4 sm:$0xff]   ;;  %v983_v5 = vshll.u32 %v2260_v56, 16 }
  0x1a   :  { %1564 = vmatmul.mubr.msk.bf16.gmra.mrb[4].mxu1 %vm99_vm0, %v1846_v27  ;;  %v959_v27 = vrot.slane %v957_v20, 2  ;;  %v1920_v15 = vld [vmem:[%s2430_s0 + $0x1c] sm:$0xfc]  }
  0x1b   :  { %1630 = vmatmul.mubr.msk.bf16.gmra.mrb[4].mxu0 %vm99_vm0, %v1847_v29  ;;  %161 = vmatprep.mubr.bf16.mxu1 %v1942_v1  ;;  %v967_v29 = vrot.slane %v965_v22, 2  ;;  %v320_v57 = vrot.slane %v318_v44, 1  ;;  %v1913_v20 = vld [vmem:[%s2429_s1 + $0xd4] ss:$8 sps:$4 sm:$0xff]  }
  0x1c   :  { %852 = vmatpush1.bf16.msra.mxu0 %v1848_v30  ;;  %879 = vmatprep.mubr.bf16.mxu0 %v1942_v1  ;;  %v970_v30 = vrot.slane %v968_v23, 3  ;;  %v963_v38 = vor.u32 %v962_v28, %v959_v27  ;;  %v1916_v21 = vld [vmem:[%s2429_s1 + $0x1f4] ss:$8 sps:$4 sm:$0xff]   ;;  %v985_v23 = vrot.slane %v983_v5, 3  ;;  %v1148_v27 = vshll.u32 %v1920_v15, 16 }
  0x1d   :  { %853 = vmatprep.subr.bf16.mxu0 %v1856_v31  ;;  %241 = vmatpush1.bf16.msra.mxu1 %v1858_v32  ;;  %v2216_v31 = vld [vmem:[%s2430_s0 + $0x10] sm:$0xff]  }
  0x1e   :  { %242 = vmatprep.subr.bf16.mxu1 %v1868_v42  ;;  %v19_v32 = vld [vmem:[%s2430_s0 + $0x10] sm:$0xf]  ;;  %v971_v39 = vor.u32 %v970_v30, %v967_v29  ;;  %v2307_v30 = vld [vmem:[%s2430_s0 + $0x4c] sm:$0x3]  ;;  %v1927_v44 = vld [vmem:[%s2429_s1 + $0xf4] ss:$8 sps:$4 sm:$0xff]  }
  0x1f   :  { %v1897_v42 = vld [vmem:[%s2429_s1 + $0xb0] ss:$8 sps:$4 sm:$0xff]  }
  0x20   :  { %854 = vmatpush1.bf16.msra.mxu0 %v1854_v36  ;;  %v20_v36 = vld [vmem:[%s2430_s0 + $0x14] sm:$0x3]  ;;  %v972_v49 = vsel %vm955_vm2, %v963_v38, %v971_v39 }
  0x21   :  { %1036 = vmatprep.subr.bf16.mxu0 %v1865_v41  ;;  %243 = vmatpush1.bf16.msra.mxu1 %v1866_v45  ;;  %v977_v41 = vshll.u32 %v2216_v31, 16  ;;  %v1568_v45 = vcombine.low %v19_v32, %v20_v36 }
  0x22   :  { %1565 = vmatmul.mubr.msk.bf16.gmra.mrb[8].mxu1 %vm99_vm0, %v1857_v40  ;;  %382 = vmatprep.subr.bf16.mxu1 %v1876_v54  ;;  %v974_v40 = vshrl.u32 %v2216_v31, 16  ;;  %v1902_v54 = vld [vmem:[%s2429_s1 + $0x1d4] ss:$8 sps:$4 sm:$0xff]  }
  0x23   :  { %1642 = vmatmul.mubr.msk.bf16.vlgmr.msra.gmra.mrb[0].mxu0 %vm99_vm0, %v786_v53  ;;  %268 = vmatprep.mubr.bf16.mxu1 %v1942_v1  ;;  %v979_v53 = vrot.slane %v977_v41, 3 }
  0x24   :  { %1037 = vmatpush1.bf16.msra.mxu0 %v1863_v46  ;;  %889 = vmatprep.mubr.bf16.mxu0 %v1942_v1  ;;  %v299_v46 = vld [vmem:[%s2430_s0 + $0x14] sm:$0x7]  ;;  %v976_v52 = vrot.slane %v974_v40, 2 }
  0x25   :  { %1038 = vmatprep.subr.bf16.mxu0 %v1871_v51  ;;  %v316_v51 = vrot.slane %v314_v37, 1 }
  0x28   :  { %1039 = vmatpush1.bf16.msra.mxu0 %v1869_v55  ;;  %v2253_v55 = vcombine.low %v19_v32, %v299_v46  ;;  %v1924_v32 = vld [vmem:[%s2429_s1 + $0x204] ss:$8 sps:$4 sm:$0xff]  }
  0x29   :  { %1040 = vmatprep.subr.bf16.mxu0 %v1879_v59  ;;  %v317_v59 = vor.u32 %v316_v51, %v312_v47  ;;  %v1925_v51 = vld [vmem:[%s2429_s1 + $0xf0] ss:$8 sps:$4 sm:$0xff]  }
  0x2a   :  { %1577 = vmatmul.mubr.msk.bf16.vlgmr.msra.gmra.mrb[0].mxu1 %vm99_vm0, %v2157_v60  ;;  %v980_v60 = vor.u32 %v979_v53, %v976_v52 }
  0x2b   :  { %1643 = vmatmul.mubr.msk.bf16.gmra.mrb[4].mxu0 %vm99_vm0, %v794_v61  ;;  %383 = vmatpush1.bf16.msra.mxu1 %v1874_v62  ;;  %v1909_v61 = vld [vmem:[%s2429_s1 + $0x1e4] ss:$8 sps:$4 sm:$0xff]   ;;  %v1904_v62 = vld [vmem:[%s2429_s1 + $0xc0] ss:$8 sps:$4 sm:$0xff]  }
  0x2c   :  { %1041 = vmatpush1.bf16.msra.mxu0 %v1877_v63  ;;  %278 = vmatprep.mubr.bf16.mxu1 %v1942_v1  ;;  %v1907_v63 = vld [vmem:[%s2429_s1 + $0x1e0] ss:$8 sps:$4 sm:$0xff]   ;;  %v981_v13 = vsel %vm955_vm2, %v971_v39, %v980_v60  ;;  %v986_v37 = vsel %vm955_vm2, %v980_v60, %v985_v23  ;;  %v1150_v39 = vrot.slane %v1148_v27, 3 }
  0x2d   :  { %899 = vmatprep.mubr.bf16.mxu0 %v1942_v1  ;;  %384 = vmatprep.subr.bf16.mxu1 %v1883_v0  ;;  %v322_v0 = vshrl.u32 %v2208_v24, 16 }
  0x2e   :  { %1042 = vmatprep.subr.bf16.mxu0 %v1886_v3  ;;  %v326_v3 = vshll.u32 %v2253_v55, 16 }
  0x2f   :  { %385 = vmatpush1.bf16.msra.mxu1 %v1881_v7  ;;  %v1921_v7 = vld [vmem:[%s2430_s0 + $0x24] sm:$0xff]   ;;  %v324_v22 = vor.u32 %v322_v0, %v320_v57 }
  0x30   :  { %1043 = vmatpush1.bf16.msra.mxu0 %v1884_v9  ;;  %386 = vmatprep.subr.bf16.mxu1 %v1891_v18  ;;  %v321_v9 = vsel %vm311_vm1, %v317_v59, %v320_v57  ;;  %v328_v18 = vrot.slane %v326_v3, 1  ;;  %v1153_v28 = vshrl.u32 %v1921_v7, 16  ;;  %v1156_v29 = vshll.u32 %v1921_v7, 16  ;;  %v1928_v59 = vld [vmem:[%s2429_s1 + $0x210] ss:$8 sps:$4 sm:$0xff]  }
  0x31   :  { %1224 = vmatprep.subr.bf16.mxu0 %v1896_v19  ;;  %v1911_v19 = vld [vmem:[%s2429_s1 + $0xd0] ss:$8 sps:$4 sm:$0xff]   ;;  %v1938_v3 = vld [vmem:[%s2429_s1 + $0x234] ss:$8 sps:$4 sm:$0xff]  }
  0x32   :  { %1578 = vmatmul.mubr.msk.bf16.gmra.mrb[4].mxu1 %vm99_vm0, %v2208_v24  ;;  %v1914_v24 = vld [vmem:[%s2429_s1 + $0x1f0] ss:$8 sps:$4 sm:$0xff]   ;;  %v329_v36 = vsel %vm311_vm1, %v324_v22, %v328_v18  ;;  %v1155_v40 = vrot.slane %v1153_v28, 2  ;;  %v1158_v41 = vrot.slane %v1156_v29, 3 }
  0x33   :  { %1644 = vmatmul.mubr.msk.bf16.gmra.mrb[8].mxu0 %vm99_vm0, %v797_v25  ;;  %288 = vmatprep.mubr.bf16.mxu1 %v1942_v1  ;;  %v1919_v25 = vld [vmem:[%s2429_s1 + $0xe4] ss:$8 sps:$4 sm:$0xff]   ;;  %v1936_v7 = vld [vmem:[%s2429_s1 + $0x230] ss:$8 sps:$4 sm:$0xff]  }
  0x34   :  { %1068 = vmatprep.mubr.bf16.mxu0 %v1942_v1  ;;  %387 = vmatpush1.bf16.msra.mxu1 %v1889_v26  ;;  %v1145_v26 = vshrl.u32 %v1920_v15, 16  ;;  %v1159_v47 = vor.u32 %v1158_v41, %v1155_v40  ;;  %v1445_v15 = vlaneseq }
  0x35   :  { %388 = vmatprep.subr.bf16.mxu1 %v1899_v33  ;;  %v1600_v33 = vcombine.low %v2130_v48, %v2307_v30 }
  0x36   :  { %v1147_v38 = vrot.slane %v1145_v26, 2 }
  0x38   :  { %389 = vmatpush1.bf16.msra.mxu1 %v1897_v42  ;;  %v1931_v42 = vld [vmem:[%s2430_s0 + $0x2c] sm:$0xff]   ;;  %v1151_v46 = vor.u32 %v1150_v39, %v1147_v38 }
  0x39   :  { %536 = vmatprep.subr.bf16.mxu1 %v1906_v43  ;;  %v1917_v43 = vld [vmem:[%s2429_s1 + $0xe0] ss:$8 sps:$4 sm:$0xff]  }
  0x3a   :  { %1579 = vmatmul.mubr.msk.bf16.gmra.mrb[8].mxu1 %vm99_vm0, %v1568_v45  ;;  %v330_v45 = vshrl.u32 %v2253_v55, 16  ;;  %v1160_v53 = vsel %vm955_vm2, %v1151_v46, %v1159_v47 }
  0x3b   :  { %1657 = vmatmul.mubr.msk.bf16.vlgmr.msra.gmra.mrb[0].mxu0 %vm99_vm0, %v972_v49  ;;  %414 = vmatprep.mubr.bf16.mxu1 %v1942_v1  ;;  %v1162_v49 = vshrl.u32 %v1931_v42, 16 }
  0x3c   :  { %1225 = vmatpush1.bf16.msra.mxu0 %v1894_v50  ;;  %1078 = vmatprep.mubr.bf16.mxu0 %v1942_v1  ;;  %v1165_v50 = vshll.u32 %v1931_v42, 16  ;;  %v332_v52 = vor.u32 %v330_v45, %v328_v18  ;;  %v1446_v18 = vshrl.u32 %v1445_v15, 7 }
  0x3d   :  { %1226 = vmatprep.subr.bf16.mxu0 %v1902_v54  ;;  %v1922_v54 = vld [vmem:[%s2429_s1 + $0x200] ss:$8 sps:$4 sm:$0xff]   ;;  %v1164_v55 = vrot.slane %v1162_v49, 2 }
  0x3e   :  { %v1167_v57 = vrot.slane %v1165_v50, 3  ;;  %v1447_v23 = vsub.s32 0, %v1446_v18 }
  0x40   :  { %1227 = vmatpush1.bf16.msra.mxu0 %v1900_v58  ;;  %v1930_v58 = vld [vmem:[%s2429_s1 + $0x214] ss:$8 sps:$4 sm:$0xff]   ;;  %v1168_v60 = vor.u32 %v1167_v57, %v1164_v55 }
  0x41   :  { %1228 = vmatprep.subr.bf16.mxu0 %v1909_v61  ;;  %v1935_v61 = vld [vmem:[%s2430_s0 + $0x34] ss:$0 sps:$4 sm:$0x11]  }
  0x42   :  { %1589 = vmatmul.mubr.msk.bf16.vlgmr.msra.gmra.mrb[0].mxu1 %vm99_vm0, %v321_v9  ;;  %v1171_v0 = vshll.u32 %v1935_v61, 16  ;;  %v1299_v9 = vld [vmem:[%s2430_s0] sm:$0x8] }
  0x43   :  { %1658 = vmatmul.mubr.msk.bf16.gmra.mrb[4].mxu0 %vm99_vm0, %v981_v13  ;;  %537 = vmatpush1.bf16.msra.mxu1 %v1904_v62  ;;  %v1169_v62 = vsel %vm955_vm2, %v1159_v47, %v1168_v60 }
  0x44   :  { %1229 = vmatpush1.bf16.msra.mxu0 %v1907_v63  ;;  %424 = vmatprep.mubr.bf16.mxu1 %v1942_v1  ;;  %v1932_v63 = vld [vmem:[%s2429_s1 + $0x220] ss:$8 sps:$4 sm:$0xff]   ;;  %v1173_v5 = vrot.slane %v1171_v0, 3 }
  0x45   :  { %1088 = vmatprep.mubr.bf16.mxu0 %v1942_v1  ;;  %538 = vmatprep.subr.bf16.mxu1 %v1913_v20 }
  0x46   :  { %1230 = vmatprep.subr.bf16.mxu0 %v1916_v21 }
  0x47   :  { %539 = vmatpush1.bf16.msra.mxu1 %v1911_v19 }
  0x48   :  { %1231 = vmatpush1.bf16.msra.mxu0 %v1914_v24  ;;  %540 = vmatprep.subr.bf16.mxu1 %v1919_v25 }
  0x49   :  { %1368 = vmatprep.subr.bf16.mxu0 %v1924_v32 }
  0x4a   :  { %1590 = vmatmul.mubr.msk.bf16.gmra.mrb[4].mxu1 %vm99_vm0, %v329_v36 }
  0x4b   :  { %1659 = vmatmul.mubr.msk.bf16.gmra.mrb[8].mxu0 %vm99_vm0, %v986_v37  ;;  %434 = vmatprep.mubr.bf16.mxu1 %v1942_v1 }
  0x4c   :  { %1256 = vmatprep.mubr.bf16.mxu0 %v1942_v1  ;;  %541 = vmatpush1.bf16.msra.mxu1 %v1917_v43 }
  0x4d   :  { %542 = vmatprep.subr.bf16.mxu1 %v1927_v44 }
  0x50   :  { %543 = vmatpush1.bf16.msra.mxu1 %v1925_v51 }
  0x51   :  { %1706 = vmatprep.subr.bf16.mxu1 %v1971_v2  ;;  %v1934_v2 = vld [vmem:[%s2429_s1 + $0x224] ss:$8 sps:$4 sm:$0xff]  }
  0x52   :  { %1591 = vmatmul.mubr.msk.bf16.gmra.mrb[8].mxu1 %vm99_vm0, %v332_v52 }
  0x53   :  { %1679 = vmatmul.mubr.msk.bf16.vlgmr.msra.gmra.mrb[0].mxu0 %vm99_vm0, %v1160_v53  ;;  %568 = vmatprep.mubr.bf16.mxu1 %v1942_v1 }
  0x54   :  { %1369 = vmatpush1.bf16.msra.mxu0 %v1922_v54  ;;  %1266 = vmatprep.mubr.bf16.mxu0 %v1942_v1 }
  0x55   :  { %1370 = vmatprep.subr.bf16.mxu0 %v1930_v58 }
  0x58   :  { %1371 = vmatpush1.bf16.msra.mxu0 %v1928_v59 }
  0x59   :  { %1372 = vmatprep.subr.bf16.mxu0 %v1934_v2 }
  0x5a   :  { %1609 = vmatmul.mubr.msk.bf16.vlgmr.msra.gmra.mrb[0].mxu1 %vm99_vm0, %v2095_v34  ;;  %v1174_v34 = vsel %vm955_vm2, %v1168_v60, %v1173_v5 }
  0x5b   :  { %1680 = vmatmul.mubr.msk.bf16.gmra.mrb[4].mxu0 %vm99_vm0, %v1169_v62  ;;  %1710 = vmatpush1.bf16.msra.mxu1 %v1979_v4  ;;  %v1682_v4 = vcombine.low %v1299_v9, %v2184_v11 }
  0x5c   :  { %1373 = vmatpush1.bf16.msra.mxu0 %v1932_v63  ;;  %578 = vmatprep.mubr.bf16.mxu1 %v1942_v1 }
  0x5d   :  { %1276 = vmatprep.mubr.bf16.mxu0 %v1942_v1  ;;  %1374 = vmatprep.subr.bf16.mxu0 %v1938_v3  ;;  %v1312_v13 = vrot.slane %v1682_v4, 3 }
  0x5e   :  { %1707 = vmatprep.subr.bf16.mxu1 %v1989_v6  ;;  %v1313_v6 = vrot.slane %v2193_v17, 3 }
  0x5f   :  { %1711 = vmatpush1.bf16.msra.mxu1 %v1997_v8 }
  0x60   :  { %1375 = vmatpush1.bf16.msra.mxu0 %v1936_v7  ;;  %1708 = vmatprep.subr.bf16.mxu1 %v2006_v10  ;;  %v1314_v8 = vsel %vm1311_vm3, %v1312_v13, %v1313_v6  ;;  %v1315_v10 = vrot.slane %v2216_v31, 3 }
  0x62   :  { %1610 = vmatmul.mubr.msk.bf16.gmra.mrb[4].mxu1 %vm99_vm0, %v2100_v35 }
  0x63   :  { %1681 = vmatmul.mubr.msk.bf16.gmra.mrb[8].mxu0 %vm99_vm0, %v1174_v34  ;;  %588 = vmatprep.mubr.bf16.mxu1 %v1942_v1 }
  0x64   :  { %1400 = vmatprep.mubr.bf16.mxu0 %v1942_v1  ;;  %1712 = vmatpush1.bf16.msra.mxu1 %v2014_v12  ;;  %v1316_v12 = vsel %vm1311_vm3, %v1313_v6, %v1315_v10 }
  0x65   :  { %1709 = vmatprep.subr.bf16.mxu1 %v2024_v14  ;;  %v1941_v14 = vld [vmem:[%s2430_s0 + $0x64] sm:$0x3f]  }
  0x68   :  { %1713 = vmatpush1.bf16.msra.mxu1 %v2033_v16  ;;  %v1317_v16 = vrot.slane %v2260_v56, 3  ;;  %v1451_v56 = vsub.s32 1, %v1446_v18 }
  0x6a   :  { %1611 = vmatmul.mubr.msk.bf16.gmra.mrb[8].mxu1 %vm99_vm0, %v1600_v33  ;;  %v1318_v35 = vsel %vm1311_vm3, %v1315_v10, %v1317_v16 }
  0x6b   :  { %1691 = vmatmul.mubr.msk.bf16.vlgmr.msra.gmra.mrb[0].mxu0 %vm99_vm0, %v1314_v8  ;;  %742 = vmatprep.mubr.bf16.mxu1 %v1942_v1 }
  0x6c   :  { %1410 = vmatprep.mubr.bf16.mxu0 %v1942_v1 }
  0x73   :  { %1692 = vmatmul.mubr.msk.bf16.gmra.mrb[4].mxu0 %vm99_vm0, %v1316_v12 }
  0x74   :  { %1420 = vmatprep.mubr.bf16.mxu0 %v1942_v1  ;;  %v1443_v1 = vld [vmem:[%s2431_s2] sm:$0x3] }
  0x75   :  { %v1448_v24 = vrot.slane %v1443_v1, %v1447_v23  ;;  %v1452_v26 = vrot.slane %v1443_v1, %v1451_v56 }
  0x76   :  { %1631 = vmatmul.mubr.msk.bf16.vlgmr.msra.gmra.mrb[8].mxu1 %vm99_vm0, %v1941_v14 }
  0x7b   :  { %1693 = vmatmul.mubr.msk.bf16.gmra.mrb[8].mxu0 %vm99_vm0, %v1318_v35 }
 0x12d   :  { %v570_v48 = vpop.f32.mrb[0].mxu1 }
 0x12e   :  { %v572_v11 = vpop.f32.mrb[1].mxu1 }
 0x12f   :  { %v574_v17 = vpop.f32.mrb[2].mxu1 }
 0x130   :  { %v576_v31 = vpop.f32.mrb[3].mxu1 }
 0x135   :  { %v580_v19 = vpop.f32.mrb[4].mxu1 }
 0x136   :  { %v582_v20 = vpop.f32.mrb[5].mxu1 }
 0x137   :  { %v584_v21 = vpop.f32.mrb[6].mxu1 }
 0x138   :  { %v586_v22 = vpop.f32.mrb[7].mxu1 }
 0x13e   :  { %v1402_v25 = vpop.f32.mrb[0].mxu0 }
 0x13f   :  { %v1714_v27 = vadd.f32 %v1402_v25, %v570_v48  ;;  %v1404_v28 = vpop.f32.mrb[1].mxu0 }
 0x140   :  { %v1715_v29 = vadd.f32 %v1404_v28, %v572_v11  ;;  %v1406_v30 = vpop.f32.mrb[2].mxu0 }
 0x141   :  { %v1455_v32 = vadd.f32 %v1714_v27, %v1448_v24  ;;  %v1716_v33 = vadd.f32 %v1406_v30, %v574_v17  ;;  %v1408_v36 = vpop.f32.mrb[3].mxu0 }
 0x142   :  { %v1456_v37 = vadd.f32 %v1715_v29, %v1452_v26  ;;  %v1717_v38 = vadd.f32 %v1408_v36, %v576_v31 }
 0x143   :  { %v1472_v39 = vmax.f32 %v1455_v32, 0.0  ;;  %v1457_v40 = vadd.f32 %v1716_v33, %v1448_v24 }
 0x144   :  { %v1458_v41 = vadd.f32 %v1717_v38, %v1452_v26 }
 0x145   :  { %v1700_v42 = vpack.c.bf16 %v1456_v37, %v1472_v39  ;;  %v1474_v43 = vmax.f32 %v1457_v40, 0.0 }
 0x146   :  { %v1412_v44 = vpop.f32.mrb[4].mxu0 }
 0x147   :  { %1536 = vst [vmem:[%s2432_s3] sm:$0xff] %v1700_v42  ;;  %v1701_v45 = vpack.c.bf16 %v1458_v41, %v1474_v43  ;;  %v1718_v46 = vadd.f32 %v1412_v44, %v580_v19  ;;  %v1414_v47 = vpop.f32.mrb[5].mxu0 }
 0x148   :  { %v1719_v49 = vadd.f32 %v1414_v47, %v582_v20  ;;  %v1416_v50 = vpop.f32.mrb[6].mxu0 }
 0x149   :  { %1537 = vst [vmem:[%s2432_s3 + $0x8] sm:$0xff] %v1701_v45  ;;  %v1459_v51 = vadd.f32 %v1718_v46, %v1448_v24  ;;  %v1720_v52 = vadd.f32 %v1416_v50, %v584_v21  ;;  %v1418_v53 = vpop.f32.mrb[7].mxu0  ;;  %v744_v57 = vpop.f32.mrb[8].mxu1 }
 0x14a   :  { %v1460_v54 = vadd.f32 %v1719_v49, %v1452_v26  ;;  %v1721_v55 = vadd.f32 %v1418_v53, %v586_v22  ;;  %v746_v60 = vpop.f32.mrb[9].mxu1 }
 0x14b   :  { %v1476_v58 = vmax.f32 %v1459_v51, 0.0  ;;  %v1461_v59 = vadd.f32 %v1720_v52, %v1448_v24  ;;  %v748_v2 = vpop.f32.mrb[10].mxu1 }
 0x14c   :  { %v1462_v61 = vadd.f32 %v1721_v55, %v1452_v26  ;;  %v750_v0 = vpop.f32.mrb[11].mxu1 }
 0x14d   :  { %v1702_v62 = vpack.c.bf16 %v1460_v54, %v1476_v58  ;;  %v1478_v63 = vmax.f32 %v1461_v59, 0.0 }
 0x14e   :  { %v1422_v3 = vpop.f32.mrb[8].mxu0 }
 0x14f   :  { %1538 = vst [vmem:[%s2432_s3 + $0x10] sm:$0xff] %v1702_v62  ;;  %v1703_v5 = vpack.c.bf16 %v1462_v61, %v1478_v63  ;;  %v1722_v7 = vadd.f32 %v1422_v3, %v744_v57  ;;  %v1424_v9 = vpop.f32.mrb[9].mxu0 }
 0x150   :  { %v1723_v34 = vadd.f32 %v1424_v9, %v746_v60  ;;  %v1426_v4 = vpop.f32.mrb[10].mxu0 }
 0x151   :  { %1539 = vst [vmem:[%s2432_s3 + $0x18] sm:$0xff] %v1703_v5  ;;  %v1463_v13 = vadd.f32 %v1722_v7, %v1448_v24  ;;  %v1724_v6 = vadd.f32 %v1426_v4, %v748_v2  ;;  %v1428_v8 = vpop.f32.mrb[11].mxu0 }
 0x152   :  { %v1464_v10 = vadd.f32 %v1723_v34, %v1452_v26  ;;  %v1725_v12 = vadd.f32 %v1428_v8, %v750_v0 }
 0x153   :  { %v1480_v14 = vmax.f32 %v1463_v13, 0.0  ;;  %v1465_v16 = vadd.f32 %v1724_v6, %v1448_v24 }
 0x154   :  { %v1466_v35 = vadd.f32 %v1725_v12, %v1452_v26 }
 0x155   :  { %v1704_v48 = vpack.c.bf16 %v1464_v10, %v1480_v14  ;;  %v1482_v11 = vmax.f32 %v1465_v16, 0.0 }
 0x157   :  { %1540 = vst [vmem:[%s2432_s3 + $0x20] sm:$0xff] %v1704_v48  ;;  %v1705_v17 = vpack.c.bf16 %v1466_v35, %v1482_v11 }
 0x159   :  { %1541 = vst [vmem:[%s2432_s3 + $0x28] sm:$0x33] %v1705_v17 }

// kernel: _lambda_.12
= control target key start
LH: loop header
LB: loop body
LE: loop exit
PB: predicated region body
PF: predicated region fallthrough
CT: control target
= control target key end

     0   :  { %vm79_vm0 = vsmask.f32 7424  ;;  %vm706_vm1 = vsmask.f32 4352  ;;  %vm525_vm2 = vcmask 1044480   ;;  %vm368_vm3 = vcmask 1046528   ;;  %s2742_s1 = inlined_call_operand.vmem [shape: bf16[1152,128], index: 1, kind: input, shape index: {}]   ;;  %s2743_s0 = inlined_call_operand.vmem [shape: bf16[1,72,128], index: 0, kind: input, shape index: {}]   ;;  %s2744_s3 = inlined_call_operand.vmem [shape: bf16[58,128], index: 3, kind: input, shape index: {}]   ;;  %s2745_s2 = inlined_call_operand.vmem [shape: f32[1,128], index: 2, kind: input, shape index: {}]   ;;  %s2746_s4 = inlined_call_operand.vmem [shape: bf16[58,128], index: 4, kind: output, shape index: {}]  }
   0x1   :  { %v2143_v0 = vld [vmem:[%s2742_s1 + $0x40] sm:$0xff]   ;;  %v2145_v2 = vld [vmem:[%s2742_s1 + $0x48] sm:$0xff]   ;;  %v2147_v4 = vld [vmem:[%s2742_s1 + $0x50] sm:$0xff]   ;;  %vm1041_vm4 = vcmask 1045504   ;;  %vm1194_vm5 = vsmask.f32 5376 }
   0x2   :  { %v2144_v1 = vld [vmem:[%s2742_s1 + $0x100] sm:$0xff]   ;;  %1847 = vmatprep.subr.bf16.mxu1 %v2143_v0  ;;  %v2146_v3 = vld [vmem:[%s2742_s1 + $0x108] sm:$0xff]   ;;  %v2148_v5 = vld [vmem:[%s2742_s1 + $0x110] sm:$0xff]  }
   0x3   :  { %1943 = vmatprep.subr.bf16.mxu0 %v2144_v1  ;;  %1848 = vmatpush3.bf16.msra.mxu1 %v2143_v0  ;;  %v2149_v6 = vld [vmem:[%s2742_s1 + $0x58] sm:$0xff]   ;;  %v2151_v8 = vld [vmem:[%s2742_s1 + $0x60] sm:$0xff]   ;;  %v2153_v10 = vld [vmem:[%s2742_s1 + $0x68] sm:$0xff]  }
   0x4   :  { %1944 = vmatpush3.bf16.msra.mxu0 %v2144_v1  ;;  %1849 = vmatprep.subr.bf16.mxu1 %v2145_v2  ;;  %v2150_v7 = vld [vmem:[%s2742_s1 + $0x118] sm:$0xff]   ;;  %v2152_v9 = vld [vmem:[%s2742_s1 + $0x120] sm:$0xff]   ;;  %v2154_v11 = vld [vmem:[%s2742_s1 + $0x128] sm:$0xff]  }
   0x5   :  { %1945 = vmatprep.subr.bf16.mxu0 %v2146_v3  ;;  %v18_v12 = vld [vmem:[%s2743_s0] sm:$0xf]  ;;  %v2303_v13 = vld [vmem:[%s2743_s0 + $0x4] sm:$0xf]  ;;  %v2311_v15 = vld [vmem:[%s2743_s0 + $0x8] sm:$0xff]  }
   0x6   :  { %v2306_v14 = vcombine.low %v18_v12, %v2303_v13  ;;  %v2155_v16 = vld [vmem:[%s2742_s1 + $0x70] sm:$0xff]   ;;  %v658_v17 = vld [vmem:[%s2743_s0] sm:$0x8]  ;;  %v88_v21 = vshll.u32 %v2311_v15, 16  ;;  %v2328_v22 = vld [vmem:[%s2743_s0 + $0x4] sm:$0xf] }
   0x7   :  { %1850 = vmatpush3.bf16.msra.mxu1 %v2145_v2  ;;  %v2156_v18 = vld [vmem:[%s2742_s1 + $0x130] sm:$0xff]   ;;  %v2333_v23 = vld [vmem:[%s2743_s0 + $0x8] sm:$0xf]  ;;  %v2338_v24 = vld [vmem:[%s2743_s0 + $0xc] sm:$0xf]  ;;  %v1638_v26 = vcombine.low %v658_v17, %v2328_v22  ;;  %v92_v37 = vshrl.u32 %v2311_v15, 16 }
   0x8   :  { %1946 = vmatpush3.bf16.msra.mxu0 %v2146_v3  ;;  %1851 = vmatprep.subr.bf16.mxu1 %v2147_v4  ;;  %v81_v19 = vshrl.u32 %v2306_v14, 16  ;;  %v83_v20 = vshll.u32 %v2306_v14, 16  ;;  %v2343_v25 = vld [vmem:[%s2743_s0 + $0x10] sm:$0xf]  ;;  %v90_v28 = vrot.slane %v88_v21, 1  ;;  %v1639_v29 = vcombine.low %v2333_v23, %v2338_v24  ;;  %v2157_v30 = vld [vmem:[%s2742_s1 + $0x78] sm:$0xff]  }
   0x9   :  { %1947 = vmatprep.subr.bf16.mxu0 %v2148_v5  ;;  %v708_v31 = vshrl.u32 %v1638_v26, 16  ;;  %v711_v32 = vshll.u32 %v1638_v26, 16  ;;  %v2354_v36 = vld [vmem:[%s2743_s0 + $0x10] sm:$0xff]   ;;  %v2158_v42 = vld [vmem:[%s2742_s1 + $0x138] sm:$0xff]   ;;  %v2161_v52 = vld [vmem:[%s2742_s1] sm:$0xff]  }
   0xa   :  { %v85_v27 = vrot.slane %v83_v20, 1  ;;  %v716_v34 = vshrl.u32 %v1639_v29, 16  ;;  %v719_v35 = vshll.u32 %v1639_v29, 16  ;;  %v2360_v38 = vld [vmem:[%s2743_s0 + $0x14] sm:$0xf]  ;;  %v96_v47 = vshll.u32 %v2354_v36, 16 }
   0xb   :  { %1852 = vmatpush3.bf16.msra.mxu1 %v2147_v4  ;;  %v710_v39 = vrot.slane %v708_v31, 3  ;;  %v713_v40 = vrot.slane %v711_v32, 4  ;;  %v1640_v41 = vcombine.low %v2343_v25, %v2360_v38  ;;  %v94_v51 = vor.u32 %v92_v37, %v90_v28  ;;  %v2165_v57 = vld [vmem:[%s2742_s1 + $0x140] sm:$0xff]   ;;  %v2168_v61 = vld [vmem:[%s2742_s1 + $0x8] sm:$0xff]   ;;  %v2170_v63 = vld [vmem:[%s2742_s1 + $0x10] sm:$0xff]  }
   0xc   :  { %1948 = vmatpush3.bf16.msra.mxu0 %v2148_v5  ;;  %1853 = vmatprep.subr.bf16.mxu1 %v2149_v6  ;;  %v86_v33 = vor.u32 %v85_v27, %v81_v19  ;;  %v718_v44 = vrot.slane %v716_v34, 3  ;;  %v721_v45 = vrot.slane %v719_v35, 4  ;;  %v98_v53 = vrot.slane %v96_v47, 1  ;;  %v2169_v62 = vld [vmem:[%s2742_s1 + $0x148] sm:$0xff]   ;;  %v2391_v1 = vld [vmem:[%s2743_s0 + $0x18] sm:$0xf] }
   0xd   :  { %1949 = vmatprep.subr.bf16.mxu0 %v2150_v7  ;;  %v714_v46 = vor.u32 %v713_v40, %v710_v39  ;;  %v725_v48 = vshrl.u32 %v1640_v41, 16  ;;  %v728_v49 = vshll.u32 %v1640_v41, 16  ;;  %v100_v0 = vshrl.u32 %v2354_v36, 16  ;;  %v42_v2 = vld [vmem:[%s2743_s0 + $0x1c] sm:$0x3]  ;;  %v2171_v3 = vld [vmem:[%s2742_s1 + $0x150] sm:$0xff]  }
   0xe   :  { %v91_v43 = vsel %vm79_vm0, %v86_v33, %v90_v28  ;;  %v722_v50 = vor.u32 %v721_v45, %v718_v44  ;;  %v99_v59 = vsel %vm79_vm0, %v94_v51, %v98_v53  ;;  %v2400_v4 = vcombine.low %v2391_v1, %v42_v2  ;;  %v664_v5 = vld [vmem:[%s2743_s0 + $0x18] sm:$0xf]  ;;  %v2174_v31 = vld [vmem:[%s2742_s1 + $0x20] sm:$0xff]   ;;  %v2176_v41 = vld [vmem:[%s2742_s1 + $0x28] sm:$0xff]  }
   0xf   :  { %1854 = vmatpush3.bf16.msra.mxu1 %v2149_v6  ;;  %1863 = vmatprep.mubr.bf16.mxu1 %v91_v43  ;;  %v727_v54 = vrot.slane %v725_v48, 3  ;;  %v730_v55 = vrot.slane %v728_v49, 4  ;;  %v2408_v6 = vld [vmem:[%s2743_s0 + $0x1c] sm:$0xf]  ;;  %v2175_v33 = vld [vmem:[%s2742_s1 + $0x160] sm:$0xff]   ;;  %v527_v34 = vrot.slane %v2311_v15, 3  ;;  %v1651_v39 = vcombine.low %v2328_v22, %v2333_v23 }
  0x10   :  { %1950 = vmatpush3.bf16.msra.mxu0 %v2150_v7  ;;  %1855 = vmatprep.subr.bf16.mxu1 %v2151_v8  ;;  %v723_v56 = vsel %vm706_vm1, %v714_v46, %v722_v50  ;;  %v102_v7 = vor.u32 %v100_v0, %v98_v53  ;;  %v2173_v20 = vld [vmem:[%s2742_s1 + $0x158] sm:$0xff]   ;;  %v529_v40 = vrot.slane %v2354_v36, 3  ;;  %v2455_v22 = vcombine.low %v2338_v24, %v2343_v25  ;;  %v2179_v43 = vld [vmem:[%s2742_s1 + $0x30] sm:$0xff]   ;;  %v2185_v48 = vld [vmem:[%s2742_s1 + $0x80] sm:$0xff]  }
  0x11   :  { %1951 = vmatprep.subr.bf16.mxu0 %v2152_v9  ;;  %1959 = vmatprep.mubr.bf16.mxu0 %v723_v56  ;;  %v731_v58 = vor.u32 %v730_v55, %v727_v54  ;;  %v2461_v44 = vcombine.low %v2360_v38, %v664_v5  ;;  %v2181_v45 = vld [vmem:[%s2742_s1 + $0x170] sm:$0xff]   ;;  %v2183_v25 = vld [vmem:[%s2742_s1 + $0x38] sm:$0xff]   ;;  %v2187_v49 = vld [vmem:[%s2742_s1 + $0x180] sm:$0xff]  }
  0x12   :  { %v1376_v46 = vrot.slane %v2455_v22, 3  ;;  %v2184_v47 = vld [vmem:[%s2742_s1 + $0x178] sm:$0xff]   ;;  %v348_v51 = vld [vmem:[%s2743_s0] sm:$0xe]  ;;  %v2189_v53 = vld [vmem:[%s2742_s1 + $0x188] sm:$0xff]   ;;  %v1043_v0 = vrot.slane %v2455_v22, 2 }
  0x13   :  { %1856 = vmatpush3.bf16.msra.mxu1 %v2151_v8  ;;  %v732_v60 = vsel %vm706_vm1, %v722_v50, %v731_v58  ;;  %v104_v8 = vshll.u32 %v2400_v4, 16  ;;  %v1378_v24 = vrot.slane %v2461_v44, 3  ;;  %v2188_v50 = vld [vmem:[%s2742_s1 + $0x88] sm:$0xff]   ;;  %v1619_v54 = vcombine.low %v348_v51, %v2303_v13  ;;  %v25_v55 = vld [vmem:[%s2743_s0 + $0x1c] sm:$0x1] }
  0x14   :  { %1952 = vmatpush3.bf16.msra.mxu0 %v2152_v9  ;;  %1857 = vmatprep.subr.bf16.mxu1 %v2153_v10  ;;  %v1641_v9 = vcombine.low %v664_v5, %v2408_v6  ;;  %v2192_v2 = vld [vmem:[%s2742_s1 + $0x98] sm:$0xff]  }
  0x15   :  { %1953 = vmatprep.subr.bf16.mxu0 %v2154_v11  ;;  %v106_v17 = vrot.slane %v104_v8, 1  ;;  %v2476_v38 = vsel %vm525_vm2, %v1376_v46, %v1378_v24 }
  0x16   :  { %v737_v19 = vshll.u32 %v1641_v9, 16 }
  0x17   :  { %1858 = vmatpush3.bf16.msra.mxu1 %v2153_v10  ;;  %v108_v10 = vshrl.u32 %v2400_v4, 16  ;;  %v107_v26 = vsel %vm79_vm0, %v102_v7, %v106_v17  ;;  %v501_v7 = vld [vmem:[%s2743_s0] sm:$0x8] }
  0x18   :  { %1954 = vmatpush3.bf16.msra.mxu0 %v2154_v11  ;;  %1859 = vmatprep.subr.bf16.mxu1 %v2155_v16  ;;  %v2416_v11 = vld [vmem:[%s2743_s0 + $0x20] sm:$0x1]  ;;  %v739_v28 = vrot.slane %v737_v19, 4  ;;  %v2196_v19 = vld [vmem:[%s2742_s1 + $0xa8] sm:$0xff]  }
  0x19   :  { %1955 = vmatprep.subr.bf16.mxu0 %v2156_v18  ;;  %v1642_v12 = vcombine.low %v2416_v11, %v2416_v11  ;;  %v110_v29 = vor.u32 %v108_v10, %v106_v17  ;;  %v2194_v10 = vld [vmem:[%s2742_s1 + $0xa0] sm:$0xff]  }
  0x1b   :  { %1860 = vmatpush3.bf16.msra.mxu1 %v2155_v16  ;;  %v2172_v16 = vld [vmem:[%s2742_s1 + $0x18] sm:$0xff]   ;;  %v743_v21 = vshll.u32 %v1642_v12, 16 }
  0x1c   :  { %1956 = vmatpush3.bf16.msra.mxu0 %v2156_v18  ;;  %1861 = vmatprep.subr.bf16.mxu1 %v2157_v30  ;;  %v734_v18 = vshrl.u32 %v1641_v9, 16  ;;  %v1628_v9 = vcombine.low %v501_v7, %v2303_v13  ;;  %v2221_v7 = vld [vmem:[%s2742_s1 + $0x1f0] sm:$0xff]  }
  0x1d   :  { %1957 = vmatprep.subr.bf16.mxu0 %v2158_v42 }
  0x1e   :  { %v736_v27 = vrot.slane %v734_v18, 3  ;;  %v526_v12 = vrot.slane %v1628_v9, 3  ;;  %v1174_v18 = vld [vmem:[%s2743_s0 + $0x20] sm:$0xf] }
  0x1f   :  { %1862 = vmatpush3.bf16.msra.mxu1 %v2157_v30  ;;  %v745_v30 = vrot.slane %v743_v21, 4 }
  0x20   :  { %1958 = vmatpush3.bf16.msra.mxu0 %v2158_v42  ;;  %1871 = vmatprep.subr.bf16.mxu1 %v2161_v52  ;;  %v740_v32 = vor.u32 %v739_v28, %v736_v27  ;;  %v2177_v42 = vld [vmem:[%s2742_s1 + $0x168] sm:$0xff]   ;;  %v2551_v17 = vsel %vm525_vm2, %v526_v12, %v527_v34  ;;  %v2198_v27 = vld [vmem:[%s2742_s1 + $0xb0] sm:$0xff]   ;;  %v1355_v28 = vld [vmem:[%s2743_s0 + $0x4] sm:$0x8] }
  0x21   :  { %1967 = vmatprep.subr.bf16.mxu0 %v2165_v57 }
  0x22   :  { %1864 = vmatmul.mubr.bf16.vlgmr.msra.gmra.mrb[0].mxu1 %v99_v59  ;;  %v741_v35 = vsel %vm706_vm1, %v731_v58, %v740_v32  ;;  %v746_v37 = vsel %vm706_vm1, %v740_v32, %v745_v30  ;;  %v2191_v58 = vld [vmem:[%s2742_s1 + $0x190] sm:$0xff]   ;;  %v1610_v59 = vcombine.low %v2391_v1, %v25_v55 }
  0x23   :  { %1872 = vmatpush3.bf16.msra.mxu1 %v2161_v52  ;;  %1960 = vmatmul.mubr.bf16.vlgmr.msra.gmra.mrb[0].mxu0 %v732_v60  ;;  %v1017_v52 = vld [vmem:[%s2743_s0 + $0x4] sm:$0xc]  ;;  %v369_v60 = vrot.slane %v1619_v54, 1  ;;  %v2200_v30 = vld [vmem:[%s2742_s1 + $0x1b0] sm:$0xff]  }
  0x24   :  { %1968 = vmatpush3.bf16.msra.mxu0 %v2165_v57  ;;  %1873 = vmatprep.subr.bf16.mxu1 %v2168_v61  ;;  %v2506_v56 = vcombine.low %v1017_v52, %v2333_v23  ;;  %v2190_v57 = vld [vmem:[%s2742_s1 + $0x90] sm:$0xff]  }
  0x25   :  { %1969 = vmatprep.subr.bf16.mxu0 %v2169_v62  ;;  %1867 = vmatprep.mubr.bf16.mxu1 %v107_v26  ;;  %v2571_v26 = vcombine.low %v2408_v6, %v1174_v18  ;;  %v2211_v54 = vld [vmem:[%s2742_s1 + $0xd0] sm:$0xff]   ;;  %v2225_v18 = vld [vmem:[%s2742_s1 + $0x200] sm:$0xff]  }
  0x26   :  { %1963 = vmatprep.mubr.bf16.mxu0 %v741_v35  ;;  %v1018_v35 = vld [vmem:[%s2743_s0 + $0x20] sm:$0x7]  ;;  %v2212_v55 = vld [vmem:[%s2742_s1 + $0x1d0] sm:$0xff]  }
  0x27   :  { %1874 = vmatpush3.bf16.msra.mxu1 %v2168_v61  ;;  %v370_v61 = vrot.slane %v2311_v15, 1  ;;  %v1225_v9 = vshll.u32 %v2571_v26, 16 }
  0x28   :  { %1970 = vmatpush3.bf16.msra.mxu0 %v2169_v62  ;;  %1875 = vmatprep.subr.bf16.mxu1 %v2170_v63  ;;  %v1654_v62 = vcombine.low %v2408_v6, %v2416_v11  ;;  %v2195_v11 = vld [vmem:[%s2742_s1 + $0x1a0] sm:$0xff]  }
  0x29   :  { %1971 = vmatprep.subr.bf16.mxu0 %v2171_v3  ;;  %v371_v5 = vsel %vm368_vm3, %v369_v60, %v370_v61 }
  0x2a   :  { %1868 = vmatmul.mubr.bf16.gmra.mrb[4].mxu1 %v110_v29  ;;  %v1380_v29 = vrot.slane %v2571_v26, 3 }
  0x2b   :  { %1876 = vmatpush3.bf16.msra.mxu1 %v2170_v63  ;;  %1887 = vmatprep.mubr.bf16.mxu1 %v2306_v14  ;;  %v2451_v14 = vsel %vm525_vm2, %v527_v34, %v529_v40  ;;  %v1042_v63 = vrot.slane %v2506_v56, 2  ;;  %v2203_v34 = vld [vmem:[%s2742_s1 + $0xb8] sm:$0xff]  }
  0x2c   :  { %1972 = vmatpush3.bf16.msra.mxu0 %v2171_v3  ;;  %1877 = vmatprep.subr.bf16.mxu1 %v2172_v16  ;;  %v2193_v3 = vld [vmem:[%s2742_s1 + $0x198] sm:$0xff]   ;;  %v2589_v32 = vsel %vm525_vm2, %v1378_v24, %v1380_v29  ;;  %v1196_v24 = vshrl.u32 %v2506_v56, 16 }
  0x2d   :  { %1973 = vmatprep.subr.bf16.mxu0 %v2173_v20  ;;  %1964 = vmatmul.mubr.bf16.gmra.mrb[4].mxu0 %v746_v37  ;;  %v1044_v8 = vsel %vm1041_vm4, %v1042_v63, %v1043_v0  ;;  %v2217_v63 = vld [vmem:[%s2742_s1 + $0xe8] sm:$0xff]  }
  0x2e   :  { %1983 = vmatprep.mubr.bf16.mxu0 %v1651_v39  ;;  %v372_v39 = vrot.slane %v2354_v36, 1 }
  0x2f   :  { %1878 = vmatpush3.bf16.msra.mxu1 %v2172_v16  ;;  %v502_v16 = vld [vmem:[%s2743_s0 + $0x1c] sm:$0xf] }
  0x30   :  { %1974 = vmatpush3.bf16.msra.mxu0 %v2173_v20  ;;  %1879 = vmatprep.subr.bf16.mxu1 %v2174_v31  ;;  %v1629_v13 = vcombine.low %v2391_v1, %v502_v16  ;;  %v2197_v1 = vld [vmem:[%s2742_s1 + $0x1a8] sm:$0xff]  }
  0x31   :  { %1975 = vmatprep.subr.bf16.mxu0 %v2175_v33 }
  0x32   :  { %v2562_v20 = vrot.slane %v1629_v13, 3  ;;  %v1227_v13 = vrot.slane %v1225_v9, 3 }
  0x33   :  { %1880 = vmatpush3.bf16.msra.mxu1 %v2174_v31  ;;  %v1682_v31 = vcombine.low %v1355_v28, %v2333_v23  ;;  %v2204_v23 = vld [vmem:[%s2742_s1 + $0x1b8] sm:$0xff]  }
  0x34   :  { %1976 = vmatpush3.bf16.msra.mxu0 %v2175_v33  ;;  %1881 = vmatprep.subr.bf16.mxu1 %v2176_v41  ;;  %v2568_v21 = vsel %vm525_vm2, %v529_v40, %v2562_v20  ;;  %v1664_v40 = vcombine.low %v2408_v6, %v1018_v35  ;;  %v1204_v6 = vshrl.u32 %v2455_v22, 16 }
  0x35   :  { %1977 = vmatprep.subr.bf16.mxu0 %v2177_v42  ;;  %v1375_v33 = vrot.slane %v1682_v31, 3  ;;  %v2231_v31 = vld [vmem:[%s2742_s1 + $0x220] sm:$0xff]  }
  0x37   :  { %1882 = vmatpush3.bf16.msra.mxu1 %v2176_v41  ;;  %v2603_v37 = vsel %vm525_vm2, %v1375_v33, %v1376_v46  ;;  %v2206_v41 = vld [vmem:[%s2742_s1 + $0xc0] sm:$0xff]   ;;  %v1047_v46 = vrot.slane %v1664_v40, 2 }
  0x38   :  { %1978 = vmatpush3.bf16.msra.mxu0 %v2177_v42  ;;  %1883 = vmatprep.subr.bf16.mxu1 %v2179_v43  ;;  %v1045_v42 = vrot.slane %v2461_v44, 2 }
  0x39   :  { %1979 = vmatprep.subr.bf16.mxu0 %v2181_v45 }
  0x3a   :  { %v1048_v51 = vsel %vm1041_vm4, %v1045_v42, %v1047_v46 }
  0x3b   :  { %1884 = vmatpush3.bf16.msra.mxu1 %v2179_v43  ;;  %v2208_v43 = vld [vmem:[%s2742_s1 + $0x1c0] sm:$0xff]  }
  0x3c   :  { %1980 = vmatpush3.bf16.msra.mxu0 %v2181_v45  ;;  %1885 = vmatprep.subr.bf16.mxu1 %v2183_v25  ;;  %v374_v45 = vrot.slane %v2400_v4, 1  ;;  %v2209_v4 = vld [vmem:[%s2742_s1 + $0xc8] sm:$0xff]  }
  0x3d   :  { %1981 = vmatprep.subr.bf16.mxu0 %v2184_v47 }
  0x3f   :  { %1886 = vmatpush3.bf16.msra.mxu1 %v2183_v25  ;;  %v1199_v25 = vshll.u32 %v2506_v56, 16 }
  0x40   :  { %1982 = vmatpush3.bf16.msra.mxu0 %v2184_v47  ;;  %1895 = vmatprep.subr.bf16.mxu1 %v2185_v48  ;;  %v1207_v47 = vshll.u32 %v2455_v22, 16 }
  0x41   :  { %1991 = vmatprep.subr.bf16.mxu0 %v2187_v49  ;;  %v1201_v52 = vrot.slane %v1199_v25, 3 }
  0x42   :  { %1888 = vmatmul.mubr.bf16.vlgmr.msra.gmra.mrb[0].mxu1 %v2311_v15  ;;  %v1046_v15 = vsel %vm1041_vm4, %v1043_v0, %v1045_v42  ;;  %v2218_v0 = vld [vmem:[%s2742_s1 + $0x1e8] sm:$0xff]  }
  0x43   :  { %1896 = vmatpush3.bf16.msra.mxu1 %v2185_v48  ;;  %1984 = vmatmul.mubr.bf16.vlgmr.msra.gmra.mrb[0].mxu0 %v2455_v22  ;;  %v2210_v48 = vld [vmem:[%s2742_s1 + $0x1c8] sm:$0xff]   ;;  %v1198_v22 = vrot.slane %v1196_v24, 2 }
  0x44   :  { %1992 = vmatpush3.bf16.msra.mxu0 %v2187_v49  ;;  %1897 = vmatprep.subr.bf16.mxu1 %v2188_v50  ;;  %v375_v49 = vsel %vm368_vm3, %v372_v39, %v374_v45 }
  0x45   :  { %1993 = vmatprep.subr.bf16.mxu0 %v2189_v53  ;;  %1891 = vmatprep.mubr.bf16.mxu1 %v2354_v36  ;;  %v373_v36 = vsel %vm368_vm3, %v370_v61, %v372_v39  ;;  %v1202_v56 = vor.u32 %v1201_v52, %v1198_v22  ;;  %v2215_v61 = vld [vmem:[%s2742_s1 + $0xe0] sm:$0xff]  }
  0x46   :  { %1987 = vmatprep.mubr.bf16.mxu0 %v2461_v44 }
  0x47   :  { %1898 = vmatpush3.bf16.msra.mxu1 %v2188_v50  ;;  %v1206_v50 = vrot.slane %v1204_v6, 2 }
  0x48   :  { %1994 = vmatpush3.bf16.msra.mxu0 %v2189_v53  ;;  %1899 = vmatprep.subr.bf16.mxu1 %v2190_v57  ;;  %v1209_v53 = vrot.slane %v1207_v47, 3  ;;  %v1736_v47 = vld [vmem:[%s2744_s3 + $0x10] sm:$0xff]  }
  0x49   :  { %1995 = vmatprep.subr.bf16.mxu0 %v2191_v58 }
  0x4a   :  { %1892 = vmatmul.mubr.bf16.gmra.mrb[4].mxu1 %v1610_v59  ;;  %v2214_v59 = vld [vmem:[%s2742_s1 + $0x1d8] sm:$0xff]  }
  0x4b   :  { %1900 = vmatpush3.bf16.msra.mxu1 %v2190_v57  ;;  %1988 = vmatmul.mubr.bf16.gmra.mrb[4].mxu0 %v1654_v62  ;;  %v1210_v57 = vor.u32 %v1209_v53, %v1206_v50  ;;  %v2216_v62 = vld [vmem:[%s2742_s1 + $0x1e0] sm:$0xff]  }
  0x4c   :  { %1996 = vmatpush3.bf16.msra.mxu0 %v2191_v58  ;;  %1901 = vmatprep.subr.bf16.mxu1 %v2192_v2  ;;  %v2213_v58 = vld [vmem:[%s2742_s1 + $0xd8] sm:$0xff]  }
  0x4d   :  { %1997 = vmatprep.subr.bf16.mxu0 %v2193_v3  ;;  %1911 = vmatprep.mubr.bf16.mxu1 %v371_v5  ;;  %v1211_v60 = vsel %vm1194_vm5, %v1202_v56, %v1210_v57  ;;  %v1216_v5 = vshll.u32 %v2461_v44, 16 }
  0x4e   :  { %2007 = vmatprep.mubr.bf16.mxu0 %v1044_v8  ;;  %v1222_v8 = vshrl.u32 %v2571_v26, 16  ;;  %v1528_v26 = vld [vmem:[%s2744_s3 + $0x18] sm:$0xf] }
  0x4f   :  { %1902 = vmatpush3.bf16.msra.mxu1 %v2192_v2  ;;  %v2220_v2 = vld [vmem:[%s2742_s1 + $0xf0] sm:$0xff]   ;;  %v1218_v12 = vrot.slane %v1216_v5, 3  ;;  %v1536_v50 = vunpack.c.l.bf16 %v1528_v26  ;;  %v1719_v5 = vunpack.c.h.bf16 %v1736_v47 }
  0x50   :  { %1998 = vmatpush3.bf16.msra.mxu0 %v2193_v3  ;;  %1903 = vmatprep.subr.bf16.mxu1 %v2194_v10  ;;  %v1213_v3 = vshrl.u32 %v2461_v44, 16  ;;  %v2223_v44 = vld [vmem:[%s2742_s1 + $0x1f8] sm:$0xff]   ;;  %v1224_v16 = vrot.slane %v1222_v8, 2 }
  0x51   :  { %1999 = vmatprep.subr.bf16.mxu0 %v2195_v11 }
  0x53   :  { %1904 = vmatpush3.bf16.msra.mxu1 %v2194_v10  ;;  %v2222_v10 = vld [vmem:[%s2742_s1 + $0xf8] sm:$0xff]  }
  0x54   :  { %2000 = vmatpush3.bf16.msra.mxu0 %v2195_v11  ;;  %1905 = vmatprep.subr.bf16.mxu1 %v2196_v19  ;;  %v1215_v11 = vrot.slane %v1213_v3, 2 }
  0x55   :  { %2001 = vmatprep.subr.bf16.mxu0 %v2197_v1 }
  0x57   :  { %1906 = vmatpush3.bf16.msra.mxu1 %v2196_v19  ;;  %v1228_v19 = vor.u32 %v1227_v13, %v1224_v16 }
  0x58   :  { %2002 = vmatpush3.bf16.msra.mxu0 %v2197_v1  ;;  %1907 = vmatprep.subr.bf16.mxu1 %v2198_v27 }
  0x59   :  { %2003 = vmatprep.subr.bf16.mxu0 %v2200_v30 }
  0x5b   :  { %1908 = vmatpush3.bf16.msra.mxu1 %v2198_v27  ;;  %v2226_v27 = vld [vmem:[%s2742_s1 + $0x208] sm:$0xff]  }
  0x5c   :  { %2004 = vmatpush3.bf16.msra.mxu0 %v2200_v30  ;;  %1909 = vmatprep.subr.bf16.mxu1 %v2203_v34  ;;  %v2229_v30 = vld [vmem:[%s2742_s1 + $0x210] sm:$0xff]  }
  0x5d   :  { %2005 = vmatprep.subr.bf16.mxu0 %v2204_v23 }
  0x5f   :  { %1910 = vmatpush3.bf16.msra.mxu1 %v2203_v34 }
  0x60   :  { %2006 = vmatpush3.bf16.msra.mxu0 %v2204_v23  ;;  %1919 = vmatprep.subr.bf16.mxu1 %v2206_v41 }
  0x61   :  { %2015 = vmatprep.subr.bf16.mxu0 %v2208_v43 }
  0x62   :  { %1912 = vmatmul.mubr.bf16.vlgmr.msra.gmra.mrb[0].mxu1 %v373_v36 }
  0x63   :  { %1920 = vmatpush3.bf16.msra.mxu1 %v2206_v41  ;;  %2008 = vmatmul.mubr.bf16.vlgmr.msra.gmra.mrb[0].mxu0 %v1046_v15  ;;  %v1529_v15 = vld [vmem:[%s2744_s3 + $0x1c] sm:$0x1] }
  0x64   :  { %2016 = vmatpush3.bf16.msra.mxu0 %v2208_v43  ;;  %1921 = vmatprep.subr.bf16.mxu1 %v2209_v4 }
  0x65   :  { %2017 = vmatprep.subr.bf16.mxu0 %v2210_v48  ;;  %1915 = vmatprep.mubr.bf16.mxu1 %v375_v49 }
  0x66   :  { %2011 = vmatprep.mubr.bf16.mxu0 %v1048_v51 }
  0x67   :  { %1922 = vmatpush3.bf16.msra.mxu1 %v2209_v4  ;;  %v1691_v4 = vld [vmem:[%s2745_s2] ss:$0 sm:$0xff] }
  0x68   :  { %2018 = vmatpush3.bf16.msra.mxu0 %v2210_v48  ;;  %1923 = vmatprep.subr.bf16.mxu1 %v2211_v54 }
  0x69   :  { %2019 = vmatprep.subr.bf16.mxu0 %v2212_v55 }
  0x6a   :  { %1916 = vmatmul.mubr.bf16.gmra.mrb[4].mxu1 %v374_v45 }
  0x6b   :  { %1924 = vmatpush3.bf16.msra.mxu1 %v2211_v54  ;;  %2012 = vmatmul.mubr.bf16.gmra.mrb[4].mxu0 %v1047_v46  ;;  %v1718_v54 = vunpack.c.l.bf16 %v1736_v47 }
  0x6c   :  { %2020 = vmatpush3.bf16.msra.mxu0 %v2212_v55  ;;  %1925 = vmatprep.subr.bf16.mxu1 %v2213_v58 }
  0x6d   :  { %2021 = vmatprep.subr.bf16.mxu0 %v2214_v59  ;;  %1935 = vmatprep.mubr.bf16.mxu1 %v2551_v17  ;;  %v1219_v17 = vor.u32 %v1218_v12, %v1215_v11 }
  0x6e   :  { %2031 = vmatprep.mubr.bf16.mxu0 %v1211_v60  ;;  %v1537_v60 = vunpack.c.l.bf16 %v1529_v15 }
  0x6f   :  { %1926 = vmatpush3.bf16.msra.mxu1 %v2213_v58  ;;  %v1220_v1 = vsel %vm1194_vm5, %v1210_v57, %v1219_v17  ;;  %v1229_v28 = vsel %vm1194_vm5, %v1219_v17, %v1228_v19 }
  0x70   :  { %2022 = vmatpush3.bf16.msra.mxu0 %v2214_v59  ;;  %1927 = vmatprep.subr.bf16.mxu1 %v2215_v61 }
  0x71   :  { %2023 = vmatprep.subr.bf16.mxu0 %v2216_v62 }
  0x73   :  { %1928 = vmatpush3.bf16.msra.mxu1 %v2215_v61 }
  0x74   :  { %2024 = vmatpush3.bf16.msra.mxu0 %v2216_v62  ;;  %1929 = vmatprep.subr.bf16.mxu1 %v2217_v63 }
  0x75   :  { %2025 = vmatprep.subr.bf16.mxu0 %v2218_v0 }
  0x77   :  { %1930 = vmatpush3.bf16.msra.mxu1 %v2217_v63 }
  0x78   :  { %2026 = vmatpush3.bf16.msra.mxu0 %v2218_v0  ;;  %1931 = vmatprep.subr.bf16.mxu1 %v2220_v2 }
  0x79   :  { %2027 = vmatprep.subr.bf16.mxu0 %v2221_v7 }
  0x7b   :  { %1932 = vmatpush3.bf16.msra.mxu1 %v2220_v2 }
  0x7c   :  { %2028 = vmatpush3.bf16.msra.mxu0 %v2221_v7  ;;  %1933 = vmatprep.subr.bf16.mxu1 %v2222_v10 }
  0x7d   :  { %2029 = vmatprep.subr.bf16.mxu0 %v2223_v44 }
  0x7f   :  { %1934 = vmatpush3.bf16.msra.mxu1 %v2222_v10 }
  0x80   :  { %2030 = vmatpush3.bf16.msra.mxu0 %v2223_v44  ;;  %2063 = vmatprep.subr.bf16.mxu1 %v2225_v18 }
  0x81   :  { %2039 = vmatprep.subr.bf16.mxu0 %v2225_v18 }
  0x82   :  { %1936 = vmatmul.mubr.bf16.vlgmr.msra.gmra.mrb[0].mxu1 %v2451_v14  ;;  %v2230_v14 = vld [vmem:[%s2742_s1 + $0x218] sm:$0xff]  }
  0x83   :  { %2032 = vmatmul.mubr.bf16.vlgmr.msra.gmra.mrb[0].mxu0 %v1220_v1  ;;  %2071 = vmatpush3.bf16.msra.mxu1 %v2225_v18 }
  0x84   :  { %2040 = vmatpush3.bf16.msra.mxu0 %v2225_v18  ;;  %2064 = vmatprep.subr.bf16.mxu1 %v2226_v27 }
  0x85   :  { %2041 = vmatprep.subr.bf16.mxu0 %v2226_v27  ;;  %1939 = vmatprep.mubr.bf16.mxu1 %v2568_v21  ;;  %v2233_v21 = vld [vmem:[%s2742_s1 + $0x230] sm:$0xff]  }
  0x86   :  { %2035 = vmatprep.mubr.bf16.mxu0 %v1229_v28 }
  0x87   :  { %2072 = vmatpush3.bf16.msra.mxu1 %v2226_v27 }
  0x88   :  { %2042 = vmatpush3.bf16.msra.mxu0 %v2226_v27  ;;  %2065 = vmatprep.subr.bf16.mxu1 %v2229_v30 }
  0x89   :  { %2043 = vmatprep.subr.bf16.mxu0 %v2229_v30 }
  0x8a   :  { %1940 = vmatmul.mubr.bf16.gmra.mrb[4].mxu1 %v2562_v20  ;;  %v2232_v20 = vld [vmem:[%s2742_s1 + $0x228] sm:$0xff]  }
  0x8b   :  { %2036 = vmatmul.mubr.bf16.gmra.mrb[4].mxu0 %v1228_v19  ;;  %2073 = vmatpush3.bf16.msra.mxu1 %v2229_v30 }
  0x8c   :  { %2044 = vmatpush3.bf16.msra.mxu0 %v2229_v30  ;;  %2066 = vmatprep.subr.bf16.mxu1 %v2230_v14 }
  0x8d   :  { %2045 = vmatprep.subr.bf16.mxu0 %v2230_v14  ;;  %2055 = vmatprep.mubr.bf16.mxu0 %v2603_v37 }
  0x8e   :  { %2059 = vmatprep.mubr.bf16.mxu1 %v2589_v32  ;;  %v2234_v32 = vld [vmem:[%s2742_s1 + $0x238] sm:$0xff]  }
  0x8f   :  { %2074 = vmatpush3.bf16.msra.mxu1 %v2230_v14 }
  0x90   :  { %2046 = vmatpush3.bf16.msra.mxu0 %v2230_v14  ;;  %2067 = vmatprep.subr.bf16.mxu1 %v2231_v31 }
  0x91   :  { %2047 = vmatprep.subr.bf16.mxu0 %v2231_v31 }
  0x93   :  { %2075 = vmatpush3.bf16.msra.mxu1 %v2231_v31 }
  0x94   :  { %2048 = vmatpush3.bf16.msra.mxu0 %v2231_v31  ;;  %2068 = vmatprep.subr.bf16.mxu1 %v2232_v20 }
  0x95   :  { %2049 = vmatprep.subr.bf16.mxu0 %v2232_v20 }
  0x97   :  { %2076 = vmatpush3.bf16.msra.mxu1 %v2232_v20 }
  0x98   :  { %2050 = vmatpush3.bf16.msra.mxu0 %v2232_v20  ;;  %2069 = vmatprep.subr.bf16.mxu1 %v2233_v21 }
  0x99   :  { %2051 = vmatprep.subr.bf16.mxu0 %v2233_v21 }
  0x9b   :  { %2077 = vmatpush3.bf16.msra.mxu1 %v2233_v21 }
  0x9c   :  { %2052 = vmatpush3.bf16.msra.mxu0 %v2233_v21  ;;  %2070 = vmatprep.subr.bf16.mxu1 %v2234_v32 }
  0x9d   :  { %2053 = vmatprep.subr.bf16.mxu0 %v2234_v32 }
  0x9f   :  { %2078 = vmatpush3.bf16.msra.mxu1 %v2234_v32 }
  0xa0   :  { %2054 = vmatpush3.bf16.msra.mxu0 %v2234_v32 }
  0xa2   :  { %2060 = vmatmul.mubr.bf16.vlgmr.msra.gmra.mrb[8].mxu1 %v1380_v29  ;;  %v1709_v29 = vld [vmem:[%s2744_s3] sm:$0xff]  }
  0xa3   :  { %2056 = vmatmul.mubr.bf16.vlgmr.msra.gmra.mrb[0].mxu0 %v2476_v38  ;;  %v1735_v38 = vld [vmem:[%s2744_s3 + $0x8] sm:$0xff]   ;;  %v1710_v52 = vunpack.c.l.bf16 %v1709_v29  ;;  %v1711_v61 = vunpack.c.h.bf16 %v1709_v29 }
  0xa4   :  { %v1714_v48 = vunpack.c.l.bf16 %v1735_v38  ;;  %v1715_v55 = vunpack.c.h.bf16 %v1735_v38 }
 0x155   :  { %v1937_v33 = vpop.f32.mrb[0].mxu1 }
 0x156   :  { %v619_v34 = vpop.f32.mrb[1].mxu1 }
 0x157   :  { %v1938_v35 = vpop.f32.mrb[2].mxu1 }
 0x158   :  { %v622_v23 = vpop.f32.mrb[3].mxu1 }
 0x15d   :  { %v1941_v37 = vpop.f32.mrb[4].mxu1 }
 0x15e   :  { %v2037_v39 = vpop.f32.mrb[4].mxu0  ;;  %v635_v40 = vpop.f32.mrb[5].mxu1 }
 0x15f   :  { %v2083_v41 = vadd.f32 %v2037_v39, %v1941_v37  ;;  %v1332_v42 = vpop.f32.mrb[5].mxu0  ;;  %v1942_v43 = vpop.f32.mrb[6].mxu1 }
 0x160   :  { %v2085_v36 = vadd.f32 %v1332_v42, %v635_v40  ;;  %v2038_v45 = vpop.f32.mrb[6].mxu0  ;;  %v638_v6 = vpop.f32.mrb[7].mxu1 }
 0x161   :  { %v2087_v46 = vadd.f32 %v2038_v45, %v1942_v43  ;;  %v1335_v24 = vpop.f32.mrb[7].mxu0 }
 0x162   :  { %v2089_v25 = vadd.f32 %v1335_v24, %v638_v6 }
 0x175   :  { %v2061_v49 = vpop.f32.mrb[8].mxu1 }
 0x176   :  { %v2057_v51 = vpop.f32.mrb[0].mxu0  ;;  %v2084_v22 = vadd.f32 %v2083_v41, %v2061_v49  ;;  %v1484_v53 = vpop.f32.mrb[9].mxu1 }
 0x177   :  { %v2079_v56 = vadd.f32 %v2057_v51, %v1937_v33  ;;  %v1468_v57 = vpop.f32.mrb[1].mxu0  ;;  %v2086_v58 = vadd.f32 %v2085_v36, %v1484_v53  ;;  %v2062_v59 = vpop.f32.mrb[10].mxu1 }
 0x178   :  { %v1520_v62 = vadd.f32 %v2084_v22, %v1691_v4  ;;  %v2080_v63 = vadd.f32 %v1468_v57, %v619_v34  ;;  %v2058_v0 = vpop.f32.mrb[2].mxu0  ;;  %v2088_v2 = vadd.f32 %v2087_v46, %v2062_v59  ;;  %v1487_v3 = vpop.f32.mrb[11].mxu1 }
 0x179   :  { %v1516_v7 = vadd.f32 %v2079_v56, %v1691_v4  ;;  %v1518_v8 = vadd.f32 %v2086_v58, %v1691_v4  ;;  %v2081_v9 = vadd.f32 %v2058_v0, %v1938_v35  ;;  %v1471_v10 = vpop.f32.mrb[3].mxu0  ;;  %v2090_v11 = vadd.f32 %v2089_v25, %v1487_v3 }
 0x17a   :  { %v1544_v12 = vadd.f32 %v1536_v50, %v1520_v62  ;;  %v1514_v44 = vadd.f32 %v2080_v63, %v1691_v4  ;;  %v1521_v16 = vadd.f32 %v2088_v2, %v1691_v4  ;;  %v2082_v13 = vadd.f32 %v1471_v10, %v622_v23 }
 0x17b   :  { %v1540_v17 = vadd.f32 %v1714_v48, %v1516_v7  ;;  %v1542_v18 = vadd.f32 %v1718_v54, %v1518_v8  ;;  %v1517_v19 = vadd.f32 %v2081_v9, %v1691_v4  ;;  %v1519_v1 = vadd.f32 %v2090_v11, %v1691_v4 }
 0x17c   :  { %v1552_v27 = vmax.f32 %v1544_v12, 0.0  ;;  %v1538_v28 = vadd.f32 %v1710_v52, %v1514_v44  ;;  %v1545_v30 = vadd.f32 %v1537_v60, %v1521_v16  ;;  %v1515_v14 = vadd.f32 %v2082_v13, %v1691_v4 }
 0x17d   :  { %v1541_v31 = vadd.f32 %v1715_v55, %v1517_v19  ;;  %v1543_v20 = vadd.f32 %v1719_v5, %v1519_v1  ;;  %v1548_v34 = vmax.f32 %v1540_v17, 0.0  ;;  %v1550_v35 = vmax.f32 %v1542_v18, 0.0 }
 0x17e   :  { %v1706_v21 = vpack.c.bf16 %v1552_v27, %v1552_v27  ;;  %v1553_v32 = vmax.f32 %v1545_v30, 0.0  ;;  %v1539_v33 = vadd.f32 %v1711_v61, %v1515_v14  ;;  %v1546_v23 = vmax.f32 %v1538_v28, 0.0 }
 0x17f   :  { %v1549_v37 = vmax.f32 %v1541_v31, 0.0  ;;  %v1551_v39 = vmax.f32 %v1543_v20, 0.0 }
 0x180   :  { %1592 = vst [vmem:[%s2746_s4 + $0x18] sm:$0xf] %v1706_v21  ;;  %v1707_v40 = vpack.c.bf16 %v1553_v32, %v1553_v32  ;;  %v1547_v41 = vmax.f32 %v1539_v33, 0.0 }
 0x181   :  { %v1728_v42 = vpack.c.bf16 %v1549_v37, %v1548_v34  ;;  %v1733_v43 = vpack.c.bf16 %v1551_v39, %v1550_v35 }
 0x182   :  { %1593 = vst [vmem:[%s2746_s4 + $0x1c] sm:$0x1] %v1707_v40  ;;  %v1723_v36 = vpack.c.bf16 %v1547_v41, %v1546_v23 }
 0x183   :  { %1737 = vst [vmem:[%s2746_s4 + $0x8] sm:$0xff] %v1728_v42   ;;  %1738 = vst [vmem:[%s2746_s4 + $0x10] sm:$0xff] %v1733_v43  }
 0x184   :  { %1724 = vst [vmem:[%s2746_s4] sm:$0xff] %v1723_v36  }

// kernel: _lambda_.13
= control target key start
LH: loop header
LB: loop body
LE: loop exit
PB: predicated region body
PF: predicated region fallthrough
CT: control target
= control target key end

     0   :  { %v3612_v1 = vmov 0   ;;  %vm2433_vm0 = vcmask 1045504   ;;  %vm1817_vm1 = vsmask.f32 6400  ;;  %s4582_s1 = inlined_call_operand.vmem [shape: bf16[1152,512], index: 1, kind: input, shape index: {}]   ;;  %s4583_s0 = inlined_call_operand.vmem [shape: bf16[4,18,128], index: 0, kind: input, shape index: {}]   ;;  %s4584_s2 = inlined_call_operand.vmem [shape: f32[1,512], index: 2, kind: input, shape index: {}]   ;;  %s4585_s3 = inlined_call_operand.vmem [shape: bf16[14,512], index: 3, kind: output, shape index: {}]  }
   0x1   :  { %v3169_v0 = vld [vmem:[%s4582_s1 + $0x104] ss:$16 sps:$4 sm:$0xff]   ;;  %282 = vmatprep.mubr.bf16.mxu0 %v3612_v1  ;;  %325 = vmatprep.mubr.bf16.mxu1 %v3612_v1  ;;  %v3171_v2 = vld [vmem:[%s4582_s1 + $0x10c] ss:$16 sps:$4 sm:$0xff]   ;;  %v3173_v3 = vld [vmem:[%s4582_s1 + $0x100] ss:$16 sps:$4 sm:$0xff]  }
   0x2   :  { %250 = vmatprep.subr.bf16.mxu0 %v3169_v0  ;;  %v3174_v4 = vld [vmem:[%s4582_s1 + $0x108] ss:$16 sps:$4 sm:$0xff]   ;;  %293 = vmatprep.subr.bf16.mxu1 %v3171_v2  ;;  %v3175_v5 = vld [vmem:[%s4582_s1 + $0x124] ss:$16 sps:$4 sm:$0xff]   ;;  %v3177_v6 = vld [vmem:[%s4582_s1 + $0x12c] ss:$16 sps:$4 sm:$0xff]  }
   0x3   :  { %251 = vmatpush1.bf16.msra.mxu0 %v3173_v3  ;;  %294 = vmatpush1.bf16.msra.mxu1 %v3174_v4  ;;  %v3179_v7 = vld [vmem:[%s4582_s1 + $0x120] ss:$16 sps:$4 sm:$0xff]   ;;  %v3180_v8 = vld [vmem:[%s4582_s1 + $0x128] ss:$16 sps:$4 sm:$0xff]   ;;  %v3181_v9 = vld [vmem:[%s4582_s1 + $0x144] ss:$16 sps:$4 sm:$0xff]  }
   0x4   :  { %252 = vmatprep.subr.bf16.mxu0 %v3175_v5  ;;  %295 = vmatprep.subr.bf16.mxu1 %v3177_v6  ;;  %v3183_v10 = vld [vmem:[%s4582_s1 + $0x14c] ss:$16 sps:$4 sm:$0xff]   ;;  %v3185_v11 = vld [vmem:[%s4582_s1 + $0x140] ss:$16 sps:$4 sm:$0xff]   ;;  %v3186_v12 = vld [vmem:[%s4582_s1 + $0x148] ss:$16 sps:$4 sm:$0xff]  }
   0x5   :  { %v3187_v13 = vld [vmem:[%s4582_s1 + $0x164] ss:$16 sps:$4 sm:$0xff]   ;;  %v3189_v14 = vld [vmem:[%s4582_s1 + $0x16c] ss:$16 sps:$4 sm:$0xff]   ;;  %v3191_v15 = vld [vmem:[%s4582_s1 + $0x160] ss:$16 sps:$4 sm:$0xff]  }
   0x6   :  { %v3192_v16 = vld [vmem:[%s4582_s1 + $0x168] ss:$16 sps:$4 sm:$0xff]   ;;  %v3193_v17 = vld [vmem:[%s4582_s1 + $0x184] ss:$16 sps:$4 sm:$0xff]   ;;  %v3195_v18 = vld [vmem:[%s4582_s1 + $0x18c] ss:$16 sps:$4 sm:$0xff]  }
   0x7   :  { %253 = vmatpush1.bf16.msra.mxu0 %v3179_v7  ;;  %296 = vmatpush1.bf16.msra.mxu1 %v3180_v8  ;;  %v3197_v19 = vld [vmem:[%s4582_s1 + $0x180] ss:$16 sps:$4 sm:$0xff]   ;;  %v3198_v20 = vld [vmem:[%s4582_s1 + $0x188] ss:$16 sps:$4 sm:$0xff]   ;;  %v3199_v21 = vld [vmem:[%s4582_s1 + $0x1a4] ss:$16 sps:$4 sm:$0xff]  }
   0x8   :  { %254 = vmatprep.subr.bf16.mxu0 %v3181_v9  ;;  %297 = vmatprep.subr.bf16.mxu1 %v3183_v10  ;;  %v3201_v22 = vld [vmem:[%s4582_s1 + $0x1ac] ss:$16 sps:$4 sm:$0xff]   ;;  %v3203_v23 = vld [vmem:[%s4582_s1 + $0x1a0] ss:$16 sps:$4 sm:$0xff]   ;;  %v3204_v24 = vld [vmem:[%s4582_s1 + $0x1a8] ss:$16 sps:$4 sm:$0xff]  }
   0x9   :  { %v3205_v25 = vld [vmem:[%s4582_s1 + $0x1c4] ss:$16 sps:$4 sm:$0xff]   ;;  %v3207_v26 = vld [vmem:[%s4582_s1 + $0x1cc] ss:$16 sps:$4 sm:$0xff]   ;;  %v3209_v27 = vld [vmem:[%s4582_s1 + $0x1c0] ss:$16 sps:$4 sm:$0xff]  }
   0xa   :  { %v3210_v28 = vld [vmem:[%s4582_s1 + $0x1c8] ss:$16 sps:$4 sm:$0xff]   ;;  %v3211_v29 = vld [vmem:[%s4582_s1 + $0x1e4] ss:$16 sps:$4 sm:$0xff]   ;;  %v3213_v30 = vld [vmem:[%s4582_s1 + $0x1ec] ss:$16 sps:$4 sm:$0xff]  }
   0xb   :  { %255 = vmatpush1.bf16.msra.mxu0 %v3185_v11  ;;  %298 = vmatpush1.bf16.msra.mxu1 %v3186_v12  ;;  %v3215_v31 = vld [vmem:[%s4582_s1 + $0x1e0] ss:$16 sps:$4 sm:$0xff]   ;;  %v3216_v32 = vld [vmem:[%s4582_s1 + $0x1e8] ss:$16 sps:$4 sm:$0xff]   ;;  %v3219_v33 = vld [vmem:[%s4582_s1 + $0x4] ss:$16 sps:$4 sm:$0xff]  }
   0xc   :  { %256 = vmatprep.subr.bf16.mxu0 %v3187_v13  ;;  %299 = vmatprep.subr.bf16.mxu1 %v3189_v14  ;;  %v3222_v34 = vld [vmem:[%s4582_s1 + $0xc] ss:$16 sps:$4 sm:$0xff]   ;;  %v3217_v35 = vld [vmem:[%s4582_s1] ss:$16 sps:$4 sm:$0xff]   ;;  %v3220_v37 = vld [vmem:[%s4582_s1 + $0x8] ss:$16 sps:$4 sm:$0xff]  }
   0xd   :  { %v3223_v36 = vld [vmem:[%s4583_s0 + $0xc] sm:$0x7f]   ;;  %v3226_v38 = vld [vmem:[%s4582_s1 + $0x24] ss:$16 sps:$4 sm:$0xff]   ;;  %v3227_v41 = vld [vmem:[%s4582_s1 + $0x28] ss:$16 sps:$4 sm:$0xff]  }
   0xe   :  { %v3229_v39 = vld [vmem:[%s4582_s1 + $0x2c] ss:$16 sps:$4 sm:$0xff]   ;;  %v3224_v40 = vld [vmem:[%s4582_s1 + $0x20] ss:$16 sps:$4 sm:$0xff]   ;;  %v3232_v42 = vld [vmem:[%s4582_s1 + $0x44] ss:$16 sps:$4 sm:$0xff]  }
   0xf   :  { %257 = vmatpush1.bf16.msra.mxu0 %v3191_v15  ;;  %300 = vmatpush1.bf16.msra.mxu1 %v3192_v16  ;;  %v3235_v43 = vld [vmem:[%s4582_s1 + $0x4c] ss:$16 sps:$4 sm:$0xff]   ;;  %v3230_v44 = vld [vmem:[%s4582_s1 + $0x40] ss:$16 sps:$4 sm:$0xff]   ;;  %v3233_v45 = vld [vmem:[%s4582_s1 + $0x48] ss:$16 sps:$4 sm:$0xff]  }
  0x10   :  { %258 = vmatprep.subr.bf16.mxu0 %v3193_v17  ;;  %301 = vmatprep.subr.bf16.mxu1 %v3195_v18  ;;  %v3238_v46 = vld [vmem:[%s4582_s1 + $0x64] ss:$16 sps:$4 sm:$0xff]   ;;  %v3241_v47 = vld [vmem:[%s4582_s1 + $0x6c] ss:$16 sps:$4 sm:$0xff]   ;;  %v3236_v48 = vld [vmem:[%s4582_s1 + $0x60] ss:$16 sps:$4 sm:$0xff]  }
  0x11   :  { %v3239_v49 = vld [vmem:[%s4582_s1 + $0x68] ss:$16 sps:$4 sm:$0xff]   ;;  %v3244_v50 = vld [vmem:[%s4582_s1 + $0x84] ss:$16 sps:$4 sm:$0xff]   ;;  %v3247_v51 = vld [vmem:[%s4582_s1 + $0x8c] ss:$16 sps:$4 sm:$0xff]  }
  0x12   :  { %v3242_v52 = vld [vmem:[%s4582_s1 + $0x80] ss:$16 sps:$4 sm:$0xff]   ;;  %v3245_v53 = vld [vmem:[%s4582_s1 + $0x88] ss:$16 sps:$4 sm:$0xff]   ;;  %v3250_v54 = vld [vmem:[%s4582_s1 + $0xa4] ss:$16 sps:$4 sm:$0xff]  }
  0x13   :  { %259 = vmatpush1.bf16.msra.mxu0 %v3197_v19  ;;  %302 = vmatpush1.bf16.msra.mxu1 %v3198_v20  ;;  %v3253_v55 = vld [vmem:[%s4582_s1 + $0xac] ss:$16 sps:$4 sm:$0xff]   ;;  %v3248_v56 = vld [vmem:[%s4582_s1 + $0xa0] ss:$16 sps:$4 sm:$0xff]   ;;  %v3251_v57 = vld [vmem:[%s4582_s1 + $0xa8] ss:$16 sps:$4 sm:$0xff]  }
  0x14   :  { %260 = vmatprep.subr.bf16.mxu0 %v3199_v21  ;;  %303 = vmatprep.subr.bf16.mxu1 %v3201_v22  ;;  %v3256_v58 = vld [vmem:[%s4582_s1 + $0xc4] ss:$16 sps:$4 sm:$0xff]   ;;  %v3259_v59 = vld [vmem:[%s4582_s1 + $0xcc] ss:$16 sps:$4 sm:$0xff]   ;;  %v3254_v60 = vld [vmem:[%s4582_s1 + $0xc0] ss:$16 sps:$4 sm:$0xff]  }
  0x15   :  { %v3257_v61 = vld [vmem:[%s4582_s1 + $0xc8] ss:$16 sps:$4 sm:$0xff]   ;;  %v3262_v62 = vld [vmem:[%s4582_s1 + $0xe4] ss:$16 sps:$4 sm:$0xff]   ;;  %v3265_v63 = vld [vmem:[%s4582_s1 + $0xec] ss:$16 sps:$4 sm:$0xff]  }
  0x16   :  { %v3260_v0 = vld [vmem:[%s4582_s1 + $0xe0] ss:$16 sps:$4 sm:$0xff]   ;;  %v3263_v2 = vld [vmem:[%s4582_s1 + $0xe8] ss:$16 sps:$4 sm:$0xff]   ;;  %v16_v4 = vld [vmem:[%s4583_s0 + $0x4] sm:$0x7] }
  0x17   :  { %261 = vmatpush1.bf16.msra.mxu0 %v3203_v23  ;;  %304 = vmatpush1.bf16.msra.mxu1 %v3204_v24  ;;  %v15_v3 = vld [vmem:[%s4583_s0] sm:$0xf]  ;;  %v3268_v5 = vld [vmem:[%s4582_s1 + $0x204] ss:$16 sps:$4 sm:$0xff]   ;;  %v3271_v6 = vld [vmem:[%s4582_s1 + $0x20c] ss:$16 sps:$4 sm:$0xff]  }
  0x18   :  { %262 = vmatprep.subr.bf16.mxu0 %v3205_v25  ;;  %305 = vmatprep.subr.bf16.mxu1 %v3207_v26  ;;  %v2822_v7 = vcombine.low %v15_v3, %v16_v4  ;;  %v3266_v8 = vld [vmem:[%s4582_s1 + $0x200] ss:$16 sps:$4 sm:$0xff]   ;;  %v3269_v9 = vld [vmem:[%s4582_s1 + $0x208] ss:$16 sps:$4 sm:$0xff]   ;;  %v3276_v10 = vld [vmem:[%s4582_s1 + $0x224] ss:$16 sps:$4 sm:$0xff]  }
  0x19   :  { %v3279_v11 = vld [vmem:[%s4582_s1 + $0x22c] ss:$16 sps:$4 sm:$0xff]   ;;  %v3274_v12 = vld [vmem:[%s4582_s1 + $0x220] ss:$16 sps:$4 sm:$0xff]   ;;  %v3277_v13 = vld [vmem:[%s4582_s1 + $0x228] ss:$16 sps:$4 sm:$0xff]  }
  0x1a   :  { %v3282_v14 = vld [vmem:[%s4582_s1 + $0x244] ss:$16 sps:$4 sm:$0xff]   ;;  %v3285_v15 = vld [vmem:[%s4582_s1 + $0x24c] ss:$16 sps:$4 sm:$0xff]   ;;  %v3280_v16 = vld [vmem:[%s4582_s1 + $0x240] ss:$16 sps:$4 sm:$0xff]  }
  0x1b   :  { %263 = vmatpush1.bf16.msra.mxu0 %v3209_v27  ;;  %306 = vmatpush1.bf16.msra.mxu1 %v3210_v28  ;;  %v3283_v17 = vld [vmem:[%s4582_s1 + $0x248] ss:$16 sps:$4 sm:$0xff]   ;;  %v3288_v18 = vld [vmem:[%s4582_s1 + $0x264] ss:$16 sps:$4 sm:$0xff]   ;;  %v3291_v19 = vld [vmem:[%s4582_s1 + $0x26c] ss:$16 sps:$4 sm:$0xff]  }
  0x1c   :  { %264 = vmatprep.subr.bf16.mxu0 %v3211_v29  ;;  %307 = vmatprep.subr.bf16.mxu1 %v3213_v30  ;;  %v3286_v20 = vld [vmem:[%s4582_s1 + $0x260] ss:$16 sps:$4 sm:$0xff]   ;;  %v3289_v21 = vld [vmem:[%s4582_s1 + $0x268] ss:$16 sps:$4 sm:$0xff]   ;;  %v3294_v22 = vld [vmem:[%s4582_s1 + $0x284] ss:$16 sps:$4 sm:$0xff]  }
  0x1d   :  { %v3297_v23 = vld [vmem:[%s4582_s1 + $0x28c] ss:$16 sps:$4 sm:$0xff]   ;;  %v588_v24 = vld [vmem:[%s4583_s0 + $0x4] sm:$0xf]  ;;  %v3292_v25 = vld [vmem:[%s4582_s1 + $0x280] ss:$16 sps:$4 sm:$0xff]  }
  0x1e   :  { %v3295_v26 = vld [vmem:[%s4582_s1 + $0x288] ss:$16 sps:$4 sm:$0xff]   ;;  %v3300_v27 = vld [vmem:[%s4582_s1 + $0x2a4] ss:$16 sps:$4 sm:$0xff]   ;;  %v3303_v28 = vld [vmem:[%s4582_s1 + $0x2ac] ss:$16 sps:$4 sm:$0xff]   ;;  %v2855_v29 = vcombine.low %v15_v3, %v588_v24 }
  0x1f   :  { %265 = vmatpush1.bf16.msra.mxu0 %v3215_v31  ;;  %308 = vmatpush1.bf16.msra.mxu1 %v3216_v32  ;;  %v3298_v30 = vld [vmem:[%s4582_s1 + $0x2a0] ss:$16 sps:$4 sm:$0xff]   ;;  %v3301_v31 = vld [vmem:[%s4582_s1 + $0x2a8] ss:$16 sps:$4 sm:$0xff]   ;;  %v3306_v32 = vld [vmem:[%s4582_s1 + $0x2c4] ss:$16 sps:$4 sm:$0xff]  }
  0x20   :  { %502 = vmatprep.subr.bf16.mxu0 %v3219_v33  ;;  %545 = vmatprep.subr.bf16.mxu1 %v3222_v34  ;;  %v3309_v33 = vld [vmem:[%s4582_s1 + $0x2cc] ss:$16 sps:$4 sm:$0xff]   ;;  %v627_v34 = vshll.u32 %v2855_v29, 16  ;;  %v3346_v3 = vld [vmem:[%s4582_s1 + $0x3a0] ss:$16 sps:$4 sm:$0xff]  }
  0x21   :  { %v3349_v4 = vld [vmem:[%s4582_s1 + $0x3a8] ss:$16 sps:$4 sm:$0xff]   ;;  %v3380_v24 = vld [vmem:[%s4582_s1 + $0x444] ss:$16 sps:$4 sm:$0xff]  }
  0x22   :  { %283 = vmatmul.mubr.bf16.vlgmr.msra.gmra.mrb[0].mxu0 %v3223_v36  ;;  %326 = vmatmul.mubr.bf16.vlgmr.msra.gmra.mrb[0].mxu1 %v3223_v36  ;;  %v3307_v36 = vld [vmem:[%s4582_s1 + $0x2c8] ss:$16 sps:$4 sm:$0xff]  }
  0x23   :  { %503 = vmatpush1.bf16.msra.mxu0 %v3217_v35  ;;  %546 = vmatpush1.bf16.msra.mxu1 %v3220_v37  ;;  %v3304_v35 = vld [vmem:[%s4582_s1 + $0x2c0] ss:$16 sps:$4 sm:$0xff]   ;;  %v3312_v37 = vld [vmem:[%s4582_s1 + $0x2e4] ss:$16 sps:$4 sm:$0xff]  }
  0x24   :  { %504 = vmatprep.subr.bf16.mxu0 %v3226_v38  ;;  %547 = vmatprep.subr.bf16.mxu1 %v3229_v39  ;;  %v3315_v38 = vld [vmem:[%s4582_s1 + $0x2ec] ss:$16 sps:$4 sm:$0xff]   ;;  %v3310_v39 = vld [vmem:[%s4582_s1 + $0x2e0] ss:$16 sps:$4 sm:$0xff]  }
  0x25   :  { %534 = vmatprep.mubr.bf16.mxu0 %v3612_v1  ;;  %577 = vmatprep.mubr.bf16.mxu1 %v3612_v1 }
  0x27   :  { %505 = vmatpush1.bf16.msra.mxu0 %v3224_v40  ;;  %548 = vmatpush1.bf16.msra.mxu1 %v3227_v41  ;;  %v625_v40 = vshrl.u32 %v2855_v29, 16  ;;  %v629_v41 = vrot.slane %v627_v34, 1  ;;  %v3389_v29 = vld [vmem:[%s4582_s1 + $0x46c] ss:$16 sps:$4 sm:$0xff]   ;;  %v3390_v34 = vld [vmem:[%s4582_s1 + $0x480] ss:$16 sps:$4 sm:$0xff]  }
  0x28   :  { %506 = vmatprep.subr.bf16.mxu0 %v3232_v42  ;;  %549 = vmatprep.subr.bf16.mxu1 %v3235_v43  ;;  %v3313_v42 = vld [vmem:[%s4582_s1 + $0x2e8] ss:$16 sps:$4 sm:$0xff]   ;;  %v3318_v43 = vld [vmem:[%s4582_s1 + $0x304] ss:$16 sps:$4 sm:$0xff]  }
  0x2b   :  { %507 = vmatpush1.bf16.msra.mxu0 %v3230_v44  ;;  %550 = vmatpush1.bf16.msra.mxu1 %v3233_v45  ;;  %v3321_v44 = vld [vmem:[%s4582_s1 + $0x30c] ss:$16 sps:$4 sm:$0xff]   ;;  %v3316_v45 = vld [vmem:[%s4582_s1 + $0x300] ss:$16 sps:$4 sm:$0xff]  }
  0x2c   :  { %508 = vmatprep.subr.bf16.mxu0 %v3238_v46  ;;  %551 = vmatprep.subr.bf16.mxu1 %v3241_v47  ;;  %v630_v46 = vor.u32 %v629_v41, %v625_v40  ;;  %v3319_v47 = vld [vmem:[%s4582_s1 + $0x308] ss:$16 sps:$4 sm:$0xff]   ;;  %v3404_v40 = vld [vmem:[%s4582_s1 + $0x4c4] ss:$16 sps:$4 sm:$0xff]   ;;  %v3407_v41 = vld [vmem:[%s4582_s1 + $0x4cc] ss:$16 sps:$4 sm:$0xff]  }
  0x2f   :  { %509 = vmatpush1.bf16.msra.mxu0 %v3236_v48  ;;  %552 = vmatpush1.bf16.msra.mxu1 %v3239_v49  ;;  %v3324_v48 = vld [vmem:[%s4582_s1 + $0x324] ss:$16 sps:$4 sm:$0xff]   ;;  %v3327_v49 = vld [vmem:[%s4582_s1 + $0x32c] ss:$16 sps:$4 sm:$0xff]  }
  0x30   :  { %510 = vmatprep.subr.bf16.mxu0 %v3244_v50  ;;  %553 = vmatprep.subr.bf16.mxu1 %v3247_v51  ;;  %v3322_v50 = vld [vmem:[%s4582_s1 + $0x320] ss:$16 sps:$4 sm:$0xff]   ;;  %v3325_v51 = vld [vmem:[%s4582_s1 + $0x328] ss:$16 sps:$4 sm:$0xff]  }
  0x33   :  { %511 = vmatpush1.bf16.msra.mxu0 %v3242_v52  ;;  %554 = vmatpush1.bf16.msra.mxu1 %v3245_v53  ;;  %v3330_v52 = vld [vmem:[%s4582_s1 + $0x344] ss:$16 sps:$4 sm:$0xff]   ;;  %v3333_v53 = vld [vmem:[%s4582_s1 + $0x34c] ss:$16 sps:$4 sm:$0xff]  }
  0x34   :  { %512 = vmatprep.subr.bf16.mxu0 %v3250_v54  ;;  %555 = vmatprep.subr.bf16.mxu1 %v3253_v55  ;;  %v3328_v54 = vld [vmem:[%s4582_s1 + $0x340] ss:$16 sps:$4 sm:$0xff]   ;;  %v3331_v55 = vld [vmem:[%s4582_s1 + $0x348] ss:$16 sps:$4 sm:$0xff]  }
  0x37   :  { %513 = vmatpush1.bf16.msra.mxu0 %v3248_v56  ;;  %556 = vmatpush1.bf16.msra.mxu1 %v3251_v57  ;;  %v3336_v56 = vld [vmem:[%s4582_s1 + $0x364] ss:$16 sps:$4 sm:$0xff]   ;;  %v3339_v57 = vld [vmem:[%s4582_s1 + $0x36c] ss:$16 sps:$4 sm:$0xff]  }
  0x38   :  { %514 = vmatprep.subr.bf16.mxu0 %v3256_v58  ;;  %557 = vmatprep.subr.bf16.mxu1 %v3259_v59  ;;  %v3334_v58 = vld [vmem:[%s4582_s1 + $0x360] ss:$16 sps:$4 sm:$0xff]   ;;  %v3337_v59 = vld [vmem:[%s4582_s1 + $0x368] ss:$16 sps:$4 sm:$0xff]  }
  0x3b   :  { %515 = vmatpush1.bf16.msra.mxu0 %v3254_v60  ;;  %558 = vmatpush1.bf16.msra.mxu1 %v3257_v61  ;;  %v3342_v60 = vld [vmem:[%s4582_s1 + $0x384] ss:$16 sps:$4 sm:$0xff]   ;;  %v3345_v61 = vld [vmem:[%s4582_s1 + $0x38c] ss:$16 sps:$4 sm:$0xff]  }
  0x3c   :  { %516 = vmatprep.subr.bf16.mxu0 %v3262_v62  ;;  %559 = vmatprep.subr.bf16.mxu1 %v3265_v63  ;;  %v3340_v62 = vld [vmem:[%s4582_s1 + $0x380] ss:$16 sps:$4 sm:$0xff]   ;;  %v3343_v63 = vld [vmem:[%s4582_s1 + $0x388] ss:$16 sps:$4 sm:$0xff]  }
  0x3f   :  { %517 = vmatpush1.bf16.msra.mxu0 %v3260_v0  ;;  %560 = vmatpush1.bf16.msra.mxu1 %v3263_v2  ;;  %v3348_v0 = vld [vmem:[%s4582_s1 + $0x3a4] ss:$16 sps:$4 sm:$0xff]   ;;  %v3351_v2 = vld [vmem:[%s4582_s1 + $0x3ac] ss:$16 sps:$4 sm:$0xff]  }
  0x40   :  { %792 = vmatprep.subr.bf16.mxu0 %v3268_v5  ;;  %835 = vmatprep.subr.bf16.mxu1 %v3271_v6  ;;  %v3354_v5 = vld [vmem:[%s4582_s1 + $0x3c4] ss:$16 sps:$4 sm:$0xff]   ;;  %v3357_v6 = vld [vmem:[%s4582_s1 + $0x3cc] ss:$16 sps:$4 sm:$0xff]  }
  0x42   :  { %535 = vmatmul.mubr.bf16.vlgmr.msra.gmra.mrb[0].mxu0 %v2822_v7  ;;  %578 = vmatmul.mubr.bf16.vlgmr.msra.gmra.mrb[0].mxu1 %v2822_v7  ;;  %v3352_v7 = vld [vmem:[%s4582_s1 + $0x3c0] ss:$16 sps:$4 sm:$0xff]  }
  0x43   :  { %793 = vmatpush1.bf16.msra.mxu0 %v3266_v8  ;;  %836 = vmatpush1.bf16.msra.mxu1 %v3269_v9  ;;  %v3355_v8 = vld [vmem:[%s4582_s1 + $0x3c8] ss:$16 sps:$4 sm:$0xff]   ;;  %v3360_v9 = vld [vmem:[%s4582_s1 + $0x3e4] ss:$16 sps:$4 sm:$0xff]  }
  0x44   :  { %794 = vmatprep.subr.bf16.mxu0 %v3276_v10  ;;  %837 = vmatprep.subr.bf16.mxu1 %v3279_v11  ;;  %v3363_v10 = vld [vmem:[%s4582_s1 + $0x3ec] ss:$16 sps:$4 sm:$0xff]   ;;  %v3358_v11 = vld [vmem:[%s4582_s1 + $0x3e0] ss:$16 sps:$4 sm:$0xff]  }
  0x45   :  { %824 = vmatprep.mubr.bf16.mxu0 %v3612_v1  ;;  %867 = vmatprep.mubr.bf16.mxu1 %v3612_v1 }
  0x47   :  { %795 = vmatpush1.bf16.msra.mxu0 %v3274_v12  ;;  %838 = vmatpush1.bf16.msra.mxu1 %v3277_v13  ;;  %v3361_v12 = vld [vmem:[%s4582_s1 + $0x3e8] ss:$16 sps:$4 sm:$0xff]   ;;  %v3366_v13 = vld [vmem:[%s4582_s1 + $0x404] ss:$16 sps:$4 sm:$0xff]  }
  0x48   :  { %796 = vmatprep.subr.bf16.mxu0 %v3282_v14  ;;  %839 = vmatprep.subr.bf16.mxu1 %v3285_v15  ;;  %v4043_v14 = vld [vmem:[%s4583_s0 + $0x18] sm:$0xf]  ;;  %v2889_v15 = vld [vmem:[%s4583_s0 + $0x1c] sm:$0x7] }
  0x4b   :  { %797 = vmatpush1.bf16.msra.mxu0 %v3280_v16  ;;  %840 = vmatpush1.bf16.msra.mxu1 %v3283_v17  ;;  %v3369_v16 = vld [vmem:[%s4582_s1 + $0x40c] ss:$16 sps:$4 sm:$0xff]   ;;  %v3364_v17 = vld [vmem:[%s4582_s1 + $0x400] ss:$16 sps:$4 sm:$0xff]  }
  0x4c   :  { %798 = vmatprep.subr.bf16.mxu0 %v3288_v18  ;;  %841 = vmatprep.subr.bf16.mxu1 %v3291_v19  ;;  %v3367_v18 = vld [vmem:[%s4582_s1 + $0x408] ss:$16 sps:$4 sm:$0xff]   ;;  %v2890_v19 = vcombine.low %v4043_v14, %v2889_v15 }
  0x4f   :  { %799 = vmatpush1.bf16.msra.mxu0 %v3286_v20  ;;  %842 = vmatpush1.bf16.msra.mxu1 %v3289_v21  ;;  %v3374_v20 = vld [vmem:[%s4582_s1 + $0x424] ss:$16 sps:$4 sm:$0xff]   ;;  %v3377_v21 = vld [vmem:[%s4582_s1 + $0x42c] ss:$16 sps:$4 sm:$0xff]  }
  0x50   :  { %800 = vmatprep.subr.bf16.mxu0 %v3294_v22  ;;  %843 = vmatprep.subr.bf16.mxu1 %v3297_v23  ;;  %v3372_v22 = vld [vmem:[%s4582_s1 + $0x420] ss:$16 sps:$4 sm:$0xff]   ;;  %v3375_v23 = vld [vmem:[%s4582_s1 + $0x428] ss:$16 sps:$4 sm:$0xff]  }
  0x53   :  { %801 = vmatpush1.bf16.msra.mxu0 %v3292_v25  ;;  %844 = vmatpush1.bf16.msra.mxu1 %v3295_v26  ;;  %v3383_v25 = vld [vmem:[%s4582_s1 + $0x44c] ss:$16 sps:$4 sm:$0xff]   ;;  %v3378_v26 = vld [vmem:[%s4582_s1 + $0x440] ss:$16 sps:$4 sm:$0xff]  }
  0x54   :  { %802 = vmatprep.subr.bf16.mxu0 %v3300_v27  ;;  %845 = vmatprep.subr.bf16.mxu1 %v3303_v28  ;;  %v3381_v27 = vld [vmem:[%s4582_s1 + $0x448] ss:$16 sps:$4 sm:$0xff]   ;;  %v3386_v28 = vld [vmem:[%s4582_s1 + $0x464] ss:$16 sps:$4 sm:$0xff]  }
  0x57   :  { %803 = vmatpush1.bf16.msra.mxu0 %v3298_v30  ;;  %846 = vmatpush1.bf16.msra.mxu1 %v3301_v31  ;;  %v3384_v30 = vld [vmem:[%s4582_s1 + $0x460] ss:$16 sps:$4 sm:$0xff]   ;;  %v3387_v31 = vld [vmem:[%s4582_s1 + $0x468] ss:$16 sps:$4 sm:$0xff]  }
  0x58   :  { %804 = vmatprep.subr.bf16.mxu0 %v3306_v32  ;;  %847 = vmatprep.subr.bf16.mxu1 %v3309_v33  ;;  %v3392_v32 = vld [vmem:[%s4582_s1 + $0x484] ss:$16 sps:$4 sm:$0xff]   ;;  %v3395_v33 = vld [vmem:[%s4582_s1 + $0x48c] ss:$16 sps:$4 sm:$0xff]  }
  0x5b   :  { %805 = vmatpush1.bf16.msra.mxu0 %v3304_v35  ;;  %848 = vmatpush1.bf16.msra.mxu1 %v3307_v36  ;;  %v3393_v35 = vld [vmem:[%s4582_s1 + $0x488] ss:$16 sps:$4 sm:$0xff]   ;;  %v3398_v36 = vld [vmem:[%s4582_s1 + $0x4a4] ss:$16 sps:$4 sm:$0xff]  }
  0x5c   :  { %806 = vmatprep.subr.bf16.mxu0 %v3312_v37  ;;  %849 = vmatprep.subr.bf16.mxu1 %v3315_v38  ;;  %v3401_v37 = vld [vmem:[%s4582_s1 + $0x4ac] ss:$16 sps:$4 sm:$0xff]   ;;  %v3396_v38 = vld [vmem:[%s4582_s1 + $0x4a0] ss:$16 sps:$4 sm:$0xff]  }
  0x5f   :  { %807 = vmatpush1.bf16.msra.mxu0 %v3310_v39  ;;  %850 = vmatpush1.bf16.msra.mxu1 %v3313_v42  ;;  %v3399_v39 = vld [vmem:[%s4582_s1 + $0x4a8] ss:$16 sps:$4 sm:$0xff]   ;;  %v3402_v42 = vld [vmem:[%s4582_s1 + $0x4c0] ss:$16 sps:$4 sm:$0xff]  }
  0x60   :  { %1087 = vmatprep.subr.bf16.mxu0 %v3318_v43  ;;  %1130 = vmatprep.subr.bf16.mxu1 %v3321_v44  ;;  %v3405_v43 = vld [vmem:[%s4582_s1 + $0x4c8] ss:$16 sps:$4 sm:$0xff]   ;;  %v3410_v44 = vld [vmem:[%s4582_s1 + $0x4e4] ss:$16 sps:$4 sm:$0xff]  }
  0x62   :  { %825 = vmatmul.mubr.bf16.vlgmr.msra.gmra.mrb[0].mxu0 %v630_v46  ;;  %868 = vmatmul.mubr.bf16.vlgmr.msra.gmra.mrb[0].mxu1 %v630_v46  ;;  %v3408_v46 = vld [vmem:[%s4582_s1 + $0x4e0] ss:$16 sps:$4 sm:$0xff]  }
  0x63   :  { %1088 = vmatpush1.bf16.msra.mxu0 %v3316_v45  ;;  %1131 = vmatpush1.bf16.msra.mxu1 %v3319_v47  ;;  %v3413_v45 = vld [vmem:[%s4582_s1 + $0x4ec] ss:$16 sps:$4 sm:$0xff]   ;;  %v3411_v47 = vld [vmem:[%s4582_s1 + $0x4e8] ss:$16 sps:$4 sm:$0xff]  }
  0x64   :  { %1089 = vmatprep.subr.bf16.mxu0 %v3324_v48  ;;  %1132 = vmatprep.subr.bf16.mxu1 %v3327_v49  ;;  %v3416_v48 = vld [vmem:[%s4582_s1 + $0x504] ss:$16 sps:$4 sm:$0xff]   ;;  %v3419_v49 = vld [vmem:[%s4582_s1 + $0x50c] ss:$16 sps:$4 sm:$0xff]  }
  0x65   :  { %1119 = vmatprep.mubr.bf16.mxu0 %v3612_v1  ;;  %1162 = vmatprep.mubr.bf16.mxu1 %v3612_v1 }
  0x67   :  { %1090 = vmatpush1.bf16.msra.mxu0 %v3322_v50  ;;  %1133 = vmatpush1.bf16.msra.mxu1 %v3325_v51  ;;  %v3414_v50 = vld [vmem:[%s4582_s1 + $0x500] ss:$16 sps:$4 sm:$0xff]   ;;  %v3420_v51 = vld [vmem:[%s4583_s0 + $0x24] sm:$0x7f]  }
  0x68   :  { %1091 = vmatprep.subr.bf16.mxu0 %v3330_v52  ;;  %1134 = vmatprep.subr.bf16.mxu1 %v3333_v53  ;;  %v3417_v52 = vld [vmem:[%s4582_s1 + $0x508] ss:$16 sps:$4 sm:$0xff]   ;;  %v3423_v53 = vld [vmem:[%s4582_s1 + $0x524] ss:$16 sps:$4 sm:$0xff]  }
  0x6b   :  { %1092 = vmatpush1.bf16.msra.mxu0 %v3328_v54  ;;  %1135 = vmatpush1.bf16.msra.mxu1 %v3331_v55  ;;  %v3426_v54 = vld [vmem:[%s4582_s1 + $0x52c] ss:$16 sps:$4 sm:$0xff]   ;;  %v3421_v55 = vld [vmem:[%s4582_s1 + $0x520] ss:$16 sps:$4 sm:$0xff]  }
  0x6c   :  { %1093 = vmatprep.subr.bf16.mxu0 %v3336_v56  ;;  %1136 = vmatprep.subr.bf16.mxu1 %v3339_v57  ;;  %v3424_v56 = vld [vmem:[%s4582_s1 + $0x528] ss:$16 sps:$4 sm:$0xff]   ;;  %v3429_v57 = vld [vmem:[%s4582_s1 + $0x544] ss:$16 sps:$4 sm:$0xff]  }
  0x6f   :  { %1094 = vmatpush1.bf16.msra.mxu0 %v3334_v58  ;;  %1137 = vmatpush1.bf16.msra.mxu1 %v3337_v59  ;;  %v3432_v58 = vld [vmem:[%s4582_s1 + $0x54c] ss:$16 sps:$4 sm:$0xff]   ;;  %v3427_v59 = vld [vmem:[%s4582_s1 + $0x540] ss:$16 sps:$4 sm:$0xff]  }
  0x70   :  { %1095 = vmatprep.subr.bf16.mxu0 %v3342_v60  ;;  %1138 = vmatprep.subr.bf16.mxu1 %v3345_v61  ;;  %v3430_v60 = vld [vmem:[%s4582_s1 + $0x548] ss:$16 sps:$4 sm:$0xff]   ;;  %v3435_v61 = vld [vmem:[%s4582_s1 + $0x564] ss:$16 sps:$4 sm:$0xff]  }
  0x73   :  { %1096 = vmatpush1.bf16.msra.mxu0 %v3340_v62  ;;  %1139 = vmatpush1.bf16.msra.mxu1 %v3343_v63  ;;  %v3438_v62 = vld [vmem:[%s4582_s1 + $0x56c] ss:$16 sps:$4 sm:$0xff]   ;;  %v3433_v63 = vld [vmem:[%s4582_s1 + $0x560] ss:$16 sps:$4 sm:$0xff]  }
  0x74   :  { %1097 = vmatprep.subr.bf16.mxu0 %v3348_v0  ;;  %1140 = vmatprep.subr.bf16.mxu1 %v3351_v2  ;;  %v3436_v0 = vld [vmem:[%s4582_s1 + $0x568] ss:$16 sps:$4 sm:$0xff]   ;;  %v3441_v2 = vld [vmem:[%s4582_s1 + $0x584] ss:$16 sps:$4 sm:$0xff]  }
  0x77   :  { %1098 = vmatpush1.bf16.msra.mxu0 %v3346_v3  ;;  %1141 = vmatpush1.bf16.msra.mxu1 %v3349_v4  ;;  %v3444_v3 = vld [vmem:[%s4582_s1 + $0x58c] ss:$16 sps:$4 sm:$0xff]  }
  0x78   :  { %1099 = vmatprep.subr.bf16.mxu0 %v3354_v5  ;;  %1142 = vmatprep.subr.bf16.mxu1 %v3357_v6  ;;  %v2958_v4 = vld [vmem:[%s4583_s0 + $0x1c] sm:$0xf]  ;;  %v3439_v5 = vld [vmem:[%s4582_s1 + $0x580] ss:$16 sps:$4 sm:$0xff]   ;;  %v3442_v6 = vld [vmem:[%s4582_s1 + $0x588] ss:$16 sps:$4 sm:$0xff]  }
  0x7b   :  { %1100 = vmatpush1.bf16.msra.mxu0 %v3352_v7  ;;  %1143 = vmatpush1.bf16.msra.mxu1 %v3355_v8  ;;  %v3447_v7 = vld [vmem:[%s4582_s1 + $0x5a4] ss:$16 sps:$4 sm:$0xff]   ;;  %v3450_v8 = vld [vmem:[%s4582_s1 + $0x5ac] ss:$16 sps:$4 sm:$0xff]  }
  0x7c   :  { %1101 = vmatprep.subr.bf16.mxu0 %v3360_v9  ;;  %1144 = vmatprep.subr.bf16.mxu1 %v3363_v10  ;;  %v2959_v9 = vcombine.low %v4043_v14, %v2958_v4  ;;  %v3445_v10 = vld [vmem:[%s4582_s1 + $0x5a0] ss:$16 sps:$4 sm:$0xff]   ;;  %v3510_v4 = vld [vmem:[%s4582_s1 + $0x6ec] ss:$16 sps:$4 sm:$0xff]  }
  0x7d   :  { %v3451_v14 = vld [vmem:[%s4582_s1 + $0x5c0] ss:$16 sps:$4 sm:$0xff]  }
  0x7e   :  { %v1515_v15 = vshll.u32 %v2959_v9, 16 }
  0x7f   :  { %1102 = vmatpush1.bf16.msra.mxu0 %v3358_v11  ;;  %1145 = vmatpush1.bf16.msra.mxu1 %v3361_v12  ;;  %v3448_v11 = vld [vmem:[%s4582_s1 + $0x5a8] ss:$16 sps:$4 sm:$0xff]   ;;  %v3453_v12 = vld [vmem:[%s4582_s1 + $0x5c4] ss:$16 sps:$4 sm:$0xff]  }
  0x80   :  { %1382 = vmatprep.subr.bf16.mxu0 %v3366_v13  ;;  %1425 = vmatprep.subr.bf16.mxu1 %v3369_v16  ;;  %v3456_v13 = vld [vmem:[%s4582_s1 + $0x5cc] ss:$16 sps:$4 sm:$0xff]   ;;  %v3454_v16 = vld [vmem:[%s4582_s1 + $0x5c8] ss:$16 sps:$4 sm:$0xff]  }
  0x82   :  { %1120 = vmatmul.mubr.bf16.vlgmr.msra.gmra.mrb[0].mxu0 %v2890_v19  ;;  %1163 = vmatmul.mubr.bf16.vlgmr.msra.gmra.mrb[0].mxu1 %v2890_v19  ;;  %v3457_v19 = vld [vmem:[%s4582_s1 + $0x5e0] ss:$16 sps:$4 sm:$0xff]  }
  0x83   :  { %1383 = vmatpush1.bf16.msra.mxu0 %v3364_v17  ;;  %1426 = vmatpush1.bf16.msra.mxu1 %v3367_v18  ;;  %v3459_v17 = vld [vmem:[%s4582_s1 + $0x5e4] ss:$16 sps:$4 sm:$0xff]   ;;  %v3462_v18 = vld [vmem:[%s4582_s1 + $0x5ec] ss:$16 sps:$4 sm:$0xff]  }
  0x84   :  { %1384 = vmatprep.subr.bf16.mxu0 %v3374_v20  ;;  %1427 = vmatprep.subr.bf16.mxu1 %v3377_v21  ;;  %v1513_v20 = vshrl.u32 %v2959_v9, 16  ;;  %v1517_v21 = vrot.slane %v1515_v15, 1  ;;  %v3513_v9 = vld [vmem:[%s4582_s1 + $0x704] ss:$16 sps:$4 sm:$0xff]   ;;  %v3524_v15 = vld [vmem:[%s4582_s1 + $0x72c] ss:$16 sps:$4 sm:$0xff]  }
  0x85   :  { %1414 = vmatprep.mubr.bf16.mxu0 %v3612_v1  ;;  %1457 = vmatprep.mubr.bf16.mxu1 %v3612_v1 }
  0x87   :  { %1385 = vmatpush1.bf16.msra.mxu0 %v3372_v22  ;;  %1428 = vmatpush1.bf16.msra.mxu1 %v3375_v23  ;;  %v3460_v22 = vld [vmem:[%s4582_s1 + $0x5e8] ss:$16 sps:$4 sm:$0xff]   ;;  %v3465_v23 = vld [vmem:[%s4582_s1 + $0x604] ss:$16 sps:$4 sm:$0xff]  }
  0x88   :  { %1386 = vmatprep.subr.bf16.mxu0 %v3380_v24  ;;  %1429 = vmatprep.subr.bf16.mxu1 %v3383_v25  ;;  %v3468_v24 = vld [vmem:[%s4582_s1 + $0x60c] ss:$16 sps:$4 sm:$0xff]   ;;  %v3463_v25 = vld [vmem:[%s4582_s1 + $0x600] ss:$16 sps:$4 sm:$0xff]  }
  0x8b   :  { %1387 = vmatpush1.bf16.msra.mxu0 %v3378_v26  ;;  %1430 = vmatpush1.bf16.msra.mxu1 %v3381_v27  ;;  %v1518_v26 = vor.u32 %v1517_v21, %v1513_v20  ;;  %v3466_v27 = vld [vmem:[%s4582_s1 + $0x608] ss:$16 sps:$4 sm:$0xff]   ;;  %v3525_v20 = vld [vmem:[%s4582_s1 + $0x740] ss:$16 sps:$4 sm:$0xff]  }
  0x8c   :  { %1388 = vmatprep.subr.bf16.mxu0 %v3386_v28  ;;  %1431 = vmatprep.subr.bf16.mxu1 %v3389_v29  ;;  %v3471_v28 = vld [vmem:[%s4582_s1 + $0x624] ss:$16 sps:$4 sm:$0xff]   ;;  %v3474_v29 = vld [vmem:[%s4582_s1 + $0x62c] ss:$16 sps:$4 sm:$0xff]   ;;  %v3528_v21 = vld [vmem:[%s4582_s1 + $0x748] ss:$16 sps:$4 sm:$0xff]  }
  0x8f   :  { %1389 = vmatpush1.bf16.msra.mxu0 %v3384_v30  ;;  %1432 = vmatpush1.bf16.msra.mxu1 %v3387_v31  ;;  %v3469_v30 = vld [vmem:[%s4582_s1 + $0x620] ss:$16 sps:$4 sm:$0xff]   ;;  %v3472_v31 = vld [vmem:[%s4582_s1 + $0x628] ss:$16 sps:$4 sm:$0xff]  }
  0x90   :  { %1390 = vmatprep.subr.bf16.mxu0 %v3392_v32  ;;  %1433 = vmatprep.subr.bf16.mxu1 %v3395_v33  ;;  %v3477_v32 = vld [vmem:[%s4582_s1 + $0x644] ss:$16 sps:$4 sm:$0xff]   ;;  %v3480_v33 = vld [vmem:[%s4582_s1 + $0x64c] ss:$16 sps:$4 sm:$0xff]  }
  0x93   :  { %1391 = vmatpush1.bf16.msra.mxu0 %v3390_v34  ;;  %1434 = vmatpush1.bf16.msra.mxu1 %v3393_v35  ;;  %v3518_v34 = vld [vmem:[%s4583_s0 + $0x8] ss:$0 sps:$4 sm:$0x11]   ;;  %v1775_v35 = vld [vmem:[%s4583_s0 + $0x4] sm:$0xf] }
  0x94   :  { %1392 = vmatprep.subr.bf16.mxu0 %v3398_v36  ;;  %1435 = vmatprep.subr.bf16.mxu1 %v3401_v37  ;;  %v2397_v36 = vld [vmem:[%s4583_s0] sm:$0xc] }
  0x95   :  { %v3475_v37 = vld [vmem:[%s4582_s1 + $0x640] ss:$16 sps:$4 sm:$0xff]  }
  0x97   :  { %1393 = vmatpush1.bf16.msra.mxu0 %v3396_v38  ;;  %1436 = vmatpush1.bf16.msra.mxu1 %v3399_v39  ;;  %v3478_v38 = vld [vmem:[%s4582_s1 + $0x648] ss:$16 sps:$4 sm:$0xff]   ;;  %v3063_v39 = vcombine.low %v2397_v36, %v1775_v35 }
  0x98   :  { %1394 = vmatprep.subr.bf16.mxu0 %v3404_v40  ;;  %1437 = vmatprep.subr.bf16.mxu1 %v3407_v41  ;;  %v2435_v40 = vrot.slane %v3518_v34, 2  ;;  %v3483_v41 = vld [vmem:[%s4582_s1 + $0x664] ss:$16 sps:$4 sm:$0xff]  }
  0x9b   :  { %1395 = vmatpush1.bf16.msra.mxu0 %v3402_v42  ;;  %1438 = vmatpush1.bf16.msra.mxu1 %v3405_v43  ;;  %v3486_v42 = vld [vmem:[%s4582_s1 + $0x66c] ss:$16 sps:$4 sm:$0xff]   ;;  %v2434_v43 = vrot.slane %v3063_v39, 2 }
  0x9c   :  { %1396 = vmatprep.subr.bf16.mxu0 %v3410_v44  ;;  %1439 = vmatprep.subr.bf16.mxu1 %v3413_v45  ;;  %v3481_v44 = vld [vmem:[%s4582_s1 + $0x660] ss:$16 sps:$4 sm:$0xff]   ;;  %v3484_v45 = vld [vmem:[%s4582_s1 + $0x668] ss:$16 sps:$4 sm:$0xff]   ;;  %v3554_v39 = vld [vmem:[%s4582_s1 + $0x7cc] ss:$16 sps:$4 sm:$0xff]  }
  0x9f   :  { %1397 = vmatpush1.bf16.msra.mxu0 %v3408_v46  ;;  %1440 = vmatpush1.bf16.msra.mxu1 %v3411_v47  ;;  %v4308_v46 = vsel %vm2433_vm0, %v2434_v43, %v2435_v40  ;;  %v3489_v47 = vld [vmem:[%s4582_s1 + $0x684] ss:$16 sps:$4 sm:$0xff]   ;;  %v3549_v40 = vld [vmem:[%s4582_s1 + $0x7c0] ss:$16 sps:$4 sm:$0xff]  }
  0xa0   :  { %1680 = vmatprep.subr.bf16.mxu0 %v3416_v48  ;;  %1723 = vmatprep.subr.bf16.mxu1 %v3419_v49  ;;  %v3492_v48 = vld [vmem:[%s4582_s1 + $0x68c] ss:$16 sps:$4 sm:$0xff]   ;;  %v1774_v49 = vld [vmem:[%s4583_s0] sm:$0xe] }
  0xa2   :  { %1415 = vmatmul.mubr.bf16.vlgmr.msra.gmra.mrb[0].mxu0 %v3420_v51  ;;  %1458 = vmatmul.mubr.bf16.vlgmr.msra.gmra.mrb[0].mxu1 %v3420_v51  ;;  %v3490_v51 = vld [vmem:[%s4582_s1 + $0x688] ss:$16 sps:$4 sm:$0xff]  }
  0xa3   :  { %1681 = vmatpush1.bf16.msra.mxu0 %v3414_v50  ;;  %1724 = vmatpush1.bf16.msra.mxu1 %v3417_v52  ;;  %v3487_v50 = vld [vmem:[%s4582_s1 + $0x680] ss:$16 sps:$4 sm:$0xff]   ;;  %v2992_v52 = vcombine.low %v1774_v49, %v1775_v35  ;;  %v3568_v35 = vld [vmem:[%s4583_s0 + $0x14] ss:$0 sps:$4 sm:$0x11]  }
  0xa4   :  { %1682 = vmatprep.subr.bf16.mxu0 %v3423_v53  ;;  %1725 = vmatprep.subr.bf16.mxu1 %v3426_v54  ;;  %v3495_v53 = vld [vmem:[%s4582_s1 + $0x6a4] ss:$16 sps:$4 sm:$0xff]   ;;  %v3498_v54 = vld [vmem:[%s4582_s1 + $0x6ac] ss:$16 sps:$4 sm:$0xff]   ;;  %v3558_v49 = vld [vmem:[%s4582_s1 + $0x7e8] ss:$16 sps:$4 sm:$0xff]  }
  0xa5   :  { %1712 = vmatprep.mubr.bf16.mxu0 %v3612_v1  ;;  %1755 = vmatprep.mubr.bf16.mxu1 %v3612_v1 }
  0xa7   :  { %1683 = vmatpush1.bf16.msra.mxu0 %v3421_v55  ;;  %1726 = vmatpush1.bf16.msra.mxu1 %v3424_v56  ;;  %v3493_v55 = vld [vmem:[%s4582_s1 + $0x6a0] ss:$16 sps:$4 sm:$0xff]   ;;  %v3496_v56 = vld [vmem:[%s4582_s1 + $0x6a8] ss:$16 sps:$4 sm:$0xff]  }
  0xa8   :  { %1684 = vmatprep.subr.bf16.mxu0 %v3429_v57  ;;  %1727 = vmatprep.subr.bf16.mxu1 %v3432_v58  ;;  %v1819_v57 = vshrl.u32 %v2992_v52, 16  ;;  %v1822_v58 = vshll.u32 %v2992_v52, 16  ;;  %v3563_v52 = vld [vmem:[%s4582_s1 + $0x804] ss:$16 sps:$4 sm:$0xff]  }
  0xab   :  { %1685 = vmatpush1.bf16.msra.mxu0 %v3427_v59  ;;  %1728 = vmatpush1.bf16.msra.mxu1 %v3430_v60  ;;  %v3501_v59 = vld [vmem:[%s4582_s1 + $0x6c4] ss:$16 sps:$4 sm:$0xff]   ;;  %v3504_v60 = vld [vmem:[%s4582_s1 + $0x6cc] ss:$16 sps:$4 sm:$0xff]  }
  0xac   :  { %1686 = vmatprep.subr.bf16.mxu0 %v3435_v61  ;;  %1729 = vmatprep.subr.bf16.mxu1 %v3438_v62  ;;  %v3499_v61 = vld [vmem:[%s4582_s1 + $0x6c0] ss:$16 sps:$4 sm:$0xff]   ;;  %v3502_v62 = vld [vmem:[%s4582_s1 + $0x6c8] ss:$16 sps:$4 sm:$0xff]  }
  0xaf   :  { %1687 = vmatpush1.bf16.msra.mxu0 %v3433_v63  ;;  %1730 = vmatpush1.bf16.msra.mxu1 %v3436_v0  ;;  %v1821_v63 = vrot.slane %v1819_v57, 1  ;;  %v1824_v0 = vrot.slane %v1822_v58, 2  ;;  %v3571_v57 = vld [vmem:[%s4582_s1 + $0x824] ss:$16 sps:$4 sm:$0xff]   ;;  %v3574_v58 = vld [vmem:[%s4582_s1 + $0x82c] ss:$16 sps:$4 sm:$0xff]  }
  0xb0   :  { %1688 = vmatprep.subr.bf16.mxu0 %v3441_v2  ;;  %1731 = vmatprep.subr.bf16.mxu1 %v3444_v3  ;;  %v1827_v2 = vshll.u32 %v3518_v34, 16  ;;  %v3507_v3 = vld [vmem:[%s4582_s1 + $0x6e4] ss:$16 sps:$4 sm:$0xff]   ;;  %v3546_v34 = vld [vmem:[%s4582_s1 + $0x7a8] ss:$16 sps:$4 sm:$0xff]  }
  0xb3   :  { %1689 = vmatpush1.bf16.msra.mxu0 %v3439_v5  ;;  %1732 = vmatpush1.bf16.msra.mxu1 %v3442_v6  ;;  %v3505_v5 = vld [vmem:[%s4582_s1 + $0x6e0] ss:$16 sps:$4 sm:$0xff]   ;;  %v3508_v6 = vld [vmem:[%s4582_s1 + $0x6e8] ss:$16 sps:$4 sm:$0xff]  }
  0xb4   :  { %1690 = vmatprep.subr.bf16.mxu0 %v3447_v7  ;;  %1733 = vmatprep.subr.bf16.mxu1 %v3450_v8  ;;  %v1825_v7 = vor.u32 %v1824_v0, %v1821_v63  ;;  %v1829_v8 = vrot.slane %v1827_v2, 2  ;;  %v3575_v63 = vld [vmem:[%s4582_s1 + $0x840] ss:$16 sps:$4 sm:$0xff]   ;;  %v3578_v0 = vld [vmem:[%s4582_s1 + $0x848] ss:$16 sps:$4 sm:$0xff]  }
  0xb5   :  { %v3583_v2 = vld [vmem:[%s4582_s1 + $0x864] ss:$16 sps:$4 sm:$0xff]  }
  0xb7   :  { %1691 = vmatpush1.bf16.msra.mxu0 %v3445_v10  ;;  %1734 = vmatpush1.bf16.msra.mxu1 %v3448_v11  ;;  %v3516_v10 = vld [vmem:[%s4582_s1 + $0x70c] ss:$16 sps:$4 sm:$0xff]   ;;  %v3511_v11 = vld [vmem:[%s4582_s1 + $0x700] ss:$16 sps:$4 sm:$0xff]  }
  0xb8   :  { %1692 = vmatprep.subr.bf16.mxu0 %v3453_v12  ;;  %1735 = vmatprep.subr.bf16.mxu1 %v3456_v13  ;;  %v3514_v12 = vld [vmem:[%s4582_s1 + $0x708] ss:$16 sps:$4 sm:$0xff]   ;;  %v1830_v13 = vsel %vm1817_vm1, %v1825_v7, %v1829_v8  ;;  %v3587_v7 = vld [vmem:[%s4582_s1 + $0x880] ss:$16 sps:$4 sm:$0xff]  }
  0xb9   :  { %v3590_v8 = vld [vmem:[%s4582_s1 + $0x888] ss:$16 sps:$4 sm:$0xff]  }
  0xbb   :  { %1693 = vmatpush1.bf16.msra.mxu0 %v3451_v14  ;;  %1736 = vmatpush1.bf16.msra.mxu1 %v3454_v16  ;;  %v3521_v14 = vld [vmem:[%s4582_s1 + $0x724] ss:$16 sps:$4 sm:$0xff]   ;;  %v3519_v16 = vld [vmem:[%s4582_s1 + $0x720] ss:$16 sps:$4 sm:$0xff]  }
  0xbc   :  { %1694 = vmatprep.subr.bf16.mxu0 %v3459_v17  ;;  %1737 = vmatprep.subr.bf16.mxu1 %v3462_v18  ;;  %v3522_v17 = vld [vmem:[%s4582_s1 + $0x728] ss:$16 sps:$4 sm:$0xff]   ;;  %v3527_v18 = vld [vmem:[%s4582_s1 + $0x744] ss:$16 sps:$4 sm:$0xff]  }
  0xbf   :  { %1695 = vmatpush1.bf16.msra.mxu0 %v3457_v19  ;;  %1738 = vmatpush1.bf16.msra.mxu1 %v3460_v22  ;;  %v3530_v19 = vld [vmem:[%s4582_s1 + $0x74c] ss:$16 sps:$4 sm:$0xff]   ;;  %v3533_v22 = vld [vmem:[%s4582_s1 + $0x764] ss:$16 sps:$4 sm:$0xff]  }
  0xc0   :  { %1992 = vmatprep.subr.bf16.mxu0 %v3465_v23  ;;  %2035 = vmatprep.subr.bf16.mxu1 %v3468_v24  ;;  %v3536_v23 = vld [vmem:[%s4582_s1 + $0x76c] ss:$16 sps:$4 sm:$0xff]   ;;  %v3531_v24 = vld [vmem:[%s4582_s1 + $0x760] ss:$16 sps:$4 sm:$0xff]  }
  0xc2   :  { %1713 = vmatmul.mubr.bf16.vlgmr.msra.gmra.mrb[0].mxu0 %v1518_v26  ;;  %1756 = vmatmul.mubr.bf16.vlgmr.msra.gmra.mrb[0].mxu1 %v1518_v26  ;;  %v3539_v26 = vld [vmem:[%s4582_s1 + $0x784] ss:$16 sps:$4 sm:$0xff]  }
  0xc3   :  { %1993 = vmatpush1.bf16.msra.mxu0 %v3463_v25  ;;  %2036 = vmatpush1.bf16.msra.mxu1 %v3466_v27  ;;  %v3534_v25 = vld [vmem:[%s4582_s1 + $0x768] ss:$16 sps:$4 sm:$0xff]   ;;  %v3542_v27 = vld [vmem:[%s4582_s1 + $0x78c] ss:$16 sps:$4 sm:$0xff]  }
  0xc4   :  { %1994 = vmatprep.subr.bf16.mxu0 %v3471_v28  ;;  %2037 = vmatprep.subr.bf16.mxu1 %v3474_v29  ;;  %v3537_v28 = vld [vmem:[%s4582_s1 + $0x780] ss:$16 sps:$4 sm:$0xff]   ;;  %v3540_v29 = vld [vmem:[%s4582_s1 + $0x788] ss:$16 sps:$4 sm:$0xff]  }
  0xc5   :  { %2024 = vmatprep.mubr.bf16.mxu0 %v3612_v1  ;;  %2067 = vmatprep.mubr.bf16.mxu1 %v3612_v1 }
  0xc7   :  { %1995 = vmatpush1.bf16.msra.mxu0 %v3469_v30  ;;  %2038 = vmatpush1.bf16.msra.mxu1 %v3472_v31  ;;  %v3567_v30 = vld [vmem:[%s4583_s0 + $0xc] sm:$0xfe]   ;;  %v3545_v31 = vld [vmem:[%s4582_s1 + $0x7a4] ss:$16 sps:$4 sm:$0xff]  }
  0xc8   :  { %1996 = vmatprep.subr.bf16.mxu0 %v3477_v32  ;;  %2039 = vmatprep.subr.bf16.mxu1 %v3480_v33  ;;  %v3548_v32 = vld [vmem:[%s4582_s1 + $0x7ac] ss:$16 sps:$4 sm:$0xff]   ;;  %v3543_v33 = vld [vmem:[%s4582_s1 + $0x7a0] ss:$16 sps:$4 sm:$0xff]   ;;  %v2130_v36 = vshrl.u32 %v3567_v30, 16 }
  0xcb   :  { %1997 = vmatpush1.bf16.msra.mxu0 %v3475_v37  ;;  %2040 = vmatpush1.bf16.msra.mxu1 %v3478_v38  ;;  %v2133_v37 = vshll.u32 %v3567_v30, 16  ;;  %v3551_v38 = vld [vmem:[%s4582_s1 + $0x7c4] ss:$16 sps:$4 sm:$0xff]  }
  0xcc   :  { %1998 = vmatprep.subr.bf16.mxu0 %v3483_v41  ;;  %2041 = vmatprep.subr.bf16.mxu1 %v3486_v42  ;;  %v3552_v41 = vld [vmem:[%s4582_s1 + $0x7c8] ss:$16 sps:$4 sm:$0xff]   ;;  %v2132_v42 = vrot.slane %v2130_v36, 1 }
  0xcd   :  { %v2135_v43 = vrot.slane %v2133_v37, 2 }
  0xcf   :  { %1999 = vmatpush1.bf16.msra.mxu0 %v3481_v44  ;;  %2042 = vmatpush1.bf16.msra.mxu1 %v3484_v45  ;;  %v2138_v44 = vshll.u32 %v3568_v35, 16  ;;  %v3557_v45 = vld [vmem:[%s4582_s1 + $0x7e4] ss:$16 sps:$4 sm:$0xff]  }
  0xd0   :  { %2000 = vmatprep.subr.bf16.mxu0 %v3489_v47  ;;  %2043 = vmatprep.subr.bf16.mxu1 %v3492_v48  ;;  %v3560_v47 = vld [vmem:[%s4582_s1 + $0x7ec] ss:$16 sps:$4 sm:$0xff]   ;;  %v3555_v48 = vld [vmem:[%s4582_s1 + $0x7e0] ss:$16 sps:$4 sm:$0xff]  }
  0xd3   :  { %2001 = vmatpush1.bf16.msra.mxu0 %v3487_v50  ;;  %2044 = vmatpush1.bf16.msra.mxu1 %v3490_v51  ;;  %v2136_v50 = vor.u32 %v2135_v43, %v2132_v42  ;;  %v2140_v51 = vrot.slane %v2138_v44, 2 }
  0xd4   :  { %2002 = vmatprep.subr.bf16.mxu0 %v3495_v53  ;;  %2045 = vmatprep.subr.bf16.mxu1 %v3498_v54  ;;  %v3566_v53 = vld [vmem:[%s4582_s1 + $0x80c] ss:$16 sps:$4 sm:$0xff]   ;;  %v3561_v54 = vld [vmem:[%s4582_s1 + $0x800] ss:$16 sps:$4 sm:$0xff]  }
  0xd7   :  { %2003 = vmatpush1.bf16.msra.mxu0 %v3493_v55  ;;  %2046 = vmatpush1.bf16.msra.mxu1 %v3496_v56  ;;  %v3564_v55 = vld [vmem:[%s4582_s1 + $0x808] ss:$16 sps:$4 sm:$0xff]   ;;  %v2141_v56 = vsel %vm1817_vm1, %v2136_v50, %v2140_v51 }
  0xd8   :  { %2004 = vmatprep.subr.bf16.mxu0 %v3501_v59  ;;  %2047 = vmatprep.subr.bf16.mxu1 %v3504_v60  ;;  %v3569_v59 = vld [vmem:[%s4582_s1 + $0x820] ss:$16 sps:$4 sm:$0xff]   ;;  %v3572_v60 = vld [vmem:[%s4582_s1 + $0x828] ss:$16 sps:$4 sm:$0xff]  }
  0xdb   :  { %2005 = vmatpush1.bf16.msra.mxu0 %v3499_v61  ;;  %2048 = vmatpush1.bf16.msra.mxu1 %v3502_v62  ;;  %v3577_v61 = vld [vmem:[%s4582_s1 + $0x844] ss:$16 sps:$4 sm:$0xff]   ;;  %v3580_v62 = vld [vmem:[%s4582_s1 + $0x84c] ss:$16 sps:$4 sm:$0xff]  }
  0xdc   :  { %2006 = vmatprep.subr.bf16.mxu0 %v3507_v3  ;;  %2049 = vmatprep.subr.bf16.mxu1 %v3510_v4  ;;  %v3581_v3 = vld [vmem:[%s4582_s1 + $0x860] ss:$16 sps:$4 sm:$0xff]   ;;  %v3584_v4 = vld [vmem:[%s4582_s1 + $0x868] ss:$16 sps:$4 sm:$0xff]  }
  0xdf   :  { %2007 = vmatpush1.bf16.msra.mxu0 %v3505_v5  ;;  %2050 = vmatpush1.bf16.msra.mxu1 %v3508_v6  ;;  %v3589_v5 = vld [vmem:[%s4582_s1 + $0x884] ss:$16 sps:$4 sm:$0xff]   ;;  %v3592_v6 = vld [vmem:[%s4582_s1 + $0x88c] ss:$16 sps:$4 sm:$0xff]  }
  0xe0   :  { %2303 = vmatprep.subr.bf16.mxu0 %v3513_v9  ;;  %2346 = vmatprep.subr.bf16.mxu1 %v3516_v10  ;;  %v3595_v9 = vld [vmem:[%s4582_s1 + $0x8a4] ss:$16 sps:$4 sm:$0xff]   ;;  %v3598_v10 = vld [vmem:[%s4582_s1 + $0x8ac] ss:$16 sps:$4 sm:$0xff]  }
  0xe2   :  { %2025 = vmatmul.mubr.bf16.vlgmr.msra.gmra.mrb[0].mxu0 %v1830_v13  ;;  %2068 = vmatmul.mubr.bf16.vlgmr.msra.gmra.mrb[0].mxu1 %v1830_v13  ;;  %v3601_v13 = vld [vmem:[%s4582_s1 + $0x8c4] ss:$16 sps:$4 sm:$0xff]  }
  0xe3   :  { %2304 = vmatpush1.bf16.msra.mxu0 %v3511_v11  ;;  %2347 = vmatpush1.bf16.msra.mxu1 %v3514_v12  ;;  %v3593_v11 = vld [vmem:[%s4582_s1 + $0x8a0] ss:$16 sps:$4 sm:$0xff]   ;;  %v3596_v12 = vld [vmem:[%s4582_s1 + $0x8a8] ss:$16 sps:$4 sm:$0xff]  }
  0xe4   :  { %2305 = vmatprep.subr.bf16.mxu0 %v3521_v14  ;;  %2348 = vmatprep.subr.bf16.mxu1 %v3524_v15  ;;  %v3604_v14 = vld [vmem:[%s4582_s1 + $0x8cc] ss:$16 sps:$4 sm:$0xff]   ;;  %v3599_v15 = vld [vmem:[%s4582_s1 + $0x8c0] ss:$16 sps:$4 sm:$0xff]  }
  0xe5   :  { %2335 = vmatprep.mubr.bf16.mxu0 %v3612_v1  ;;  %2378 = vmatprep.mubr.bf16.mxu1 %v3612_v1 }
  0xe7   :  { %2306 = vmatpush1.bf16.msra.mxu0 %v3519_v16  ;;  %2349 = vmatpush1.bf16.msra.mxu1 %v3522_v17  ;;  %v3602_v16 = vld [vmem:[%s4582_s1 + $0x8c8] ss:$16 sps:$4 sm:$0xff]   ;;  %v3607_v17 = vld [vmem:[%s4582_s1 + $0x8e4] ss:$16 sps:$4 sm:$0xff]  }
  0xe8   :  { %2307 = vmatprep.subr.bf16.mxu0 %v3527_v18  ;;  %2350 = vmatprep.subr.bf16.mxu1 %v3530_v19  ;;  %v3610_v18 = vld [vmem:[%s4582_s1 + $0x8ec] ss:$16 sps:$4 sm:$0xff]   ;;  %v3605_v19 = vld [vmem:[%s4582_s1 + $0x8e0] ss:$16 sps:$4 sm:$0xff]  }
  0xeb   :  { %2308 = vmatpush1.bf16.msra.mxu0 %v3525_v20  ;;  %2351 = vmatpush1.bf16.msra.mxu1 %v3528_v21  ;;  %v3608_v20 = vld [vmem:[%s4582_s1 + $0x8e8] ss:$16 sps:$4 sm:$0xff]   ;;  %v2694_v21 = vlaneseq }
  0xec   :  { %2309 = vmatprep.subr.bf16.mxu0 %v3533_v22  ;;  %2352 = vmatprep.subr.bf16.mxu1 %v3536_v23 }
  0xed   :  { %v2695_v22 = vshrl.u32 %v2694_v21, 7 }
  0xef   :  { %2310 = vmatpush1.bf16.msra.mxu0 %v3531_v24  ;;  %2353 = vmatpush1.bf16.msra.mxu1 %v3534_v25  ;;  %v2696_v23 = vsub.s32 0, %v2695_v22  ;;  %v2704_v24 = vsub.s32 2, %v2695_v22  ;;  %v2692_v25 = vld [vmem:[%s4584_s2] sm:$0xf] }
  0xf0   :  { %2311 = vmatprep.subr.bf16.mxu0 %v3539_v26  ;;  %2354 = vmatprep.subr.bf16.mxu1 %v3542_v27  ;;  %v2700_v26 = vsub.s32 1, %v2695_v22  ;;  %v2708_v27 = vsub.s32 3, %v2695_v22 }
  0xf2   :  { %v2701_v30 = vrot.slane %v2692_v25, %v2700_v26 }
  0xf3   :  { %2312 = vmatpush1.bf16.msra.mxu0 %v3537_v28  ;;  %2355 = vmatpush1.bf16.msra.mxu1 %v3540_v29  ;;  %v2697_v28 = vrot.slane %v2692_v25, %v2696_v23  ;;  %v2705_v29 = vrot.slane %v2692_v25, %v2704_v24 }
  0xf4   :  { %2313 = vmatprep.subr.bf16.mxu0 %v3545_v31  ;;  %2356 = vmatprep.subr.bf16.mxu1 %v3548_v32  ;;  %v2709_v31 = vrot.slane %v2692_v25, %v2708_v27 }
  0xf7   :  { %2314 = vmatpush1.bf16.msra.mxu0 %v3543_v33  ;;  %2357 = vmatpush1.bf16.msra.mxu1 %v3546_v34 }
  0xf8   :  { %2315 = vmatprep.subr.bf16.mxu0 %v3551_v38  ;;  %2358 = vmatprep.subr.bf16.mxu1 %v3554_v39 }
  0xfb   :  { %2316 = vmatpush1.bf16.msra.mxu0 %v3549_v40  ;;  %2359 = vmatpush1.bf16.msra.mxu1 %v3552_v41 }
  0xfc   :  { %2317 = vmatprep.subr.bf16.mxu0 %v3557_v45  ;;  %2360 = vmatprep.subr.bf16.mxu1 %v3560_v47 }
  0xff   :  { %2318 = vmatpush1.bf16.msra.mxu0 %v3555_v48  ;;  %2361 = vmatpush1.bf16.msra.mxu1 %v3558_v49 }
 0x100   :  { %2598 = vmatprep.subr.bf16.mxu0 %v3563_v52  ;;  %2641 = vmatprep.subr.bf16.mxu1 %v3566_v53 }
 0x102   :  { %2336 = vmatmul.mubr.bf16.vlgmr.msra.gmra.mrb[0].mxu0 %v2141_v56  ;;  %2379 = vmatmul.mubr.bf16.vlgmr.msra.gmra.mrb[0].mxu1 %v2141_v56 }
 0x103   :  { %2599 = vmatpush1.bf16.msra.mxu0 %v3561_v54  ;;  %2642 = vmatpush1.bf16.msra.mxu1 %v3564_v55 }
 0x104   :  { %2600 = vmatprep.subr.bf16.mxu0 %v3571_v57  ;;  %2643 = vmatprep.subr.bf16.mxu1 %v3574_v58 }
 0x105   :  { %2630 = vmatprep.mubr.bf16.mxu0 %v3612_v1  ;;  %2673 = vmatprep.mubr.bf16.mxu1 %v3612_v1  ;;  %v3586_v1 = vld [vmem:[%s4582_s1 + $0x86c] ss:$16 sps:$4 sm:$0xff]  }
 0x107   :  { %2601 = vmatpush1.bf16.msra.mxu0 %v3569_v59  ;;  %2644 = vmatpush1.bf16.msra.mxu1 %v3572_v60 }
 0x108   :  { %2602 = vmatprep.subr.bf16.mxu0 %v3577_v61  ;;  %2645 = vmatprep.subr.bf16.mxu1 %v3580_v62 }
 0x10b   :  { %2603 = vmatpush1.bf16.msra.mxu0 %v3575_v63  ;;  %2646 = vmatpush1.bf16.msra.mxu1 %v3578_v0 }
 0x10c   :  { %2604 = vmatprep.subr.bf16.mxu0 %v3583_v2  ;;  %2647 = vmatprep.subr.bf16.mxu1 %v3586_v1 }
 0x10f   :  { %2605 = vmatpush1.bf16.msra.mxu0 %v3581_v3  ;;  %2648 = vmatpush1.bf16.msra.mxu1 %v3584_v4 }
 0x110   :  { %2606 = vmatprep.subr.bf16.mxu0 %v3589_v5  ;;  %2649 = vmatprep.subr.bf16.mxu1 %v3592_v6 }
 0x113   :  { %2607 = vmatpush1.bf16.msra.mxu0 %v3587_v7  ;;  %2650 = vmatpush1.bf16.msra.mxu1 %v3590_v8 }
 0x114   :  { %2608 = vmatprep.subr.bf16.mxu0 %v3595_v9  ;;  %2651 = vmatprep.subr.bf16.mxu1 %v3598_v10 }
 0x117   :  { %2609 = vmatpush1.bf16.msra.mxu0 %v3593_v11  ;;  %2652 = vmatpush1.bf16.msra.mxu1 %v3596_v12 }
 0x118   :  { %2610 = vmatprep.subr.bf16.mxu0 %v3601_v13  ;;  %2653 = vmatprep.subr.bf16.mxu1 %v3604_v14 }
 0x11b   :  { %2611 = vmatpush1.bf16.msra.mxu0 %v3599_v15  ;;  %2654 = vmatpush1.bf16.msra.mxu1 %v3602_v16 }
 0x11c   :  { %2612 = vmatprep.subr.bf16.mxu0 %v3607_v17  ;;  %2655 = vmatprep.subr.bf16.mxu1 %v3610_v18 }
 0x11f   :  { %2613 = vmatpush1.bf16.msra.mxu0 %v3605_v19  ;;  %2656 = vmatpush1.bf16.msra.mxu1 %v3608_v20 }
 0x122   :  { %2631 = vmatmul.mubr.bf16.vlgmr.msra.gmra.mrb[0].mxu0 %v4308_v46  ;;  %2674 = vmatmul.mubr.bf16.vlgmr.msra.gmra.mrb[0].mxu1 %v4308_v46 }
 0x1f5   :  { %v2632_v32 = vpop.f32.mrb[0].mxu0  ;;  %v2675_v33 = vpop.f32.mrb[0].mxu1 }
 0x1f6   :  { %v2714_v34 = vadd.f32 %v2697_v28, %v2632_v32  ;;  %v2716_v35 = vadd.f32 %v2705_v29, %v2675_v33  ;;  %v2634_v36 = vpop.f32.mrb[1].mxu0  ;;  %v2677_v46 = vpop.f32.mrb[1].mxu1 }
 0x1f7   :  { %v2715_v37 = vadd.f32 %v2701_v30, %v2634_v36  ;;  %v2717_v38 = vadd.f32 %v2709_v31, %v2677_v46  ;;  %v2636_v39 = vpop.f32.mrb[2].mxu0  ;;  %v2679_v40 = vpop.f32.mrb[2].mxu1 }
 0x1f8   :  { %v2731_v41 = vmax.f32 %v2714_v34, 0.0  ;;  %v2718_v42 = vadd.f32 %v2697_v28, %v2636_v39  ;;  %v2720_v43 = vadd.f32 %v2705_v29, %v2679_v40  ;;  %v2638_v44 = vpop.f32.mrb[3].mxu0  ;;  %v2681_v45 = vpop.f32.mrb[3].mxu1 }
 0x1f9   :  { %v2732_v47 = vmax.f32 %v2715_v37, 0.0  ;;  %v3101_v48 = vpack.c.bf16 %v2717_v38, %v2716_v35  ;;  %v2719_v49 = vadd.f32 %v2701_v30, %v2638_v44  ;;  %v2721_v50 = vadd.f32 %v2709_v31, %v2681_v45 }
 0x1fa   :  { %v2735_v51 = vmax.f32 %v2718_v42, 0.0 }
 0x1fb   :  { %v3100_v52 = vpack.c.bf16 %v2732_v47, %v2731_v41  ;;  %2780 = vst [vmem:[%s4585_s3 + $0x8] sm:$0xff] %v3101_v48  ;;  %v2736_v53 = vmax.f32 %v2719_v49, 0.0  ;;  %v3103_v54 = vpack.c.bf16 %v2721_v50, %v2720_v43 }
 0x1fd   :  { %2779 = vst [vmem:[%s4585_s3] sm:$0xff] %v3100_v52  ;;  %v3102_v55 = vpack.c.bf16 %v2736_v53, %v2735_v51  ;;  %2782 = vst [vmem:[%s4585_s3 + $0x18] sm:$0x77] %v3103_v54 }
 0x1ff   :  { %2781 = vst [vmem:[%s4585_s3 + $0x10] sm:$0x77] %v3102_v55 }

// kernel: _lambda_.15
= control target key start
LH: loop header
LB: loop body
LE: loop exit
PB: predicated region body
PF: predicated region fallthrough
CT: control target
= control target key end

     0   :  { %vm26_vm0 = vcmask 1043456   ;;  %s440_s0 = inlined_call_operand.vmem [shape: bf16[2,4,256], index: 0, kind: input, shape index: {}]   ;;  %s441_s1 = inlined_call_operand.vmem [shape: bf16[256,128], index: 1, kind: input, shape index: {}]   ;;  %s442_s2 = inlined_call_operand.vmem [shape: f32[1,128], index: 2, kind: input, shape index: {}]   ;;  %s443_s3 = inlined_call_operand.hbm [shape: f32[2,128], index: 3, kind: output, shape index: {}]  }
   0x1   :  { %v313_v0 = vld [vmem:[%s441_s1 + $0x40] sm:$0xff]   ;;  %v315_v2 = vld [vmem:[%s441_s1 + $0x48] sm:$0xff]   ;;  %v317_v4 = vld [vmem:[%s441_s1 + $0x50] sm:$0xff]  }
   0x2   :  { %v314_v1 = vld [vmem:[%s441_s1] sm:$0xff]   ;;  %290 = vmatprep.subr.bf16.mxu0 %v313_v0  ;;  %v316_v3 = vld [vmem:[%s441_s1 + $0x8] sm:$0xff]   ;;  %v318_v5 = vld [vmem:[%s441_s1 + $0x10] sm:$0xff]  }
   0x3   :  { %291 = vmatpush3.bf16.msra.mxu0 %v314_v1  ;;  %v319_v6 = vld [vmem:[%s441_s1 + $0x58] sm:$0xff]   ;;  %v321_v8 = vld [vmem:[%s441_s1 + $0x60] sm:$0xff]   ;;  %v323_v10 = vld [vmem:[%s441_s1 + $0x68] sm:$0xff]  }
   0x4   :  { %292 = vmatprep.subr.bf16.mxu0 %v315_v2  ;;  %v320_v7 = vld [vmem:[%s441_s1 + $0x18] sm:$0xff]   ;;  %v322_v9 = vld [vmem:[%s441_s1 + $0x20] sm:$0xff]  }
   0x5   :  { %v287_v11 = vld [vmem:[%s440_s0] sm:$0xff]  }
   0x7   :  { %293 = vmatpush3.bf16.msra.mxu0 %v316_v3 }
   0x8   :  { %294 = vmatprep.subr.bf16.mxu0 %v317_v4 }
   0xb   :  { %295 = vmatpush3.bf16.msra.mxu0 %v318_v5 }
   0xc   :  { %296 = vmatprep.subr.bf16.mxu0 %v319_v6 }
   0xf   :  { %297 = vmatpush3.bf16.msra.mxu0 %v320_v7 }
  0x10   :  { %298 = vmatprep.subr.bf16.mxu0 %v321_v8 }
  0x11   :  { %8 = vsyncpa [#allocation3], 0  ;;  %v288_v12 = vunpack.c.l.bf16 %v287_v11  ;;  %v289_v13 = vunpack.c.h.bf16 %v287_v11  ;;  %v324_v14 = vld [vmem:[%s441_s1 + $0x28] sm:$0xff]   ;;  %v325_v19 = vld [vmem:[%s441_s1 + $0x70] sm:$0xff]   ;;  %vm111_vm1 = vcmask 1041409   ;;  %s353_s19 = smov [#allocation2]  }
  0x12   :  { %v326_v28 = vld [vmem:[%s441_s1 + $0x30] sm:$0xff]   ;;  %v327_v29 = vld [vmem:[%s441_s1 + $0x78] sm:$0xff]   ;;  %v269_v3 = vld [vmem:[%s442_s2] ss:$0 sm:$0xff]  ;;  %s261_s20 = sshll.u32 %s353_s19, 4  ;;  %s262_s20 = int_to_ptr.vmem [resolvable:$true] %s261_s20 }
  0x13   :  { %299 = vmatpush3.bf16.msra.mxu0 %v322_v9  ;;  %v22_v15 = vcombine.high %v288_v12, %v288_v12  ;;  %v23_v16 = vcombine.high %v289_v13, %v289_v13  ;;  %v27_v17 = vsel %vm26_vm0, %v288_v12, 0.0  ;;  %v41_v18 = vsel %vm26_vm0, %v289_v13, 0.0  ;;  %v328_v38 = vld [vmem:[%s441_s1 + $0x38] sm:$0xff]   ;;  %s329_s21 = scalar_lea.vmem %s262_s20, 32  ;;  %p334_p1 = scmp.lt.s32.totalorder %s262_s20, %s262_s20 }
  0x14   :  { %300 = vmatprep.subr.bf16.mxu0 %v323_v10  ;;  %v28_v20 = vrot.slane %v27_v17, 4  ;;  %v42_v21 = vrot.slane %v41_v18, 4  ;;  %p330_p0 = scmp.ne.s32.totalorder %s262_s20, %s329_s21  ;;  %p335_p2 = scmp.lt.s32.totalorder %s329_s21, %s329_s21 }
  0x15   :  { %v34_v22 = vsel %vm26_vm0, %v22_v15, 0.0  ;;  %v48_v23 = vsel %vm26_vm0, %v23_v16, 0.0 }
  0x16   :  { %v35_v24 = vrot.slane %v34_v22, 4  ;;  %v49_v25 = vrot.slane %v48_v23, 4  ;;  %v29_v26 = vadd.f32 %v28_v20, %v27_v17  ;;  %v43_v27 = vadd.f32 %v42_v21, %v41_v18  ;;  %p336_p3 = por %p335_p2, %p334_p1 }
  0x17   :  { %301 = vmatpush3.bf16.msra.mxu0 %v324_v14 }
  0x18   :  { %302 = vmatprep.subr.bf16.mxu0 %v325_v19  ;;  %v36_v30 = vadd.f32 %v35_v24, %v34_v22  ;;  %v50_v31 = vadd.f32 %v49_v25, %v48_v23  ;;  %v30_v32 = vrot.slane %v29_v26, 2  ;;  %v44_v33 = vrot.slane %v43_v27, 2  ;;  %p337_p4 = pnand %p336_p3, %p330_p0 }
  0x1a   :  { %v37_v34 = vrot.slane %v36_v30, 2  ;;  %v51_v35 = vrot.slane %v50_v31, 2  ;;  %v31_v36 = vadd.f32 %v30_v32, %v29_v26  ;;  %v45_v37 = vadd.f32 %v44_v33, %v43_v27 }
  0x1b   :  { %303 = vmatpush3.bf16.msra.mxu0 %v326_v28 }
  0x1c   :  { %304 = vmatprep.subr.bf16.mxu0 %v327_v29  ;;  %v38_v39 = vadd.f32 %v37_v34, %v36_v30  ;;  %v52_v40 = vadd.f32 %v51_v35, %v50_v31  ;;  %v32_v41 = vrot.slane %v31_v36, 1  ;;  %v46_v42 = vrot.slane %v45_v37, 1 }
  0x1e   :  { %v39_v43 = vrot.slane %v38_v39, 1  ;;  %v53_v44 = vrot.slane %v52_v40, 1  ;;  %v33_v45 = vadd.f32 %v32_v41, %v31_v36  ;;  %v47_v46 = vadd.f32 %v46_v42, %v45_v37 }
  0x1f   :  { %305 = vmatpush3.bf16.msra.mxu0 %v328_v38 }
  0x20   :  { %v40_v47 = vadd.f32 %v39_v43, %v38_v39  ;;  %v54_v48 = vadd.f32 %v53_v44, %v52_v40  ;;  %v56_v49 = vmul.f32 0.25, %v33_v45  ;;  %v58_v50 = vmul.f32 0.25, %v47_v46 }
  0x22   :  { %v57_v51 = vmul.f32 0.25, %v40_v47  ;;  %v59_v52 = vmul.f32 0.25, %v54_v48  ;;  %v60_v53 = vpack.c.bf16 %v56_v49, %v56_v49  ;;  %v62_v54 = vpack.c.bf16 %v58_v50, %v58_v50 }
  0x24   :  { %v61_v55 = vpack.c.bf16 %v57_v51, %v57_v51  ;;  %v63_v56 = vpack.c.bf16 %v59_v52, %v59_v52  ;;  %v107_v57 = vunpack.c.l.b16 %v60_v53  ;;  %v109_v58 = vunpack.c.l.b16 %v62_v54 }
  0x26   :  { %v108_v59 = vunpack.c.l.b16 %v61_v55  ;;  %v110_v60 = vunpack.c.l.b16 %v63_v56  ;;  %v112_v61 = vsel %vm111_vm1, %v109_v58, %v107_v57 }
  0x27   :  { %v114_v63 = vpack.c.b16 %v112_v61, %v112_v61 }
  0x28   :  { %v113_v62 = vsel %vm111_vm1, %v110_v60, %v108_v59 }
  0x29   :  { %v115_v0 = vpack.c.b16 %v113_v62, %v113_v62 }
  0x2b   :  { %246 = vmatprep.mubr.bf16.mxu0 %v115_v0 }
  0x2c   :  { %247 = vmatmul.mubr.bf16.vlgmr.msra.gmra.mrb[0].mxu0 %v114_v63 }
  0xff   :  { %v306_v1 = vpop.f32.mrb[0].mxu0 }
 0x100   :  { %v307_v2 = vpop.f32.mrb[1].mxu0 }
 0x101   :  { %v308_v4 = vadd.f32 %v307_v2, %v306_v1  ;;  %v309_v5 = vpop.f32.mrb[2].mxu0 }
 0x102   :  { %v310_v6 = vpop.f32.mrb[3].mxu0 }
 0x103   :  { %v249_v7 = vadd.f32 %v308_v4, %v269_v3 }
 0x105   :  { %254 = vst [vmem:[#allocation2] sm:$0x3] %v249_v7 }
 0x106   :  { %340 = shalt.err (!%p337_p4)
}
 0x107   :  { %s341_s24 = scalar_lea.hbm %s443_s3, 32 }
 0x108   :  { %p342_p5 = scmp.ne.s32.totalorder %s443_s3, %s341_s24  ;;  %p345_p6 = scmp.lt.u32.totalorder %s341_s24, %s443_s3 }
 0x10a   :  { %p347_p7 = pnand %p345_p6, %p342_p5 }
 0x10c   :  { %350 = shalt.err (!%p347_p7)
}
 0x10d   :  { %264 = dma.vmem_to_hbm [thread:$0]  %s262_s20, 32, %s443_s3, [#allocation3]  }
 0x10e   :  { %351 = dma.done.wait [#allocation3], 32  }
 0x10f   :  { %352 = vsyncadd [#allocation3], 4294967264 }
 0x110   :  { %268 = vsyncpa [#allocation3], 1 }

// kernel: _lambda_.14
= control target key start
LH: loop header
LB: loop body
LE: loop exit
PB: predicated region body
PF: predicated region fallthrough
CT: control target
= control target key end

     0   :  { %vm98_vm0 = vsmask.f32 7424  ;;  %vm1148_vm1 = vsmask.f32 5376  ;;  %vm1442_vm2 = vcmask 1044480   ;;  %vm602_vm3 = vcmask 1046528   ;;  %s4497_s1 = inlined_call_operand.vmem [shape: bf16[2304,256], index: 1, kind: input, shape index: {}]   ;;  %s4498_s0 = inlined_call_operand.vmem [shape: bf16[1,32,256], index: 0, kind: input, shape index: {}]   ;;  %s4499_s2 = inlined_call_operand.vmem [shape: f32[1,256], index: 2, kind: input, shape index: {}]   ;;  %s4500_s3 = inlined_call_operand.vmem [shape: bf16[22,256], index: 3, kind: input, shape index: {}]   ;;  %s4501_s4 = inlined_call_operand.vmem [shape: bf16[22,256], index: 4, kind: output, shape index: {}]  }
   0x1   :  { %v2933_v0 = vld [vmem:[%s4497_s1 + $0x104] ss:$8 sps:$4 sm:$0xff]   ;;  %v2937_v2 = vld [vmem:[%s4497_s1 + $0x100] ss:$8 sps:$4 sm:$0xff]   ;;  %v2939_v4 = vld [vmem:[%s4497_s1 + $0x114] ss:$8 sps:$4 sm:$0xff]  }
   0x2   :  { %v2935_v1 = vld [vmem:[%s4497_s1 + $0x404] ss:$8 sps:$4 sm:$0xff]   ;;  %293 = vmatprep.subr.bf16.mxu1 %v2933_v0  ;;  %v2938_v3 = vld [vmem:[%s4497_s1 + $0x400] ss:$8 sps:$4 sm:$0xff]   ;;  %v2941_v5 = vld [vmem:[%s4497_s1 + $0x414] ss:$8 sps:$4 sm:$0xff]  }
   0x3   :  { %1347 = vmatprep.subr.bf16.mxu0 %v2935_v1  ;;  %294 = vmatpush1.bf16.msra.mxu1 %v2937_v2  ;;  %v2943_v6 = vld [vmem:[%s4497_s1 + $0x110] ss:$8 sps:$4 sm:$0xff]   ;;  %v2945_v8 = vld [vmem:[%s4497_s1 + $0x124] ss:$8 sps:$4 sm:$0xff]   ;;  %v2949_v10 = vld [vmem:[%s4497_s1 + $0x120] ss:$8 sps:$4 sm:$0xff]  }
   0x4   :  { %1348 = vmatpush1.bf16.msra.mxu0 %v2938_v3  ;;  %295 = vmatprep.subr.bf16.mxu1 %v2939_v4  ;;  %v2944_v7 = vld [vmem:[%s4497_s1 + $0x410] ss:$8 sps:$4 sm:$0xff]   ;;  %v2947_v9 = vld [vmem:[%s4497_s1 + $0x424] ss:$8 sps:$4 sm:$0xff]   ;;  %v2950_v11 = vld [vmem:[%s4497_s1 + $0x420] ss:$8 sps:$4 sm:$0xff]  }
   0x5   :  { %1349 = vmatprep.subr.bf16.mxu0 %v2941_v5  ;;  %v2951_v12 = vld [vmem:[%s4497_s1 + $0x134] ss:$8 sps:$4 sm:$0xff]   ;;  %v2955_v14 = vld [vmem:[%s4497_s1 + $0x130] ss:$8 sps:$4 sm:$0xff]   ;;  %v2957_v16 = vld [vmem:[%s4497_s1 + $0x144] ss:$8 sps:$4 sm:$0xff]  }
   0x6   :  { %v2953_v13 = vld [vmem:[%s4497_s1 + $0x434] ss:$8 sps:$4 sm:$0xff]   ;;  %v2956_v15 = vld [vmem:[%s4497_s1 + $0x430] ss:$8 sps:$4 sm:$0xff]   ;;  %v2959_v17 = vld [vmem:[%s4497_s1 + $0x444] ss:$8 sps:$4 sm:$0xff]  }
   0x7   :  { %296 = vmatpush1.bf16.msra.mxu1 %v2943_v6  ;;  %v2961_v18 = vld [vmem:[%s4497_s1 + $0x140] ss:$8 sps:$4 sm:$0xff]   ;;  %v2963_v20 = vld [vmem:[%s4497_s1 + $0x154] ss:$8 sps:$4 sm:$0xff]   ;;  %v2967_v22 = vld [vmem:[%s4497_s1 + $0x150] ss:$8 sps:$4 sm:$0xff]  }
   0x8   :  { %1350 = vmatpush1.bf16.msra.mxu0 %v2944_v7  ;;  %297 = vmatprep.subr.bf16.mxu1 %v2945_v8  ;;  %v2962_v19 = vld [vmem:[%s4497_s1 + $0x440] ss:$8 sps:$4 sm:$0xff]   ;;  %v2965_v21 = vld [vmem:[%s4497_s1 + $0x454] ss:$8 sps:$4 sm:$0xff]   ;;  %v2968_v23 = vld [vmem:[%s4497_s1 + $0x450] ss:$8 sps:$4 sm:$0xff]  }
   0x9   :  { %1351 = vmatprep.subr.bf16.mxu0 %v2947_v9  ;;  %v2969_v24 = vld [vmem:[%s4497_s1 + $0x164] ss:$8 sps:$4 sm:$0xff]   ;;  %v2973_v26 = vld [vmem:[%s4497_s1 + $0x160] ss:$8 sps:$4 sm:$0xff]   ;;  %v2975_v28 = vld [vmem:[%s4497_s1 + $0x174] ss:$8 sps:$4 sm:$0xff]  }
   0xa   :  { %v2971_v25 = vld [vmem:[%s4497_s1 + $0x464] ss:$8 sps:$4 sm:$0xff]   ;;  %v2974_v27 = vld [vmem:[%s4497_s1 + $0x460] ss:$8 sps:$4 sm:$0xff]   ;;  %v2977_v29 = vld [vmem:[%s4497_s1 + $0x474] ss:$8 sps:$4 sm:$0xff]  }
   0xb   :  { %298 = vmatpush1.bf16.msra.mxu1 %v2949_v10  ;;  %v2979_v30 = vld [vmem:[%s4497_s1 + $0x170] ss:$8 sps:$4 sm:$0xff]   ;;  %v2981_v32 = vld [vmem:[%s4497_s1 + $0x184] ss:$8 sps:$4 sm:$0xff]   ;;  %v2985_v34 = vld [vmem:[%s4497_s1 + $0x180] ss:$8 sps:$4 sm:$0xff]  }
   0xc   :  { %1352 = vmatpush1.bf16.msra.mxu0 %v2950_v11  ;;  %299 = vmatprep.subr.bf16.mxu1 %v2951_v12  ;;  %v2980_v31 = vld [vmem:[%s4497_s1 + $0x470] ss:$8 sps:$4 sm:$0xff]   ;;  %v2983_v33 = vld [vmem:[%s4497_s1 + $0x484] ss:$8 sps:$4 sm:$0xff]   ;;  %v2986_v35 = vld [vmem:[%s4497_s1 + $0x480] ss:$8 sps:$4 sm:$0xff]  }
   0xd   :  { %1353 = vmatprep.subr.bf16.mxu0 %v2953_v13  ;;  %v2987_v36 = vld [vmem:[%s4497_s1 + $0x194] ss:$8 sps:$4 sm:$0xff]   ;;  %v2991_v38 = vld [vmem:[%s4497_s1 + $0x190] ss:$8 sps:$4 sm:$0xff]   ;;  %v2993_v40 = vld [vmem:[%s4497_s1 + $0x1a4] ss:$8 sps:$4 sm:$0xff]  }
   0xe   :  { %v2989_v37 = vld [vmem:[%s4497_s1 + $0x494] ss:$8 sps:$4 sm:$0xff]   ;;  %v2992_v39 = vld [vmem:[%s4497_s1 + $0x490] ss:$8 sps:$4 sm:$0xff]   ;;  %v2995_v41 = vld [vmem:[%s4497_s1 + $0x4a4] ss:$8 sps:$4 sm:$0xff]  }
   0xf   :  { %300 = vmatpush1.bf16.msra.mxu1 %v2955_v14  ;;  %v2997_v42 = vld [vmem:[%s4497_s1 + $0x1a0] ss:$8 sps:$4 sm:$0xff]   ;;  %v2999_v44 = vld [vmem:[%s4497_s1 + $0x1b4] ss:$8 sps:$4 sm:$0xff]   ;;  %v3003_v46 = vld [vmem:[%s4497_s1 + $0x1b0] ss:$8 sps:$4 sm:$0xff]  }
  0x10   :  { %1354 = vmatpush1.bf16.msra.mxu0 %v2956_v15  ;;  %301 = vmatprep.subr.bf16.mxu1 %v2957_v16  ;;  %v2998_v43 = vld [vmem:[%s4497_s1 + $0x4a0] ss:$8 sps:$4 sm:$0xff]   ;;  %v3001_v45 = vld [vmem:[%s4497_s1 + $0x4b4] ss:$8 sps:$4 sm:$0xff]   ;;  %v3004_v47 = vld [vmem:[%s4497_s1 + $0x4b0] ss:$8 sps:$4 sm:$0xff]  }
  0x11   :  { %1355 = vmatprep.subr.bf16.mxu0 %v2959_v17  ;;  %v17_v48 = vld [vmem:[%s4498_s0] sm:$0xff]  ;;  %v3566_v49 = vld [vmem:[%s4498_s0 + $0x8] sm:$0xff]  ;;  %v3571_v50 = vld [vmem:[%s4498_s0 + $0x10] sm:$0xff]  ;;  %vm882_vm4 = vcmask 1045504  }
  0x12   :  { %v3005_v51 = vld [vmem:[%s4497_s1 + $0x1c4] ss:$8 sps:$4 sm:$0xff]   ;;  %v3580_v53 = vcombine.high %v17_v48, %v3566_v49  ;;  %v3584_v54 = vcombine.high %v3571_v50, %v3571_v50  ;;  %v1110_v56 = vld [vmem:[%s4498_s0 + $0x18] sm:$0x33]  ;;  %v3009_v61 = vld [vmem:[%s4497_s1 + $0x1c0] ss:$8 sps:$4 sm:$0xff]   ;;  %v3608_v0 = vcombine.low %v17_v48, %v3566_v49  ;;  %v3624_v9 = vcombine.low %v3571_v50, %v3571_v50 }
  0x13   :  { %302 = vmatpush1.bf16.msra.mxu1 %v2961_v18  ;;  %v3007_v52 = vld [vmem:[%s4497_s1 + $0x4c4] ss:$8 sps:$4 sm:$0xff]   ;;  %v3010_v62 = vld [vmem:[%s4497_s1 + $0x4c0] ss:$8 sps:$4 sm:$0xff]   ;;  %v3605_v63 = vcombine.high %v3571_v50, %v1110_v56  ;;  %v3011_v5 = vld [vmem:[%s4497_s1 + $0x1d4] ss:$8 sps:$4 sm:$0xff]  }
  0x14   :  { %1356 = vmatpush1.bf16.msra.mxu0 %v2962_v19  ;;  %303 = vmatprep.subr.bf16.mxu1 %v2963_v20  ;;  %v830_v55 = vld [vmem:[%s4498_s0] sm:$0xcc]  ;;  %v112_v57 = vshrl.u32 %v3580_v53, 16  ;;  %v114_v58 = vshll.u32 %v3580_v53, 16  ;;  %v119_v59 = vshll.u32 %v3584_v54, 16  ;;  %v102_v18 = vshll.u32 %v3608_v0, 16 }
  0x15   :  { %1357 = vmatprep.subr.bf16.mxu0 %v2965_v21  ;;  %v3596_v60 = vcombine.high %v830_v55, %v3566_v49  ;;  %v3013_v6 = vld [vmem:[%s4497_s1 + $0x4d4] ss:$8 sps:$4 sm:$0xff]   ;;  %v1175_v7 = vshrl.u32 %v3605_v63, 16  ;;  %v1178_v8 = vshll.u32 %v3605_v63, 16  ;;  %v3015_v10 = vld [vmem:[%s4497_s1 + $0x1d0] ss:$8 sps:$4 sm:$0xff]   ;;  %v3630_v14 = vcombine.low %v830_v55, %v3566_v49 }
  0x16   :  { %v116_v1 = vrot.slane %v114_v58, 1  ;;  %v3610_v2 = vrot.slane %v119_v59, 1  ;;  %v3016_v15 = vld [vmem:[%s4497_s1 + $0x4d0] ss:$8 sps:$4 sm:$0xff]   ;;  %v3637_v19 = vcombine.low %v3571_v50, %v1110_v56  ;;  %v3017_v20 = vld [vmem:[%s4497_s1 + $0x1e4] ss:$8 sps:$4 sm:$0xff]  }
  0x17   :  { %304 = vmatpush1.bf16.msra.mxu1 %v2967_v22  ;;  %v1167_v3 = vshrl.u32 %v3596_v60, 16  ;;  %v1170_v4 = vshll.u32 %v3596_v60, 16  ;;  %v1177_v16 = vrot.slane %v1175_v7, 2  ;;  %v1180_v17 = vrot.slane %v1178_v8, 3  ;;  %v3038_v48 = vld [vmem:[%s4497_s1 + $0x504] ss:$8 sps:$4 sm:$0xff]  }
  0x18   :  { %1358 = vmatpush1.bf16.msra.mxu0 %v2968_v23  ;;  %305 = vmatprep.subr.bf16.mxu1 %v2969_v24  ;;  %v117_v11 = vor.u32 %v116_v1, %v112_v57  ;;  %v1150_v23 = vshrl.u32 %v3630_v14, 16  ;;  %v1153_v24 = vshll.u32 %v3630_v14, 16  ;;  %v3036_v55 = vld [vmem:[%s4497_s1 + $0x500] ss:$8 sps:$4 sm:$0xff]   ;;  %v3045_v58 = vld [vmem:[%s4497_s1 + $0x14] ss:$8 sps:$4 sm:$0xff]  }
  0x19   :  { %1359 = vmatprep.subr.bf16.mxu0 %v2971_v25  ;;  %v1169_v12 = vrot.slane %v1167_v3, 2  ;;  %v1172_v13 = vrot.slane %v1170_v4, 3  ;;  %v3019_v25 = vld [vmem:[%s4497_s1 + $0x4e4] ss:$8 sps:$4 sm:$0xff]   ;;  %v3048_v59 = vld [vmem:[%s4497_s1 + $0x514] ss:$8 sps:$4 sm:$0xff]  }
  0x1a   :  { %v122_v21 = vsel %vm98_vm0, %v117_v11, %v3610_v2  ;;  %v3046_v1 = vld [vmem:[%s4497_s1 + $0x510] ss:$8 sps:$4 sm:$0xff]   ;;  %v123_v3 = vshrl.u32 %v3624_v9, 16  ;;  %v3051_v4 = vld [vmem:[%s4497_s1 + $0x24] ss:$8 sps:$4 sm:$0xff]  }
  0x1b   :  { %306 = vmatpush1.bf16.msra.mxu1 %v2973_v26  ;;  %v1173_v22 = vor.u32 %v1172_v13, %v1169_v12  ;;  %v1181_v26 = vor.u32 %v1180_v17, %v1177_v16  ;;  %325 = vmatprep.mubr.bf16.mxu1 %v122_v21  ;;  %v3057_v8 = vld [vmem:[%s4497_s1 + $0x34] ss:$8 sps:$4 sm:$0xff]   ;;  %v3055_v11 = vld [vmem:[%s4497_s1 + $0x30] ss:$8 sps:$4 sm:$0xff]   ;;  %v3063_v13 = vld [vmem:[%s4497_s1 + $0x44] ss:$8 sps:$4 sm:$0xff]  }
  0x1c   :  { %1360 = vmatpush1.bf16.msra.mxu0 %v2974_v27  ;;  %307 = vmatprep.subr.bf16.mxu1 %v2975_v28  ;;  %v1158_v27 = vshrl.u32 %v3637_v19, 16  ;;  %v1161_v28 = vshll.u32 %v3637_v19, 16  ;;  %v3058_v12 = vld [vmem:[%s4497_s1 + $0x530] ss:$8 sps:$4 sm:$0xff]   ;;  %v3061_v16 = vld [vmem:[%s4497_s1 + $0x40] ss:$8 sps:$4 sm:$0xff]  }
  0x1d   :  { %1361 = vmatprep.subr.bf16.mxu0 %v2977_v29  ;;  %v3021_v29 = vld [vmem:[%s4497_s1 + $0x1e0] ss:$8 sps:$4 sm:$0xff]   ;;  %v3070_v21 = vld [vmem:[%s4497_s1 + $0x550] ss:$8 sps:$4 sm:$0xff]  }
  0x1e   :  { %v3064_v17 = vld [vmem:[%s4497_s1 + $0x540] ss:$8 sps:$4 sm:$0xff]  }
  0x1f   :  { %308 = vmatpush1.bf16.msra.mxu1 %v2979_v30  ;;  %v3022_v30 = vld [vmem:[%s4497_s1 + $0x4e0] ss:$8 sps:$4 sm:$0xff]  }
  0x20   :  { %1362 = vmatpush1.bf16.msra.mxu0 %v2980_v31  ;;  %309 = vmatprep.subr.bf16.mxu1 %v2981_v32  ;;  %v3023_v31 = vld [vmem:[%s4497_s1 + $0x1f4] ss:$8 sps:$4 sm:$0xff]   ;;  %v1182_v32 = vsel %vm1148_vm1, %v1173_v22, %v1181_v26  ;;  %v3075_v22 = vld [vmem:[%s4497_s1 + $0x64] ss:$8 sps:$4 sm:$0xff]  }
  0x21   :  { %1363 = vmatprep.subr.bf16.mxu0 %v2983_v33  ;;  %v100_v33 = vshrl.u32 %v3608_v0, 16  ;;  %1379 = vmatprep.mubr.bf16.mxu0 %v1182_v32  ;;  %v3082_v32 = vld [vmem:[%s4497_s1 + $0x570] ss:$8 sps:$4 sm:$0xff]  }
  0x23   :  { %310 = vmatpush1.bf16.msra.mxu1 %v2985_v34  ;;  %v104_v34 = vrot.slane %v102_v18, 1  ;;  %v3069_v18 = vld [vmem:[%s4497_s1 + $0x54] ss:$8 sps:$4 sm:$0xff]  }
  0x24   :  { %1364 = vmatpush1.bf16.msra.mxu0 %v2986_v35  ;;  %311 = vmatprep.subr.bf16.mxu1 %v2987_v36  ;;  %v107_v35 = vshll.u32 %v3624_v9, 16  ;;  %v1152_v36 = vrot.slane %v1150_v23, 2  ;;  %v3078_v23 = vld [vmem:[%s4497_s1 + $0x564] ss:$8 sps:$4 sm:$0xff]  }
  0x25   :  { %1365 = vmatprep.subr.bf16.mxu0 %v2989_v37  ;;  %v1155_v37 = vrot.slane %v1153_v24, 3  ;;  %v3073_v24 = vld [vmem:[%s4497_s1 + $0x60] ss:$8 sps:$4 sm:$0xff]  }
  0x27   :  { %312 = vmatpush1.bf16.msra.mxu1 %v2991_v38  ;;  %v1160_v38 = vrot.slane %v1158_v27, 2  ;;  %v3084_v27 = vld [vmem:[%s4497_s1 + $0x574] ss:$8 sps:$4 sm:$0xff]  }
  0x28   :  { %1366 = vmatpush1.bf16.msra.mxu0 %v2992_v39  ;;  %313 = vmatprep.subr.bf16.mxu1 %v2993_v40  ;;  %v1163_v39 = vrot.slane %v1161_v28, 3  ;;  %v3025_v40 = vld [vmem:[%s4497_s1 + $0x4f4] ss:$8 sps:$4 sm:$0xff]   ;;  %v3771_v28 = vld [vmem:[%s4498_s0] sm:$0x88] }
  0x29   :  { %1367 = vmatprep.subr.bf16.mxu0 %v2995_v41  ;;  %v3027_v41 = vld [vmem:[%s4497_s1 + $0x1f0] ss:$8 sps:$4 sm:$0xff]  }
  0x2b   :  { %314 = vmatpush1.bf16.msra.mxu1 %v2997_v42  ;;  %v3028_v42 = vld [vmem:[%s4497_s1 + $0x4f0] ss:$8 sps:$4 sm:$0xff]  }
  0x2c   :  { %1368 = vmatpush1.bf16.msra.mxu0 %v2998_v43  ;;  %315 = vmatprep.subr.bf16.mxu1 %v2999_v44  ;;  %v3033_v43 = vld [vmem:[%s4497_s1 + $0x4] ss:$8 sps:$4 sm:$0xff]   ;;  %v105_v44 = vor.u32 %v104_v34, %v100_v33 }
  0x2d   :  { %1369 = vmatprep.subr.bf16.mxu0 %v3001_v45  ;;  %v109_v45 = vrot.slane %v107_v35, 1  ;;  %v3087_v33 = vld [vmem:[%s4497_s1 + $0x84] ss:$8 sps:$4 sm:$0xff]  }
  0x2e   :  { %v3090_v34 = vld [vmem:[%s4497_s1 + $0x584] ss:$8 sps:$4 sm:$0xff]  }
  0x2f   :  { %316 = vmatpush1.bf16.msra.mxu1 %v3003_v46  ;;  %v1156_v46 = vor.u32 %v1155_v37, %v1152_v36  ;;  %v110_v56 = vsel %vm98_vm0, %v105_v44, %v109_v45  ;;  %v125_v7 = vor.u32 %v123_v3, %v109_v45  ;;  %v3085_v36 = vld [vmem:[%s4497_s1 + $0x80] ss:$8 sps:$4 sm:$0xff]   ;;  %v3102_v44 = vld [vmem:[%s4497_s1 + $0x5a4] ss:$8 sps:$4 sm:$0xff]  }
  0x30   :  { %1370 = vmatpush1.bf16.msra.mxu0 %v3004_v47  ;;  %317 = vmatprep.subr.bf16.mxu1 %v3005_v51  ;;  %v1164_v47 = vor.u32 %v1163_v39, %v1160_v38  ;;  %v126_v51 = vshrl.u32 %v3584_v54, 16  ;;  %v3088_v38 = vld [vmem:[%s4497_s1 + $0x580] ss:$8 sps:$4 sm:$0xff]   ;;  %v3093_v39 = vld [vmem:[%s4497_s1 + $0x94] ss:$8 sps:$4 sm:$0xff]  }
  0x31   :  { %1371 = vmatprep.subr.bf16.mxu0 %v3007_v52  ;;  %v3031_v52 = vld [vmem:[%s4497_s1] ss:$8 sps:$4 sm:$0xff]   ;;  %v3123_v3 = vld [vmem:[%s4497_s1 + $0xe4] ss:$8 sps:$4 sm:$0xff]  }
  0x32   :  { %v1165_v57 = vsel %vm1148_vm1, %v1156_v46, %v1164_v47  ;;  %v3097_v45 = vld [vmem:[%s4497_s1 + $0xa0] ss:$8 sps:$4 sm:$0xff]  }
  0x33   :  { %318 = vmatpush1.bf16.msra.mxu1 %v3009_v61  ;;  %v128_v61 = vor.u32 %v126_v51, %v3610_v2  ;;  %v3054_v2 = vld [vmem:[%s4497_s1 + $0x524] ss:$8 sps:$4 sm:$0xff]   ;;  %v3100_v46 = vld [vmem:[%s4497_s1 + $0x5a0] ss:$8 sps:$4 sm:$0xff]   ;;  %v3103_v51 = vld [vmem:[%s4497_s1 + $0xb0] ss:$8 sps:$4 sm:$0xff]  }
  0x34   :  { %1372 = vmatpush1.bf16.msra.mxu0 %v3010_v62  ;;  %319 = vmatprep.subr.bf16.mxu1 %v3011_v5  ;;  %v3043_v62 = vld [vmem:[%s4497_s1 + $0x10] ss:$8 sps:$4 sm:$0xff]   ;;  %v3049_v5 = vld [vmem:[%s4497_s1 + $0x20] ss:$8 sps:$4 sm:$0xff]  }
  0x35   :  { %1373 = vmatprep.subr.bf16.mxu0 %v3013_v6  ;;  %v3052_v6 = vld [vmem:[%s4497_s1 + $0x520] ss:$8 sps:$4 sm:$0xff]  }
  0x37   :  { %320 = vmatpush1.bf16.msra.mxu1 %v3015_v10  ;;  %v3060_v10 = vld [vmem:[%s4497_s1 + $0x534] ss:$8 sps:$4 sm:$0xff]  }
  0x38   :  { %1374 = vmatpush1.bf16.msra.mxu0 %v3016_v15  ;;  %321 = vmatprep.subr.bf16.mxu1 %v3017_v20  ;;  %v3066_v15 = vld [vmem:[%s4497_s1 + $0x544] ss:$8 sps:$4 sm:$0xff]   ;;  %v3067_v20 = vld [vmem:[%s4497_s1 + $0x50] ss:$8 sps:$4 sm:$0xff]  }
  0x39   :  { %1375 = vmatprep.subr.bf16.mxu0 %v3019_v25  ;;  %v3076_v25 = vld [vmem:[%s4497_s1 + $0x560] ss:$8 sps:$4 sm:$0xff]  }
  0x3b   :  { %322 = vmatpush1.bf16.msra.mxu1 %v3021_v29  ;;  %v3079_v29 = vld [vmem:[%s4497_s1 + $0x70] ss:$8 sps:$4 sm:$0xff]  }
  0x3c   :  { %1376 = vmatpush1.bf16.msra.mxu0 %v3022_v30  ;;  %323 = vmatprep.subr.bf16.mxu1 %v3023_v31  ;;  %v2726_v30 = vcombine.high %v3771_v28, %v3566_v49  ;;  %v1447_v31 = vrot.slane %v3605_v63, 3  ;;  %v3157_v63 = vld [vmem:[%s4497_s1 + $0x234] ss:$8 sps:$4 sm:$0xff]  }
  0x3d   :  { %1377 = vmatprep.subr.bf16.mxu0 %v3025_v40  ;;  %v3096_v40 = vld [vmem:[%s4497_s1 + $0x594] ss:$8 sps:$4 sm:$0xff]  }
  0x3e   :  { %v1446_v35 = vrot.slane %v2726_v30, 3  ;;  %v3152_v30 = vld [vmem:[%s4497_s1 + $0x620] ss:$8 sps:$4 sm:$0xff]  }
  0x3f   :  { %324 = vmatpush1.bf16.msra.mxu1 %v3027_v41  ;;  %v3091_v41 = vld [vmem:[%s4497_s1 + $0x90] ss:$8 sps:$4 sm:$0xff]  }
  0x40   :  { %1378 = vmatpush1.bf16.msra.mxu0 %v3028_v42  ;;  %513 = vmatprep.subr.bf16.mxu1 %v3033_v43  ;;  %v1448_v37 = vsel %vm1442_vm2, %v1446_v35, %v1447_v31  ;;  %v3094_v42 = vld [vmem:[%s4497_s1 + $0x590] ss:$8 sps:$4 sm:$0xff]   ;;  %v3099_v43 = vld [vmem:[%s4497_s1 + $0xa4] ss:$8 sps:$4 sm:$0xff]  }
  0x41   :  { %1613 = vmatprep.subr.bf16.mxu0 %v3038_v48  ;;  %v3108_v48 = vld [vmem:[%s4497_s1 + $0x5b4] ss:$8 sps:$4 sm:$0xff]   ;;  %v3155_v35 = vld [vmem:[%s4497_s1 + $0x230] ss:$8 sps:$4 sm:$0xff]  }
  0x42   :  { %326 = vmatmul.mubr.bf16.vlgmr.msra.gmra.mrb[0].mxu1 %v110_v56  ;;  %v3114_v56 = vld [vmem:[%s4497_s1 + $0x5c4] ss:$8 sps:$4 sm:$0xff]  }
  0x43   :  { %1380 = vmatmul.mubr.bf16.vlgmr.msra.gmra.mrb[0].mxu0 %v1165_v57  ;;  %514 = vmatpush1.bf16.msra.mxu1 %v3031_v52  ;;  %v3106_v52 = vld [vmem:[%s4497_s1 + $0x5b0] ss:$8 sps:$4 sm:$0xff]   ;;  %v3109_v57 = vld [vmem:[%s4497_s1 + $0xc0] ss:$8 sps:$4 sm:$0xff]  }
  0x44   :  { %1614 = vmatpush1.bf16.msra.mxu0 %v3036_v55  ;;  %515 = vmatprep.subr.bf16.mxu1 %v3045_v58  ;;  %v3111_v55 = vld [vmem:[%s4497_s1 + $0xc4] ss:$8 sps:$4 sm:$0xff]   ;;  %v3112_v58 = vld [vmem:[%s4497_s1 + $0x5c0] ss:$8 sps:$4 sm:$0xff]  }
  0x45   :  { %1615 = vmatprep.subr.bf16.mxu0 %v3048_v59  ;;  %1389 = vmatprep.mubr.bf16.mxu0 %v1181_v26  ;;  %v3081_v26 = vld [vmem:[%s4497_s1 + $0x74] ss:$8 sps:$4 sm:$0xff]  }
  0x46   :  { %335 = vmatprep.mubr.bf16.mxu1 %v128_v61  ;;  %v3117_v59 = vld [vmem:[%s4497_s1 + $0xd4] ss:$8 sps:$4 sm:$0xff]  }
  0x47   :  { %516 = vmatpush1.bf16.msra.mxu1 %v3043_v62  ;;  %v3120_v61 = vld [vmem:[%s4497_s1 + $0x5d4] ss:$8 sps:$4 sm:$0xff]   ;;  %v3115_v62 = vld [vmem:[%s4497_s1 + $0xd0] ss:$8 sps:$4 sm:$0xff]  }
  0x48   :  { %1616 = vmatpush1.bf16.msra.mxu0 %v3046_v1  ;;  %517 = vmatprep.subr.bf16.mxu1 %v3051_v4  ;;  %v3118_v1 = vld [vmem:[%s4497_s1 + $0x5d0] ss:$8 sps:$4 sm:$0xff]   ;;  %v3126_v4 = vld [vmem:[%s4497_s1 + $0x5e4] ss:$8 sps:$4 sm:$0xff]  }
  0x49   :  { %1617 = vmatprep.subr.bf16.mxu0 %v3054_v2  ;;  %v3121_v2 = vld [vmem:[%s4497_s1 + $0xe0] ss:$8 sps:$4 sm:$0xff]  }
  0x4a   :  { %336 = vmatmul.mubr.bf16.gmra.mrb[4].mxu1 %v125_v7  ;;  %v2725_v7 = vcombine.low %v3771_v28, %v3566_v49 }
  0x4b   :  { %1390 = vmatmul.mubr.bf16.gmra.mrb[4].mxu0 %v1164_v47  ;;  %518 = vmatpush1.bf16.msra.mxu1 %v3049_v5  ;;  %v3105_v47 = vld [vmem:[%s4497_s1 + $0xb4] ss:$8 sps:$4 sm:$0xff]   ;;  %v3124_v5 = vld [vmem:[%s4497_s1 + $0x5e0] ss:$8 sps:$4 sm:$0xff]  }
  0x4c   :  { %1618 = vmatpush1.bf16.msra.mxu0 %v3052_v6  ;;  %519 = vmatprep.subr.bf16.mxu1 %v3057_v8  ;;  %v3129_v6 = vld [vmem:[%s4497_s1 + $0xf4] ss:$8 sps:$4 sm:$0xff]  }
  0x4d   :  { %1619 = vmatprep.subr.bf16.mxu0 %v3060_v10  ;;  %545 = vmatprep.mubr.bf16.mxu1 %v3580_v53  ;;  %v3072_v53 = vld [vmem:[%s4497_s1 + $0x554] ss:$8 sps:$4 sm:$0xff]   ;;  %v3127_v10 = vld [vmem:[%s4497_s1 + $0xf0] ss:$8 sps:$4 sm:$0xff]  }
  0x4e   :  { %1645 = vmatprep.mubr.bf16.mxu0 %v1448_v37  ;;  %v3132_v8 = vld [vmem:[%s4497_s1 + $0x5f4] ss:$8 sps:$4 sm:$0xff]  }
  0x4f   :  { %520 = vmatpush1.bf16.msra.mxu1 %v3055_v11  ;;  %v1444_v11 = vrot.slane %v3637_v19, 3  ;;  %v3133_v19 = vld [vmem:[%s4497_s1 + $0x200] ss:$8 sps:$4 sm:$0xff]  }
  0x50   :  { %1620 = vmatpush1.bf16.msra.mxu0 %v3058_v12  ;;  %521 = vmatprep.subr.bf16.mxu1 %v3063_v13  ;;  %v3130_v12 = vld [vmem:[%s4497_s1 + $0x5f0] ss:$8 sps:$4 sm:$0xff]   ;;  %v3135_v13 = vld [vmem:[%s4497_s1 + $0x204] ss:$8 sps:$4 sm:$0xff]  }
  0x51   :  { %1621 = vmatprep.subr.bf16.mxu0 %v3066_v15  ;;  %v1443_v15 = vrot.slane %v2725_v7, 3  ;;  %v3205_v7 = vld [vmem:[%s4497_s1 + $0x2b4] ss:$8 sps:$4 sm:$0xff]  }
  0x53   :  { %522 = vmatpush1.bf16.msra.mxu1 %v3061_v16  ;;  %v3140_v16 = vld [vmem:[%s4497_s1 + $0x604] ss:$8 sps:$4 sm:$0xff]  }
  0x54   :  { %1622 = vmatpush1.bf16.msra.mxu0 %v3064_v17  ;;  %523 = vmatprep.subr.bf16.mxu1 %v3069_v18  ;;  %v19_v17 = vld [vmem:[%s4498_s0 + $0x10] sm:$0x77]  ;;  %v3138_v18 = vld [vmem:[%s4497_s1 + $0x600] ss:$8 sps:$4 sm:$0xff]  }
  0x55   :  { %1623 = vmatprep.subr.bf16.mxu0 %v3072_v53  ;;  %v1445_v53 = vsel %vm1442_vm2, %v1443_v15, %v1444_v11  ;;  %v2587_v28 = vcombine.low %v19_v17, %v19_v17  ;;  %v3209_v15 = vld [vmem:[%s4497_s1 + $0x2c0] ss:$8 sps:$4 sm:$0xff]  }
  0x57   :  { %524 = vmatpush1.bf16.msra.mxu1 %v3067_v20  ;;  %v3143_v20 = vld [vmem:[%s4497_s1 + $0x214] ss:$8 sps:$4 sm:$0xff]  }
  0x58   :  { %1624 = vmatpush1.bf16.msra.mxu0 %v3070_v21  ;;  %525 = vmatprep.subr.bf16.mxu1 %v3075_v22  ;;  %v3146_v21 = vld [vmem:[%s4497_s1 + $0x614] ss:$8 sps:$4 sm:$0xff]   ;;  %v2588_v22 = vcombine.high %v19_v17, %v19_v17 }
  0x59   :  { %1625 = vmatprep.subr.bf16.mxu0 %v3078_v23  ;;  %v3141_v23 = vld [vmem:[%s4497_s1 + $0x210] ss:$8 sps:$4 sm:$0xff]   ;;  %v3220_v17 = vld [vmem:[%s4497_s1 + $0x6d4] ss:$8 sps:$4 sm:$0xff]  }
  0x5b   :  { %526 = vmatpush1.bf16.msra.mxu1 %v3073_v24  ;;  %v3144_v24 = vld [vmem:[%s4497_s1 + $0x610] ss:$8 sps:$4 sm:$0xff]  }
  0x5c   :  { %1626 = vmatpush1.bf16.msra.mxu0 %v3076_v25  ;;  %527 = vmatprep.subr.bf16.mxu1 %v3081_v26  ;;  %v3151_v25 = vld [vmem:[%s4497_s1 + $0x224] ss:$8 sps:$4 sm:$0xff]  }
  0x5d   :  { %1627 = vmatprep.subr.bf16.mxu0 %v3084_v27  ;;  %v3154_v26 = vld [vmem:[%s4497_s1 + $0x624] ss:$8 sps:$4 sm:$0xff]  }
  0x5f   :  { %528 = vmatpush1.bf16.msra.mxu1 %v3079_v29  ;;  %v3149_v29 = vld [vmem:[%s4497_s1 + $0x220] ss:$8 sps:$4 sm:$0xff]  }
  0x60   :  { %1628 = vmatpush1.bf16.msra.mxu0 %v3082_v32  ;;  %529 = vmatprep.subr.bf16.mxu1 %v3087_v33  ;;  %v607_v32 = vrot.slane %v3584_v54, 1  ;;  %v3160_v33 = vld [vmem:[%s4497_s1 + $0x634] ss:$8 sps:$4 sm:$0xff]   ;;  %v3252_v54 = vld [vmem:[%s4497_s1 + $0x720] ss:$8 sps:$4 sm:$0xff]  }
  0x61   :  { %1629 = vmatprep.subr.bf16.mxu0 %v3090_v34  ;;  %v3943_v34 = vcombine.high %v3566_v49, %v3571_v50  ;;  %v3166_v50 = vld [vmem:[%s4497_s1 + $0x644] ss:$8 sps:$4 sm:$0xff]  }
  0x63   :  { %530 = vmatpush1.bf16.msra.mxu1 %v3085_v36  ;;  %v3158_v36 = vld [vmem:[%s4497_s1 + $0x630] ss:$8 sps:$4 sm:$0xff]  }
  0x64   :  { %1630 = vmatpush1.bf16.msra.mxu0 %v3088_v38  ;;  %531 = vmatprep.subr.bf16.mxu1 %v3093_v39  ;;  %v3161_v38 = vld [vmem:[%s4497_s1 + $0x240] ss:$8 sps:$4 sm:$0xff]  }
  0x65   :  { %1631 = vmatprep.subr.bf16.mxu0 %v3096_v40  ;;  %v3164_v39 = vld [vmem:[%s4497_s1 + $0x640] ss:$8 sps:$4 sm:$0xff]   ;;  %v3169_v40 = vld [vmem:[%s4497_s1 + $0x254] ss:$8 sps:$4 sm:$0xff]  }
  0x67   :  { %532 = vmatpush1.bf16.msra.mxu1 %v3091_v41  ;;  %v3172_v41 = vld [vmem:[%s4497_s1 + $0x654] ss:$8 sps:$4 sm:$0xff]  }
  0x68   :  { %1632 = vmatpush1.bf16.msra.mxu0 %v3094_v42  ;;  %533 = vmatprep.subr.bf16.mxu1 %v3099_v43  ;;  %v3167_v42 = vld [vmem:[%s4497_s1 + $0x250] ss:$8 sps:$4 sm:$0xff]  }
  0x69   :  { %1633 = vmatprep.subr.bf16.mxu0 %v3102_v44  ;;  %v3170_v43 = vld [vmem:[%s4497_s1 + $0x650] ss:$8 sps:$4 sm:$0xff]   ;;  %v3175_v44 = vld [vmem:[%s4497_s1 + $0x264] ss:$8 sps:$4 sm:$0xff]  }
  0x6b   :  { %534 = vmatpush1.bf16.msra.mxu1 %v3097_v45  ;;  %v3178_v45 = vld [vmem:[%s4497_s1 + $0x664] ss:$8 sps:$4 sm:$0xff]  }
  0x6c   :  { %1634 = vmatpush1.bf16.msra.mxu0 %v3100_v46  ;;  %535 = vmatprep.subr.bf16.mxu1 %v3105_v47  ;;  %v3173_v46 = vld [vmem:[%s4497_s1 + $0x260] ss:$8 sps:$4 sm:$0xff]  }
  0x6d   :  { %1635 = vmatprep.subr.bf16.mxu0 %v3108_v48  ;;  %v3176_v47 = vld [vmem:[%s4497_s1 + $0x660] ss:$8 sps:$4 sm:$0xff]   ;;  %v3181_v48 = vld [vmem:[%s4497_s1 + $0x274] ss:$8 sps:$4 sm:$0xff]  }
  0x6f   :  { %536 = vmatpush1.bf16.msra.mxu1 %v3103_v51  ;;  %v3184_v51 = vld [vmem:[%s4497_s1 + $0x674] ss:$8 sps:$4 sm:$0xff]  }
  0x70   :  { %1636 = vmatpush1.bf16.msra.mxu0 %v3106_v52  ;;  %537 = vmatprep.subr.bf16.mxu1 %v3111_v55  ;;  %v3179_v52 = vld [vmem:[%s4497_s1 + $0x270] ss:$8 sps:$4 sm:$0xff]  }
  0x71   :  { %1637 = vmatprep.subr.bf16.mxu0 %v3114_v56  ;;  %v3182_v55 = vld [vmem:[%s4497_s1 + $0x670] ss:$8 sps:$4 sm:$0xff]   ;;  %v3187_v56 = vld [vmem:[%s4497_s1 + $0x284] ss:$8 sps:$4 sm:$0xff]  }
  0x73   :  { %538 = vmatpush1.bf16.msra.mxu1 %v3109_v57  ;;  %v3190_v57 = vld [vmem:[%s4497_s1 + $0x684] ss:$8 sps:$4 sm:$0xff]  }
  0x74   :  { %1638 = vmatpush1.bf16.msra.mxu0 %v3112_v58  ;;  %539 = vmatprep.subr.bf16.mxu1 %v3117_v59  ;;  %v3185_v58 = vld [vmem:[%s4497_s1 + $0x280] ss:$8 sps:$4 sm:$0xff]  }
  0x75   :  { %1639 = vmatprep.subr.bf16.mxu0 %v3120_v61  ;;  %v3188_v59 = vld [vmem:[%s4497_s1 + $0x680] ss:$8 sps:$4 sm:$0xff]   ;;  %v3193_v61 = vld [vmem:[%s4497_s1 + $0x294] ss:$8 sps:$4 sm:$0xff]  }
  0x77   :  { %540 = vmatpush1.bf16.msra.mxu1 %v3115_v62  ;;  %v3196_v62 = vld [vmem:[%s4497_s1 + $0x694] ss:$8 sps:$4 sm:$0xff]  }
  0x78   :  { %1640 = vmatpush1.bf16.msra.mxu0 %v3118_v1  ;;  %541 = vmatprep.subr.bf16.mxu1 %v3123_v3  ;;  %v3191_v1 = vld [vmem:[%s4497_s1 + $0x290] ss:$8 sps:$4 sm:$0xff]  }
  0x79   :  { %1641 = vmatprep.subr.bf16.mxu0 %v3126_v4  ;;  %v3194_v3 = vld [vmem:[%s4497_s1 + $0x690] ss:$8 sps:$4 sm:$0xff]   ;;  %v3199_v4 = vld [vmem:[%s4497_s1 + $0x2a4] ss:$8 sps:$4 sm:$0xff]  }
  0x7b   :  { %542 = vmatpush1.bf16.msra.mxu1 %v3121_v2  ;;  %v3202_v2 = vld [vmem:[%s4497_s1 + $0x6a4] ss:$8 sps:$4 sm:$0xff]  }
  0x7c   :  { %1642 = vmatpush1.bf16.msra.mxu0 %v3124_v5  ;;  %543 = vmatprep.subr.bf16.mxu1 %v3129_v6  ;;  %v3197_v5 = vld [vmem:[%s4497_s1 + $0x2a0] ss:$8 sps:$4 sm:$0xff]  }
  0x7d   :  { %1643 = vmatprep.subr.bf16.mxu0 %v3132_v8  ;;  %v3200_v6 = vld [vmem:[%s4497_s1 + $0x6a0] ss:$8 sps:$4 sm:$0xff]   ;;  %v3208_v8 = vld [vmem:[%s4497_s1 + $0x6b4] ss:$8 sps:$4 sm:$0xff]  }
  0x7f   :  { %544 = vmatpush1.bf16.msra.mxu1 %v3127_v10  ;;  %v3203_v10 = vld [vmem:[%s4497_s1 + $0x2b0] ss:$8 sps:$4 sm:$0xff]  }
  0x80   :  { %1644 = vmatpush1.bf16.msra.mxu0 %v3130_v12  ;;  %773 = vmatprep.subr.bf16.mxu1 %v3135_v13  ;;  %v3211_v12 = vld [vmem:[%s4497_s1 + $0x2c4] ss:$8 sps:$4 sm:$0xff]  }
  0x81   :  { %1874 = vmatprep.subr.bf16.mxu0 %v3140_v16  ;;  %v3214_v13 = vld [vmem:[%s4497_s1 + $0x6c4] ss:$8 sps:$4 sm:$0xff]   ;;  %v3212_v16 = vld [vmem:[%s4497_s1 + $0x6c0] ss:$8 sps:$4 sm:$0xff]  }
  0x82   :  { %546 = vmatmul.mubr.bf16.vlgmr.msra.gmra.mrb[0].mxu1 %v3608_v0  ;;  %v3922_v0 = vld [vmem:[%s4498_s0] sm:$0xee] }
  0x83   :  { %1646 = vmatmul.mubr.bf16.vlgmr.msra.gmra.mrb[0].mxu0 %v1445_v53  ;;  %774 = vmatpush1.bf16.msra.mxu1 %v3133_v19  ;;  %v2622_v27 = vcombine.high %v3922_v0, %v3566_v49  ;;  %v3163_v49 = vld [vmem:[%s4497_s1 + $0x244] ss:$8 sps:$4 sm:$0xff]   ;;  %v3217_v19 = vld [vmem:[%s4497_s1 + $0x2d4] ss:$8 sps:$4 sm:$0xff]   ;;  %v3218_v53 = vld [vmem:[%s4497_s1 + $0x6d0] ss:$8 sps:$4 sm:$0xff]  }
  0x84   :  { %1875 = vmatpush1.bf16.msra.mxu0 %v3138_v18  ;;  %775 = vmatprep.subr.bf16.mxu1 %v3143_v20  ;;  %v3215_v18 = vld [vmem:[%s4497_s1 + $0x2d0] ss:$8 sps:$4 sm:$0xff]   ;;  %v3223_v20 = vld [vmem:[%s4497_s1 + $0x2e4] ss:$8 sps:$4 sm:$0xff]  }
  0x85   :  { %1876 = vmatprep.subr.bf16.mxu0 %v3146_v21  ;;  %555 = vmatprep.mubr.bf16.mxu1 %v2588_v22  ;;  %v3226_v21 = vld [vmem:[%s4497_s1 + $0x6e4] ss:$8 sps:$4 sm:$0xff]   ;;  %v3221_v22 = vld [vmem:[%s4497_s1 + $0x2e0] ss:$8 sps:$4 sm:$0xff]  }
  0x86   :  { %1655 = vmatprep.mubr.bf16.mxu0 %v1447_v31  ;;  %v606_v31 = vrot.slane %v2622_v27, 1  ;;  %v3232_v27 = vld [vmem:[%s4497_s1 + $0x6f4] ss:$8 sps:$4 sm:$0xff]  }
  0x87   :  { %776 = vmatpush1.bf16.msra.mxu1 %v3141_v23  ;;  %v3224_v23 = vld [vmem:[%s4497_s1 + $0x6e0] ss:$8 sps:$4 sm:$0xff]  }
  0x88   :  { %1877 = vmatpush1.bf16.msra.mxu0 %v3144_v24  ;;  %777 = vmatprep.subr.bf16.mxu1 %v3151_v25  ;;  %v608_v37 = vsel %vm602_vm3, %v606_v31, %v607_v32  ;;  %v3389_v24 = vld [vmem:[%s4498_s0 + $0x8] sm:$0xff] }
  0x89   :  { %1878 = vmatprep.subr.bf16.mxu0 %v3154_v26  ;;  %v2621_v25 = vcombine.low %v3922_v0, %v3389_v24  ;;  %v3229_v26 = vld [vmem:[%s4497_s1 + $0x2f4] ss:$8 sps:$4 sm:$0xff]   ;;  %v3237_v31 = vld [vmem:[%s4497_s1 + $0x304] ss:$8 sps:$4 sm:$0xff]  }
  0x8a   :  { %556 = vmatmul.mubr.bf16.gmra.mrb[8].mxu1 %v2587_v28  ;;  %v3227_v28 = vld [vmem:[%s4497_s1 + $0x2f0] ss:$8 sps:$4 sm:$0xff]  }
  0x8b   :  { %1656 = vmatmul.mubr.bf16.gmra.mrb[8].mxu0 %v1444_v11  ;;  %778 = vmatpush1.bf16.msra.mxu1 %v3149_v29  ;;  %v3206_v11 = vld [vmem:[%s4497_s1 + $0x6b0] ss:$8 sps:$4 sm:$0xff]   ;;  %v603_v0 = vrot.slane %v2621_v25, 1  ;;  %v3293_v25 = vld [vmem:[%s4497_s1 + $0x394] ss:$8 sps:$4 sm:$0xff]  }
  0x8c   :  { %1879 = vmatpush1.bf16.msra.mxu0 %v3152_v30  ;;  %779 = vmatprep.subr.bf16.mxu1 %v3157_v63  ;;  %v3230_v29 = vld [vmem:[%s4497_s1 + $0x6f0] ss:$8 sps:$4 sm:$0xff]   ;;  %v604_v30 = vrot.slane %v3624_v9, 1  ;;  %v3239_v9 = vld [vmem:[%s4497_s1 + $0x700] ss:$8 sps:$4 sm:$0xff]  }
  0x8d   :  { %1880 = vmatprep.subr.bf16.mxu0 %v3160_v33  ;;  %805 = vmatprep.mubr.bf16.mxu1 %v608_v37  ;;  %v4107_v63 = vld [vmem:[%s4498_s0 + $0x18] sm:$0xff]  ;;  %v3241_v33 = vld [vmem:[%s4497_s1 + $0x704] ss:$8 sps:$4 sm:$0xff]   ;;  %v4125_v37 = vld [vmem:[%s4498_s0 + $0x10] sm:$0xff] }
  0x8e   :  { %1906 = vmatprep.mubr.bf16.mxu0 %v3943_v34 }
  0x8f   :  { %780 = vmatpush1.bf16.msra.mxu1 %v3155_v35  ;;  %v3235_v35 = vld [vmem:[%s4497_s1 + $0x300] ss:$8 sps:$4 sm:$0xff]  }
  0x90   :  { %1881 = vmatpush1.bf16.msra.mxu0 %v3158_v36  ;;  %781 = vmatprep.subr.bf16.mxu1 %v3163_v49  ;;  %v1984_v36 = vshll.u32 %v3943_v34, 16  ;;  %v4128_v49 = vcombine.low %v3389_v24, %v4125_v37  ;;  %v3288_v24 = vld [vmem:[%s4497_s1 + $0x780] ss:$8 sps:$4 sm:$0xff]  }
  0x91   :  { %1882 = vmatprep.subr.bf16.mxu0 %v3166_v50  ;;  %v1670_v50 = vld [vmem:[%s4498_s0 + $0x18] sm:$0x77] }
  0x93   :  { %782 = vmatpush1.bf16.msra.mxu1 %v3161_v38  ;;  %v4135_v38 = vcombine.high %v4107_v63, %v4107_v63 }
  0x94   :  { %1883 = vmatpush1.bf16.msra.mxu0 %v3164_v39  ;;  %783 = vmatprep.subr.bf16.mxu1 %v3169_v40  ;;  %v605_v39 = vsel %vm602_vm3, %v603_v0, %v604_v30  ;;  %v4141_v40 = vld [vmem:[%s4498_s0 + $0x18] sm:$0x11]  ;;  %v3302_v0 = vld [vmem:[%s4497_s1 + $0x7a4] ss:$8 sps:$4 sm:$0xff]  }
  0x95   :  { %1884 = vmatprep.subr.bf16.mxu0 %v3172_v41  ;;  %v3245_v41 = vld [vmem:[%s4497_s1 + $0x314] ss:$8 sps:$4 sm:$0xff]  }
  0x97   :  { %784 = vmatpush1.bf16.msra.mxu1 %v3167_v42  ;;  %v3248_v42 = vld [vmem:[%s4497_s1 + $0x714] ss:$8 sps:$4 sm:$0xff]  }
  0x98   :  { %1885 = vmatpush1.bf16.msra.mxu0 %v3170_v43  ;;  %785 = vmatprep.subr.bf16.mxu1 %v3175_v44  ;;  %v2762_v43 = vcombine.high %v1670_v50, %v1670_v50  ;;  %v1982_v44 = vshrl.u32 %v3943_v34, 16  ;;  %v3251_v34 = vld [vmem:[%s4497_s1 + $0x324] ss:$8 sps:$4 sm:$0xff]  }
  0x99   :  { %1886 = vmatprep.subr.bf16.mxu0 %v3178_v45  ;;  %v3243_v45 = vld [vmem:[%s4497_s1 + $0x310] ss:$8 sps:$4 sm:$0xff]  }
  0x9b   :  { %786 = vmatpush1.bf16.msra.mxu1 %v3173_v46  ;;  %v2658_v46 = vcombine.high %v4125_v37, %v4141_v40 }
  0x9c   :  { %1887 = vmatpush1.bf16.msra.mxu0 %v3176_v47  ;;  %787 = vmatprep.subr.bf16.mxu1 %v3181_v48  ;;  %v1986_v47 = vrot.slane %v1984_v36, 1  ;;  %v1989_v48 = vshll.u32 %v4135_v38, 16  ;;  %v3306_v36 = vld [vmem:[%s4497_s1 + $0x7b0] ss:$8 sps:$4 sm:$0xff]  }
  0x9d   :  { %1888 = vmatprep.subr.bf16.mxu0 %v3184_v51  ;;  %v3246_v51 = vld [vmem:[%s4497_s1 + $0x710] ss:$8 sps:$4 sm:$0xff]  }
  0x9f   :  { %788 = vmatpush1.bf16.msra.mxu1 %v3179_v52  ;;  %v3254_v52 = vld [vmem:[%s4497_s1 + $0x724] ss:$8 sps:$4 sm:$0xff]  }
  0xa0   :  { %1889 = vmatpush1.bf16.msra.mxu0 %v3182_v55  ;;  %789 = vmatprep.subr.bf16.mxu1 %v3187_v56  ;;  %v886_v55 = vrot.slane %v3596_v60, 2  ;;  %v2761_v56 = vcombine.low %v1670_v50, %v1670_v50  ;;  %v3257_v60 = vld [vmem:[%s4497_s1 + $0x334] ss:$8 sps:$4 sm:$0xff]   ;;  %v3311_v50 = vld [vmem:[%s4497_s1 + $0x3c4] ss:$8 sps:$4 sm:$0xff]  }
  0xa1   :  { %1890 = vmatprep.subr.bf16.mxu0 %v3190_v57  ;;  %v4169_v57 = vrot.slane %v2658_v46, 2  ;;  %v3318_v46 = vld [vmem:[%s4497_s1 + $0x7d0] ss:$8 sps:$4 sm:$0xff]  }
  0xa3   :  { %790 = vmatpush1.bf16.msra.mxu1 %v3185_v58  ;;  %v1987_v58 = vor.u32 %v1986_v47, %v1982_v44  ;;  %v3320_v44 = vld [vmem:[%s4497_s1 + $0x7d4] ss:$8 sps:$4 sm:$0xff]   ;;  %v4317_v47 = vcombine.low %v4107_v63, %v4107_v63  ;;  %v3323_v63 = vld [vmem:[%s4497_s1 + $0x3e0] ss:$8 sps:$4 sm:$0xff]  }
  0xa4   :  { %1891 = vmatpush1.bf16.msra.mxu0 %v3188_v59  ;;  %791 = vmatprep.subr.bf16.mxu1 %v3193_v61  ;;  %v4171_v59 = vrot.slane %v1989_v48, 1  ;;  %v3249_v61 = vld [vmem:[%s4497_s1 + $0x320] ss:$8 sps:$4 sm:$0xff]   ;;  %v1972_v48 = vshll.u32 %v4128_v49, 16 }
  0xa5   :  { %1892 = vmatprep.subr.bf16.mxu0 %v3196_v62  ;;  %v888_v62 = vsel %vm882_vm4, %v886_v55, %v4169_v57  ;;  %v3326_v55 = vld [vmem:[%s4497_s1 + $0x7e0] ss:$8 sps:$4 sm:$0xff]  }
  0xa7   :  { %792 = vmatpush1.bf16.msra.mxu1 %v3191_v1  ;;  %v1992_v1 = vsel %vm98_vm0, %v1987_v58, %v4171_v59  ;;  %v1974_v58 = vrot.slane %v1972_v48, 1  ;;  %v3380_v48 = vld [vmem:[%s4497_s1 + $0x8d4] ss:$8 sps:$4 sm:$0xff]  }
  0xa8   :  { %1893 = vmatpush1.bf16.msra.mxu0 %v3194_v3  ;;  %793 = vmatprep.subr.bf16.mxu1 %v3199_v4  ;;  %v3255_v3 = vld [vmem:[%s4497_s1 + $0x330] ss:$8 sps:$4 sm:$0xff]  }
  0xa9   :  { %1894 = vmatprep.subr.bf16.mxu0 %v3202_v2  ;;  %v3258_v4 = vld [vmem:[%s4497_s1 + $0x730] ss:$8 sps:$4 sm:$0xff]   ;;  %v3263_v2 = vld [vmem:[%s4497_s1 + $0x344] ss:$8 sps:$4 sm:$0xff]  }
  0xab   :  { %794 = vmatpush1.bf16.msra.mxu1 %v3197_v5  ;;  %v3266_v5 = vld [vmem:[%s4497_s1 + $0x744] ss:$8 sps:$4 sm:$0xff]  }
  0xac   :  { %1895 = vmatpush1.bf16.msra.mxu0 %v3200_v6  ;;  %795 = vmatprep.subr.bf16.mxu1 %v3205_v7  ;;  %v3261_v6 = vld [vmem:[%s4497_s1 + $0x340] ss:$8 sps:$4 sm:$0xff]  }
  0xad   :  { %1896 = vmatprep.subr.bf16.mxu0 %v3208_v8  ;;  %v3264_v7 = vld [vmem:[%s4497_s1 + $0x740] ss:$8 sps:$4 sm:$0xff]   ;;  %v3269_v8 = vld [vmem:[%s4497_s1 + $0x354] ss:$8 sps:$4 sm:$0xff]  }
  0xaf   :  { %796 = vmatpush1.bf16.msra.mxu1 %v3203_v10  ;;  %v3272_v10 = vld [vmem:[%s4497_s1 + $0x754] ss:$8 sps:$4 sm:$0xff]  }
  0xb0   :  { %1897 = vmatpush1.bf16.msra.mxu0 %v3206_v11  ;;  %797 = vmatprep.subr.bf16.mxu1 %v3211_v12  ;;  %v3267_v11 = vld [vmem:[%s4497_s1 + $0x350] ss:$8 sps:$4 sm:$0xff]  }
  0xb1   :  { %1898 = vmatprep.subr.bf16.mxu0 %v3214_v13  ;;  %v3270_v12 = vld [vmem:[%s4497_s1 + $0x750] ss:$8 sps:$4 sm:$0xff]   ;;  %v3275_v13 = vld [vmem:[%s4497_s1 + $0x364] ss:$8 sps:$4 sm:$0xff]  }
  0xb3   :  { %798 = vmatpush1.bf16.msra.mxu1 %v3209_v15  ;;  %v3278_v15 = vld [vmem:[%s4497_s1 + $0x764] ss:$8 sps:$4 sm:$0xff]  }
  0xb4   :  { %1899 = vmatpush1.bf16.msra.mxu0 %v3212_v16  ;;  %799 = vmatprep.subr.bf16.mxu1 %v3217_v19  ;;  %v3273_v16 = vld [vmem:[%s4497_s1 + $0x360] ss:$8 sps:$4 sm:$0xff]  }
  0xb5   :  { %1900 = vmatprep.subr.bf16.mxu0 %v3220_v17  ;;  %v3276_v19 = vld [vmem:[%s4497_s1 + $0x760] ss:$8 sps:$4 sm:$0xff]   ;;  %v3281_v17 = vld [vmem:[%s4497_s1 + $0x374] ss:$8 sps:$4 sm:$0xff]  }
  0xb7   :  { %800 = vmatpush1.bf16.msra.mxu1 %v3215_v18  ;;  %v3284_v18 = vld [vmem:[%s4497_s1 + $0x774] ss:$8 sps:$4 sm:$0xff]  }
  0xb8   :  { %1901 = vmatpush1.bf16.msra.mxu0 %v3218_v53  ;;  %801 = vmatprep.subr.bf16.mxu1 %v3223_v20  ;;  %v3279_v53 = vld [vmem:[%s4497_s1 + $0x370] ss:$8 sps:$4 sm:$0xff]  }
  0xb9   :  { %1902 = vmatprep.subr.bf16.mxu0 %v3226_v21  ;;  %v3282_v20 = vld [vmem:[%s4497_s1 + $0x770] ss:$8 sps:$4 sm:$0xff]   ;;  %v3287_v21 = vld [vmem:[%s4497_s1 + $0x384] ss:$8 sps:$4 sm:$0xff]  }
  0xbb   :  { %802 = vmatpush1.bf16.msra.mxu1 %v3221_v22  ;;  %v3290_v22 = vld [vmem:[%s4497_s1 + $0x784] ss:$8 sps:$4 sm:$0xff]  }
  0xbc   :  { %1903 = vmatpush1.bf16.msra.mxu0 %v3224_v23  ;;  %803 = vmatprep.subr.bf16.mxu1 %v3229_v26  ;;  %v3285_v23 = vld [vmem:[%s4497_s1 + $0x380] ss:$8 sps:$4 sm:$0xff]   ;;  %v3296_v26 = vld [vmem:[%s4497_s1 + $0x794] ss:$8 sps:$4 sm:$0xff]  }
  0xbd   :  { %1904 = vmatprep.subr.bf16.mxu0 %v3232_v27  ;;  %v3291_v27 = vld [vmem:[%s4497_s1 + $0x390] ss:$8 sps:$4 sm:$0xff]  }
  0xbf   :  { %804 = vmatpush1.bf16.msra.mxu1 %v3227_v28  ;;  %v3294_v28 = vld [vmem:[%s4497_s1 + $0x790] ss:$8 sps:$4 sm:$0xff]  }
  0xc0   :  { %1905 = vmatpush1.bf16.msra.mxu0 %v3230_v29  ;;  %1053 = vmatprep.subr.bf16.mxu1 %v3237_v31  ;;  %v3299_v29 = vld [vmem:[%s4497_s1 + $0x3a4] ss:$8 sps:$4 sm:$0xff]   ;;  %v3300_v31 = vld [vmem:[%s4497_s1 + $0x7a0] ss:$8 sps:$4 sm:$0xff]  }
  0xc1   :  { %2163 = vmatprep.subr.bf16.mxu0 %v3241_v33  ;;  %v3305_v33 = vld [vmem:[%s4497_s1 + $0x3b4] ss:$8 sps:$4 sm:$0xff]  }
  0xc2   :  { %806 = vmatmul.mubr.bf16.vlgmr.msra.gmra.mrb[0].mxu1 %v605_v39  ;;  %v3314_v39 = vld [vmem:[%s4497_s1 + $0x7c4] ss:$8 sps:$4 sm:$0xff]  }
  0xc3   :  { %1907 = vmatmul.mubr.bf16.vlgmr.msra.gmra.mrb[0].mxu0 %v4128_v49  ;;  %1054 = vmatpush1.bf16.msra.mxu1 %v3235_v35  ;;  %v3308_v35 = vld [vmem:[%s4497_s1 + $0x7b4] ss:$8 sps:$4 sm:$0xff]  }
  0xc4   :  { %2164 = vmatpush1.bf16.msra.mxu0 %v3239_v9  ;;  %1055 = vmatprep.subr.bf16.mxu1 %v3245_v41  ;;  %v3303_v9 = vld [vmem:[%s4497_s1 + $0x3b0] ss:$8 sps:$4 sm:$0xff]   ;;  %v3309_v41 = vld [vmem:[%s4497_s1 + $0x3c0] ss:$8 sps:$4 sm:$0xff]  }
  0xc5   :  { %2165 = vmatprep.subr.bf16.mxu0 %v3248_v42  ;;  %815 = vmatprep.mubr.bf16.mxu1 %v607_v32  ;;  %v3260_v32 = vld [vmem:[%s4497_s1 + $0x734] ss:$8 sps:$4 sm:$0xff]   ;;  %v3312_v42 = vld [vmem:[%s4497_s1 + $0x7c0] ss:$8 sps:$4 sm:$0xff]  }
  0xc6   :  { %1916 = vmatprep.mubr.bf16.mxu0 %v2762_v43  ;;  %v3317_v43 = vld [vmem:[%s4497_s1 + $0x3d4] ss:$8 sps:$4 sm:$0xff]  }
  0xc7   :  { %1056 = vmatpush1.bf16.msra.mxu1 %v3243_v45  ;;  %v3315_v45 = vld [vmem:[%s4497_s1 + $0x3d0] ss:$8 sps:$4 sm:$0xff]  }
  0xc8   :  { %2166 = vmatpush1.bf16.msra.mxu0 %v3246_v51  ;;  %1057 = vmatprep.subr.bf16.mxu1 %v3251_v34  ;;  %v3325_v51 = vld [vmem:[%s4497_s1 + $0x3e4] ss:$8 sps:$4 sm:$0xff]  }
  0xc9   :  { %2167 = vmatprep.subr.bf16.mxu0 %v3254_v52  ;;  %v3328_v34 = vld [vmem:[%s4497_s1 + $0x7e4] ss:$8 sps:$4 sm:$0xff]   ;;  %v1970_v52 = vshrl.u32 %v4128_v49, 16  ;;  %v3331_v49 = vld [vmem:[%s4497_s1 + $0x3f4] ss:$8 sps:$4 sm:$0xff]  }
  0xca   :  { %816 = vmatmul.mubr.bf16.gmra.mrb[12].mxu1 %v604_v30  ;;  %v3297_v30 = vld [vmem:[%s4497_s1 + $0x3a0] ss:$8 sps:$4 sm:$0xff]  }
  0xcb   :  { %1917 = vmatmul.mubr.bf16.gmra.mrb[12].mxu0 %v2761_v56  ;;  %1058 = vmatpush1.bf16.msra.mxu1 %v3249_v61  ;;  %v2657_v56 = vcombine.low %v4125_v37, %v4141_v40  ;;  %v1977_v61 = vshll.u32 %v4317_v47, 16  ;;  %v3329_v40 = vld [vmem:[%s4497_s1 + $0x3f0] ss:$8 sps:$4 sm:$0xff]  }
  0xcc   :  { %2168 = vmatpush1.bf16.msra.mxu0 %v3252_v54  ;;  %1059 = vmatprep.subr.bf16.mxu1 %v3257_v60  ;;  %v3334_v54 = vld [vmem:[%s4497_s1 + $0x7f4] ss:$8 sps:$4 sm:$0xff]   ;;  %v883_v60 = vrot.slane %v3630_v14, 2  ;;  %v1996_v14 = vshrl.u32 %v4135_v38, 16 }
  0xcd   :  { %2169 = vmatprep.subr.bf16.mxu0 %v3260_v32  ;;  %1085 = vmatprep.mubr.bf16.mxu1 %v888_v62  ;;  %v3332_v32 = vld [vmem:[%s4497_s1 + $0x7f0] ss:$8 sps:$4 sm:$0xff]   ;;  %v884_v62 = vrot.slane %v2657_v56, 2 }
  0xce   :  { %2195 = vmatprep.mubr.bf16.mxu0 %v1992_v1  ;;  %v1975_v1 = vor.u32 %v1974_v58, %v1970_v52  ;;  %v3381_v52 = vld [vmem:[%s4497_s1 + $0x8e0] ss:$8 sps:$4 sm:$0xff]   ;;  %v3384_v56 = vld [vmem:[%s4497_s1 + $0x8f0] ss:$8 sps:$4 sm:$0xff]  }
  0xcf   :  { %1060 = vmatpush1.bf16.msra.mxu1 %v3255_v3  ;;  %v1979_v3 = vrot.slane %v1977_v61, 1  ;;  %v2259_v61 = vrot.slane %v4317_v47, 1 }
  0xd0   :  { %2170 = vmatpush1.bf16.msra.mxu0 %v3258_v4  ;;  %1061 = vmatprep.subr.bf16.mxu1 %v3263_v2  ;;  %v3341_v4 = vld [vmem:[%s4497_s1 + $0x804] ss:$8 sps:$4 sm:$0xff]   ;;  %v885_v2 = vsel %vm882_vm4, %v883_v60, %v884_v62 }
  0xd1   :  { %2171 = vmatprep.subr.bf16.mxu0 %v3266_v5  ;;  %v3339_v5 = vld [vmem:[%s4497_s1 + $0x800] ss:$8 sps:$4 sm:$0xff]  }
  0xd3   :  { %1062 = vmatpush1.bf16.msra.mxu1 %v3261_v6  ;;  %v1980_v6 = vsel %vm98_vm0, %v1975_v1, %v1979_v3 }
  0xd4   :  { %2172 = vmatpush1.bf16.msra.mxu0 %v3264_v7  ;;  %1063 = vmatprep.subr.bf16.mxu1 %v3269_v8  ;;  %v4361_v7 = vld [vmem:[%s4498_s0 + $0x8] sm:$0xee]  ;;  %v3344_v8 = vld [vmem:[%s4497_s1 + $0x814] ss:$8 sps:$4 sm:$0xff]  }
  0xd5   :  { %2173 = vmatprep.subr.bf16.mxu0 %v3272_v10  ;;  %v1998_v10 = vor.u32 %v1996_v14, %v4171_v59 }
  0xd7   :  { %1064 = vmatpush1.bf16.msra.mxu1 %v3267_v11  ;;  %v1993_v11 = vshrl.u32 %v4317_v47, 16 }
  0xd8   :  { %2174 = vmatpush1.bf16.msra.mxu0 %v3270_v12  ;;  %1065 = vmatprep.subr.bf16.mxu1 %v3275_v13  ;;  %v2830_v12 = vcombine.high %v4361_v7, %v4125_v37  ;;  %v3342_v13 = vld [vmem:[%s4497_s1 + $0x810] ss:$8 sps:$4 sm:$0xff]  }
  0xd9   :  { %2175 = vmatprep.subr.bf16.mxu0 %v3278_v15  ;;  %v3347_v15 = vld [vmem:[%s4497_s1 + $0x824] ss:$8 sps:$4 sm:$0xff]   ;;  %v1995_v59 = vor.u32 %v1993_v11, %v1979_v3 }
  0xdb   :  { %1066 = vmatpush1.bf16.msra.mxu1 %v3273_v16  ;;  %v2261_v16 = vrot.slane %v2830_v12, 1 }
  0xdc   :  { %2176 = vmatpush1.bf16.msra.mxu0 %v3276_v19  ;;  %1067 = vmatprep.subr.bf16.mxu1 %v3281_v17  ;;  %v2262_v19 = vrot.slane %v4135_v38, 1  ;;  %v3345_v17 = vld [vmem:[%s4497_s1 + $0x820] ss:$8 sps:$4 sm:$0xff]   ;;  %v3348_v38 = vld [vmem:[%s4497_s1 + $0x830] ss:$8 sps:$4 sm:$0xff]  }
  0xdd   :  { %2177 = vmatprep.subr.bf16.mxu0 %v3284_v18  ;;  %v3350_v18 = vld [vmem:[%s4497_s1 + $0x834] ss:$8 sps:$4 sm:$0xff]  }
  0xdf   :  { %1068 = vmatpush1.bf16.msra.mxu1 %v3279_v53  ;;  %v3353_v53 = vld [vmem:[%s4497_s1 + $0x844] ss:$8 sps:$4 sm:$0xff]  }
  0xe0   :  { %2178 = vmatpush1.bf16.msra.mxu0 %v3282_v20  ;;  %1069 = vmatprep.subr.bf16.mxu1 %v3287_v21  ;;  %v3351_v20 = vld [vmem:[%s4497_s1 + $0x840] ss:$8 sps:$4 sm:$0xff]   ;;  %v3356_v21 = vld [vmem:[%s4497_s1 + $0x854] ss:$8 sps:$4 sm:$0xff]  }
  0xe1   :  { %2179 = vmatprep.subr.bf16.mxu0 %v3290_v22  ;;  %v3354_v22 = vld [vmem:[%s4497_s1 + $0x850] ss:$8 sps:$4 sm:$0xff]  }
  0xe3   :  { %1070 = vmatpush1.bf16.msra.mxu1 %v3285_v23  ;;  %v3359_v23 = vld [vmem:[%s4497_s1 + $0x864] ss:$8 sps:$4 sm:$0xff]  }
  0xe4   :  { %2180 = vmatpush1.bf16.msra.mxu0 %v3288_v24  ;;  %1071 = vmatprep.subr.bf16.mxu1 %v3293_v25  ;;  %v3357_v24 = vld [vmem:[%s4497_s1 + $0x860] ss:$8 sps:$4 sm:$0xff]   ;;  %v3362_v25 = vld [vmem:[%s4497_s1 + $0x874] ss:$8 sps:$4 sm:$0xff]  }
  0xe5   :  { %2181 = vmatprep.subr.bf16.mxu0 %v3296_v26  ;;  %v3360_v26 = vld [vmem:[%s4497_s1 + $0x870] ss:$8 sps:$4 sm:$0xff]  }
  0xe7   :  { %1072 = vmatpush1.bf16.msra.mxu1 %v3291_v27  ;;  %v3365_v27 = vld [vmem:[%s4497_s1 + $0x884] ss:$8 sps:$4 sm:$0xff]  }
  0xe8   :  { %2182 = vmatpush1.bf16.msra.mxu0 %v3294_v28  ;;  %1073 = vmatprep.subr.bf16.mxu1 %v3299_v29 }
  0xe9   :  { %2183 = vmatprep.subr.bf16.mxu0 %v3302_v0 }
  0xeb   :  { %1074 = vmatpush1.bf16.msra.mxu1 %v3297_v30 }
  0xec   :  { %2184 = vmatpush1.bf16.msra.mxu0 %v3300_v31  ;;  %1075 = vmatprep.subr.bf16.mxu1 %v3305_v33  ;;  %v3363_v31 = vld [vmem:[%s4497_s1 + $0x880] ss:$8 sps:$4 sm:$0xff]  }
  0xed   :  { %2185 = vmatprep.subr.bf16.mxu0 %v3308_v35 }
  0xef   :  { %1076 = vmatpush1.bf16.msra.mxu1 %v3303_v9  ;;  %v3368_v9 = vld [vmem:[%s4497_s1 + $0x894] ss:$8 sps:$4 sm:$0xff]  }
  0xf0   :  { %2186 = vmatpush1.bf16.msra.mxu0 %v3306_v36  ;;  %1077 = vmatprep.subr.bf16.mxu1 %v3311_v50 }
  0xf1   :  { %2187 = vmatprep.subr.bf16.mxu0 %v3314_v39  ;;  %v3366_v39 = vld [vmem:[%s4497_s1 + $0x890] ss:$8 sps:$4 sm:$0xff]  }
  0xf3   :  { %1078 = vmatpush1.bf16.msra.mxu1 %v3309_v41  ;;  %v3371_v41 = vld [vmem:[%s4497_s1 + $0x8a4] ss:$8 sps:$4 sm:$0xff]  }
  0xf4   :  { %2188 = vmatpush1.bf16.msra.mxu0 %v3312_v42  ;;  %1079 = vmatprep.subr.bf16.mxu1 %v3317_v43  ;;  %v3369_v42 = vld [vmem:[%s4497_s1 + $0x8a0] ss:$8 sps:$4 sm:$0xff]   ;;  %v3374_v43 = vld [vmem:[%s4497_s1 + $0x8b4] ss:$8 sps:$4 sm:$0xff]  }
  0xf5   :  { %2189 = vmatprep.subr.bf16.mxu0 %v3320_v44  ;;  %v3372_v44 = vld [vmem:[%s4497_s1 + $0x8b0] ss:$8 sps:$4 sm:$0xff]  }
  0xf7   :  { %1080 = vmatpush1.bf16.msra.mxu1 %v3315_v45  ;;  %v3377_v45 = vld [vmem:[%s4497_s1 + $0x8c4] ss:$8 sps:$4 sm:$0xff]  }
  0xf8   :  { %2190 = vmatpush1.bf16.msra.mxu0 %v3318_v46  ;;  %1081 = vmatprep.subr.bf16.mxu1 %v3325_v51  ;;  %v3375_v46 = vld [vmem:[%s4497_s1 + $0x8c0] ss:$8 sps:$4 sm:$0xff]   ;;  %v3378_v51 = vld [vmem:[%s4497_s1 + $0x8d0] ss:$8 sps:$4 sm:$0xff]  }
  0xf9   :  { %2191 = vmatprep.subr.bf16.mxu0 %v3328_v34  ;;  %v3383_v34 = vld [vmem:[%s4497_s1 + $0x8e4] ss:$8 sps:$4 sm:$0xff]  }
  0xfb   :  { %1082 = vmatpush1.bf16.msra.mxu1 %v3323_v63  ;;  %v2829_v63 = vcombine.low %v4361_v7, %v4125_v37 }
  0xfc   :  { %2192 = vmatpush1.bf16.msra.mxu0 %v3326_v55  ;;  %1083 = vmatprep.subr.bf16.mxu1 %v3331_v49  ;;  %v3386_v55 = vld [vmem:[%s4497_s1 + $0x8f4] ss:$8 sps:$4 sm:$0xff]  }
  0xfd   :  { %2193 = vmatprep.subr.bf16.mxu0 %v3334_v54  ;;  %v2258_v58 = vrot.slane %v2829_v63, 1 }
  0xff   :  { %1084 = vmatpush1.bf16.msra.mxu1 %v3329_v40  ;;  %v2260_v37 = vsel %vm602_vm3, %v2258_v58, %v2259_v61 }
 0x100   :  { %2194 = vmatpush1.bf16.msra.mxu0 %v3332_v32  ;;  %2869 = vmatprep.subr.bf16.mxu1 %v3341_v4 }
 0x101   :  { %2428 = vmatprep.subr.bf16.mxu0 %v3341_v4 }
 0x102   :  { %1086 = vmatmul.mubr.bf16.vlgmr.msra.gmra.mrb[0].mxu1 %v885_v2 }
 0x103   :  { %2196 = vmatmul.mubr.bf16.vlgmr.msra.gmra.mrb[0].mxu0 %v1980_v6  ;;  %2885 = vmatpush1.bf16.msra.mxu1 %v3339_v5 }
 0x104   :  { %2429 = vmatpush1.bf16.msra.mxu0 %v3339_v5  ;;  %2870 = vmatprep.subr.bf16.mxu1 %v3344_v8 }
 0x105   :  { %2430 = vmatprep.subr.bf16.mxu0 %v3344_v8  ;;  %1095 = vmatprep.mubr.bf16.mxu1 %v4169_v57  ;;  %v2263_v57 = vsel %vm602_vm3, %v2261_v16, %v2262_v19 }
 0x106   :  { %2205 = vmatprep.mubr.bf16.mxu0 %v1998_v10 }
 0x107   :  { %2886 = vmatpush1.bf16.msra.mxu1 %v3342_v13 }
 0x108   :  { %2431 = vmatpush1.bf16.msra.mxu0 %v3342_v13  ;;  %2871 = vmatprep.subr.bf16.mxu1 %v3347_v15 }
 0x109   :  { %2432 = vmatprep.subr.bf16.mxu0 %v3347_v15 }
 0x10a   :  { %1096 = vmatmul.mubr.bf16.gmra.mrb[16].mxu1 %v884_v62 }
 0x10b   :  { %2206 = vmatmul.mubr.bf16.gmra.mrb[16].mxu0 %v1995_v59  ;;  %2887 = vmatpush1.bf16.msra.mxu1 %v3345_v17 }
 0x10c   :  { %2433 = vmatpush1.bf16.msra.mxu0 %v3345_v17  ;;  %2872 = vmatprep.subr.bf16.mxu1 %v3350_v18 }
 0x10d   :  { %2434 = vmatprep.subr.bf16.mxu0 %v3350_v18  ;;  %2460 = vmatprep.mubr.bf16.mxu0 %v2263_v57 }
 0x10e   :  { %2470 = vmatprep.mubr.bf16.mxu1 %v2262_v19 }
 0x10f   :  { %2888 = vmatpush1.bf16.msra.mxu1 %v3348_v38 }
 0x110   :  { %2435 = vmatpush1.bf16.msra.mxu0 %v3348_v38  ;;  %2873 = vmatprep.subr.bf16.mxu1 %v3353_v53 }
 0x111   :  { %2436 = vmatprep.subr.bf16.mxu0 %v3353_v53 }
 0x113   :  { %2889 = vmatpush1.bf16.msra.mxu1 %v3351_v20 }
 0x114   :  { %2437 = vmatpush1.bf16.msra.mxu0 %v3351_v20  ;;  %2874 = vmatprep.subr.bf16.mxu1 %v3356_v21 }
 0x115   :  { %2438 = vmatprep.subr.bf16.mxu0 %v3356_v21 }
 0x117   :  { %2890 = vmatpush1.bf16.msra.mxu1 %v3354_v22 }
 0x118   :  { %2439 = vmatpush1.bf16.msra.mxu0 %v3354_v22  ;;  %2875 = vmatprep.subr.bf16.mxu1 %v3359_v23 }
 0x119   :  { %2440 = vmatprep.subr.bf16.mxu0 %v3359_v23 }
 0x11b   :  { %2891 = vmatpush1.bf16.msra.mxu1 %v3357_v24 }
 0x11c   :  { %2441 = vmatpush1.bf16.msra.mxu0 %v3357_v24  ;;  %2876 = vmatprep.subr.bf16.mxu1 %v3362_v25 }
 0x11d   :  { %2442 = vmatprep.subr.bf16.mxu0 %v3362_v25  ;;  %v4417_v29 = vpop.f32.mrb[4].mxu1 }
 0x11e   :  { %v4415_v28 = vpop.f32.mrb[4].mxu0  ;;  %v4421_v30 = vpop.f32.mrb[5].mxu1 }
 0x11f   :  { %v4419_v0 = vpop.f32.mrb[5].mxu0  ;;  %2892 = vmatpush1.bf16.msra.mxu1 %v3360_v26  ;;  %v341_v35 = vpop.f32.mrb[6].mxu1 }
 0x120   :  { %2443 = vmatpush1.bf16.msra.mxu0 %v3360_v26  ;;  %v1395_v33 = vpop.f32.mrb[6].mxu0  ;;  %2877 = vmatprep.subr.bf16.mxu1 %v3365_v27  ;;  %v342_v50 = vpop.f32.mrb[7].mxu1 }
 0x121   :  { %2444 = vmatprep.subr.bf16.mxu0 %v3365_v27  ;;  %v1396_v36 = vpop.f32.mrb[7].mxu0 }
 0x123   :  { %2893 = vmatpush1.bf16.msra.mxu1 %v3363_v31 }
 0x124   :  { %2445 = vmatpush1.bf16.msra.mxu0 %v3363_v31  ;;  %2878 = vmatprep.subr.bf16.mxu1 %v3368_v9 }
 0x125   :  { %2446 = vmatprep.subr.bf16.mxu0 %v3368_v9  ;;  %v2487_v9 = vlaneseq }
 0x127   :  { %2894 = vmatpush1.bf16.msra.mxu1 %v3366_v39  ;;  %v2488_v36 = vshrl.u32 %v2487_v9, 7 }
 0x128   :  { %2447 = vmatpush1.bf16.msra.mxu0 %v3366_v39  ;;  %2879 = vmatprep.subr.bf16.mxu1 %v3371_v41  ;;  %v2485_v39 = vld [vmem:[%s4499_s2] sm:$0x3] }
 0x129   :  { %2448 = vmatprep.subr.bf16.mxu0 %v3371_v41  ;;  %v2489_v50 = vsub.s32 0, %v2488_v36  ;;  %v2493_v41 = vsub.s32 1, %v2488_v36 }
 0x12b   :  { %2895 = vmatpush1.bf16.msra.mxu1 %v3369_v42 }
 0x12c   :  { %2449 = vmatpush1.bf16.msra.mxu0 %v3369_v42  ;;  %2880 = vmatprep.subr.bf16.mxu1 %v3374_v43  ;;  %v2490_v42 = vrot.slane %v2485_v39, %v2489_v50 }
 0x12d   :  { %2450 = vmatprep.subr.bf16.mxu0 %v3374_v43 }
 0x12f   :  { %2896 = vmatpush1.bf16.msra.mxu1 %v3372_v44 }
 0x130   :  { %2451 = vmatpush1.bf16.msra.mxu0 %v3372_v44  ;;  %2881 = vmatprep.subr.bf16.mxu1 %v3377_v45 }
 0x131   :  { %2452 = vmatprep.subr.bf16.mxu0 %v3377_v45  ;;  %v2494_v45 = vrot.slane %v2485_v39, %v2493_v41 }
 0x133   :  { %2897 = vmatpush1.bf16.msra.mxu1 %v3375_v46 }
 0x134   :  { %2453 = vmatpush1.bf16.msra.mxu0 %v3375_v46  ;;  %2882 = vmatprep.subr.bf16.mxu1 %v3380_v48  ;;  %v2504_v46 = vld [vmem:[%s4500_s3 + $0x8] sm:$0xff] }
 0x135   :  { %2454 = vmatprep.subr.bf16.mxu0 %v3380_v48 }
 0x137   :  { %2898 = vmatpush1.bf16.msra.mxu1 %v3378_v51 }
 0x138   :  { %2455 = vmatpush1.bf16.msra.mxu0 %v3378_v51  ;;  %2883 = vmatprep.subr.bf16.mxu1 %v3383_v34 }
 0x139   :  { %2456 = vmatprep.subr.bf16.mxu0 %v3383_v34 }
 0x13b   :  { %2899 = vmatpush1.bf16.msra.mxu1 %v3381_v52 }
 0x13c   :  { %2457 = vmatpush1.bf16.msra.mxu0 %v3381_v52  ;;  %2884 = vmatprep.subr.bf16.mxu1 %v3386_v55 }
 0x13d   :  { %2458 = vmatprep.subr.bf16.mxu0 %v3386_v55 }
 0x13f   :  { %2900 = vmatpush1.bf16.msra.mxu1 %v3384_v56 }
 0x140   :  { %2459 = vmatpush1.bf16.msra.mxu0 %v3384_v56 }
 0x142   :  { %2471 = vmatmul.mubr.bf16.vlgmr.msra.gmra.mrb[20].mxu1 %v2259_v61 }
 0x143   :  { %2461 = vmatmul.mubr.bf16.vlgmr.msra.gmra.mrb[0].mxu0 %v2260_v37 }
 0x15d   :  { %v557_v49 = vpop.f32.mrb[8].mxu1 }
 0x15e   :  { %v1657_v54 = vpop.f32.mrb[8].mxu0  ;;  %v558_v60 = vadd.f32 %v557_v49, %v4417_v29  ;;  %v559_v40 = vpop.f32.mrb[9].mxu1 }
 0x15f   :  { %v1659_v32 = vpop.f32.mrb[9].mxu0  ;;  %v560_v62 = vadd.f32 %v559_v40, %v4421_v30  ;;  %v561_v3 = vpop.f32.mrb[10].mxu1 }
 0x160   :  { %v1661_v1 = vpop.f32.mrb[10].mxu0  ;;  %v562_v47 = vpop.f32.mrb[11].mxu1 }
 0x161   :  { %v1662_v4 = vpop.f32.mrb[11].mxu0 }
 0x19d   :  { %v817_v14 = vpop.f32.mrb[12].mxu1 }
 0x19e   :  { %v1918_v2 = vpop.f32.mrb[12].mxu0  ;;  %v828_v5 = vadd.f32 %v817_v14, %v558_v60  ;;  %v819_v6 = vpop.f32.mrb[13].mxu1 }
 0x19f   :  { %v1920_v7 = vpop.f32.mrb[13].mxu0  ;;  %v829_v8 = vadd.f32 %v819_v6, %v560_v62  ;;  %v821_v11 = vpop.f32.mrb[14].mxu1  ;;  %v2508_v62 = vunpack.c.l.bf16 %v2504_v46 }
 0x1a0   :  { %v1922_v10 = vpop.f32.mrb[14].mxu0  ;;  %v822_v13 = vpop.f32.mrb[15].mxu1 }
 0x1a1   :  { %v1923_v12 = vpop.f32.mrb[15].mxu0 }
 0x1d5   :  { %v1087_v15 = vpop.f32.mrb[0].mxu1 }
 0x1d6   :  { %v1089_v59 = vpop.f32.mrb[1].mxu1 }
 0x1d7   :  { %v1091_v16 = vpop.f32.mrb[2].mxu1 }
 0x1d8   :  { %v1093_v19 = vpop.f32.mrb[3].mxu1 }
 0x1dd   :  { %v1097_v17 = vpop.f32.mrb[16].mxu1 }
 0x1de   :  { %v2207_v18 = vpop.f32.mrb[16].mxu0  ;;  %v1108_v57 = vadd.f32 %v1097_v17, %v828_v5  ;;  %v1099_v38 = vpop.f32.mrb[17].mxu1 }
 0x1df   :  { %v2209_v53 = vpop.f32.mrb[17].mxu0  ;;  %v1109_v20 = vadd.f32 %v1099_v38, %v829_v8  ;;  %v1101_v21 = vpop.f32.mrb[18].mxu1 }
 0x1e0   :  { %v2211_v22 = vpop.f32.mrb[18].mxu0  ;;  %v1402_v23 = vadd.f32 %v4415_v28, %v1108_v57  ;;  %v1102_v24 = vpop.f32.mrb[19].mxu1  ;;  %v2503_v28 = vld [vmem:[%s4500_s3] sm:$0xff] }
 0x1e1   :  { %v2212_v25 = vpop.f32.mrb[19].mxu0  ;;  %v1403_v26 = vadd.f32 %v4419_v0, %v1109_v20  ;;  %v2505_v0 = vld [vmem:[%s4500_s3 + $0x10] sm:$0x77]  ;;  %v2506_v51 = vunpack.c.l.bf16 %v2503_v28  ;;  %v2507_v58 = vunpack.c.h.bf16 %v2503_v28 }
 0x1e2   :  { %v1668_v27 = vadd.f32 %v1657_v54, %v1402_v23  ;;  %v2510_v52 = vunpack.c.l.bf16 %v2505_v0  ;;  %v2511_v37 = vunpack.c.h.bf16 %v2505_v0 }
 0x1e3   :  { %v1669_v29 = vadd.f32 %v1659_v32, %v1403_v26 }
 0x1e4   :  { %v1929_v30 = vadd.f32 %v1918_v2, %v1668_v27  ;;  %v2509_v2 = vunpack.c.h.bf16 %v2504_v46 }
 0x1e5   :  { %v1930_v31 = vadd.f32 %v1920_v7, %v1669_v29 }
 0x1e6   :  { %v2218_v33 = vadd.f32 %v2207_v18, %v1929_v30 }
 0x1e7   :  { %v2219_v35 = vadd.f32 %v2209_v53, %v1930_v31 }
 0x215   :  { %v2472_v44 = vpop.f32.mrb[20].mxu1 }
 0x216   :  { %v2462_v43 = vpop.f32.mrb[0].mxu0  ;;  %v2483_v34 = vadd.f32 %v2472_v44, %v2218_v33  ;;  %v2474_v55 = vpop.f32.mrb[21].mxu1 }
 0x217   :  { %v2901_v48 = vadd.f32 %v2462_v43, %v1087_v15  ;;  %v2464_v63 = vpop.f32.mrb[1].mxu0  ;;  %v2484_v61 = vadd.f32 %v2474_v55, %v2219_v35  ;;  %v2476_v54 = vpop.f32.mrb[22].mxu1 }
 0x218   :  { %v2902_v56 = vadd.f32 %v2464_v63, %v1089_v59  ;;  %v2466_v49 = vpop.f32.mrb[2].mxu0  ;;  %v2501_v40 = vadd.f32 %v2490_v42, %v2483_v34  ;;  %v2477_v3 = vpop.f32.mrb[23].mxu1 }
 0x219   :  { %v2497_v60 = vadd.f32 %v2901_v48, %v2490_v42  ;;  %v2903_v32 = vadd.f32 %v2466_v49, %v1091_v16  ;;  %v2468_v1 = vpop.f32.mrb[3].mxu0  ;;  %v2502_v47 = vadd.f32 %v2494_v45, %v2484_v61 }
 0x21a   :  { %v2498_v4 = vadd.f32 %v2902_v56, %v2494_v45  ;;  %v2904_v14 = vadd.f32 %v2468_v1, %v1093_v19  ;;  %v2516_v6 = vadd.f32 %v2510_v52, %v2501_v40 }
 0x21b   :  { %v2512_v5 = vadd.f32 %v2506_v51, %v2497_v60  ;;  %v2499_v7 = vadd.f32 %v2903_v32, %v2490_v42  ;;  %v2517_v10 = vadd.f32 %v2511_v37, %v2502_v47 }
 0x21c   :  { %v2513_v8 = vadd.f32 %v2507_v58, %v2498_v4  ;;  %v2500_v11 = vadd.f32 %v2904_v14, %v2494_v45  ;;  %v2522_v13 = vmax.f32 %v2516_v6, 0.0 }
 0x21d   :  { %v2518_v12 = vmax.f32 %v2512_v5, 0.0  ;;  %v2514_v15 = vadd.f32 %v2508_v62, %v2499_v7  ;;  %v2523_v17 = vmax.f32 %v2517_v10, 0.0 }
 0x21e   :  { %v2519_v59 = vmax.f32 %v2513_v8, 0.0  ;;  %v2515_v18 = vadd.f32 %v2509_v2, %v2500_v11 }
 0x21f   :  { %v2520_v16 = vmax.f32 %v2514_v15, 0.0  ;;  %v2868_v38 = vpack.c.bf16 %v2523_v17, %v2522_v13 }
 0x220   :  { %v2866_v57 = vpack.c.bf16 %v2519_v59, %v2518_v12  ;;  %v2521_v53 = vmax.f32 %v2515_v18, 0.0 }
 0x221   :  { %2546 = vst [vmem:[%s4501_s4 + $0x10] sm:$0x77] %v2868_v38 }
 0x222   :  { %2544 = vst [vmem:[%s4501_s4] sm:$0xff] %v2866_v57  ;;  %v2867_v19 = vpack.c.bf16 %v2521_v53, %v2520_v16 }
 0x224   :  { %2545 = vst [vmem:[%s4501_s4 + $0x8] sm:$0xff] %v2867_v19 }

</bundles_post_ra>
